<compile_context>
chip_gen: v7x
topology: tpu7x:2x2x1
jax: 0.10.0
libtpu: 0.0.40
codegen_flags: <defaults>
</compile_context>

<pallas_src>
import jax
import jax.numpy as jnp
from jax.experimental import pallas as pl
from jax.experimental.pallas import tpu as pltpu


# ---------------------------------------------------------------------------
# Pallas kernels
# ---------------------------------------------------------------------------
def _mm_bias_relu_kernel(x_ref, w_ref, b_ref, o_ref):
    # x:(tm,K) bf16, w:(K,N) bf16, b:(1,N) f32 -> relu(x@w+b) stored bf16
    acc = jnp.dot(x_ref[...], w_ref[...], preferred_element_type=jnp.float32)
    acc = acc + b_ref[...]
    o_ref[...] = jnp.maximum(acc, 0.0).astype(o_ref.dtype)


def _conv_pool_kernel(x_ref, w_ref, b_ref, o_ref):
    # x:(4,tm,K) bf16 -- the 4 pool-tap patch matrices; w:(K,N) bf16; b:(1,N) f32
    # relu(max_t(x_t@w) + b) == maxpool2x2(relu(conv+b))   (bias shared, relu monotone)
    w = w_ref[...]
    m = jnp.dot(x_ref[0], w, preferred_element_type=jnp.float32)
    for t in range(1, 4):
        m = jnp.maximum(m, jnp.dot(x_ref[t], w, preferred_element_type=jnp.float32))
    m = m + b_ref[...]
    o_ref[...] = jnp.maximum(m, 0.0).astype(o_ref.dtype)


def _head_kernel(x_ref, w0_ref, b0_ref, w1_ref, b1_ref, wc_ref, bc_ref, o_ref):
    # (B,512) -> lin0 -> lin1 -> classifier -> log_softmax, all resident in VMEM.
    h = jnp.dot(x_ref[...], w0_ref[...], preferred_element_type=jnp.float32) + b0_ref[...]
    h = jnp.dot(h.astype(w1_ref.dtype), w1_ref[...],
                preferred_element_type=jnp.float32) + b1_ref[...]
    logits = jnp.dot(h.astype(wc_ref.dtype), wc_ref[...],
                     preferred_element_type=jnp.float32) + bc_ref[...]
    m = jnp.max(logits, axis=1, keepdims=True)
    z = logits - m
    lse = jnp.log(jnp.sum(jnp.exp(z), axis=1, keepdims=True))
    o_ref[...] = (z - lse).astype(o_ref.dtype)


# ---------------------------------------------------------------------------
# Pallas wrappers
# ---------------------------------------------------------------------------
def conv_matmul_relu(x, w, b):
    # x:(M,K) bf16, w:(K,N) bf16, b:(1,N) f32 -> (M,N) bf16
    M, K = x.shape
    N = w.shape[1]
    tm = min(M, 1024)
    assert M % tm == 0
    ce = pl.CostEstimate(flops=2 * M * K * N, transcendentals=0,
                         bytes_accessed=2 * x.size + 2 * w.size + 4 * b.size + 2 * M * N)
    return pl.pallas_call(
        _mm_bias_relu_kernel,
        out_shape=jax.ShapeDtypeStruct((M, N), jnp.bfloat16),
        grid=(M // tm,),
        in_specs=[pl.BlockSpec((tm, K), lambda i: (i, 0)),
                  pl.BlockSpec((K, N), lambda i: (0, 0)),
                  pl.BlockSpec((1, N), lambda i: (0, 0))],
        out_specs=pl.BlockSpec((tm, N), lambda i: (i, 0)),
        compiler_params=pltpu.CompilerParams(dimension_semantics=("parallel",)),
        cost_estimate=ce,
    )(x, w, b)


def conv_relu_maxpool(taps, w, b):
    # taps:(4,M,K) bf16 (pool-tap patch matrices), w:(K,N) bf16, b:(1,N) f32 -> (M,N) bf16
    _, M, K = taps.shape
    N = w.shape[1]
    tm = min(M, 1024)
    assert M % tm == 0
    ce = pl.CostEstimate(flops=8 * M * K * N, transcendentals=0,
                         bytes_accessed=2 * taps.size + 2 * w.size + 4 * b.size + 2 * M * N)
    return pl.pallas_call(
        _conv_pool_kernel,
        out_shape=jax.ShapeDtypeStruct((M, N), jnp.bfloat16),
        grid=(M // tm,),
        in_specs=[pl.BlockSpec((4, tm, K), lambda i: (0, i, 0)),
                  pl.BlockSpec((K, N), lambda i: (0, 0)),
                  pl.BlockSpec((1, N), lambda i: (0, 0))],
        out_specs=pl.BlockSpec((tm, N), lambda i: (i, 0)),
        compiler_params=pltpu.CompilerParams(dimension_semantics=("parallel",)),
        cost_estimate=ce,
    )(taps, w, b)


def head(x, w0, b0, w1, b1, wc, bc):
    # x:(B,512) bf16 -> (B,10) f32 log-probs.  Everything fits whole in VMEM.
    M = x.shape[0]
    N = wc.shape[1]
    D = w0.shape[0]
    ce = pl.CostEstimate(
        flops=2 * M * (D * D + D * D + D * N),
        transcendentals=M * (N + 1),
        bytes_accessed=2 * (x.size + w0.size + w1.size + wc.size)
                       + 4 * (b0.size + b1.size + bc.size) + 4 * M * N)
    vspecs = [pl.BlockSpec(memory_space=pltpu.MemorySpace.VMEM) for _ in range(7)]
    return pl.pallas_call(
        _head_kernel,
        out_shape=jax.ShapeDtypeStruct((M, N), jnp.float32),
        in_specs=vspecs,
        out_specs=pl.BlockSpec(memory_space=pltpu.MemorySpace.VMEM),
        cost_estimate=ce,
    )(x, w0, b0, w1, b1, wc, bc)


# ---------------------------------------------------------------------------
# Layout glue (pure strided-slice / stack / reshape, runs in XLA between kernels)
# ---------------------------------------------------------------------------
def _im2col_3x3(x, dtype):
    # x: (B,H,W,C) -> (B*H*W, 9*C); column order = (kh, kw, c)
    B, H, W, C = x.shape
    xp = jnp.pad(x, ((0, 0), (1, 1), (1, 1), (0, 0)))
    cols = [xp[:, kh:kh + H, kw:kw + W, :] for kh in range(3) for kw in range(3)]
    p = jnp.stack(cols, axis=3)                      # (B,H,W,9,C)
    return p.reshape(B * H * W, 9 * C).astype(dtype)


def _pool_tap_patches(x, dtype):
    # x: (B,H,W,C) -> (4, B*Ho*Wo, 9*C).  Tap t=(ph,pw) holds the im2col rows of the
    # conv output pixels at spatial positions (2*ho+ph, 2*wo+pw); the kernel maxes
    # over the 4 taps, which is exactly the 2x2/stride-2 maxpool of the conv output.
    B, H, W, C = x.shape
    Ho, Wo = H // 2, W // 2
    xp = jnp.pad(x, ((0, 0), (1, 1), (1, 1), (0, 0)))
    taps = []
    for ph in range(2):
        for pw in range(2):
            cols = []
            for kh in range(3):
                for kw in range(3):
                    sh, sw = ph + kh, pw + kw
                    cols.append(xp[:, sh:sh + 2 * Ho - 1:2, sw:sw + 2 * Wo - 1:2, :])
            t = jnp.stack(cols, axis=3)              # (B,Ho,Wo,9,C)
            taps.append(t.reshape(B * Ho * Wo, 9 * C))
    return jnp.stack(taps, axis=0).astype(dtype)     # (4, M, 9C)


# ---------------------------------------------------------------------------
# Model: parameters + forward (mirrors PyTorch Net)
# ---------------------------------------------------------------------------
def init_params(key):
    # PyTorch-equivalent layouts: conv (3,3,Cin,Cout), linear (din,dout), bias (n,)
    p = {}
    conv_specs = [("conv0", 1, 8), ("conv1", 8, 16), ("conv2", 16, 32),
                  ("conv3", 32, 64), ("conv4", 64, 128)]
    for name, cin, cout in conv_specs:
        key, k1, k2 = jax.random.split(key, 3)
        fan_in = 9 * cin
        p[name + "_w"] = (jax.random.normal(k1, (3, 3, cin, cout), jnp.float32)
                          * (2.0 / fan_in) ** 0.5)
        p[name + "_b"] = jax.random.normal(k2, (cout,), jnp.float32) * 0.01
    for name, din, dout in [("lin0", 512, 512), ("lin1", 512, 512), ("cls", 512, 10)]:
        key, k1, k2 = jax.random.split(key, 3)
        p[name + "_w"] = (jax.random.normal(k1, (din, dout), jnp.float32)
                          * (1.0 / din) ** 0.5)
        p[name + "_b"] = jax.random.normal(k2, (dout,), jnp.float32) * 0.01
    return p


def prepare_params(p):
    # One-time (outside jit) conversion to kernel-ready layout:
    #  * conv weights -> (9*Cin, Cout) bf16 matmul matrices (column order kh,kw,cin)
    #  * biases -> (1, N) f32 (epilogue stays f32)
    #  * lin0 rows permuted so it consumes the NHWC (h,w,c) flatten directly while
    #    staying equivalent to PyTorch's NCHW .view(-1, 512) followed by Linear.
    q = {}
    for name in ("conv0", "conv1", "conv2", "conv3", "conv4"):
        w = p[name + "_w"]
        cin, cout = w.shape[2], w.shape[3]
        q[name + "_w"] = w.reshape(9 * cin, cout).astype(jnp.bfloat16)
        q[name + "_b"] = p[name + "_b"].reshape(1, cout).astype(jnp.float32)
    # hwc_to_chw[i_hwc] = i_chw  (C=128, H=W=2)
    hwc_to_chw = jnp.arange(512).reshape(128, 2, 2).transpose(1, 2, 0).reshape(512)
    q["lin0_w"] = p["lin0_w"][hwc_to_chw, :].astype(jnp.bfloat16)
    q["lin0_b"] = p["lin0_b"].reshape(1, -1).astype(jnp.float32)
    for name in ("lin1", "cls"):
        q[name + "_w"] = p[name + "_w"].astype(jnp.bfloat16)
        q[name + "_b"] = p[name + "_b"].reshape(1, -1).astype(jnp.float32)
    return q


def net_forward(params, x_nchw):
    # x_nchw: (B, 1, 32, 32) float32
    B = x_nchw.shape[0]
    assert x_nchw.shape[1:] == (1, 32, 32)
    x = jnp.transpose(x_nchw, (0, 2, 3, 1)).astype(jnp.bfloat16)          # NHWC bf16

    # low_feat: conv(1->8) + ReLU  (no pool)
    cols0 = _im2col_3x3(x, jnp.bfloat16)                                  # (B*1024, 9)
    y = conv_matmul_relu(cols0, params["conv0_w"], params["conv0_b"])     # (B*1024, 8)
    y = y.reshape(B, 32, 32, 8)

    # encoders: 4 x [conv + ReLU + maxpool2x2], each fused in a single kernel
    stages = [("conv1", 32, 16), ("conv2", 16, 32), ("conv3", 8, 64), ("conv4", 4, 128)]
    for name, H, cout in stages:
        taps = _pool_tap_patches(y, jnp.bfloat16)                         # (4, B*Ho*Wo, 9*Cin)
        y = conv_relu_maxpool(taps, params[name + "_w"], params[name + "_b"])
        y = y.reshape(B, H // 2, H // 2, cout)

    # flatten in (h,w,c) order; lin0_w rows are pre-permuted to match NCHW .view(-1,512)
    xf = y.reshape(B, 512)
    return head(xf, params["lin0_w"], params["lin0_b"],
                params["lin1_w"], params["lin1_b"],
                params["cls_w"], params["cls_b"])                          # (B,10) log-probs


if __name__ == "__main__":
    key = jax.random.PRNGKey(0)
    pkey, xkey = jax.random.split(key)
    params = prepare_params(init_params(pkey))
    # 32x32 spatial is required so that 4 maxpools -> 2x2x128 = 512 features
    x = jax.random.normal(xkey, (2, 1, 32, 32), jnp.float32)

    fwd = jax.jit(net_forward)
    out = jax.block_until_ready(fwd(params, x))

    assert out.shape == (2, 10), out.shape
    row_sums = jnp.sum(jnp.exp(out), axis=1)
    assert bool(jnp.all(jnp.isfinite(out)))
    assert bool(jnp.all(jnp.abs(row_sums - 1.0) < 1e-4))
    print("KERNEL_OK")
</pallas_src>

<mosaic_0001>
module attributes {stable_mosaic.version = 11 : i64} {
  func.func @_mm_bias_relu_kernel(%arg0: i32, %arg1: memref<1024x9xbf16, #tpu.memory_space<vmem>>, %arg2: memref<9x8xbf16, #tpu.memory_space<vmem>>, %arg3: memref<1x8xf32, #tpu.memory_space<vmem>>, %arg4: memref<1024x8xbf16, #tpu.memory_space<vmem>>) attributes {dimension_semantics = [#tpu.dimension_semantics<parallel>], iteration_bounds = array<i64: 2>, scalar_prefetch = 0 : i64, scratch_operands = 0 : i64, tpu.core_type = #tpu.core_type<tc>, window_params = [{transform_indices = @transform_0, window_bounds = array<i64: 1024, 9>}, {pipeline_mode = #tpu.pipeline_mode<synchronous>, transform_indices = @transform_1, window_bounds = array<i64: 9, 8>}, {pipeline_mode = #tpu.pipeline_mode<synchronous>, transform_indices = @transform_2, window_bounds = array<i64: 1, 8>}, {transform_indices = @transform_3, window_bounds = array<i64: 1024, 8>}]} {
    %c0 = arith.constant 0 : index
    %c0_0 = arith.constant 0 : index
    %0 = vector.load %arg1[%c0, %c0_0] : memref<1024x9xbf16, #tpu.memory_space<vmem>>, vector<1024x9xbf16>
    %c0_1 = arith.constant 0 : index
    %c0_2 = arith.constant 0 : index
    %1 = vector.load %arg2[%c0_1, %c0_2] : memref<9x8xbf16, #tpu.memory_space<vmem>>, vector<9x8xbf16>
    %cst = arith.constant dense<0.000000e+00> : vector<1024x8xf32>
    %2 = tpu.matmul %0, %1, %cst {dimension_numbers = #tpu.dot_dimension_numbers<[1], [0], [0], [1], [0, 0, 1, 1], [], []>} : vector<1024x9xbf16>, vector<9x8xbf16>, vector<1024x8xf32> -> vector<1024x8xf32>
    %c0_3 = arith.constant 0 : index
    %c0_4 = arith.constant 0 : index
    %3 = vector.load %arg3[%c0_3, %c0_4] : memref<1x8xf32, #tpu.memory_space<vmem>>, vector<1x8xf32>
    %4 = vector.broadcast %3 : vector<1x8xf32> to vector<1024x8xf32>
    %5 = arith.addf %2, %4 : vector<1024x8xf32>
    %cst_5 = arith.constant 0.000000e+00 : f32
    %6 = vector.broadcast %cst_5 : f32 to vector<1024x8xf32>
    %7 = arith.maximumf %5, %6 : vector<1024x8xf32>
    %8 = arith.truncf %7 : vector<1024x8xf32> to vector<1024x8xbf16>
    %c0_6 = arith.constant 0 : index
    %c0_7 = arith.constant 0 : index
    %9 = vector.load %arg4[%c0_6, %c0_7] : memref<1024x8xbf16, #tpu.memory_space<vmem>>, vector<1024x8xbf16>
    tpu.vector_store %arg4[%c0_6, %c0_7], %8 {strides = array<i32>} : memref<1024x8xbf16, #tpu.memory_space<vmem>>, vector<1024x8xbf16>,
    return
  }
  func.func @transform_0(%arg0: i32) -> (i32, i32) {
    %c0_i32 = arith.constant 0 : i32
    %c0_i32_0 = arith.constant 0 : i32
    return %arg0, %c0_i32 : i32, i32
  }
  func.func @transform_1(%arg0: i32) -> (i32, i32) {
    %c0_i32 = arith.constant 0 : i32
    %c0_i32_0 = arith.constant 0 : i32
    %c0_i32_1 = arith.constant 0 : i32
    return %c0_i32, %c0_i32_0 : i32, i32
  }
  func.func @transform_2(%arg0: i32) -> (i32, i32) {
    %c0_i32 = arith.constant 0 : i32
    %c0_i32_0 = arith.constant 0 : i32
    %c0_i32_1 = arith.constant 0 : i32
    return %c0_i32, %c0_i32_0 : i32, i32
  }
  func.func @transform_3(%arg0: i32) -> (i32, i32) {
    %c0_i32 = arith.constant 0 : i32
    %c0_i32_0 = arith.constant 0 : i32
    return %arg0, %c0_i32 : i32, i32
  }
}

module attributes {stable_mosaic.version = 11 : i64} {
  func.func @_conv_pool_kernel(%arg0: i32, %arg1: memref<4x512x72xbf16, #tpu.memory_space<vmem>>, %arg2: memref<72x16xbf16, #tpu.memory_space<vmem>>, %arg3: memref<1x16xf32, #tpu.memory_space<vmem>>, %arg4: memref<512x16xbf16, #tpu.memory_space<vmem>>) attributes {dimension_semantics = [#tpu.dimension_semantics<parallel>], iteration_bounds = array<i64: 1>, scalar_prefetch = 0 : i64, scratch_operands = 0 : i64, tpu.core_type = #tpu.core_type<tc>, window_params = [{transform_indices = @transform_0, window_bounds = array<i64: 4, 512, 72>}, {pipeline_mode = #tpu.pipeline_mode<synchronous>, transform_indices = @transform_1, window_bounds = array<i64: 72, 16>}, {pipeline_mode = #tpu.pipeline_mode<synchronous>, transform_indices = @transform_2, window_bounds = array<i64: 1, 16>}, {transform_indices = @transform_3, window_bounds = array<i64: 512, 16>}]} {
    %c0 = arith.constant 0 : index
    %c0_0 = arith.constant 0 : index
    %0 = vector.load %arg2[%c0, %c0_0] : memref<72x16xbf16, #tpu.memory_space<vmem>>, vector<72x16xbf16>
    %c0_1 = arith.constant 0 : index
    %c0_2 = arith.constant 0 : index
    %c0_3 = arith.constant 0 : index
    %1 = vector.load %arg1[%c0_1, %c0_2, %c0_3] : memref<4x512x72xbf16, #tpu.memory_space<vmem>>, vector<1x512x72xbf16>
    %2 = vector.shape_cast %1 : vector<1x512x72xbf16> to vector<512x72xbf16>
    %cst = arith.constant dense<0.000000e+00> : vector<512x16xf32>
    %3 = tpu.matmul %2, %0, %cst {dimension_numbers = #tpu.dot_dimension_numbers<[1], [0], [0], [1], [0, 0, 1, 1], [], []>} : vector<512x72xbf16>, vector<72x16xbf16>, vector<512x16xf32> -> vector<512x16xf32>
    %c1 = arith.constant 1 : index
    %c0_4 = arith.constant 0 : index
    %c0_5 = arith.constant 0 : index
    %4 = vector.load %arg1[%c1, %c0_4, %c0_5] : memref<4x512x72xbf16, #tpu.memory_space<vmem>>, vector<1x512x72xbf16>
    %5 = vector.shape_cast %4 : vector<1x512x72xbf16> to vector<512x72xbf16>
    %cst_6 = arith.constant dense<0.000000e+00> : vector<512x16xf32>
    %6 = tpu.matmul %5, %0, %cst_6 {dimension_numbers = #tpu.dot_dimension_numbers<[1], [0], [0], [1], [0, 0, 1, 1], [], []>} : vector<512x72xbf16>, vector<72x16xbf16>, vector<512x16xf32> -> vector<512x16xf32>
    %7 = arith.maximumf %3, %6 : vector<512x16xf32>
    %c2 = arith.constant 2 : index
    %c0_7 = arith.constant 0 : index
    %c0_8 = arith.constant 0 : index
    %8 = vector.load %arg1[%c2, %c0_7, %c0_8] : memref<4x512x72xbf16, #tpu.memory_space<vmem>>, vector<1x512x72xbf16>
    %9 = vector.shape_cast %8 : vector<1x512x72xbf16> to vector<512x72xbf16>
    %cst_9 = arith.constant dense<0.000000e+00> : vector<512x16xf32>
    %10 = tpu.matmul %9, %0, %cst_9 {dimension_numbers = #tpu.dot_dimension_numbers<[1], [0], [0], [1], [0, 0, 1, 1], [], []>} : vector<512x72xbf16>, vector<72x16xbf16>, vector<512x16xf32> -> vector<512x16xf32>
    %11 = arith.maximumf %7, %10 : vector<512x16xf32>
    %c3 = arith.constant 3 : index
    %c0_10 = arith.constant 0 : index
    %c0_11 = arith.constant 0 : index
    %12 = vector.load %arg1[%c3, %c0_10, %c0_11] : memref<4x512x72xbf16, #tpu.memory_space<vmem>>, vector<1x512x72xbf16>
    %13 = vector.shape_cast %12 : vector<1x512x72xbf16> to vector<512x72xbf16>
    %cst_12 = arith.constant dense<0.000000e+00> : vector<512x16xf32>
    %14 = tpu.matmul %13, %0, %cst_12 {dimension_numbers = #tpu.dot_dimension_numbers<[1], [0], [0], [1], [0, 0, 1, 1], [], []>} : vector<512x72xbf16>, vector<72x16xbf16>, vector<512x16xf32> -> vector<512x16xf32>
    %15 = arith.maximumf %11, %14 : vector<512x16xf32>
    %c0_13 = arith.constant 0 : index
    %c0_14 = arith.constant 0 : index
    %16 = vector.load %arg3[%c0_13, %c0_14] : memref<1x16xf32, #tpu.memory_space<vmem>>, vector<1x16xf32>
    %17 = vector.broadcast %16 : vector<1x16xf32> to vector<512x16xf32>
    %18 = arith.addf %15, %17 : vector<512x16xf32>
    %cst_15 = arith.constant 0.000000e+00 : f32
    %19 = vector.broadcast %cst_15 : f32 to vector<512x16xf32>
    %20 = arith.maximumf %18, %19 : vector<512x16xf32>
    %21 = arith.truncf %20 : vector<512x16xf32> to vector<512x16xbf16>
    %c0_16 = arith.constant 0 : index
    %c0_17 = arith.constant 0 : index
    %22 = vector.load %arg4[%c0_16, %c0_17] : memref<512x16xbf16, #tpu.memory_space<vmem>>, vector<512x16xbf16>
    tpu.vector_store %arg4[%c0_16, %c0_17], %21 {strides = array<i32>} : memref<512x16xbf16, #tpu.memory_space<vmem>>, vector<512x16xbf16>,
    return
  }
  func.func @transform_0(%arg0: i32) -> (i32, i32, i32) {
    %c0_i32 = arith.constant 0 : i32
    %c0_i32_0 = arith.constant 0 : i32
    %c0_i32_1 = arith.constant 0 : i32
    return %c0_i32, %arg0, %c0_i32_0 : i32, i32, i32
  }
  func.func @transform_1(%arg0: i32) -> (i32, i32) {
    %c0_i32 = arith.constant 0 : i32
    %c0_i32_0 = arith.constant 0 : i32
    %c0_i32_1 = arith.constant 0 : i32
    return %c0_i32, %c0_i32_0 : i32, i32
  }
  func.func @transform_2(%arg0: i32) -> (i32, i32) {
    %c0_i32 = arith.constant 0 : i32
    %c0_i32_0 = arith.constant 0 : i32
    %c0_i32_1 = arith.constant 0 : i32
    return %c0_i32, %c0_i32_0 : i32, i32
  }
  func.func @transform_3(%arg0: i32) -> (i32, i32) {
    %c0_i32 = arith.constant 0 : i32
    %c0_i32_0 = arith.constant 0 : i32
    return %arg0, %c0_i32 : i32, i32
  }
}

module attributes {stable_mosaic.version = 11 : i64} {
  func.func @_conv_pool_kernel(%arg0: i32, %arg1: memref<4x128x144xbf16, #tpu.memory_space<vmem>>, %arg2: memref<144x32xbf16, #tpu.memory_space<vmem>>, %arg3: memref<1x32xf32, #tpu.memory_space<vmem>>, %arg4: memref<128x32xbf16, #tpu.memory_space<vmem>>) attributes {dimension_semantics = [#tpu.dimension_semantics<parallel>], iteration_bounds = array<i64: 1>, scalar_prefetch = 0 : i64, scratch_operands = 0 : i64, tpu.core_type = #tpu.core_type<tc>, window_params = [{transform_indices = @transform_0, window_bounds = array<i64: 4, 128, 144>}, {pipeline_mode = #tpu.pipeline_mode<synchronous>, transform_indices = @transform_1, window_bounds = array<i64: 144, 32>}, {pipeline_mode = #tpu.pipeline_mode<synchronous>, transform_indices = @transform_2, window_bounds = array<i64: 1, 32>}, {transform_indices = @transform_3, window_bounds = array<i64: 128, 32>}]} {
    %c0 = arith.constant 0 : index
    %c0_0 = arith.constant 0 : index
    %0 = vector.load %arg2[%c0, %c0_0] : memref<144x32xbf16, #tpu.memory_space<vmem>>, vector<144x32xbf16>
    %c0_1 = arith.constant 0 : index
    %c0_2 = arith.constant 0 : index
    %c0_3 = arith.constant 0 : index
    %1 = vector.load %arg1[%c0_1, %c0_2, %c0_3] : memref<4x128x144xbf16, #tpu.memory_space<vmem>>, vector<1x128x144xbf16>
    %2 = vector.shape_cast %1 : vector<1x128x144xbf16> to vector<128x144xbf16>
    %cst = arith.constant dense<0.000000e+00> : vector<128x32xf32>
    %3 = tpu.matmul %2, %0, %cst {dimension_numbers = #tpu.dot_dimension_numbers<[1], [0], [0], [1], [0, 0, 1, 1], [], []>} : vector<128x144xbf16>, vector<144x32xbf16>, vector<128x32xf32> -> vector<128x32xf32>
    %c1 = arith.constant 1 : index
    %c0_4 = arith.constant 0 : index
    %c0_5 = arith.constant 0 : index
    %4 = vector.load %arg1[%c1, %c0_4, %c0_5] : memref<4x128x144xbf16, #tpu.memory_space<vmem>>, vector<1x128x144xbf16>
    %5 = vector.shape_cast %4 : vector<1x128x144xbf16> to vector<128x144xbf16>
    %cst_6 = arith.constant dense<0.000000e+00> : vector<128x32xf32>
    %6 = tpu.matmul %5, %0, %cst_6 {dimension_numbers = #tpu.dot_dimension_numbers<[1], [0], [0], [1], [0, 0, 1, 1], [], []>} : vector<128x144xbf16>, vector<144x32xbf16>, vector<128x32xf32> -> vector<128x32xf32>
    %7 = arith.maximumf %3, %6 : vector<128x32xf32>
    %c2 = arith.constant 2 : index
    %c0_7 = arith.constant 0 : index
    %c0_8 = arith.constant 0 : index
    %8 = vector.load %arg1[%c2, %c0_7, %c0_8] : memref<4x128x144xbf16, #tpu.memory_space<vmem>>, vector<1x128x144xbf16>
    %9 = vector.shape_cast %8 : vector<1x128x144xbf16> to vector<128x144xbf16>
    %cst_9 = arith.constant dense<0.000000e+00> : vector<128x32xf32>
    %10 = tpu.matmul %9, %0, %cst_9 {dimension_numbers = #tpu.dot_dimension_numbers<[1], [0], [0], [1], [0, 0, 1, 1], [], []>} : vector<128x144xbf16>, vector<144x32xbf16>, vector<128x32xf32> -> vector<128x32xf32>
    %11 = arith.maximumf %7, %10 : vector<128x32xf32>
    %c3 = arith.constant 3 : index
    %c0_10 = arith.constant 0 : index
    %c0_11 = arith.constant 0 : index
    %12 = vector.load %arg1[%c3, %c0_10, %c0_11] : memref<4x128x144xbf16, #tpu.memory_space<vmem>>, vector<1x128x144xbf16>
    %13 = vector.shape_cast %12 : vector<1x128x144xbf16> to vector<128x144xbf16>
    %cst_12 = arith.constant dense<0.000000e+00> : vector<128x32xf32>
    %14 = tpu.matmul %13, %0, %cst_12 {dimension_numbers = #tpu.dot_dimension_numbers<[1], [0], [0], [1], [0, 0, 1, 1], [], []>} : vector<128x144xbf16>, vector<144x32xbf16>, vector<128x32xf32> -> vector<128x32xf32>
    %15 = arith.maximumf %11, %14 : vector<128x32xf32>
    %c0_13 = arith.constant 0 : index
    %c0_14 = arith.constant 0 : index
    %16 = vector.load %arg3[%c0_13, %c0_14] : memref<1x32xf32, #tpu.memory_space<vmem>>, vector<1x32xf32>
    %17 = vector.broadcast %16 : vector<1x32xf32> to vector<128x32xf32>
    %18 = arith.addf %15, %17 : vector<128x32xf32>
    %cst_15 = arith.constant 0.000000e+00 : f32
    %19 = vector.broadcast %cst_15 : f32 to vector<128x32xf32>
    %20 = arith.maximumf %18, %19 : vector<128x32xf32>
    %21 = arith.truncf %20 : vector<128x32xf32> to vector<128x32xbf16>
    %c0_16 = arith.constant 0 : index
    %c0_17 = arith.constant 0 : index
    %22 = vector.load %arg4[%c0_16, %c0_17] : memref<128x32xbf16, #tpu.memory_space<vmem>>, vector<128x32xbf16>
    tpu.vector_store %arg4[%c0_16, %c0_17], %21 {strides = array<i32>} : memref<128x32xbf16, #tpu.memory_space<vmem>>, vector<128x32xbf16>,
    return
  }
  func.func @transform_0(%arg0: i32) -> (i32, i32, i32) {
    %c0_i32 = arith.constant 0 : i32
    %c0_i32_0 = arith.constant 0 : i32
    %c0_i32_1 = arith.constant 0 : i32
    return %c0_i32, %arg0, %c0_i32_0 : i32, i32, i32
  }
  func.func @transform_1(%arg0: i32) -> (i32, i32) {
    %c0_i32 = arith.constant 0 : i32
    %c0_i32_0 = arith.constant 0 : i32
    %c0_i32_1 = arith.constant 0 : i32
    return %c0_i32, %c0_i32_0 : i32, i32
  }
  func.func @transform_2(%arg0: i32) -> (i32, i32) {
    %c0_i32 = arith.constant 0 : i32
    %c0_i32_0 = arith.constant 0 : i32
    %c0_i32_1 = arith.constant 0 : i32
    return %c0_i32, %c0_i32_0 : i32, i32
  }
  func.func @transform_3(%arg0: i32) -> (i32, i32) {
    %c0_i32 = arith.constant 0 : i32
    %c0_i32_0 = arith.constant 0 : i32
    return %arg0, %c0_i32 : i32, i32
  }
}

module attributes {stable_mosaic.version = 11 : i64} {
  func.func @_conv_pool_kernel(%arg0: i32, %arg1: memref<4x32x288xbf16, #tpu.memory_space<vmem>>, %arg2: memref<288x64xbf16, #tpu.memory_space<vmem>>, %arg3: memref<1x64xf32, #tpu.memory_space<vmem>>, %arg4: memref<32x64xbf16, #tpu.memory_space<vmem>>) attributes {dimension_semantics = [#tpu.dimension_semantics<parallel>], iteration_bounds = array<i64: 1>, scalar_prefetch = 0 : i64, scratch_operands = 0 : i64, tpu.core_type = #tpu.core_type<tc>, window_params = [{transform_indices = @transform_0, window_bounds = array<i64: 4, 32, 288>}, {pipeline_mode = #tpu.pipeline_mode<synchronous>, transform_indices = @transform_1, window_bounds = array<i64: 288, 64>}, {pipeline_mode = #tpu.pipeline_mode<synchronous>, transform_indices = @transform_2, window_bounds = array<i64: 1, 64>}, {transform_indices = @transform_3, window_bounds = array<i64: 32, 64>}]} {
    %c0 = arith.constant 0 : index
    %c0_0 = arith.constant 0 : index
    %0 = vector.load %arg2[%c0, %c0_0] : memref<288x64xbf16, #tpu.memory_space<vmem>>, vector<288x64xbf16>
    %c0_1 = arith.constant 0 : index
    %c0_2 = arith.constant 0 : index
    %c0_3 = arith.constant 0 : index
    %1 = vector.load %arg1[%c0_1, %c0_2, %c0_3] : memref<4x32x288xbf16, #tpu.memory_space<vmem>>, vector<1x32x288xbf16>
    %2 = vector.shape_cast %1 : vector<1x32x288xbf16> to vector<32x288xbf16>
    %cst = arith.constant dense<0.000000e+00> : vector<32x64xf32>
    %3 = tpu.matmul %2, %0, %cst {dimension_numbers = #tpu.dot_dimension_numbers<[1], [0], [0], [1], [0, 0, 1, 1], [], []>} : vector<32x288xbf16>, vector<288x64xbf16>, vector<32x64xf32> -> vector<32x64xf32>
    %c1 = arith.constant 1 : index
    %c0_4 = arith.constant 0 : index
    %c0_5 = arith.constant 0 : index
    %4 = vector.load %arg1[%c1, %c0_4, %c0_5] : memref<4x32x288xbf16, #tpu.memory_space<vmem>>, vector<1x32x288xbf16>
    %5 = vector.shape_cast %4 : vector<1x32x288xbf16> to vector<32x288xbf16>
    %cst_6 = arith.constant dense<0.000000e+00> : vector<32x64xf32>
    %6 = tpu.matmul %5, %0, %cst_6 {dimension_numbers = #tpu.dot_dimension_numbers<[1], [0], [0], [1], [0, 0, 1, 1], [], []>} : vector<32x288xbf16>, vector<288x64xbf16>, vector<32x64xf32> -> vector<32x64xf32>
    %7 = arith.maximumf %3, %6 : vector<32x64xf32>
    %c2 = arith.constant 2 : index
    %c0_7 = arith.constant 0 : index
    %c0_8 = arith.constant 0 : index
    %8 = vector.load %arg1[%c2, %c0_7, %c0_8] : memref<4x32x288xbf16, #tpu.memory_space<vmem>>, vector<1x32x288xbf16>
    %9 = vector.shape_cast %8 : vector<1x32x288xbf16> to vector<32x288xbf16>
    %cst_9 = arith.constant dense<0.000000e+00> : vector<32x64xf32>
    %10 = tpu.matmul %9, %0, %cst_9 {dimension_numbers = #tpu.dot_dimension_numbers<[1], [0], [0], [1], [0, 0, 1, 1], [], []>} : vector<32x288xbf16>, vector<288x64xbf16>, vector<32x64xf32> -> vector<32x64xf32>
    %11 = arith.maximumf %7, %10 : vector<32x64xf32>
    %c3 = arith.constant 3 : index
    %c0_10 = arith.constant 0 : index
    %c0_11 = arith.constant 0 : index
    %12 = vector.load %arg1[%c3, %c0_10, %c0_11] : memref<4x32x288xbf16, #tpu.memory_space<vmem>>, vector<1x32x288xbf16>
    %13 = vector.shape_cast %12 : vector<1x32x288xbf16> to vector<32x288xbf16>
    %cst_12 = arith.constant dense<0.000000e+00> : vector<32x64xf32>
    %14 = tpu.matmul %13, %0, %cst_12 {dimension_numbers = #tpu.dot_dimension_numbers<[1], [0], [0], [1], [0, 0, 1, 1], [], []>} : vector<32x288xbf16>, vector<288x64xbf16>, vector<32x64xf32> -> vector<32x64xf32>
    %15 = arith.maximumf %11, %14 : vector<32x64xf32>
    %c0_13 = arith.constant 0 : index
    %c0_14 = arith.constant 0 : index
    %16 = vector.load %arg3[%c0_13, %c0_14] : memref<1x64xf32, #tpu.memory_space<vmem>>, vector<1x64xf32>
    %17 = vector.broadcast %16 : vector<1x64xf32> to vector<32x64xf32>
    %18 = arith.addf %15, %17 : vector<32x64xf32>
    %cst_15 = arith.constant 0.000000e+00 : f32
    %19 = vector.broadcast %cst_15 : f32 to vector<32x64xf32>
    %20 = arith.maximumf %18, %19 : vector<32x64xf32>
    %21 = arith.truncf %20 : vector<32x64xf32> to vector<32x64xbf16>
    %c0_16 = arith.constant 0 : index
    %c0_17 = arith.constant 0 : index
    %22 = vector.load %arg4[%c0_16, %c0_17] : memref<32x64xbf16, #tpu.memory_space<vmem>>, vector<32x64xbf16>
    tpu.vector_store %arg4[%c0_16, %c0_17], %21 {strides = array<i32>} : memref<32x64xbf16, #tpu.memory_space<vmem>>, vector<32x64xbf16>,
    return
  }
  func.func @transform_0(%arg0: i32) -> (i32, i32, i32) {
    %c0_i32 = arith.constant 0 : i32
    %c0_i32_0 = arith.constant 0 : i32
    %c0_i32_1 = arith.constant 0 : i32
    return %c0_i32, %arg0, %c0_i32_0 : i32, i32, i32
  }
  func.func @transform_1(%arg0: i32) -> (i32, i32) {
    %c0_i32 = arith.constant 0 : i32
    %c0_i32_0 = arith.constant 0 : i32
    %c0_i32_1 = arith.constant 0 : i32
    return %c0_i32, %c0_i32_0 : i32, i32
  }
  func.func @transform_2(%arg0: i32) -> (i32, i32) {
    %c0_i32 = arith.constant 0 : i32
    %c0_i32_0 = arith.constant 0 : i32
    %c0_i32_1 = arith.constant 0 : i32
    return %c0_i32, %c0_i32_0 : i32, i32
  }
  func.func @transform_3(%arg0: i32) -> (i32, i32) {
    %c0_i32 = arith.constant 0 : i32
    %c0_i32_0 = arith.constant 0 : i32
    return %arg0, %c0_i32 : i32, i32
  }
}

module attributes {stable_mosaic.version = 11 : i64} {
  func.func @_conv_pool_kernel(%arg0: i32, %arg1: memref<4x8x576xbf16, #tpu.memory_space<vmem>>, %arg2: memref<576x128xbf16, #tpu.memory_space<vmem>>, %arg3: memref<1x128xf32, #tpu.memory_space<vmem>>, %arg4: memref<8x128xbf16, #tpu.memory_space<vmem>>) attributes {dimension_semantics = [#tpu.dimension_semantics<parallel>], iteration_bounds = array<i64: 1>, scalar_prefetch = 0 : i64, scratch_operands = 0 : i64, tpu.core_type = #tpu.core_type<tc>, window_params = [{transform_indices = @transform_0, window_bounds = array<i64: 4, 8, 576>}, {pipeline_mode = #tpu.pipeline_mode<synchronous>, transform_indices = @transform_1, window_bounds = array<i64: 576, 128>}, {pipeline_mode = #tpu.pipeline_mode<synchronous>, transform_indices = @transform_2, window_bounds = array<i64: 1, 128>}, {transform_indices = @transform_3, window_bounds = array<i64: 8, 128>}]} {
    %c0 = arith.constant 0 : index
    %c0_0 = arith.constant 0 : index
    %0 = vector.load %arg2[%c0, %c0_0] : memref<576x128xbf16, #tpu.memory_space<vmem>>, vector<576x128xbf16>
    %c0_1 = arith.constant 0 : index
    %c0_2 = arith.constant 0 : index
    %c0_3 = arith.constant 0 : index
    %1 = vector.load %arg1[%c0_1, %c0_2, %c0_3] : memref<4x8x576xbf16, #tpu.memory_space<vmem>>, vector<1x8x576xbf16>
    %2 = vector.shape_cast %1 : vector<1x8x576xbf16> to vector<8x576xbf16>
    %cst = arith.constant dense<0.000000e+00> : vector<8x128xf32>
    %3 = tpu.matmul %2, %0, %cst {dimension_numbers = #tpu.dot_dimension_numbers<[1], [0], [0], [1], [0, 0, 1, 1], [], []>} : vector<8x576xbf16>, vector<576x128xbf16>, vector<8x128xf32> -> vector<8x128xf32>
    %c1 = arith.constant 1 : index
    %c0_4 = arith.constant 0 : index
    %c0_5 = arith.constant 0 : index
    %4 = vector.load %arg1[%c1, %c0_4, %c0_5] : memref<4x8x576xbf16, #tpu.memory_space<vmem>>, vector<1x8x576xbf16>
    %5 = vector.shape_cast %4 : vector<1x8x576xbf16> to vector<8x576xbf16>
    %cst_6 = arith.constant dense<0.000000e+00> : vector<8x128xf32>
    %6 = tpu.matmul %5, %0, %cst_6 {dimension_numbers = #tpu.dot_dimension_numbers<[1], [0], [0], [1], [0, 0, 1, 1], [], []>} : vector<8x576xbf16>, vector<576x128xbf16>, vector<8x128xf32> -> vector<8x128xf32>
    %7 = arith.maximumf %3, %6 : vector<8x128xf32>
    %c2 = arith.constant 2 : index
    %c0_7 = arith.constant 0 : index
    %c0_8 = arith.constant 0 : index
    %8 = vector.load %arg1[%c2, %c0_7, %c0_8] : memref<4x8x576xbf16, #tpu.memory_space<vmem>>, vector<1x8x576xbf16>
    %9 = vector.shape_cast %8 : vector<1x8x576xbf16> to vector<8x576xbf16>
    %cst_9 = arith.constant dense<0.000000e+00> : vector<8x128xf32>
    %10 = tpu.matmul %9, %0, %cst_9 {dimension_numbers = #tpu.dot_dimension_numbers<[1], [0], [0], [1], [0, 0, 1, 1], [], []>} : vector<8x576xbf16>, vector<576x128xbf16>, vector<8x128xf32> -> vector<8x128xf32>
    %11 = arith.maximumf %7, %10 : vector<8x128xf32>
    %c3 = arith.constant 3 : index
    %c0_10 = arith.constant 0 : index
    %c0_11 = arith.constant 0 : index
    %12 = vector.load %arg1[%c3, %c0_10, %c0_11] : memref<4x8x576xbf16, #tpu.memory_space<vmem>>, vector<1x8x576xbf16>
    %13 = vector.shape_cast %12 : vector<1x8x576xbf16> to vector<8x576xbf16>
    %cst_12 = arith.constant dense<0.000000e+00> : vector<8x128xf32>
    %14 = tpu.matmul %13, %0, %cst_12 {dimension_numbers = #tpu.dot_dimension_numbers<[1], [0], [0], [1], [0, 0, 1, 1], [], []>} : vector<8x576xbf16>, vector<576x128xbf16>, vector<8x128xf32> -> vector<8x128xf32>
    %15 = arith.maximumf %11, %14 : vector<8x128xf32>
    %c0_13 = arith.constant 0 : index
    %c0_14 = arith.constant 0 : index
    %16 = vector.load %arg3[%c0_13, %c0_14] : memref<1x128xf32, #tpu.memory_space<vmem>>, vector<1x128xf32>
    %17 = vector.broadcast %16 : vector<1x128xf32> to vector<8x128xf32>
    %18 = arith.addf %15, %17 : vector<8x128xf32>
    %cst_15 = arith.constant 0.000000e+00 : f32
    %19 = vector.broadcast %cst_15 : f32 to vector<8x128xf32>
    %20 = arith.maximumf %18, %19 : vector<8x128xf32>
    %21 = arith.truncf %20 : vector<8x128xf32> to vector<8x128xbf16>
    %c0_16 = arith.constant 0 : index
    %c0_17 = arith.constant 0 : index
    %22 = vector.load %arg4[%c0_16, %c0_17] : memref<8x128xbf16, #tpu.memory_space<vmem>>, vector<8x128xbf16>
    tpu.vector_store %arg4[%c0_16, %c0_17], %21 {strides = array<i32>} : memref<8x128xbf16, #tpu.memory_space<vmem>>, vector<8x128xbf16>,
    return
  }
  func.func @transform_0(%arg0: i32) -> (i32, i32, i32) {
    %c0_i32 = arith.constant 0 : i32
    %c0_i32_0 = arith.constant 0 : i32
    %c0_i32_1 = arith.constant 0 : i32
    return %c0_i32, %arg0, %c0_i32_0 : i32, i32, i32
  }
  func.func @transform_1(%arg0: i32) -> (i32, i32) {
    %c0_i32 = arith.constant 0 : i32
    %c0_i32_0 = arith.constant 0 : i32
    %c0_i32_1 = arith.constant 0 : i32
    return %c0_i32, %c0_i32_0 : i32, i32
  }
  func.func @transform_2(%arg0: i32) -> (i32, i32) {
    %c0_i32 = arith.constant 0 : i32
    %c0_i32_0 = arith.constant 0 : i32
    %c0_i32_1 = arith.constant 0 : i32
    return %c0_i32, %c0_i32_0 : i32, i32
  }
  func.func @transform_3(%arg0: i32) -> (i32, i32) {
    %c0_i32 = arith.constant 0 : i32
    %c0_i32_0 = arith.constant 0 : i32
    return %arg0, %c0_i32 : i32, i32
  }
}

module attributes {stable_mosaic.version = 11 : i64} {
  func.func @_head_kernel(%arg0: memref<2x512xbf16, #tpu.memory_space<vmem>>, %arg1: memref<512x512xbf16, #tpu.memory_space<vmem>>, %arg2: memref<1x512xf32, #tpu.memory_space<vmem>>, %arg3: memref<512x512xbf16, #tpu.memory_space<vmem>>, %arg4: memref<1x512xf32, #tpu.memory_space<vmem>>, %arg5: memref<512x10xbf16, #tpu.memory_space<vmem>>, %arg6: memref<1x10xf32, #tpu.memory_space<vmem>>, %arg7: memref<2x10xf32, #tpu.memory_space<vmem>>) attributes {dimension_semantics = [], scalar_prefetch = 0 : i64, scratch_operands = 0 : i64, tpu.core_type = #tpu.core_type<tc>} {
    %c0 = arith.constant 0 : index
    %c0_0 = arith.constant 0 : index
    %0 = vector.load %arg0[%c0, %c0_0] : memref<2x512xbf16, #tpu.memory_space<vmem>>, vector<2x512xbf16>
    %c0_1 = arith.constant 0 : index
    %c0_2 = arith.constant 0 : index
    %1 = vector.load %arg1[%c0_1, %c0_2] : memref<512x512xbf16, #tpu.memory_space<vmem>>, vector<512x512xbf16>
    %cst = arith.constant dense<0.000000e+00> : vector<2x512xf32>
    %2 = tpu.matmul %0, %1, %cst {dimension_numbers = #tpu.dot_dimension_numbers<[1], [0], [0], [1], [0, 0, 1, 1], [], []>} : vector<2x512xbf16>, vector<512x512xbf16>, vector<2x512xf32> -> vector<2x512xf32>
    %c0_3 = arith.constant 0 : index
    %c0_4 = arith.constant 0 : index
    %3 = vector.load %arg2[%c0_3, %c0_4] : memref<1x512xf32, #tpu.memory_space<vmem>>, vector<1x512xf32>
    %4 = vector.broadcast %3 : vector<1x512xf32> to vector<2x512xf32>
    %5 = arith.addf %2, %4 : vector<2x512xf32>
    %6 = arith.truncf %5 : vector<2x512xf32> to vector<2x512xbf16>
    %c0_5 = arith.constant 0 : index
    %c0_6 = arith.constant 0 : index
    %7 = vector.load %arg3[%c0_5, %c0_6] : memref<512x512xbf16, #tpu.memory_space<vmem>>, vector<512x512xbf16>
    %cst_7 = arith.constant dense<0.000000e+00> : vector<2x512xf32>
    %8 = tpu.matmul %6, %7, %cst_7 {dimension_numbers = #tpu.dot_dimension_numbers<[1], [0], [0], [1], [0, 0, 1, 1], [], []>} : vector<2x512xbf16>, vector<512x512xbf16>, vector<2x512xf32> -> vector<2x512xf32>
    %c0_8 = arith.constant 0 : index
    %c0_9 = arith.constant 0 : index
    %9 = vector.load %arg4[%c0_8, %c0_9] : memref<1x512xf32, #tpu.memory_space<vmem>>, vector<1x512xf32>
    %10 = vector.broadcast %9 : vector<1x512xf32> to vector<2x512xf32>
    %11 = arith.addf %8, %10 : vector<2x512xf32>
    %12 = arith.truncf %11 : vector<2x512xf32> to vector<2x512xbf16>
    %c0_10 = arith.constant 0 : index
    %c0_11 = arith.constant 0 : index
    %13 = vector.load %arg5[%c0_10, %c0_11] : memref<512x10xbf16, #tpu.memory_space<vmem>>, vector<512x10xbf16>
    %cst_12 = arith.constant dense<0.000000e+00> : vector<2x10xf32>
    %14 = tpu.matmul %12, %13, %cst_12 {dimension_numbers = #tpu.dot_dimension_numbers<[1], [0], [0], [1], [0, 0, 1, 1], [], []>} : vector<2x512xbf16>, vector<512x10xbf16>, vector<2x10xf32> -> vector<2x10xf32>
    %c0_13 = arith.constant 0 : index
    %c0_14 = arith.constant 0 : index
    %15 = vector.load %arg6[%c0_13, %c0_14] : memref<1x10xf32, #tpu.memory_space<vmem>>, vector<1x10xf32>
    %16 = vector.broadcast %15 : vector<1x10xf32> to vector<2x10xf32>
    %17 = arith.addf %14, %16 : vector<2x10xf32>
    %cst_15 = arith.constant dense<0xFF800000> : vector<2xf32>
    %18 = vector.multi_reduction <maximumf>, %17, %cst_15 [1] : vector<2x10xf32> to vector<2xf32>
    %19 = vector.shape_cast %18 : vector<2xf32> to vector<2x1xf32>
    %20 = vector.broadcast %19 : vector<2x1xf32> to vector<2x10xf32>
    %21 = arith.subf %17, %20 : vector<2x10xf32>
    %22 = math.exp %21 : vector<2x10xf32>
    %cst_16 = arith.constant dense<0.000000e+00> : vector<2xf32>
    %23 = vector.multi_reduction <add>, %22, %cst_16 [1] : vector<2x10xf32> to vector<2xf32>
    %24 = vector.shape_cast %23 : vector<2xf32> to vector<2x1xf32>
    %25 = math.log %24 : vector<2x1xf32>
    %26 = vector.broadcast %25 : vector<2x1xf32> to vector<2x10xf32>
    %27 = arith.subf %21, %26 : vector<2x10xf32>
    %c0_17 = arith.constant 0 : index
    %c0_18 = arith.constant 0 : index
    %28 = vector.load %arg7[%c0_17, %c0_18] : memref<2x10xf32, #tpu.memory_space<vmem>>, vector<2x10xf32>
    tpu.vector_store %arg7[%c0_17, %c0_18], %27 {strides = array<i32>} : memref<2x10xf32, #tpu.memory_space<vmem>>, vector<2x10xf32>,
    return
  }
}

</mosaic_0001>

<bundles_post_ra>
// kernel: net_forward.6
= control target key start
LH: loop header
LB: loop body
LE: loop exit
PB: predicated region body
PF: predicated region fallthrough
CT: control target
= control target key end

     0   :  { %s2905_s12 = smov 0   ;;  %s3458_s0 = inlined_call_operand.vmem [shape: bf16[2048,9], index: 0, kind: input, shape index: {}]   ;;  %s3459_s1 = inlined_call_operand.vmem [shape: bf16[9,8], index: 1, kind: input, shape index: {}]   ;;  %s3460_s2 = inlined_call_operand.vmem [shape: f32[1,8], index: 2, kind: input, shape index: {}]   ;;  %s3461_s3 = inlined_call_operand.vmem [shape: bf16[2048,8], index: 3, kind: output, shape index: {}]  }
   0x1 LB: > { %s2207_s13 = sadd.s32 4294967295, %s2882_s12   ;;  %p2211_p0 = scmp.ge.s32.totalorder %s2882_s12, 1  ;;  %s2882_s12 = sphi %s2905_s12, %s13_s12  }
   0x2   : > { %p138_p1 = scmp.lt.s32.totalorder %s2882_s12, 3 }
   0x4   : > { %p139_p2 = pnand %p2211_p0, %p138_p1 }
   0x5   : > { %v2810_v0 = vld [vmem:[%s3459_s1] sm:$0x1f] (!%p139_p2)   ;;  %vm830_vm0 = vcmask (!%p139_p2), 1043456   ;;  %vm831_vm1 = vcmask (!%p139_p2), 1044480   ;;  %s2212_s16 = sshll.u32 (!%p139_p2), %s2207_s13, 7  ;;  %v2884_v1 = vmov (!%p139_p2), 65535  }
   0x6   : > { %142 = sbr.rel (%p139_p2) target bundleno = 361 (0x169), region = 32  ;;  %v832_v2 = vsel (!%p139_p2), %vm830_vm0, 4294967295, %v2884_v1  ;;  %p163_p3 = scmp.lt.s32.totalorder (!%p139_p2), %s2212_s16, 255  ;;  %vm637_vm2 = vcmask (!%p139_p2), 72704   ;;  %vm2022_vm3 = vcmask (!%p139_p2), 60416  }
   0x7   : > { %v833_v3 = vsel (!%p139_p2), %vm831_vm1, %v832_v2, 0 }
   0x8   : > { %v835_v4 = vand.u32 (!%p139_p2), %v2810_v0, %v833_v3 }
   0xa   : > { %2669 = vmatprep.subr.bf16.mxu0 (!%p139_p2), %v835_v4  ;;  %2799 = vmatprep.subr.bf16.mxu1 (!%p139_p2), %v835_v4 }
   0xb   : > { %2670 = vmatpush3.bf16.msra.mxu0 (!%p139_p2), %v835_v4  ;;  %2800 = vmatpush3.bf16.msra.mxu1 (!%p139_p2), %v835_v4 }
   0xd   : > { %s3463_s16 = smov (!%p163_p3, %s2212_s16), 255 }
   0xe   : > { %s2213_s17 = sshll.u32 %s3463_s16, 2 }
   0xf   : > { %s2924_s20 = scalar_lea.vmem %s3458_s0, %s2213_s17  ;;  %s3069_s25 = scalar_lea.vmem %s3461_s3, %s2213_s17 }
  0x10   : > { %v2811_v5 = vld [vmem:[%s2924_s20] sm:$0xff]   ;;  %v2813_v7 = vld [vmem:[%s2924_s20 + $0x8] sm:$0xff]   ;;  %v2815_v9 = vld [vmem:[%s2924_s20 + $0x10] sm:$0xff]  }
  0x11   : > { %v2812_v6 = vld [vmem:[%s2924_s20 + $0x100] sm:$0xff]   ;;  %2671 = vmatprep.mubr.msk.bf16.mxu0 %vm637_vm2, %v2811_v5  ;;  %v2814_v8 = vld [vmem:[%s2924_s20 + $0x108] sm:$0xff]   ;;  %v2816_v10 = vld [vmem:[%s2924_s20 + $0x110] sm:$0xff]  }
  0x12   : > { %2735 = vmatprep.mubr.msk.bf16.mxu1 %vm637_vm2, %v2812_v6  ;;  %2672 = vmatmul.mubr.msk.bf16.vlgmr.msra.gmra.mrb[0].mxu0 %vm637_vm2, %v2813_v7  ;;  %v2817_v11 = vld [vmem:[%s2924_s20 + $0x18] sm:$0xff]   ;;  %v2819_v13 = vld [vmem:[%s2924_s20 + $0x20] sm:$0xff]   ;;  %v2821_v15 = vld [vmem:[%s2924_s20 + $0x28] sm:$0xff]  }
  0x13   : > { %2736 = vmatmul.mubr.msk.bf16.vlgmr.msra.gmra.mrb[0].mxu1 %vm637_vm2, %v2814_v8  ;;  %2675 = vmatprep.mubr.msk.bf16.mxu0 %vm637_vm2, %v2815_v9  ;;  %v2818_v12 = vld [vmem:[%s2924_s20 + $0x118] sm:$0xff]   ;;  %v2820_v14 = vld [vmem:[%s2924_s20 + $0x120] sm:$0xff]   ;;  %v2822_v16 = vld [vmem:[%s2924_s20 + $0x128] sm:$0xff]  }
  0x14   : > { %2739 = vmatprep.mubr.msk.bf16.mxu1 %vm637_vm2, %v2816_v10  ;;  %v2823_v17 = vld [vmem:[%s2924_s20 + $0x30] sm:$0xff]   ;;  %v2825_v19 = vld [vmem:[%s2924_s20 + $0x38] sm:$0xff]   ;;  %v2827_v21 = vld [vmem:[%s2924_s20 + $0x40] sm:$0xff]  }
  0x15   : > { %v2824_v18 = vld [vmem:[%s2924_s20 + $0x130] sm:$0xff]   ;;  %v2826_v20 = vld [vmem:[%s2924_s20 + $0x138] sm:$0xff]   ;;  %v2828_v22 = vld [vmem:[%s2924_s20 + $0x140] sm:$0xff]  }
  0x16   : > { %v2829_v23 = vld [vmem:[%s2924_s20 + $0x48] sm:$0xff]   ;;  %v2831_v25 = vld [vmem:[%s2924_s20 + $0x50] sm:$0xff]   ;;  %v2833_v27 = vld [vmem:[%s2924_s20 + $0x58] sm:$0xff]  }
  0x17   : > { %v2830_v24 = vld [vmem:[%s2924_s20 + $0x148] sm:$0xff]   ;;  %v2832_v26 = vld [vmem:[%s2924_s20 + $0x150] sm:$0xff]   ;;  %v2834_v28 = vld [vmem:[%s2924_s20 + $0x158] sm:$0xff]  }
  0x18   : > { %v2835_v29 = vld [vmem:[%s2924_s20 + $0x60] sm:$0xff]   ;;  %v2837_v31 = vld [vmem:[%s2924_s20 + $0x68] sm:$0xff]   ;;  %v2839_v33 = vld [vmem:[%s2924_s20 + $0x70] sm:$0xff]  }
  0x19   : > { %v2836_v30 = vld [vmem:[%s2924_s20 + $0x160] sm:$0xff]   ;;  %v2838_v32 = vld [vmem:[%s2924_s20 + $0x168] sm:$0xff]   ;;  %v2840_v34 = vld [vmem:[%s2924_s20 + $0x170] sm:$0xff]  }
  0x1a   : > { %2676 = vmatmul.mubr.msk.bf16.gmra.mrb[4].mxu0 %vm637_vm2, %v2817_v11  ;;  %v2841_v35 = vld [vmem:[%s2924_s20 + $0x78] sm:$0xff]   ;;  %v2843_v37 = vld [vmem:[%s2924_s20 + $0x80] sm:$0xff]   ;;  %v2845_v39 = vld [vmem:[%s2924_s20 + $0x88] sm:$0xff]  }
  0x1b   : > { %2740 = vmatmul.mubr.msk.bf16.gmra.mrb[4].mxu1 %vm637_vm2, %v2818_v12  ;;  %2679 = vmatprep.mubr.msk.bf16.mxu0 %vm637_vm2, %v2819_v13  ;;  %v2842_v36 = vld [vmem:[%s2924_s20 + $0x178] sm:$0xff]   ;;  %v2844_v38 = vld [vmem:[%s2924_s20 + $0x180] sm:$0xff]   ;;  %v2846_v40 = vld [vmem:[%s2924_s20 + $0x188] sm:$0xff]  }
  0x1c   : > { %2743 = vmatprep.mubr.msk.bf16.mxu1 %vm637_vm2, %v2820_v14  ;;  %v2847_v41 = vld [vmem:[%s2924_s20 + $0x90] sm:$0xff]   ;;  %v2849_v43 = vld [vmem:[%s2924_s20 + $0x98] sm:$0xff]   ;;  %v2851_v45 = vld [vmem:[%s2924_s20 + $0xa0] sm:$0xff]  }
  0x1d   : > { %v2848_v42 = vld [vmem:[%s2924_s20 + $0x190] sm:$0xff]   ;;  %v2850_v44 = vld [vmem:[%s2924_s20 + $0x198] sm:$0xff]   ;;  %v2852_v46 = vld [vmem:[%s2924_s20 + $0x1a0] sm:$0xff]  }
  0x1e   : > { %v2853_v47 = vld [vmem:[%s2924_s20 + $0xa8] sm:$0xff]   ;;  %v2855_v49 = vld [vmem:[%s2924_s20 + $0xb0] sm:$0xff]   ;;  %v2857_v51 = vld [vmem:[%s2924_s20 + $0xb8] sm:$0xff]  }
  0x1f   : > { %v2854_v48 = vld [vmem:[%s2924_s20 + $0x1a8] sm:$0xff]   ;;  %v2856_v50 = vld [vmem:[%s2924_s20 + $0x1b0] sm:$0xff]   ;;  %v2858_v52 = vld [vmem:[%s2924_s20 + $0x1b8] sm:$0xff]  }
  0x20   : > { %v2859_v53 = vld [vmem:[%s2924_s20 + $0xc0] sm:$0xff]   ;;  %v2861_v55 = vld [vmem:[%s2924_s20 + $0xc8] sm:$0xff]   ;;  %v2863_v57 = vld [vmem:[%s2924_s20 + $0xd0] sm:$0xff]  }
  0x21   : > { %v2860_v54 = vld [vmem:[%s2924_s20 + $0x1c0] sm:$0xff]   ;;  %v2862_v56 = vld [vmem:[%s2924_s20 + $0x1c8] sm:$0xff]   ;;  %v2864_v58 = vld [vmem:[%s2924_s20 + $0x1d0] sm:$0xff]  }
  0x22   : > { %2680 = vmatmul.mubr.msk.bf16.gmra.mrb[8].mxu0 %vm637_vm2, %v2821_v15  ;;  %v2865_v59 = vld [vmem:[%s2924_s20 + $0xd8] sm:$0xff]   ;;  %v2867_v61 = vld [vmem:[%s2924_s20 + $0xe0] sm:$0xff]   ;;  %v2869_v63 = vld [vmem:[%s2924_s20 + $0xe8] sm:$0xff]  }
  0x23   : > { %2744 = vmatmul.mubr.msk.bf16.gmra.mrb[8].mxu1 %vm637_vm2, %v2822_v16  ;;  %2683 = vmatprep.mubr.msk.bf16.mxu0 %vm637_vm2, %v2823_v17  ;;  %v2866_v60 = vld [vmem:[%s2924_s20 + $0x1d8] sm:$0xff]   ;;  %v2868_v62 = vld [vmem:[%s2924_s20 + $0x1e0] sm:$0xff]   ;;  %v2870_v0 = vld [vmem:[%s2924_s20 + $0x1e8] sm:$0xff]  }
  0x24   : > { %2747 = vmatprep.mubr.msk.bf16.mxu1 %vm637_vm2, %v2824_v18  ;;  %v2871_v1 = vld [vmem:[%s2924_s20 + $0xf0] sm:$0xff]   ;;  %v2873_v3 = vld [vmem:[%s2924_s20 + $0xf8] sm:$0xff]   ;;  %v3057_v5 = vld [vmem:[%s3460_s2] ss:$0 sm:$0xff] }
  0x25   : > { %v2872_v2 = vld [vmem:[%s2924_s20 + $0x1f0] sm:$0xff]   ;;  %v2874_v4 = vld [vmem:[%s2924_s20 + $0x1f8] sm:$0xff]  }
  0x2a   : > { %2684 = vmatmul.mubr.msk.bf16.gmra.mrb[12].mxu0 %vm637_vm2, %v2825_v19 }
  0x2b   : > { %2748 = vmatmul.mubr.msk.bf16.gmra.mrb[12].mxu1 %vm637_vm2, %v2826_v20  ;;  %2687 = vmatprep.mubr.msk.bf16.mxu0 %vm637_vm2, %v2827_v21 }
  0x2c   : > { %2751 = vmatprep.mubr.msk.bf16.mxu1 %vm637_vm2, %v2828_v22 }
  0x32   : > { %2688 = vmatmul.mubr.msk.bf16.gmra.mrb[16].mxu0 %vm637_vm2, %v2829_v23 }
  0x33   : > { %2752 = vmatmul.mubr.msk.bf16.gmra.mrb[16].mxu1 %vm637_vm2, %v2830_v24  ;;  %2691 = vmatprep.mubr.msk.bf16.mxu0 %vm637_vm2, %v2831_v25 }
  0x34   : > { %2755 = vmatprep.mubr.msk.bf16.mxu1 %vm637_vm2, %v2832_v26 }
  0x3a   : > { %2692 = vmatmul.mubr.msk.bf16.gmra.mrb[20].mxu0 %vm637_vm2, %v2833_v27 }
  0x3b   : > { %2756 = vmatmul.mubr.msk.bf16.gmra.mrb[20].mxu1 %vm637_vm2, %v2834_v28  ;;  %2695 = vmatprep.mubr.msk.bf16.mxu0 %vm637_vm2, %v2835_v29 }
  0x3c   : > { %2759 = vmatprep.mubr.msk.bf16.mxu1 %vm637_vm2, %v2836_v30 }
  0x42   : > { %2696 = vmatmul.mubr.msk.bf16.gmra.mrb[24].mxu0 %vm637_vm2, %v2837_v31 }
  0x43   : > { %2760 = vmatmul.mubr.msk.bf16.gmra.mrb[24].mxu1 %vm637_vm2, %v2838_v32  ;;  %2699 = vmatprep.mubr.msk.bf16.mxu0 %vm637_vm2, %v2839_v33 }
  0x44   : > { %2763 = vmatprep.mubr.msk.bf16.mxu1 %vm637_vm2, %v2840_v34 }
  0x4a   : > { %2700 = vmatmul.mubr.msk.bf16.gmra.mrb[28].mxu0 %vm637_vm2, %v2841_v35 }
  0x4b   : > { %2764 = vmatmul.mubr.msk.bf16.gmra.mrb[28].mxu1 %vm637_vm2, %v2842_v36  ;;  %2703 = vmatprep.mubr.msk.bf16.mxu0 %vm637_vm2, %v2843_v37 }
  0x4c   : > { %2767 = vmatprep.mubr.msk.bf16.mxu1 %vm637_vm2, %v2844_v38 }
  0x52   : > { %2704 = vmatmul.mubr.msk.bf16.gmra.mrb[32].mxu0 %vm637_vm2, %v2845_v39 }
  0x53   : > { %2768 = vmatmul.mubr.msk.bf16.gmra.mrb[32].mxu1 %vm637_vm2, %v2846_v40  ;;  %2707 = vmatprep.mubr.msk.bf16.mxu0 %vm637_vm2, %v2847_v41 }
  0x54   : > { %2771 = vmatprep.mubr.msk.bf16.mxu1 %vm637_vm2, %v2848_v42 }
  0x5a   : > { %2708 = vmatmul.mubr.msk.bf16.gmra.mrb[36].mxu0 %vm637_vm2, %v2849_v43 }
  0x5b   : > { %2772 = vmatmul.mubr.msk.bf16.gmra.mrb[36].mxu1 %vm637_vm2, %v2850_v44  ;;  %2711 = vmatprep.mubr.msk.bf16.mxu0 %vm637_vm2, %v2851_v45 }
  0x5c   : > { %2775 = vmatprep.mubr.msk.bf16.mxu1 %vm637_vm2, %v2852_v46 }
  0x62   : > { %2712 = vmatmul.mubr.msk.bf16.gmra.mrb[40].mxu0 %vm637_vm2, %v2853_v47 }
  0x63   : > { %2776 = vmatmul.mubr.msk.bf16.gmra.mrb[40].mxu1 %vm637_vm2, %v2854_v48  ;;  %2715 = vmatprep.mubr.msk.bf16.mxu0 %vm637_vm2, %v2855_v49 }
  0x64   : > { %2779 = vmatprep.mubr.msk.bf16.mxu1 %vm637_vm2, %v2856_v50 }
  0x6a   : > { %2716 = vmatmul.mubr.msk.bf16.gmra.mrb[44].mxu0 %vm637_vm2, %v2857_v51 }
  0x6b   : > { %2780 = vmatmul.mubr.msk.bf16.gmra.mrb[44].mxu1 %vm637_vm2, %v2858_v52  ;;  %2719 = vmatprep.mubr.msk.bf16.mxu0 %vm637_vm2, %v2859_v53 }
  0x6c   : > { %2783 = vmatprep.mubr.msk.bf16.mxu1 %vm637_vm2, %v2860_v54 }
  0x72   : > { %2720 = vmatmul.mubr.msk.bf16.gmra.mrb[48].mxu0 %vm637_vm2, %v2861_v55 }
  0x73   : > { %2784 = vmatmul.mubr.msk.bf16.gmra.mrb[48].mxu1 %vm637_vm2, %v2862_v56  ;;  %2723 = vmatprep.mubr.msk.bf16.mxu0 %vm637_vm2, %v2863_v57 }
  0x74   : > { %2787 = vmatprep.mubr.msk.bf16.mxu1 %vm637_vm2, %v2864_v58 }
  0x7a   : > { %2724 = vmatmul.mubr.msk.bf16.gmra.mrb[52].mxu0 %vm637_vm2, %v2865_v59 }
  0x7b   : > { %2788 = vmatmul.mubr.msk.bf16.gmra.mrb[52].mxu1 %vm637_vm2, %v2866_v60  ;;  %2727 = vmatprep.mubr.msk.bf16.mxu0 %vm637_vm2, %v2867_v61 }
  0x7c   : > { %2791 = vmatprep.mubr.msk.bf16.mxu1 %vm637_vm2, %v2868_v62 }
  0x82   : > { %2728 = vmatmul.mubr.msk.bf16.gmra.mrb[56].mxu0 %vm637_vm2, %v2869_v63 }
  0x83   : > { %2792 = vmatmul.mubr.msk.bf16.gmra.mrb[56].mxu1 %vm637_vm2, %v2870_v0  ;;  %2731 = vmatprep.mubr.msk.bf16.mxu0 %vm637_vm2, %v2871_v1 }
  0x84   : > { %2795 = vmatprep.mubr.msk.bf16.mxu1 %vm637_vm2, %v2872_v2 }
  0x8a   : > { %2732 = vmatmul.mubr.msk.bf16.gmra.mrb[60].mxu0 %vm637_vm2, %v2873_v3 }
  0x8b   : > { %2796 = vmatmul.mubr.msk.bf16.gmra.mrb[60].mxu1 %vm637_vm2, %v2874_v4 }
  0xe5   : > { %v2673_v6 = vpop.f32.mrb[0].mxu0 }
  0xe6   : > { %v880_v7 = vadd.f32 %v2673_v6, %v3057_v5  ;;  %v2737_v8 = vpop.f32.mrb[0].mxu1  ;;  %v871_v9 = vpop.f32.mrb[1].mxu0 }
  0xe7   : > { %v1136_v10 = vadd.f32 %v2737_v8, %v3057_v5  ;;  %v872_v11 = vadd.f32 %v3057_v5, %v871_v9  ;;  %v1127_v12 = vpop.f32.mrb[1].mxu1  ;;  %v2674_v13 = vpop.f32.mrb[2].mxu0 }
  0xe8   : > { %v1384_v14 = vmax.f32 %v880_v7, 0.0  ;;  %v1128_v15 = vadd.f32 %v3057_v5, %v1127_v12  ;;  %v883_v16 = vadd.f32 %v2674_v13, %v3057_v5  ;;  %v2738_v17 = vpop.f32.mrb[2].mxu1  ;;  %v874_v18 = vpop.f32.mrb[3].mxu0 }
  0xe9   : > { %v1448_v19 = vmax.f32 %v1136_v10, 0.0  ;;  %v1382_v20 = vmax.f32 %v872_v11, 0.0  ;;  %v1139_v21 = vadd.f32 %v2738_v17, %v3057_v5  ;;  %v875_v22 = vadd.f32 %v3057_v5, %v874_v18  ;;  %v1130_v23 = vpop.f32.mrb[3].mxu1 }
  0xea   : > { %v2478_v24 = vpack.c.bf16 %v1384_v14, %v1384_v14  ;;  %v1446_v25 = vmax.f32 %v1128_v15, 0.0  ;;  %v1385_v26 = vmax.f32 %v883_v16, 0.0  ;;  %v1131_v27 = vadd.f32 %v3057_v5, %v1130_v23 }
  0xeb   : > { %v2542_v28 = vpack.c.bf16 %v1448_v19, %v1448_v19  ;;  %v2476_v29 = vpack.c.bf16 %v1382_v20, %v1382_v20  ;;  %v1449_v30 = vmax.f32 %v1139_v21, 0.0  ;;  %v1383_v31 = vmax.f32 %v875_v22, 0.0 }
  0xec   : > { %2025 = vst.msk [vmem:[%s3069_s25 + $0x8] sm:$0xf] %vm2022_vm3, %v2478_v24  ;;  %v2540_v32 = vpack.c.bf16 %v1446_v25, %v1446_v25  ;;  %v2479_v33 = vpack.c.bf16 %v1385_v26, %v1385_v26  ;;  %v1447_v34 = vmax.f32 %v1131_v27, 0.0 }
  0xed   : > { %2089 = vst.msk [vmem:[%s3069_s25 + $0x108] sm:$0xf] %vm2022_vm3, %v2542_v28  ;;  %2023 = vst.msk [vmem:[%s3069_s25] sm:$0xf] %vm2022_vm3, %v2476_v29  ;;  %v2543_v35 = vpack.c.bf16 %v1449_v30, %v1449_v30  ;;  %v2477_v36 = vpack.c.bf16 %v1383_v31, %v1383_v31  ;;  %v2677_v37 = vpop.f32.mrb[4].mxu0 }
  0xee   : > { %2087 = vst.msk [vmem:[%s3069_s25 + $0x100] sm:$0xf] %vm2022_vm3, %v2540_v32  ;;  %2026 = vst.msk [vmem:[%s3069_s25 + $0xc] sm:$0xf] %vm2022_vm3, %v2479_v33  ;;  %v2541_v38 = vpack.c.bf16 %v1447_v34, %v1447_v34  ;;  %v896_v39 = vadd.f32 %v2677_v37, %v3057_v5  ;;  %v2741_v40 = vpop.f32.mrb[4].mxu1  ;;  %v887_v41 = vpop.f32.mrb[5].mxu0 }
  0xef   : > { %2090 = vst.msk [vmem:[%s3069_s25 + $0x10c] sm:$0xf] %vm2022_vm3, %v2543_v35  ;;  %2024 = vst.msk [vmem:[%s3069_s25 + $0x4] sm:$0xf] %vm2022_vm3, %v2477_v36  ;;  %v1152_v42 = vadd.f32 %v2741_v40, %v3057_v5  ;;  %v888_v43 = vadd.f32 %v3057_v5, %v887_v41  ;;  %v1143_v44 = vpop.f32.mrb[5].mxu1  ;;  %v2678_v45 = vpop.f32.mrb[6].mxu0 }
  0xf0   : > { %2088 = vst.msk [vmem:[%s3069_s25 + $0x104] sm:$0xf] %vm2022_vm3, %v2541_v38  ;;  %v1388_v46 = vmax.f32 %v896_v39, 0.0  ;;  %v1144_v47 = vadd.f32 %v3057_v5, %v1143_v44  ;;  %v899_v48 = vadd.f32 %v2678_v45, %v3057_v5  ;;  %v2742_v49 = vpop.f32.mrb[6].mxu1  ;;  %v890_v50 = vpop.f32.mrb[7].mxu0 }
  0xf1   : > { %v1452_v51 = vmax.f32 %v1152_v42, 0.0  ;;  %v1386_v52 = vmax.f32 %v888_v43, 0.0  ;;  %v1155_v53 = vadd.f32 %v2742_v49, %v3057_v5  ;;  %v891_v54 = vadd.f32 %v3057_v5, %v890_v50  ;;  %v1146_v55 = vpop.f32.mrb[7].mxu1 }
  0xf2   : > { %v2482_v56 = vpack.c.bf16 %v1388_v46, %v1388_v46  ;;  %v1450_v57 = vmax.f32 %v1144_v47, 0.0  ;;  %v1389_v58 = vmax.f32 %v899_v48, 0.0  ;;  %v1147_v59 = vadd.f32 %v3057_v5, %v1146_v55 }
  0xf3   : > { %v2546_v60 = vpack.c.bf16 %v1452_v51, %v1452_v51  ;;  %v2480_v61 = vpack.c.bf16 %v1386_v52, %v1386_v52  ;;  %v1453_v62 = vmax.f32 %v1155_v53, 0.0  ;;  %v1387_v63 = vmax.f32 %v891_v54, 0.0 }
  0xf4   : > { %2029 = vst.msk [vmem:[%s3069_s25 + $0x18] sm:$0xf] %vm2022_vm3, %v2482_v56  ;;  %v2544_v0 = vpack.c.bf16 %v1450_v57, %v1450_v57  ;;  %v2483_v1 = vpack.c.bf16 %v1389_v58, %v1389_v58  ;;  %v1451_v2 = vmax.f32 %v1147_v59, 0.0 }
  0xf5   : > { %2093 = vst.msk [vmem:[%s3069_s25 + $0x118] sm:$0xf] %vm2022_vm3, %v2546_v60  ;;  %2027 = vst.msk [vmem:[%s3069_s25 + $0x10] sm:$0xf] %vm2022_vm3, %v2480_v61  ;;  %v2547_v3 = vpack.c.bf16 %v1453_v62, %v1453_v62  ;;  %v2481_v4 = vpack.c.bf16 %v1387_v63, %v1387_v63  ;;  %v2681_v6 = vpop.f32.mrb[8].mxu0 }
  0xf6   : > { %2091 = vst.msk [vmem:[%s3069_s25 + $0x110] sm:$0xf] %vm2022_vm3, %v2544_v0  ;;  %2030 = vst.msk [vmem:[%s3069_s25 + $0x1c] sm:$0xf] %vm2022_vm3, %v2483_v1  ;;  %v2545_v7 = vpack.c.bf16 %v1451_v2, %v1451_v2  ;;  %v912_v8 = vadd.f32 %v2681_v6, %v3057_v5  ;;  %v2745_v9 = vpop.f32.mrb[8].mxu1  ;;  %v903_v10 = vpop.f32.mrb[9].mxu0 }
  0xf7   : > { %2094 = vst.msk [vmem:[%s3069_s25 + $0x11c] sm:$0xf] %vm2022_vm3, %v2547_v3  ;;  %2028 = vst.msk [vmem:[%s3069_s25 + $0x14] sm:$0xf] %vm2022_vm3, %v2481_v4  ;;  %v1168_v11 = vadd.f32 %v2745_v9, %v3057_v5  ;;  %v904_v12 = vadd.f32 %v3057_v5, %v903_v10  ;;  %v1159_v13 = vpop.f32.mrb[9].mxu1  ;;  %v2682_v14 = vpop.f32.mrb[10].mxu0 }
  0xf8   : > { %2092 = vst.msk [vmem:[%s3069_s25 + $0x114] sm:$0xf] %vm2022_vm3, %v2545_v7  ;;  %v1392_v15 = vmax.f32 %v912_v8, 0.0  ;;  %v1160_v16 = vadd.f32 %v3057_v5, %v1159_v13  ;;  %v915_v17 = vadd.f32 %v2682_v14, %v3057_v5  ;;  %v2746_v18 = vpop.f32.mrb[10].mxu1  ;;  %v906_v19 = vpop.f32.mrb[11].mxu0 }
  0xf9   : > { %v1456_v20 = vmax.f32 %v1168_v11, 0.0  ;;  %v1390_v21 = vmax.f32 %v904_v12, 0.0  ;;  %v1171_v22 = vadd.f32 %v2746_v18, %v3057_v5  ;;  %v907_v23 = vadd.f32 %v3057_v5, %v906_v19  ;;  %v1162_v24 = vpop.f32.mrb[11].mxu1 }
  0xfa   : > { %v2486_v25 = vpack.c.bf16 %v1392_v15, %v1392_v15  ;;  %v1454_v26 = vmax.f32 %v1160_v16, 0.0  ;;  %v1393_v27 = vmax.f32 %v915_v17, 0.0  ;;  %v1163_v28 = vadd.f32 %v3057_v5, %v1162_v24 }
  0xfb   : > { %v2550_v29 = vpack.c.bf16 %v1456_v20, %v1456_v20  ;;  %v2484_v30 = vpack.c.bf16 %v1390_v21, %v1390_v21  ;;  %v1457_v31 = vmax.f32 %v1171_v22, 0.0  ;;  %v1391_v32 = vmax.f32 %v907_v23, 0.0 }
  0xfc   : > { %2033 = vst.msk [vmem:[%s3069_s25 + $0x28] sm:$0xf] %vm2022_vm3, %v2486_v25  ;;  %v2548_v33 = vpack.c.bf16 %v1454_v26, %v1454_v26  ;;  %v2487_v34 = vpack.c.bf16 %v1393_v27, %v1393_v27  ;;  %v1455_v35 = vmax.f32 %v1163_v28, 0.0 }
  0xfd   : > { %2097 = vst.msk [vmem:[%s3069_s25 + $0x128] sm:$0xf] %vm2022_vm3, %v2550_v29  ;;  %2031 = vst.msk [vmem:[%s3069_s25 + $0x20] sm:$0xf] %vm2022_vm3, %v2484_v30  ;;  %v2551_v36 = vpack.c.bf16 %v1457_v31, %v1457_v31  ;;  %v2485_v37 = vpack.c.bf16 %v1391_v32, %v1391_v32  ;;  %v2685_v38 = vpop.f32.mrb[12].mxu0 }
  0xfe   : > { %2095 = vst.msk [vmem:[%s3069_s25 + $0x120] sm:$0xf] %vm2022_vm3, %v2548_v33  ;;  %2034 = vst.msk [vmem:[%s3069_s25 + $0x2c] sm:$0xf] %vm2022_vm3, %v2487_v34  ;;  %v2549_v39 = vpack.c.bf16 %v1455_v35, %v1455_v35  ;;  %v928_v40 = vadd.f32 %v2685_v38, %v3057_v5  ;;  %v2749_v41 = vpop.f32.mrb[12].mxu1  ;;  %v919_v42 = vpop.f32.mrb[13].mxu0 }
  0xff   : > { %2098 = vst.msk [vmem:[%s3069_s25 + $0x12c] sm:$0xf] %vm2022_vm3, %v2551_v36  ;;  %2032 = vst.msk [vmem:[%s3069_s25 + $0x24] sm:$0xf] %vm2022_vm3, %v2485_v37  ;;  %v1184_v43 = vadd.f32 %v2749_v41, %v3057_v5  ;;  %v920_v44 = vadd.f32 %v3057_v5, %v919_v42  ;;  %v1175_v45 = vpop.f32.mrb[13].mxu1  ;;  %v2686_v46 = vpop.f32.mrb[14].mxu0 }
 0x100   : > { %2096 = vst.msk [vmem:[%s3069_s25 + $0x124] sm:$0xf] %vm2022_vm3, %v2549_v39  ;;  %v1396_v47 = vmax.f32 %v928_v40, 0.0  ;;  %v1176_v48 = vadd.f32 %v3057_v5, %v1175_v45  ;;  %v931_v49 = vadd.f32 %v2686_v46, %v3057_v5  ;;  %v2750_v50 = vpop.f32.mrb[14].mxu1  ;;  %v922_v51 = vpop.f32.mrb[15].mxu0 }
 0x101   : > { %v1460_v52 = vmax.f32 %v1184_v43, 0.0  ;;  %v1394_v53 = vmax.f32 %v920_v44, 0.0  ;;  %v1187_v54 = vadd.f32 %v2750_v50, %v3057_v5  ;;  %v923_v55 = vadd.f32 %v3057_v5, %v922_v51  ;;  %v1178_v56 = vpop.f32.mrb[15].mxu1 }
 0x102   : > { %v2490_v57 = vpack.c.bf16 %v1396_v47, %v1396_v47  ;;  %v1458_v58 = vmax.f32 %v1176_v48, 0.0  ;;  %v1397_v59 = vmax.f32 %v931_v49, 0.0  ;;  %v1179_v60 = vadd.f32 %v3057_v5, %v1178_v56 }
 0x103   : > { %v2554_v61 = vpack.c.bf16 %v1460_v52, %v1460_v52  ;;  %v2488_v62 = vpack.c.bf16 %v1394_v53, %v1394_v53  ;;  %v1461_v63 = vmax.f32 %v1187_v54, 0.0  ;;  %v1395_v0 = vmax.f32 %v923_v55, 0.0 }
 0x104   : > { %2037 = vst.msk [vmem:[%s3069_s25 + $0x38] sm:$0xf] %vm2022_vm3, %v2490_v57  ;;  %v2552_v1 = vpack.c.bf16 %v1458_v58, %v1458_v58  ;;  %v2491_v2 = vpack.c.bf16 %v1397_v59, %v1397_v59  ;;  %v1459_v3 = vmax.f32 %v1179_v60, 0.0 }
 0x105   : > { %2101 = vst.msk [vmem:[%s3069_s25 + $0x138] sm:$0xf] %vm2022_vm3, %v2554_v61  ;;  %2035 = vst.msk [vmem:[%s3069_s25 + $0x30] sm:$0xf] %vm2022_vm3, %v2488_v62  ;;  %v2555_v4 = vpack.c.bf16 %v1461_v63, %v1461_v63  ;;  %v2489_v6 = vpack.c.bf16 %v1395_v0, %v1395_v0  ;;  %v2689_v7 = vpop.f32.mrb[16].mxu0 }
 0x106   : > { %2099 = vst.msk [vmem:[%s3069_s25 + $0x130] sm:$0xf] %vm2022_vm3, %v2552_v1  ;;  %2038 = vst.msk [vmem:[%s3069_s25 + $0x3c] sm:$0xf] %vm2022_vm3, %v2491_v2  ;;  %v2553_v8 = vpack.c.bf16 %v1459_v3, %v1459_v3  ;;  %v944_v9 = vadd.f32 %v2689_v7, %v3057_v5  ;;  %v2753_v10 = vpop.f32.mrb[16].mxu1  ;;  %v935_v11 = vpop.f32.mrb[17].mxu0 }
 0x107   : > { %2102 = vst.msk [vmem:[%s3069_s25 + $0x13c] sm:$0xf] %vm2022_vm3, %v2555_v4  ;;  %2036 = vst.msk [vmem:[%s3069_s25 + $0x34] sm:$0xf] %vm2022_vm3, %v2489_v6  ;;  %v1200_v12 = vadd.f32 %v2753_v10, %v3057_v5  ;;  %v936_v13 = vadd.f32 %v3057_v5, %v935_v11  ;;  %v1191_v14 = vpop.f32.mrb[17].mxu1  ;;  %v2690_v15 = vpop.f32.mrb[18].mxu0 }
 0x108   : > { %2100 = vst.msk [vmem:[%s3069_s25 + $0x134] sm:$0xf] %vm2022_vm3, %v2553_v8  ;;  %v1400_v16 = vmax.f32 %v944_v9, 0.0  ;;  %v1192_v17 = vadd.f32 %v3057_v5, %v1191_v14  ;;  %v947_v18 = vadd.f32 %v2690_v15, %v3057_v5  ;;  %v2754_v19 = vpop.f32.mrb[18].mxu1  ;;  %v938_v20 = vpop.f32.mrb[19].mxu0 }
 0x109   : > { %v1464_v21 = vmax.f32 %v1200_v12, 0.0  ;;  %v1398_v22 = vmax.f32 %v936_v13, 0.0  ;;  %v1203_v23 = vadd.f32 %v2754_v19, %v3057_v5  ;;  %v939_v24 = vadd.f32 %v3057_v5, %v938_v20  ;;  %v1194_v25 = vpop.f32.mrb[19].mxu1 }
 0x10a   : > { %v2494_v26 = vpack.c.bf16 %v1400_v16, %v1400_v16  ;;  %v1462_v27 = vmax.f32 %v1192_v17, 0.0  ;;  %v1401_v28 = vmax.f32 %v947_v18, 0.0  ;;  %v1195_v29 = vadd.f32 %v3057_v5, %v1194_v25 }
 0x10b   : > { %v2558_v30 = vpack.c.bf16 %v1464_v21, %v1464_v21  ;;  %v2492_v31 = vpack.c.bf16 %v1398_v22, %v1398_v22  ;;  %v1465_v32 = vmax.f32 %v1203_v23, 0.0  ;;  %v1399_v33 = vmax.f32 %v939_v24, 0.0 }
 0x10c   : > { %2041 = vst.msk [vmem:[%s3069_s25 + $0x48] sm:$0xf] %vm2022_vm3, %v2494_v26  ;;  %v2556_v34 = vpack.c.bf16 %v1462_v27, %v1462_v27  ;;  %v2495_v35 = vpack.c.bf16 %v1401_v28, %v1401_v28  ;;  %v1463_v36 = vmax.f32 %v1195_v29, 0.0 }
 0x10d   : > { %2105 = vst.msk [vmem:[%s3069_s25 + $0x148] sm:$0xf] %vm2022_vm3, %v2558_v30  ;;  %2039 = vst.msk [vmem:[%s3069_s25 + $0x40] sm:$0xf] %vm2022_vm3, %v2492_v31  ;;  %v2559_v37 = vpack.c.bf16 %v1465_v32, %v1465_v32  ;;  %v2493_v38 = vpack.c.bf16 %v1399_v33, %v1399_v33  ;;  %v2693_v39 = vpop.f32.mrb[20].mxu0 }
 0x10e   : > { %2103 = vst.msk [vmem:[%s3069_s25 + $0x140] sm:$0xf] %vm2022_vm3, %v2556_v34  ;;  %2042 = vst.msk [vmem:[%s3069_s25 + $0x4c] sm:$0xf] %vm2022_vm3, %v2495_v35  ;;  %v2557_v40 = vpack.c.bf16 %v1463_v36, %v1463_v36  ;;  %v960_v41 = vadd.f32 %v2693_v39, %v3057_v5  ;;  %v2757_v42 = vpop.f32.mrb[20].mxu1  ;;  %v951_v43 = vpop.f32.mrb[21].mxu0 }
 0x10f   : > { %2106 = vst.msk [vmem:[%s3069_s25 + $0x14c] sm:$0xf] %vm2022_vm3, %v2559_v37  ;;  %2040 = vst.msk [vmem:[%s3069_s25 + $0x44] sm:$0xf] %vm2022_vm3, %v2493_v38  ;;  %v1216_v44 = vadd.f32 %v2757_v42, %v3057_v5  ;;  %v952_v45 = vadd.f32 %v3057_v5, %v951_v43  ;;  %v1207_v46 = vpop.f32.mrb[21].mxu1  ;;  %v2694_v47 = vpop.f32.mrb[22].mxu0 }
 0x110   : > { %2104 = vst.msk [vmem:[%s3069_s25 + $0x144] sm:$0xf] %vm2022_vm3, %v2557_v40  ;;  %v1404_v48 = vmax.f32 %v960_v41, 0.0  ;;  %v1208_v49 = vadd.f32 %v3057_v5, %v1207_v46  ;;  %v963_v50 = vadd.f32 %v2694_v47, %v3057_v5  ;;  %v2758_v51 = vpop.f32.mrb[22].mxu1  ;;  %v954_v52 = vpop.f32.mrb[23].mxu0 }
 0x111   : > { %v1468_v53 = vmax.f32 %v1216_v44, 0.0  ;;  %v1402_v54 = vmax.f32 %v952_v45, 0.0  ;;  %v1219_v55 = vadd.f32 %v2758_v51, %v3057_v5  ;;  %v955_v56 = vadd.f32 %v3057_v5, %v954_v52  ;;  %v1210_v57 = vpop.f32.mrb[23].mxu1 }
 0x112   : > { %v2498_v58 = vpack.c.bf16 %v1404_v48, %v1404_v48  ;;  %v1466_v59 = vmax.f32 %v1208_v49, 0.0  ;;  %v1405_v60 = vmax.f32 %v963_v50, 0.0  ;;  %v1211_v61 = vadd.f32 %v3057_v5, %v1210_v57 }
 0x113   : > { %v2562_v62 = vpack.c.bf16 %v1468_v53, %v1468_v53  ;;  %v2496_v63 = vpack.c.bf16 %v1402_v54, %v1402_v54  ;;  %v1469_v0 = vmax.f32 %v1219_v55, 0.0  ;;  %v1403_v1 = vmax.f32 %v955_v56, 0.0 }
 0x114   : > { %2045 = vst.msk [vmem:[%s3069_s25 + $0x58] sm:$0xf] %vm2022_vm3, %v2498_v58  ;;  %v2560_v2 = vpack.c.bf16 %v1466_v59, %v1466_v59  ;;  %v2499_v3 = vpack.c.bf16 %v1405_v60, %v1405_v60  ;;  %v1467_v4 = vmax.f32 %v1211_v61, 0.0 }
 0x115   : > { %2109 = vst.msk [vmem:[%s3069_s25 + $0x158] sm:$0xf] %vm2022_vm3, %v2562_v62  ;;  %2043 = vst.msk [vmem:[%s3069_s25 + $0x50] sm:$0xf] %vm2022_vm3, %v2496_v63  ;;  %v2563_v6 = vpack.c.bf16 %v1469_v0, %v1469_v0  ;;  %v2497_v7 = vpack.c.bf16 %v1403_v1, %v1403_v1  ;;  %v2697_v8 = vpop.f32.mrb[24].mxu0 }
 0x116   : > { %2107 = vst.msk [vmem:[%s3069_s25 + $0x150] sm:$0xf] %vm2022_vm3, %v2560_v2  ;;  %2046 = vst.msk [vmem:[%s3069_s25 + $0x5c] sm:$0xf] %vm2022_vm3, %v2499_v3  ;;  %v2561_v9 = vpack.c.bf16 %v1467_v4, %v1467_v4  ;;  %v976_v10 = vadd.f32 %v2697_v8, %v3057_v5  ;;  %v2761_v11 = vpop.f32.mrb[24].mxu1  ;;  %v967_v12 = vpop.f32.mrb[25].mxu0 }
 0x117   : > { %2110 = vst.msk [vmem:[%s3069_s25 + $0x15c] sm:$0xf] %vm2022_vm3, %v2563_v6  ;;  %2044 = vst.msk [vmem:[%s3069_s25 + $0x54] sm:$0xf] %vm2022_vm3, %v2497_v7  ;;  %v1232_v13 = vadd.f32 %v2761_v11, %v3057_v5  ;;  %v968_v14 = vadd.f32 %v3057_v5, %v967_v12  ;;  %v1223_v15 = vpop.f32.mrb[25].mxu1  ;;  %v2698_v16 = vpop.f32.mrb[26].mxu0 }
 0x118   : > { %2108 = vst.msk [vmem:[%s3069_s25 + $0x154] sm:$0xf] %vm2022_vm3, %v2561_v9  ;;  %v1408_v17 = vmax.f32 %v976_v10, 0.0  ;;  %v1224_v18 = vadd.f32 %v3057_v5, %v1223_v15  ;;  %v979_v19 = vadd.f32 %v2698_v16, %v3057_v5  ;;  %v2762_v20 = vpop.f32.mrb[26].mxu1  ;;  %v970_v21 = vpop.f32.mrb[27].mxu0 }
 0x119   : > { %v1472_v22 = vmax.f32 %v1232_v13, 0.0  ;;  %v1406_v23 = vmax.f32 %v968_v14, 0.0  ;;  %v1235_v24 = vadd.f32 %v2762_v20, %v3057_v5  ;;  %v971_v25 = vadd.f32 %v3057_v5, %v970_v21  ;;  %v1226_v26 = vpop.f32.mrb[27].mxu1 }
 0x11a   : > { %v2502_v27 = vpack.c.bf16 %v1408_v17, %v1408_v17  ;;  %v1470_v28 = vmax.f32 %v1224_v18, 0.0  ;;  %v1409_v29 = vmax.f32 %v979_v19, 0.0  ;;  %v1227_v30 = vadd.f32 %v3057_v5, %v1226_v26 }
 0x11b   : > { %v2566_v31 = vpack.c.bf16 %v1472_v22, %v1472_v22  ;;  %v2500_v32 = vpack.c.bf16 %v1406_v23, %v1406_v23  ;;  %v1473_v33 = vmax.f32 %v1235_v24, 0.0  ;;  %v1407_v34 = vmax.f32 %v971_v25, 0.0 }
 0x11c   : > { %2049 = vst.msk [vmem:[%s3069_s25 + $0x68] sm:$0xf] %vm2022_vm3, %v2502_v27  ;;  %v2564_v35 = vpack.c.bf16 %v1470_v28, %v1470_v28  ;;  %v2503_v36 = vpack.c.bf16 %v1409_v29, %v1409_v29  ;;  %v1471_v37 = vmax.f32 %v1227_v30, 0.0 }
 0x11d   : > { %2113 = vst.msk [vmem:[%s3069_s25 + $0x168] sm:$0xf] %vm2022_vm3, %v2566_v31  ;;  %2047 = vst.msk [vmem:[%s3069_s25 + $0x60] sm:$0xf] %vm2022_vm3, %v2500_v32  ;;  %v2567_v38 = vpack.c.bf16 %v1473_v33, %v1473_v33  ;;  %v2501_v39 = vpack.c.bf16 %v1407_v34, %v1407_v34  ;;  %v2701_v40 = vpop.f32.mrb[28].mxu0 }
 0x11e   : > { %2111 = vst.msk [vmem:[%s3069_s25 + $0x160] sm:$0xf] %vm2022_vm3, %v2564_v35  ;;  %2050 = vst.msk [vmem:[%s3069_s25 + $0x6c] sm:$0xf] %vm2022_vm3, %v2503_v36  ;;  %v2565_v41 = vpack.c.bf16 %v1471_v37, %v1471_v37  ;;  %v992_v42 = vadd.f32 %v2701_v40, %v3057_v5  ;;  %v2765_v43 = vpop.f32.mrb[28].mxu1  ;;  %v983_v44 = vpop.f32.mrb[29].mxu0 }
 0x11f   : > { %2114 = vst.msk [vmem:[%s3069_s25 + $0x16c] sm:$0xf] %vm2022_vm3, %v2567_v38  ;;  %2048 = vst.msk [vmem:[%s3069_s25 + $0x64] sm:$0xf] %vm2022_vm3, %v2501_v39  ;;  %v1248_v45 = vadd.f32 %v2765_v43, %v3057_v5  ;;  %v984_v46 = vadd.f32 %v3057_v5, %v983_v44  ;;  %v1239_v47 = vpop.f32.mrb[29].mxu1  ;;  %v2702_v48 = vpop.f32.mrb[30].mxu0 }
 0x120   : > { %2112 = vst.msk [vmem:[%s3069_s25 + $0x164] sm:$0xf] %vm2022_vm3, %v2565_v41  ;;  %v1412_v49 = vmax.f32 %v992_v42, 0.0  ;;  %v1240_v50 = vadd.f32 %v3057_v5, %v1239_v47  ;;  %v995_v51 = vadd.f32 %v2702_v48, %v3057_v5  ;;  %v2766_v52 = vpop.f32.mrb[30].mxu1  ;;  %v986_v53 = vpop.f32.mrb[31].mxu0 }
 0x121   : > { %v1476_v54 = vmax.f32 %v1248_v45, 0.0  ;;  %v1410_v55 = vmax.f32 %v984_v46, 0.0  ;;  %v1251_v56 = vadd.f32 %v2766_v52, %v3057_v5  ;;  %v987_v57 = vadd.f32 %v3057_v5, %v986_v53  ;;  %v1242_v58 = vpop.f32.mrb[31].mxu1 }
 0x122   : > { %v2506_v59 = vpack.c.bf16 %v1412_v49, %v1412_v49  ;;  %v1474_v60 = vmax.f32 %v1240_v50, 0.0  ;;  %v1413_v61 = vmax.f32 %v995_v51, 0.0  ;;  %v1243_v62 = vadd.f32 %v3057_v5, %v1242_v58 }
 0x123   : > { %v2570_v63 = vpack.c.bf16 %v1476_v54, %v1476_v54  ;;  %v2504_v0 = vpack.c.bf16 %v1410_v55, %v1410_v55  ;;  %v1477_v1 = vmax.f32 %v1251_v56, 0.0  ;;  %v1411_v2 = vmax.f32 %v987_v57, 0.0 }
 0x124   : > { %2053 = vst.msk [vmem:[%s3069_s25 + $0x78] sm:$0xf] %vm2022_vm3, %v2506_v59  ;;  %v2568_v3 = vpack.c.bf16 %v1474_v60, %v1474_v60  ;;  %v2507_v4 = vpack.c.bf16 %v1413_v61, %v1413_v61  ;;  %v1475_v6 = vmax.f32 %v1243_v62, 0.0 }
 0x125   : > { %2117 = vst.msk [vmem:[%s3069_s25 + $0x178] sm:$0xf] %vm2022_vm3, %v2570_v63  ;;  %2051 = vst.msk [vmem:[%s3069_s25 + $0x70] sm:$0xf] %vm2022_vm3, %v2504_v0  ;;  %v2571_v7 = vpack.c.bf16 %v1477_v1, %v1477_v1  ;;  %v2505_v8 = vpack.c.bf16 %v1411_v2, %v1411_v2  ;;  %v2705_v9 = vpop.f32.mrb[32].mxu0 }
 0x126   : > { %2115 = vst.msk [vmem:[%s3069_s25 + $0x170] sm:$0xf] %vm2022_vm3, %v2568_v3  ;;  %2054 = vst.msk [vmem:[%s3069_s25 + $0x7c] sm:$0xf] %vm2022_vm3, %v2507_v4  ;;  %v2569_v10 = vpack.c.bf16 %v1475_v6, %v1475_v6  ;;  %v1008_v11 = vadd.f32 %v2705_v9, %v3057_v5  ;;  %v2769_v12 = vpop.f32.mrb[32].mxu1  ;;  %v999_v13 = vpop.f32.mrb[33].mxu0 }
 0x127   : > { %2118 = vst.msk [vmem:[%s3069_s25 + $0x17c] sm:$0xf] %vm2022_vm3, %v2571_v7  ;;  %2052 = vst.msk [vmem:[%s3069_s25 + $0x74] sm:$0xf] %vm2022_vm3, %v2505_v8  ;;  %v1264_v14 = vadd.f32 %v2769_v12, %v3057_v5  ;;  %v1000_v15 = vadd.f32 %v3057_v5, %v999_v13  ;;  %v1255_v16 = vpop.f32.mrb[33].mxu1  ;;  %v2706_v17 = vpop.f32.mrb[34].mxu0 }
 0x128   : > { %2116 = vst.msk [vmem:[%s3069_s25 + $0x174] sm:$0xf] %vm2022_vm3, %v2569_v10  ;;  %v1416_v18 = vmax.f32 %v1008_v11, 0.0  ;;  %v1256_v19 = vadd.f32 %v3057_v5, %v1255_v16  ;;  %v1011_v20 = vadd.f32 %v2706_v17, %v3057_v5  ;;  %v2770_v21 = vpop.f32.mrb[34].mxu1  ;;  %v1002_v22 = vpop.f32.mrb[35].mxu0 }
 0x129   : > { %v1480_v23 = vmax.f32 %v1264_v14, 0.0  ;;  %v1414_v24 = vmax.f32 %v1000_v15, 0.0  ;;  %v1267_v25 = vadd.f32 %v2770_v21, %v3057_v5  ;;  %v1003_v26 = vadd.f32 %v3057_v5, %v1002_v22  ;;  %v1258_v27 = vpop.f32.mrb[35].mxu1 }
 0x12a   : > { %v2510_v28 = vpack.c.bf16 %v1416_v18, %v1416_v18  ;;  %v1478_v29 = vmax.f32 %v1256_v19, 0.0  ;;  %v1417_v30 = vmax.f32 %v1011_v20, 0.0  ;;  %v1259_v31 = vadd.f32 %v3057_v5, %v1258_v27 }
 0x12b   : > { %v2574_v32 = vpack.c.bf16 %v1480_v23, %v1480_v23  ;;  %v2508_v33 = vpack.c.bf16 %v1414_v24, %v1414_v24  ;;  %v1481_v34 = vmax.f32 %v1267_v25, 0.0  ;;  %v1415_v35 = vmax.f32 %v1003_v26, 0.0 }
 0x12c   : > { %2057 = vst.msk [vmem:[%s3069_s25 + $0x88] sm:$0xf] %vm2022_vm3, %v2510_v28  ;;  %v2572_v36 = vpack.c.bf16 %v1478_v29, %v1478_v29  ;;  %v2511_v37 = vpack.c.bf16 %v1417_v30, %v1417_v30  ;;  %v1479_v38 = vmax.f32 %v1259_v31, 0.0 }
 0x12d   : > { %2121 = vst.msk [vmem:[%s3069_s25 + $0x188] sm:$0xf] %vm2022_vm3, %v2574_v32  ;;  %2055 = vst.msk [vmem:[%s3069_s25 + $0x80] sm:$0xf] %vm2022_vm3, %v2508_v33  ;;  %v2575_v39 = vpack.c.bf16 %v1481_v34, %v1481_v34  ;;  %v2509_v40 = vpack.c.bf16 %v1415_v35, %v1415_v35  ;;  %v2709_v41 = vpop.f32.mrb[36].mxu0 }
 0x12e   : > { %2119 = vst.msk [vmem:[%s3069_s25 + $0x180] sm:$0xf] %vm2022_vm3, %v2572_v36  ;;  %2058 = vst.msk [vmem:[%s3069_s25 + $0x8c] sm:$0xf] %vm2022_vm3, %v2511_v37  ;;  %v2573_v42 = vpack.c.bf16 %v1479_v38, %v1479_v38  ;;  %v1024_v43 = vadd.f32 %v2709_v41, %v3057_v5  ;;  %v2773_v44 = vpop.f32.mrb[36].mxu1  ;;  %v1015_v45 = vpop.f32.mrb[37].mxu0 }
 0x12f   : > { %2122 = vst.msk [vmem:[%s3069_s25 + $0x18c] sm:$0xf] %vm2022_vm3, %v2575_v39  ;;  %2056 = vst.msk [vmem:[%s3069_s25 + $0x84] sm:$0xf] %vm2022_vm3, %v2509_v40  ;;  %v1280_v46 = vadd.f32 %v2773_v44, %v3057_v5  ;;  %v1016_v47 = vadd.f32 %v3057_v5, %v1015_v45  ;;  %v1271_v48 = vpop.f32.mrb[37].mxu1  ;;  %v2710_v49 = vpop.f32.mrb[38].mxu0 }
 0x130   : > { %2120 = vst.msk [vmem:[%s3069_s25 + $0x184] sm:$0xf] %vm2022_vm3, %v2573_v42  ;;  %v1420_v50 = vmax.f32 %v1024_v43, 0.0  ;;  %v1272_v51 = vadd.f32 %v3057_v5, %v1271_v48  ;;  %v1027_v52 = vadd.f32 %v2710_v49, %v3057_v5  ;;  %v2774_v53 = vpop.f32.mrb[38].mxu1  ;;  %v1018_v54 = vpop.f32.mrb[39].mxu0 }
 0x131   : > { %v1484_v55 = vmax.f32 %v1280_v46, 0.0  ;;  %v1418_v56 = vmax.f32 %v1016_v47, 0.0  ;;  %v1283_v57 = vadd.f32 %v2774_v53, %v3057_v5  ;;  %v1019_v58 = vadd.f32 %v3057_v5, %v1018_v54  ;;  %v1274_v59 = vpop.f32.mrb[39].mxu1 }
 0x132   : > { %v2514_v60 = vpack.c.bf16 %v1420_v50, %v1420_v50  ;;  %v1482_v61 = vmax.f32 %v1272_v51, 0.0  ;;  %v1421_v62 = vmax.f32 %v1027_v52, 0.0  ;;  %v1275_v63 = vadd.f32 %v3057_v5, %v1274_v59 }
 0x133   : > { %v2578_v0 = vpack.c.bf16 %v1484_v55, %v1484_v55  ;;  %v2512_v1 = vpack.c.bf16 %v1418_v56, %v1418_v56  ;;  %v1485_v2 = vmax.f32 %v1283_v57, 0.0  ;;  %v1419_v3 = vmax.f32 %v1019_v58, 0.0 }
 0x134   : > { %2061 = vst.msk [vmem:[%s3069_s25 + $0x98] sm:$0xf] %vm2022_vm3, %v2514_v60  ;;  %v2576_v4 = vpack.c.bf16 %v1482_v61, %v1482_v61  ;;  %v2515_v6 = vpack.c.bf16 %v1421_v62, %v1421_v62  ;;  %v1483_v7 = vmax.f32 %v1275_v63, 0.0 }
 0x135   : > { %2125 = vst.msk [vmem:[%s3069_s25 + $0x198] sm:$0xf] %vm2022_vm3, %v2578_v0  ;;  %2059 = vst.msk [vmem:[%s3069_s25 + $0x90] sm:$0xf] %vm2022_vm3, %v2512_v1  ;;  %v2579_v8 = vpack.c.bf16 %v1485_v2, %v1485_v2  ;;  %v2513_v9 = vpack.c.bf16 %v1419_v3, %v1419_v3  ;;  %v2713_v10 = vpop.f32.mrb[40].mxu0 }
 0x136   : > { %2123 = vst.msk [vmem:[%s3069_s25 + $0x190] sm:$0xf] %vm2022_vm3, %v2576_v4  ;;  %2062 = vst.msk [vmem:[%s3069_s25 + $0x9c] sm:$0xf] %vm2022_vm3, %v2515_v6  ;;  %v2577_v11 = vpack.c.bf16 %v1483_v7, %v1483_v7  ;;  %v1040_v12 = vadd.f32 %v2713_v10, %v3057_v5  ;;  %v2777_v13 = vpop.f32.mrb[40].mxu1  ;;  %v1031_v14 = vpop.f32.mrb[41].mxu0 }
 0x137   : > { %2126 = vst.msk [vmem:[%s3069_s25 + $0x19c] sm:$0xf] %vm2022_vm3, %v2579_v8  ;;  %2060 = vst.msk [vmem:[%s3069_s25 + $0x94] sm:$0xf] %vm2022_vm3, %v2513_v9  ;;  %v1296_v15 = vadd.f32 %v2777_v13, %v3057_v5  ;;  %v1032_v16 = vadd.f32 %v3057_v5, %v1031_v14  ;;  %v1287_v17 = vpop.f32.mrb[41].mxu1  ;;  %v2714_v18 = vpop.f32.mrb[42].mxu0 }
 0x138   : > { %2124 = vst.msk [vmem:[%s3069_s25 + $0x194] sm:$0xf] %vm2022_vm3, %v2577_v11  ;;  %v1424_v19 = vmax.f32 %v1040_v12, 0.0  ;;  %v1288_v20 = vadd.f32 %v3057_v5, %v1287_v17  ;;  %v1043_v21 = vadd.f32 %v2714_v18, %v3057_v5  ;;  %v2778_v22 = vpop.f32.mrb[42].mxu1  ;;  %v1034_v23 = vpop.f32.mrb[43].mxu0 }
 0x139   : > { %v1488_v24 = vmax.f32 %v1296_v15, 0.0  ;;  %v1422_v25 = vmax.f32 %v1032_v16, 0.0  ;;  %v1299_v26 = vadd.f32 %v2778_v22, %v3057_v5  ;;  %v1035_v27 = vadd.f32 %v3057_v5, %v1034_v23  ;;  %v1290_v28 = vpop.f32.mrb[43].mxu1 }
 0x13a   : > { %v2518_v29 = vpack.c.bf16 %v1424_v19, %v1424_v19  ;;  %v1486_v30 = vmax.f32 %v1288_v20, 0.0  ;;  %v1425_v31 = vmax.f32 %v1043_v21, 0.0  ;;  %v1291_v32 = vadd.f32 %v3057_v5, %v1290_v28 }
 0x13b   : > { %v2582_v33 = vpack.c.bf16 %v1488_v24, %v1488_v24  ;;  %v2516_v34 = vpack.c.bf16 %v1422_v25, %v1422_v25  ;;  %v1489_v35 = vmax.f32 %v1299_v26, 0.0  ;;  %v1423_v36 = vmax.f32 %v1035_v27, 0.0 }
 0x13c   : > { %2065 = vst.msk [vmem:[%s3069_s25 + $0xa8] sm:$0xf] %vm2022_vm3, %v2518_v29  ;;  %v2580_v37 = vpack.c.bf16 %v1486_v30, %v1486_v30  ;;  %v2519_v38 = vpack.c.bf16 %v1425_v31, %v1425_v31  ;;  %v1487_v39 = vmax.f32 %v1291_v32, 0.0 }
 0x13d   : > { %2129 = vst.msk [vmem:[%s3069_s25 + $0x1a8] sm:$0xf] %vm2022_vm3, %v2582_v33  ;;  %2063 = vst.msk [vmem:[%s3069_s25 + $0xa0] sm:$0xf] %vm2022_vm3, %v2516_v34  ;;  %v2583_v40 = vpack.c.bf16 %v1489_v35, %v1489_v35  ;;  %v2517_v41 = vpack.c.bf16 %v1423_v36, %v1423_v36  ;;  %v2717_v42 = vpop.f32.mrb[44].mxu0 }
 0x13e   : > { %2127 = vst.msk [vmem:[%s3069_s25 + $0x1a0] sm:$0xf] %vm2022_vm3, %v2580_v37  ;;  %2066 = vst.msk [vmem:[%s3069_s25 + $0xac] sm:$0xf] %vm2022_vm3, %v2519_v38  ;;  %v2581_v43 = vpack.c.bf16 %v1487_v39, %v1487_v39  ;;  %v1056_v44 = vadd.f32 %v2717_v42, %v3057_v5  ;;  %v2781_v45 = vpop.f32.mrb[44].mxu1  ;;  %v1047_v46 = vpop.f32.mrb[45].mxu0 }
 0x13f   : > { %2130 = vst.msk [vmem:[%s3069_s25 + $0x1ac] sm:$0xf] %vm2022_vm3, %v2583_v40  ;;  %2064 = vst.msk [vmem:[%s3069_s25 + $0xa4] sm:$0xf] %vm2022_vm3, %v2517_v41  ;;  %v1312_v47 = vadd.f32 %v2781_v45, %v3057_v5  ;;  %v1048_v48 = vadd.f32 %v3057_v5, %v1047_v46  ;;  %v1303_v49 = vpop.f32.mrb[45].mxu1  ;;  %v2718_v50 = vpop.f32.mrb[46].mxu0 }
 0x140   : > { %2128 = vst.msk [vmem:[%s3069_s25 + $0x1a4] sm:$0xf] %vm2022_vm3, %v2581_v43  ;;  %v1428_v51 = vmax.f32 %v1056_v44, 0.0  ;;  %v1304_v52 = vadd.f32 %v3057_v5, %v1303_v49  ;;  %v1059_v53 = vadd.f32 %v2718_v50, %v3057_v5  ;;  %v2782_v54 = vpop.f32.mrb[46].mxu1  ;;  %v1050_v55 = vpop.f32.mrb[47].mxu0 }
 0x141   : > { %v1492_v56 = vmax.f32 %v1312_v47, 0.0  ;;  %v1426_v57 = vmax.f32 %v1048_v48, 0.0  ;;  %v1315_v58 = vadd.f32 %v2782_v54, %v3057_v5  ;;  %v1051_v59 = vadd.f32 %v3057_v5, %v1050_v55  ;;  %v1306_v60 = vpop.f32.mrb[47].mxu1  ;;  %v3375_v44 = vld [vmem:[%s3460_s2] ss:$0 sm:$0xff] }
 0x142   : > { %v2522_v61 = vpack.c.bf16 %v1428_v51, %v1428_v51  ;;  %v1490_v62 = vmax.f32 %v1304_v52, 0.0  ;;  %v1429_v63 = vmax.f32 %v1059_v53, 0.0  ;;  %v1307_v0 = vadd.f32 %v3057_v5, %v1306_v60 }
 0x143   : > { %v2586_v1 = vpack.c.bf16 %v1492_v56, %v1492_v56  ;;  %v2520_v2 = vpack.c.bf16 %v1426_v57, %v1426_v57  ;;  %v1493_v3 = vmax.f32 %v1315_v58, 0.0  ;;  %v1427_v4 = vmax.f32 %v1051_v59, 0.0 }
 0x144   : > { %2069 = vst.msk [vmem:[%s3069_s25 + $0xb8] sm:$0xf] %vm2022_vm3, %v2522_v61  ;;  %v2584_v6 = vpack.c.bf16 %v1490_v62, %v1490_v62  ;;  %v2523_v7 = vpack.c.bf16 %v1429_v63, %v1429_v63  ;;  %v1491_v8 = vmax.f32 %v1307_v0, 0.0 }
 0x145   : > { %2133 = vst.msk [vmem:[%s3069_s25 + $0x1b8] sm:$0xf] %vm2022_vm3, %v2586_v1  ;;  %2067 = vst.msk [vmem:[%s3069_s25 + $0xb0] sm:$0xf] %vm2022_vm3, %v2520_v2  ;;  %v2587_v9 = vpack.c.bf16 %v1493_v3, %v1493_v3  ;;  %v2521_v10 = vpack.c.bf16 %v1427_v4, %v1427_v4  ;;  %v2721_v11 = vpop.f32.mrb[48].mxu0 }
 0x146   : > { %2131 = vst.msk [vmem:[%s3069_s25 + $0x1b0] sm:$0xf] %vm2022_vm3, %v2584_v6  ;;  %2070 = vst.msk [vmem:[%s3069_s25 + $0xbc] sm:$0xf] %vm2022_vm3, %v2523_v7  ;;  %v2585_v12 = vpack.c.bf16 %v1491_v8, %v1491_v8  ;;  %v1072_v13 = vadd.f32 %v2721_v11, %v3057_v5  ;;  %v2785_v14 = vpop.f32.mrb[48].mxu1  ;;  %v1063_v15 = vpop.f32.mrb[49].mxu0 }
 0x147   : > { %2134 = vst.msk [vmem:[%s3069_s25 + $0x1bc] sm:$0xf] %vm2022_vm3, %v2587_v9  ;;  %2068 = vst.msk [vmem:[%s3069_s25 + $0xb4] sm:$0xf] %vm2022_vm3, %v2521_v10  ;;  %v1328_v16 = vadd.f32 %v2785_v14, %v3057_v5  ;;  %v1064_v17 = vadd.f32 %v3057_v5, %v1063_v15  ;;  %v1319_v18 = vpop.f32.mrb[49].mxu1  ;;  %v2722_v19 = vpop.f32.mrb[50].mxu0 }
 0x148   : > { %2132 = vst.msk [vmem:[%s3069_s25 + $0x1b4] sm:$0xf] %vm2022_vm3, %v2585_v12  ;;  %v1432_v20 = vmax.f32 %v1072_v13, 0.0  ;;  %v1320_v21 = vadd.f32 %v3057_v5, %v1319_v18  ;;  %v1075_v22 = vadd.f32 %v2722_v19, %v3057_v5  ;;  %v2786_v23 = vpop.f32.mrb[50].mxu1  ;;  %v1066_v24 = vpop.f32.mrb[51].mxu0 }
 0x149   : > { %v1496_v25 = vmax.f32 %v1328_v16, 0.0  ;;  %v1430_v26 = vmax.f32 %v1064_v17, 0.0  ;;  %v1331_v27 = vadd.f32 %v2786_v23, %v3057_v5  ;;  %v1067_v28 = vadd.f32 %v3057_v5, %v1066_v24  ;;  %v1322_v29 = vpop.f32.mrb[51].mxu1 }
 0x14a   : > { %v2526_v30 = vpack.c.bf16 %v1432_v20, %v1432_v20  ;;  %v1494_v31 = vmax.f32 %v1320_v21, 0.0  ;;  %v1433_v32 = vmax.f32 %v1075_v22, 0.0  ;;  %v1323_v33 = vadd.f32 %v3057_v5, %v1322_v29 }
 0x14b   : > { %v2590_v34 = vpack.c.bf16 %v1496_v25, %v1496_v25  ;;  %v2524_v35 = vpack.c.bf16 %v1430_v26, %v1430_v26  ;;  %v1497_v36 = vmax.f32 %v1331_v27, 0.0  ;;  %v1431_v37 = vmax.f32 %v1067_v28, 0.0 }
 0x14c   : > { %2073 = vst.msk [vmem:[%s3069_s25 + $0xc8] sm:$0xf] %vm2022_vm3, %v2526_v30  ;;  %v2588_v38 = vpack.c.bf16 %v1494_v31, %v1494_v31  ;;  %v2527_v39 = vpack.c.bf16 %v1433_v32, %v1433_v32  ;;  %v1495_v40 = vmax.f32 %v1323_v33, 0.0 }
 0x14d   : > { %2137 = vst.msk [vmem:[%s3069_s25 + $0x1c8] sm:$0xf] %vm2022_vm3, %v2590_v34  ;;  %2071 = vst.msk [vmem:[%s3069_s25 + $0xc0] sm:$0xf] %vm2022_vm3, %v2524_v35  ;;  %v2591_v41 = vpack.c.bf16 %v1497_v36, %v1497_v36  ;;  %v2525_v42 = vpack.c.bf16 %v1431_v37, %v1431_v37  ;;  %v2725_v43 = vpop.f32.mrb[52].mxu0 }
 0x14e   : > { %2135 = vst.msk [vmem:[%s3069_s25 + $0x1c0] sm:$0xf] %vm2022_vm3, %v2588_v38  ;;  %2074 = vst.msk [vmem:[%s3069_s25 + $0xcc] sm:$0xf] %vm2022_vm3, %v2527_v39  ;;  %v2589_v5 = vpack.c.bf16 %v1495_v40, %v1495_v40  ;;  %v1088_v45 = vadd.f32 %v3375_v44, %v2725_v43  ;;  %v2789_v46 = vpop.f32.mrb[52].mxu1  ;;  %v1079_v47 = vpop.f32.mrb[53].mxu0 }
 0x14f   : > { %2138 = vst.msk [vmem:[%s3069_s25 + $0x1cc] sm:$0xf] %vm2022_vm3, %v2591_v41  ;;  %2072 = vst.msk [vmem:[%s3069_s25 + $0xc4] sm:$0xf] %vm2022_vm3, %v2525_v42  ;;  %v1344_v48 = vadd.f32 %v3375_v44, %v2789_v46  ;;  %v1080_v49 = vadd.f32 %v3375_v44, %v1079_v47  ;;  %v1335_v50 = vpop.f32.mrb[53].mxu1  ;;  %v2726_v51 = vpop.f32.mrb[54].mxu0 }
 0x150   : > { %2136 = vst.msk [vmem:[%s3069_s25 + $0x1c4] sm:$0xf] %vm2022_vm3, %v2589_v5  ;;  %v1436_v52 = vmax.f32 %v1088_v45, 0.0  ;;  %v1336_v53 = vadd.f32 %v3375_v44, %v1335_v50  ;;  %v1091_v54 = vadd.f32 %v3375_v44, %v2726_v51  ;;  %v2790_v55 = vpop.f32.mrb[54].mxu1  ;;  %v1082_v56 = vpop.f32.mrb[55].mxu0 }
 0x151   : > { %v1500_v57 = vmax.f32 %v1344_v48, 0.0  ;;  %v1434_v58 = vmax.f32 %v1080_v49, 0.0  ;;  %v1347_v59 = vadd.f32 %v3375_v44, %v2790_v55  ;;  %v1083_v60 = vadd.f32 %v3375_v44, %v1082_v56  ;;  %v1338_v61 = vpop.f32.mrb[55].mxu1 }
 0x152   : > { %v2530_v62 = vpack.c.bf16 %v1436_v52, %v1436_v52  ;;  %v1498_v63 = vmax.f32 %v1336_v53, 0.0  ;;  %v1437_v0 = vmax.f32 %v1091_v54, 0.0  ;;  %v1339_v1 = vadd.f32 %v3375_v44, %v1338_v61 }
 0x153   : > { %v2594_v2 = vpack.c.bf16 %v1500_v57, %v1500_v57  ;;  %v2528_v3 = vpack.c.bf16 %v1434_v58, %v1434_v58  ;;  %v1501_v4 = vmax.f32 %v1347_v59, 0.0  ;;  %v1435_v6 = vmax.f32 %v1083_v60, 0.0 }
 0x154   : > { %2077 = vst.msk [vmem:[%s3069_s25 + $0xd8] sm:$0xf] %vm2022_vm3, %v2530_v62  ;;  %v2592_v7 = vpack.c.bf16 %v1498_v63, %v1498_v63  ;;  %v2531_v8 = vpack.c.bf16 %v1437_v0, %v1437_v0  ;;  %v1499_v9 = vmax.f32 %v1339_v1, 0.0 }
 0x155   : > { %2141 = vst.msk [vmem:[%s3069_s25 + $0x1d8] sm:$0xf] %vm2022_vm3, %v2594_v2  ;;  %2075 = vst.msk [vmem:[%s3069_s25 + $0xd0] sm:$0xf] %vm2022_vm3, %v2528_v3  ;;  %v2595_v10 = vpack.c.bf16 %v1501_v4, %v1501_v4  ;;  %v2529_v11 = vpack.c.bf16 %v1435_v6, %v1435_v6  ;;  %v2729_v12 = vpop.f32.mrb[56].mxu0 }
 0x156   : > { %2139 = vst.msk [vmem:[%s3069_s25 + $0x1d0] sm:$0xf] %vm2022_vm3, %v2592_v7  ;;  %2078 = vst.msk [vmem:[%s3069_s25 + $0xdc] sm:$0xf] %vm2022_vm3, %v2531_v8  ;;  %v2593_v13 = vpack.c.bf16 %v1499_v9, %v1499_v9  ;;  %v1104_v14 = vadd.f32 %v3375_v44, %v2729_v12  ;;  %v2793_v15 = vpop.f32.mrb[56].mxu1  ;;  %v1095_v16 = vpop.f32.mrb[57].mxu0 }
 0x157   : > { %2142 = vst.msk [vmem:[%s3069_s25 + $0x1dc] sm:$0xf] %vm2022_vm3, %v2595_v10  ;;  %2076 = vst.msk [vmem:[%s3069_s25 + $0xd4] sm:$0xf] %vm2022_vm3, %v2529_v11  ;;  %v1360_v17 = vadd.f32 %v3375_v44, %v2793_v15  ;;  %v1096_v18 = vadd.f32 %v3375_v44, %v1095_v16  ;;  %v1351_v19 = vpop.f32.mrb[57].mxu1  ;;  %v2730_v20 = vpop.f32.mrb[58].mxu0 }
 0x158   : > { %2140 = vst.msk [vmem:[%s3069_s25 + $0x1d4] sm:$0xf] %vm2022_vm3, %v2593_v13  ;;  %v1440_v21 = vmax.f32 %v1104_v14, 0.0  ;;  %v1352_v22 = vadd.f32 %v3375_v44, %v1351_v19  ;;  %v1107_v23 = vadd.f32 %v3375_v44, %v2730_v20  ;;  %v2794_v24 = vpop.f32.mrb[58].mxu1  ;;  %v1098_v25 = vpop.f32.mrb[59].mxu0 }
 0x159   : > { %v1504_v26 = vmax.f32 %v1360_v17, 0.0  ;;  %v1438_v27 = vmax.f32 %v1096_v18, 0.0  ;;  %v1363_v28 = vadd.f32 %v3375_v44, %v2794_v24  ;;  %v1099_v29 = vadd.f32 %v3375_v44, %v1098_v25  ;;  %v1354_v30 = vpop.f32.mrb[59].mxu1 }
 0x15a   : > { %v2534_v31 = vpack.c.bf16 %v1440_v21, %v1440_v21  ;;  %v1502_v32 = vmax.f32 %v1352_v22, 0.0  ;;  %v1441_v33 = vmax.f32 %v1107_v23, 0.0  ;;  %v1355_v34 = vadd.f32 %v3375_v44, %v1354_v30 }
 0x15b   : > { %v2598_v35 = vpack.c.bf16 %v1504_v26, %v1504_v26  ;;  %v2532_v36 = vpack.c.bf16 %v1438_v27, %v1438_v27  ;;  %v1505_v37 = vmax.f32 %v1363_v28, 0.0  ;;  %v1439_v38 = vmax.f32 %v1099_v29, 0.0 }
 0x15c   : > { %2081 = vst.msk [vmem:[%s3069_s25 + $0xe8] sm:$0xf] %vm2022_vm3, %v2534_v31  ;;  %v2596_v39 = vpack.c.bf16 %v1502_v32, %v1502_v32  ;;  %v2535_v40 = vpack.c.bf16 %v1441_v33, %v1441_v33  ;;  %v1503_v41 = vmax.f32 %v1355_v34, 0.0 }
 0x15d   : > { %2145 = vst.msk [vmem:[%s3069_s25 + $0x1e8] sm:$0xf] %vm2022_vm3, %v2598_v35  ;;  %2079 = vst.msk [vmem:[%s3069_s25 + $0xe0] sm:$0xf] %vm2022_vm3, %v2532_v36  ;;  %v2599_v42 = vpack.c.bf16 %v1505_v37, %v1505_v37  ;;  %v2533_v43 = vpack.c.bf16 %v1439_v38, %v1439_v38  ;;  %v2733_v5 = vpop.f32.mrb[60].mxu0 }
 0x15e   : > { %2143 = vst.msk [vmem:[%s3069_s25 + $0x1e0] sm:$0xf] %vm2022_vm3, %v2596_v39  ;;  %2082 = vst.msk [vmem:[%s3069_s25 + $0xec] sm:$0xf] %vm2022_vm3, %v2535_v40  ;;  %v2597_v45 = vpack.c.bf16 %v1503_v41, %v1503_v41  ;;  %v1120_v46 = vadd.f32 %v3375_v44, %v2733_v5  ;;  %v2797_v47 = vpop.f32.mrb[60].mxu1  ;;  %v1111_v48 = vpop.f32.mrb[61].mxu0 }
 0x15f   : > { %2146 = vst.msk [vmem:[%s3069_s25 + $0x1ec] sm:$0xf] %vm2022_vm3, %v2599_v42  ;;  %2080 = vst.msk [vmem:[%s3069_s25 + $0xe4] sm:$0xf] %vm2022_vm3, %v2533_v43  ;;  %v1376_v49 = vadd.f32 %v3375_v44, %v2797_v47  ;;  %v1112_v50 = vadd.f32 %v3375_v44, %v1111_v48  ;;  %v1367_v51 = vpop.f32.mrb[61].mxu1  ;;  %v2734_v52 = vpop.f32.mrb[62].mxu0 }
 0x160   : > { %2144 = vst.msk [vmem:[%s3069_s25 + $0x1e4] sm:$0xf] %vm2022_vm3, %v2597_v45  ;;  %v1444_v53 = vmax.f32 %v1120_v46, 0.0  ;;  %v1368_v54 = vadd.f32 %v3375_v44, %v1367_v51  ;;  %v1123_v55 = vadd.f32 %v3375_v44, %v2734_v52  ;;  %v2798_v56 = vpop.f32.mrb[62].mxu1  ;;  %v1114_v57 = vpop.f32.mrb[63].mxu0 }
 0x161   : > { %v1508_v58 = vmax.f32 %v1376_v49, 0.0  ;;  %v1442_v59 = vmax.f32 %v1112_v50, 0.0  ;;  %v1379_v60 = vadd.f32 %v3375_v44, %v2798_v56  ;;  %v1115_v61 = vadd.f32 %v3375_v44, %v1114_v57  ;;  %v1370_v62 = vpop.f32.mrb[63].mxu1 }
 0x162   : > { %v2538_v63 = vpack.c.bf16 %v1444_v53, %v1444_v53  ;;  %v1506_v0 = vmax.f32 %v1368_v54, 0.0  ;;  %v1445_v1 = vmax.f32 %v1123_v55, 0.0  ;;  %v1371_v2 = vadd.f32 %v3375_v44, %v1370_v62 }
 0x163   : > { %v2602_v3 = vpack.c.bf16 %v1508_v58, %v1508_v58  ;;  %v2536_v4 = vpack.c.bf16 %v1442_v59, %v1442_v59  ;;  %v1509_v6 = vmax.f32 %v1379_v60, 0.0  ;;  %v1443_v7 = vmax.f32 %v1115_v61, 0.0 }
 0x164   : > { %2085 = vst.msk [vmem:[%s3069_s25 + $0xf8] sm:$0xf] %vm2022_vm3, %v2538_v63  ;;  %v2600_v8 = vpack.c.bf16 %v1506_v0, %v1506_v0  ;;  %v2539_v9 = vpack.c.bf16 %v1445_v1, %v1445_v1  ;;  %v1507_v10 = vmax.f32 %v1371_v2, 0.0 }
 0x165   : > { %2149 = vst.msk [vmem:[%s3069_s25 + $0x1f8] sm:$0xf] %vm2022_vm3, %v2602_v3  ;;  %2083 = vst.msk [vmem:[%s3069_s25 + $0xf0] sm:$0xf] %vm2022_vm3, %v2536_v4  ;;  %v2603_v11 = vpack.c.bf16 %v1509_v6, %v1509_v6  ;;  %v2537_v12 = vpack.c.bf16 %v1443_v7, %v1443_v7 }
 0x166   : > { %2147 = vst.msk [vmem:[%s3069_s25 + $0x1f0] sm:$0xf] %vm2022_vm3, %v2600_v8  ;;  %2086 = vst.msk [vmem:[%s3069_s25 + $0xfc] sm:$0xf] %vm2022_vm3, %v2539_v9  ;;  %v2601_v44 = vpack.c.bf16 %v1507_v10, %v1507_v10 }
 0x167   : > { %2150 = vst.msk [vmem:[%s3069_s25 + $0x1fc] sm:$0xf] %vm2022_vm3, %v2603_v11  ;;  %2084 = vst.msk [vmem:[%s3069_s25 + $0xf4] sm:$0xf] %vm2022_vm3, %v2537_v12 }
 0x168   : > { %2148 = vst.msk [vmem:[%s3069_s25 + $0x1f4] sm:$0xf] %vm2022_vm3, %v2601_v44 }
 0x169 PF: > { %s13_s12 = sadd.s32 1, %s2882_s12  }
 0x16a   : > { %p10_p4 = scmp.ge.s32.totalorder %s13_s12, 4  }
 0x16c   :  { %12 = sbr.rel (!%p10_p4) target bundleno = 1 (0x1), region = 62 }

// kernel: net_forward.7
= control target key start
LH: loop header
LB: loop body
LE: loop exit
PB: predicated region body
PF: predicated region fallthrough
CT: control target
= control target key end

     0   :  { %vm275_vm0 = vcmask 588800   ;;  %vm372_vm1 = vcmask 1043456   ;;  %vm3078_vm2 = vcmask 125952   ;;  %s5763_s1 = inlined_call_operand.vmem [shape: bf16[72,16], index: 1, kind: input, shape index: {}]   ;;  %s5764_s0 = inlined_call_operand.vmem [shape: bf16[4,512,72], index: 0, kind: input, shape index: {}]   ;;  %s5765_s2 = inlined_call_operand.vmem [shape: f32[1,16], index: 2, kind: input, shape index: {}]   ;;  %s5766_s3 = inlined_call_operand.vmem [shape: bf16[512,16], index: 3, kind: output, shape index: {}]  }
   0x1   :  { %v4177_v0 = vld [vmem:[%s5763_s1] sm:$0xff]   ;;  %v4178_v1 = vld [vmem:[%s5763_s1 + $0x8] sm:$0xff]   ;;  %v4179_v2 = vld [vmem:[%s5763_s1 + $0x10] sm:$0xff]  }
   0x2   :  { %3877 = vmatprep.subr.bf16.mxu0 %v4177_v0  ;;  %3951 = vmatprep.subr.bf16.mxu1 %v4177_v0  ;;  %v4182_v3 = vld [vmem:[%s5764_s0] sm:$0xff]   ;;  %v4180_v5 = vld [vmem:[%s5763_s1 + $0x18] sm:$0xff]   ;;  %v4184_v8 = vld [vmem:[%s5764_s0 + $0x8] sm:$0xff]  }
   0x3   :  { %3878 = vmatpush3.bf16.msra.mxu0 %v4177_v0  ;;  %3952 = vmatpush3.bf16.msra.mxu1 %v4177_v0  ;;  %v4183_v4 = vld [vmem:[%s5764_s0 + $0x100] sm:$0xff]   ;;  %v4185_v9 = vld [vmem:[%s5764_s0 + $0x108] sm:$0xff]   ;;  %v4186_v10 = vld [vmem:[%s5764_s0 + $0x10] sm:$0xff]  }
   0x4   :  { %3879 = vmatprep.subr.bf16.mxu0 %v4178_v1  ;;  %3953 = vmatprep.subr.bf16.mxu1 %v4178_v1  ;;  %v4181_v6 = vld [vmem:[%s5763_s1 + $0x20] ss:$0 sps:$4 sm:$0xff]   ;;  %v4187_v11 = vld [vmem:[%s5764_s0 + $0x110] sm:$0xff]   ;;  %v4188_v12 = vld [vmem:[%s5764_s0 + $0x18] sm:$0xff]  }
   0x5   :  { %3887 = vmatprep.mubr.msk.bf16.mxu0 %vm275_vm0, %v4182_v3  ;;  %3961 = vmatprep.mubr.msk.bf16.mxu1 %vm275_vm0, %v4183_v4  ;;  %v374_v7 = vsel %vm372_vm1, %v4181_v6, 0  ;;  %v4189_v13 = vld [vmem:[%s5764_s0 + $0x118] sm:$0xff]   ;;  %v4190_v14 = vld [vmem:[%s5764_s0 + $0x20] sm:$0xff]   ;;  %v4192_v16 = vld [vmem:[%s5764_s0 + $0x28] sm:$0xff]  }
   0x6   :  { %v4191_v15 = vld [vmem:[%s5764_s0 + $0x120] sm:$0xff]   ;;  %v4193_v17 = vld [vmem:[%s5764_s0 + $0x128] sm:$0xff]   ;;  %v4194_v18 = vld [vmem:[%s5764_s0 + $0x30] sm:$0xff]  }
   0x7   :  { %3880 = vmatpush3.bf16.msra.mxu0 %v4178_v1  ;;  %3954 = vmatpush3.bf16.msra.mxu1 %v4178_v1  ;;  %v4195_v19 = vld [vmem:[%s5764_s0 + $0x130] sm:$0xff]   ;;  %v4196_v20 = vld [vmem:[%s5764_s0 + $0x38] sm:$0xff]   ;;  %v4198_v22 = vld [vmem:[%s5764_s0 + $0x40] sm:$0xff]  }
   0x8   :  { %3881 = vmatprep.subr.bf16.mxu0 %v4179_v2  ;;  %3955 = vmatprep.subr.bf16.mxu1 %v4179_v2  ;;  %v4197_v21 = vld [vmem:[%s5764_s0 + $0x138] sm:$0xff]   ;;  %v4199_v23 = vld [vmem:[%s5764_s0 + $0x140] sm:$0xff]   ;;  %v4200_v24 = vld [vmem:[%s5764_s0 + $0x48] sm:$0xff]  }
   0x9   :  { %v4201_v25 = vld [vmem:[%s5764_s0 + $0x148] sm:$0xff]   ;;  %v4202_v26 = vld [vmem:[%s5764_s0 + $0x50] sm:$0xff]   ;;  %v4204_v28 = vld [vmem:[%s5764_s0 + $0x58] sm:$0xff]  }
   0xa   :  { %v4203_v27 = vld [vmem:[%s5764_s0 + $0x150] sm:$0xff]   ;;  %v4205_v29 = vld [vmem:[%s5764_s0 + $0x158] sm:$0xff]   ;;  %v4206_v30 = vld [vmem:[%s5764_s0 + $0x60] sm:$0xff]  }
   0xb   :  { %3882 = vmatpush3.bf16.msra.mxu0 %v4179_v2  ;;  %3956 = vmatpush3.bf16.msra.mxu1 %v4179_v2  ;;  %v4207_v31 = vld [vmem:[%s5764_s0 + $0x160] sm:$0xff]   ;;  %v4208_v32 = vld [vmem:[%s5764_s0 + $0x68] sm:$0xff]   ;;  %v4210_v34 = vld [vmem:[%s5764_s0 + $0x70] sm:$0xff]  }
   0xc   :  { %3883 = vmatprep.subr.bf16.mxu0 %v4180_v5  ;;  %3957 = vmatprep.subr.bf16.mxu1 %v4180_v5  ;;  %v4209_v33 = vld [vmem:[%s5764_s0 + $0x168] sm:$0xff]   ;;  %v4211_v35 = vld [vmem:[%s5764_s0 + $0x170] sm:$0xff]   ;;  %v4212_v36 = vld [vmem:[%s5764_s0 + $0x78] sm:$0xff]  }
   0xd   :  { %v4213_v37 = vld [vmem:[%s5764_s0 + $0x178] sm:$0xff]   ;;  %v4214_v38 = vld [vmem:[%s5764_s0 + $0x80] sm:$0xff]   ;;  %v4216_v40 = vld [vmem:[%s5764_s0 + $0x88] sm:$0xff]  }
   0xe   :  { %v4215_v39 = vld [vmem:[%s5764_s0 + $0x180] sm:$0xff]   ;;  %v4217_v41 = vld [vmem:[%s5764_s0 + $0x188] sm:$0xff]   ;;  %v4218_v42 = vld [vmem:[%s5764_s0 + $0x90] sm:$0xff]  }
   0xf   :  { %3884 = vmatpush3.bf16.msra.mxu0 %v4180_v5  ;;  %3958 = vmatpush3.bf16.msra.mxu1 %v4180_v5  ;;  %v4219_v43 = vld [vmem:[%s5764_s0 + $0x190] sm:$0xff]   ;;  %v4220_v44 = vld [vmem:[%s5764_s0 + $0x98] sm:$0xff]   ;;  %v4222_v46 = vld [vmem:[%s5764_s0 + $0xa0] sm:$0xff]  }
  0x10   :  { %4173 = vmatprep.subr.msk.bf16.mxu0 %vm372_vm1, %v4181_v6  ;;  %4174 = vmatprep.subr.msk.bf16.mxu1 %vm372_vm1, %v4181_v6  ;;  %v4221_v45 = vld [vmem:[%s5764_s0 + $0x198] sm:$0xff]   ;;  %v4223_v47 = vld [vmem:[%s5764_s0 + $0x1a0] sm:$0xff]   ;;  %v4224_v48 = vld [vmem:[%s5764_s0 + $0xa8] sm:$0xff]  }
  0x11   :  { %v4225_v49 = vld [vmem:[%s5764_s0 + $0x1a8] sm:$0xff]   ;;  %v4226_v50 = vld [vmem:[%s5764_s0 + $0xb0] sm:$0xff]   ;;  %v4228_v52 = vld [vmem:[%s5764_s0 + $0xb8] sm:$0xff]  }
  0x12   :  { %v4227_v51 = vld [vmem:[%s5764_s0 + $0x1b0] sm:$0xff]   ;;  %v4229_v53 = vld [vmem:[%s5764_s0 + $0x1b8] sm:$0xff]   ;;  %v4230_v54 = vld [vmem:[%s5764_s0 + $0xc0] sm:$0xff]  }
  0x13   :  { %3886 = vmatpush3.bf16.msra.mxu0 %v374_v7  ;;  %3960 = vmatpush3.bf16.msra.mxu1 %v374_v7  ;;  %v4231_v55 = vld [vmem:[%s5764_s0 + $0x1c0] sm:$0xff]   ;;  %v4232_v56 = vld [vmem:[%s5764_s0 + $0xc8] sm:$0xff]   ;;  %v4234_v58 = vld [vmem:[%s5764_s0 + $0xd0] sm:$0xff]  }
  0x14   :  { %4025 = vmatprep.subr.bf16.mxu0 %v4177_v0  ;;  %4099 = vmatprep.subr.bf16.mxu1 %v4177_v0  ;;  %v4233_v57 = vld [vmem:[%s5764_s0 + $0x1c8] sm:$0xff]   ;;  %v4235_v59 = vld [vmem:[%s5764_s0 + $0x1d0] sm:$0xff]   ;;  %v4236_v60 = vld [vmem:[%s5764_s0 + $0xd8] sm:$0xff]  }
  0x15   :  { %v4237_v61 = vld [vmem:[%s5764_s0 + $0x1d8] sm:$0xff]   ;;  %v4238_v62 = vld [vmem:[%s5764_s0 + $0xe0] sm:$0xff]   ;;  %v4243_v3 = vld [vmem:[%s5764_s0 + $0x1f0] sm:$0xff]  }
  0x16   :  { %3888 = vmatmul.mubr.msk.bf16.vlgmr.msra.gmra.mrb[0].mxu0 %vm275_vm0, %v4184_v8  ;;  %3962 = vmatmul.mubr.msk.bf16.vlgmr.msra.gmra.mrb[0].mxu1 %vm275_vm0, %v4185_v9  ;;  %v4239_v63 = vld [vmem:[%s5764_s0 + $0x1e0] sm:$0xff]   ;;  %v4244_v4 = vld [vmem:[%s5764_s0 + $0xf8] sm:$0xff]   ;;  %v4248_v8 = vld [vmem:[%s5764_s0 + $0x208] sm:$0xff]  }
  0x17   :  { %4026 = vmatpush3.bf16.msra.mxu0 %v4177_v0  ;;  %4100 = vmatpush3.bf16.msra.mxu1 %v4177_v0  ;;  %v4240_v0 = vld [vmem:[%s5764_s0 + $0xe8] sm:$0xff]  }
  0x18   :  { %3891 = vmatprep.mubr.msk.bf16.mxu0 %vm275_vm0, %v4186_v10  ;;  %3965 = vmatprep.mubr.msk.bf16.mxu1 %vm275_vm0, %v4187_v11  ;;  %v4249_v9 = vld [vmem:[%s5764_s0 + $0x308] sm:$0xff]   ;;  %v4250_v10 = vld [vmem:[%s5764_s0 + $0x210] sm:$0xff]  }
  0x19   :  { %4027 = vmatprep.subr.bf16.mxu0 %v4178_v1  ;;  %4101 = vmatprep.subr.bf16.mxu1 %v4178_v1  ;;  %v4251_v11 = vld [vmem:[%s5764_s0 + $0x310] sm:$0xff]  }
  0x1b   :  { %4028 = vmatpush3.bf16.msra.mxu0 %v4178_v1  ;;  %4102 = vmatpush3.bf16.msra.mxu1 %v4178_v1  ;;  %v4241_v1 = vld [vmem:[%s5764_s0 + $0x1e8] sm:$0xff]  }
  0x1c   :  { %4029 = vmatprep.subr.bf16.mxu0 %v4179_v2  ;;  %4103 = vmatprep.subr.bf16.mxu1 %v4179_v2 }
  0x1e   :  { %3892 = vmatmul.mubr.msk.bf16.gmra.mrb[4].mxu0 %vm275_vm0, %v4188_v12  ;;  %3966 = vmatmul.mubr.msk.bf16.gmra.mrb[4].mxu1 %vm275_vm0, %v4189_v13  ;;  %v4252_v12 = vld [vmem:[%s5764_s0 + $0x218] sm:$0xff]  }
  0x1f   :  { %3895 = vmatprep.mubr.msk.bf16.mxu0 %vm275_vm0, %v4190_v14  ;;  %3969 = vmatprep.mubr.msk.bf16.mxu1 %vm275_vm0, %v4191_v15  ;;  %v4253_v13 = vld [vmem:[%s5764_s0 + $0x318] sm:$0xff]   ;;  %v4254_v14 = vld [vmem:[%s5764_s0 + $0x220] sm:$0xff]  }
  0x20   :  { %4030 = vmatpush3.bf16.msra.mxu0 %v4179_v2  ;;  %4104 = vmatpush3.bf16.msra.mxu1 %v4179_v2  ;;  %v4242_v2 = vld [vmem:[%s5764_s0 + $0xf0] sm:$0xff]   ;;  %v4255_v15 = vld [vmem:[%s5764_s0 + $0x320] sm:$0xff]  }
  0x21   :  { %4031 = vmatprep.subr.bf16.mxu0 %v4180_v5  ;;  %4105 = vmatprep.subr.bf16.mxu1 %v4180_v5 }
  0x24   :  { %4032 = vmatpush3.bf16.msra.mxu0 %v4180_v5  ;;  %4106 = vmatpush3.bf16.msra.mxu1 %v4180_v5  ;;  %v4245_v5 = vld [vmem:[%s5764_s0 + $0x1f8] sm:$0xff]  }
  0x25   :  { %4175 = vmatprep.subr.msk.bf16.mxu0 %vm372_vm1, %v4181_v6  ;;  %4176 = vmatprep.subr.msk.bf16.mxu1 %vm372_vm1, %v4181_v6  ;;  %v4246_v6 = vld [vmem:[%s5764_s0 + $0x200] sm:$0xff]  }
  0x26   :  { %3896 = vmatmul.mubr.msk.bf16.gmra.mrb[8].mxu0 %vm275_vm0, %v4192_v16  ;;  %3970 = vmatmul.mubr.msk.bf16.gmra.mrb[8].mxu1 %vm275_vm0, %v4193_v17  ;;  %v4256_v16 = vld [vmem:[%s5764_s0 + $0x228] sm:$0xff]  }
  0x27   :  { %3899 = vmatprep.mubr.msk.bf16.mxu0 %vm275_vm0, %v4194_v18  ;;  %3973 = vmatprep.mubr.msk.bf16.mxu1 %vm275_vm0, %v4195_v19  ;;  %v4257_v17 = vld [vmem:[%s5764_s0 + $0x328] sm:$0xff]   ;;  %v4258_v18 = vld [vmem:[%s5764_s0 + $0x230] sm:$0xff]  }
  0x28   :  { %4034 = vmatpush3.bf16.msra.mxu0 %v374_v7  ;;  %4108 = vmatpush3.bf16.msra.mxu1 %v374_v7  ;;  %v4247_v7 = vld [vmem:[%s5764_s0 + $0x300] sm:$0xff]   ;;  %v4259_v19 = vld [vmem:[%s5764_s0 + $0x330] sm:$0xff]  }
  0x2e   :  { %3900 = vmatmul.mubr.msk.bf16.gmra.mrb[12].mxu0 %vm275_vm0, %v4196_v20  ;;  %3974 = vmatmul.mubr.msk.bf16.gmra.mrb[12].mxu1 %vm275_vm0, %v4197_v21  ;;  %v4260_v20 = vld [vmem:[%s5764_s0 + $0x238] sm:$0xff]  }
  0x2f   :  { %3903 = vmatprep.mubr.msk.bf16.mxu0 %vm275_vm0, %v4198_v22  ;;  %3977 = vmatprep.mubr.msk.bf16.mxu1 %vm275_vm0, %v4199_v23  ;;  %v4261_v21 = vld [vmem:[%s5764_s0 + $0x338] sm:$0xff]   ;;  %v4262_v22 = vld [vmem:[%s5764_s0 + $0x240] sm:$0xff]  }
  0x30   :  { %v4263_v23 = vld [vmem:[%s5764_s0 + $0x340] sm:$0xff]  }
  0x36   :  { %3904 = vmatmul.mubr.msk.bf16.gmra.mrb[16].mxu0 %vm275_vm0, %v4200_v24  ;;  %3978 = vmatmul.mubr.msk.bf16.gmra.mrb[16].mxu1 %vm275_vm0, %v4201_v25  ;;  %v4264_v24 = vld [vmem:[%s5764_s0 + $0x248] sm:$0xff]  }
  0x37   :  { %3907 = vmatprep.mubr.msk.bf16.mxu0 %vm275_vm0, %v4202_v26  ;;  %3981 = vmatprep.mubr.msk.bf16.mxu1 %vm275_vm0, %v4203_v27  ;;  %v4265_v25 = vld [vmem:[%s5764_s0 + $0x348] sm:$0xff]   ;;  %v4266_v26 = vld [vmem:[%s5764_s0 + $0x250] sm:$0xff]  }
  0x38   :  { %v4267_v27 = vld [vmem:[%s5764_s0 + $0x350] sm:$0xff]  }
  0x3e   :  { %3908 = vmatmul.mubr.msk.bf16.gmra.mrb[20].mxu0 %vm275_vm0, %v4204_v28  ;;  %3982 = vmatmul.mubr.msk.bf16.gmra.mrb[20].mxu1 %vm275_vm0, %v4205_v29  ;;  %v4268_v28 = vld [vmem:[%s5764_s0 + $0x258] sm:$0xff]  }
  0x3f   :  { %3911 = vmatprep.mubr.msk.bf16.mxu0 %vm275_vm0, %v4206_v30  ;;  %3985 = vmatprep.mubr.msk.bf16.mxu1 %vm275_vm0, %v4207_v31  ;;  %v4269_v29 = vld [vmem:[%s5764_s0 + $0x358] sm:$0xff]   ;;  %v4270_v30 = vld [vmem:[%s5764_s0 + $0x260] sm:$0xff]  }
  0x40   :  { %v4271_v31 = vld [vmem:[%s5764_s0 + $0x360] sm:$0xff]  }
  0x46   :  { %3912 = vmatmul.mubr.msk.bf16.gmra.mrb[24].mxu0 %vm275_vm0, %v4208_v32  ;;  %3986 = vmatmul.mubr.msk.bf16.gmra.mrb[24].mxu1 %vm275_vm0, %v4209_v33  ;;  %v4272_v32 = vld [vmem:[%s5764_s0 + $0x268] sm:$0xff]  }
  0x47   :  { %3915 = vmatprep.mubr.msk.bf16.mxu0 %vm275_vm0, %v4210_v34  ;;  %3989 = vmatprep.mubr.msk.bf16.mxu1 %vm275_vm0, %v4211_v35  ;;  %v4273_v33 = vld [vmem:[%s5764_s0 + $0x368] sm:$0xff]   ;;  %v4274_v34 = vld [vmem:[%s5764_s0 + $0x270] sm:$0xff]  }
  0x48   :  { %v4275_v35 = vld [vmem:[%s5764_s0 + $0x370] sm:$0xff]  }
  0x4e   :  { %3916 = vmatmul.mubr.msk.bf16.gmra.mrb[28].mxu0 %vm275_vm0, %v4212_v36  ;;  %3990 = vmatmul.mubr.msk.bf16.gmra.mrb[28].mxu1 %vm275_vm0, %v4213_v37  ;;  %v4276_v36 = vld [vmem:[%s5764_s0 + $0x278] sm:$0xff]  }
  0x4f   :  { %3919 = vmatprep.mubr.msk.bf16.mxu0 %vm275_vm0, %v4214_v38  ;;  %3993 = vmatprep.mubr.msk.bf16.mxu1 %vm275_vm0, %v4215_v39  ;;  %v4277_v37 = vld [vmem:[%s5764_s0 + $0x378] sm:$0xff]   ;;  %v4278_v38 = vld [vmem:[%s5764_s0 + $0x280] sm:$0xff]  }
  0x50   :  { %v4279_v39 = vld [vmem:[%s5764_s0 + $0x380] sm:$0xff]  }
  0x56   :  { %3920 = vmatmul.mubr.msk.bf16.gmra.mrb[32].mxu0 %vm275_vm0, %v4216_v40  ;;  %3994 = vmatmul.mubr.msk.bf16.gmra.mrb[32].mxu1 %vm275_vm0, %v4217_v41  ;;  %v4280_v40 = vld [vmem:[%s5764_s0 + $0x288] sm:$0xff]  }
  0x57   :  { %3923 = vmatprep.mubr.msk.bf16.mxu0 %vm275_vm0, %v4218_v42  ;;  %3997 = vmatprep.mubr.msk.bf16.mxu1 %vm275_vm0, %v4219_v43  ;;  %v4281_v41 = vld [vmem:[%s5764_s0 + $0x388] sm:$0xff]   ;;  %v4282_v42 = vld [vmem:[%s5764_s0 + $0x290] sm:$0xff]  }
  0x58   :  { %v4283_v43 = vld [vmem:[%s5764_s0 + $0x390] sm:$0xff]  }
  0x5e   :  { %3924 = vmatmul.mubr.msk.bf16.gmra.mrb[36].mxu0 %vm275_vm0, %v4220_v44  ;;  %3998 = vmatmul.mubr.msk.bf16.gmra.mrb[36].mxu1 %vm275_vm0, %v4221_v45  ;;  %v4284_v44 = vld [vmem:[%s5764_s0 + $0x298] sm:$0xff]  }
  0x5f   :  { %3927 = vmatprep.mubr.msk.bf16.mxu0 %vm275_vm0, %v4222_v46  ;;  %4001 = vmatprep.mubr.msk.bf16.mxu1 %vm275_vm0, %v4223_v47  ;;  %v4285_v45 = vld [vmem:[%s5764_s0 + $0x398] sm:$0xff]   ;;  %v4286_v46 = vld [vmem:[%s5764_s0 + $0x2a0] sm:$0xff]  }
  0x60   :  { %v4287_v47 = vld [vmem:[%s5764_s0 + $0x3a0] sm:$0xff]  }
  0x66   :  { %3928 = vmatmul.mubr.msk.bf16.gmra.mrb[40].mxu0 %vm275_vm0, %v4224_v48  ;;  %4002 = vmatmul.mubr.msk.bf16.gmra.mrb[40].mxu1 %vm275_vm0, %v4225_v49  ;;  %v4288_v48 = vld [vmem:[%s5764_s0 + $0x2a8] sm:$0xff]  }
  0x67   :  { %3931 = vmatprep.mubr.msk.bf16.mxu0 %vm275_vm0, %v4226_v50  ;;  %4005 = vmatprep.mubr.msk.bf16.mxu1 %vm275_vm0, %v4227_v51  ;;  %v4289_v49 = vld [vmem:[%s5764_s0 + $0x3a8] sm:$0xff]   ;;  %v4290_v50 = vld [vmem:[%s5764_s0 + $0x2b0] sm:$0xff]  }
  0x68   :  { %v4291_v51 = vld [vmem:[%s5764_s0 + $0x3b0] sm:$0xff]  }
  0x6e   :  { %3932 = vmatmul.mubr.msk.bf16.gmra.mrb[44].mxu0 %vm275_vm0, %v4228_v52  ;;  %4006 = vmatmul.mubr.msk.bf16.gmra.mrb[44].mxu1 %vm275_vm0, %v4229_v53 }
  0x6f   :  { %3935 = vmatprep.mubr.msk.bf16.mxu0 %vm275_vm0, %v4230_v54  ;;  %4009 = vmatprep.mubr.msk.bf16.mxu1 %vm275_vm0, %v4231_v55 }
  0x76   :  { %3936 = vmatmul.mubr.msk.bf16.gmra.mrb[48].mxu0 %vm275_vm0, %v4232_v56  ;;  %4010 = vmatmul.mubr.msk.bf16.gmra.mrb[48].mxu1 %vm275_vm0, %v4233_v57  ;;  %v4292_v57 = vld [vmem:[%s5764_s0 + $0x2b8] sm:$0xff]  }
  0x77   :  { %3939 = vmatprep.mubr.msk.bf16.mxu0 %vm275_vm0, %v4234_v58  ;;  %4013 = vmatprep.mubr.msk.bf16.mxu1 %vm275_vm0, %v4235_v59  ;;  %v4293_v58 = vld [vmem:[%s5764_s0 + $0x3b8] sm:$0xff]  }
  0x7e   :  { %3940 = vmatmul.mubr.msk.bf16.gmra.mrb[52].mxu0 %vm275_vm0, %v4236_v60  ;;  %4014 = vmatmul.mubr.msk.bf16.gmra.mrb[52].mxu1 %vm275_vm0, %v4237_v61 }
  0x7f   :  { %3943 = vmatprep.mubr.msk.bf16.mxu0 %vm275_vm0, %v4238_v62  ;;  %4017 = vmatprep.mubr.msk.bf16.mxu1 %vm275_vm0, %v4239_v63  ;;  %v4294_v62 = vld [vmem:[%s5764_s0 + $0x2c0] sm:$0xff]  }
  0x80   :  { %v4295_v63 = vld [vmem:[%s5764_s0 + $0x3c0] sm:$0xff]  }
  0x86   :  { %3944 = vmatmul.mubr.msk.bf16.gmra.mrb[56].mxu0 %vm275_vm0, %v4240_v0  ;;  %4018 = vmatmul.mubr.msk.bf16.gmra.mrb[56].mxu1 %vm275_vm0, %v4241_v1 }
  0x87   :  { %3947 = vmatprep.mubr.msk.bf16.mxu0 %vm275_vm0, %v4242_v2  ;;  %4021 = vmatprep.mubr.msk.bf16.mxu1 %vm275_vm0, %v4243_v3 }
  0x8e   :  { %3948 = vmatmul.mubr.msk.bf16.gmra.mrb[60].mxu0 %vm275_vm0, %v4244_v4  ;;  %4022 = vmatmul.mubr.msk.bf16.gmra.mrb[60].mxu1 %vm275_vm0, %v4245_v5 }
  0x8f   :  { %4035 = vmatprep.mubr.msk.bf16.mxu0 %vm275_vm0, %v4246_v6  ;;  %4109 = vmatprep.mubr.msk.bf16.mxu1 %vm275_vm0, %v4247_v7 }
  0x96   :  { %4036 = vmatmul.mubr.msk.bf16.vlgmr.msra.gmra.mrb[64].mxu0 %vm275_vm0, %v4248_v8  ;;  %4110 = vmatmul.mubr.msk.bf16.vlgmr.msra.gmra.mrb[64].mxu1 %vm275_vm0, %v4249_v9  ;;  %v4296_v9 = vld [vmem:[%s5764_s0 + $0x2c8] sm:$0xff]  }
  0x97   :  { %4039 = vmatprep.mubr.msk.bf16.mxu0 %vm275_vm0, %v4250_v10  ;;  %4113 = vmatprep.mubr.msk.bf16.mxu1 %vm275_vm0, %v4251_v11  ;;  %v4297_v10 = vld [vmem:[%s5764_s0 + $0x3c8] sm:$0xff]  }
  0x9e   :  { %4040 = vmatmul.mubr.msk.bf16.gmra.mrb[68].mxu0 %vm275_vm0, %v4252_v12  ;;  %4114 = vmatmul.mubr.msk.bf16.gmra.mrb[68].mxu1 %vm275_vm0, %v4253_v13 }
  0x9f   :  { %4043 = vmatprep.mubr.msk.bf16.mxu0 %vm275_vm0, %v4254_v14  ;;  %4117 = vmatprep.mubr.msk.bf16.mxu1 %vm275_vm0, %v4255_v15  ;;  %v4298_v14 = vld [vmem:[%s5764_s0 + $0x2d0] sm:$0xff]  }
  0xa0   :  { %v4299_v15 = vld [vmem:[%s5764_s0 + $0x3d0] sm:$0xff]  }
  0xa6   :  { %4044 = vmatmul.mubr.msk.bf16.gmra.mrb[72].mxu0 %vm275_vm0, %v4256_v16  ;;  %4118 = vmatmul.mubr.msk.bf16.gmra.mrb[72].mxu1 %vm275_vm0, %v4257_v17 }
  0xa7   :  { %4047 = vmatprep.mubr.msk.bf16.mxu0 %vm275_vm0, %v4258_v18  ;;  %4121 = vmatprep.mubr.msk.bf16.mxu1 %vm275_vm0, %v4259_v19 }
  0xae   :  { %4048 = vmatmul.mubr.msk.bf16.gmra.mrb[76].mxu0 %vm275_vm0, %v4260_v20  ;;  %4122 = vmatmul.mubr.msk.bf16.gmra.mrb[76].mxu1 %vm275_vm0, %v4261_v21 }
  0xaf   :  { %4051 = vmatprep.mubr.msk.bf16.mxu0 %vm275_vm0, %v4262_v22  ;;  %4125 = vmatprep.mubr.msk.bf16.mxu1 %vm275_vm0, %v4263_v23 }
  0xb6   :  { %4052 = vmatmul.mubr.msk.bf16.gmra.mrb[80].mxu0 %vm275_vm0, %v4264_v24  ;;  %4126 = vmatmul.mubr.msk.bf16.gmra.mrb[80].mxu1 %vm275_vm0, %v4265_v25  ;;  %v4300_v25 = vld [vmem:[%s5764_s0 + $0x2d8] sm:$0xff]  }
  0xb7   :  { %4055 = vmatprep.mubr.msk.bf16.mxu0 %vm275_vm0, %v4266_v26  ;;  %4129 = vmatprep.mubr.msk.bf16.mxu1 %vm275_vm0, %v4267_v27  ;;  %v4301_v26 = vld [vmem:[%s5764_s0 + $0x3d8] sm:$0xff]  }
  0xbe   :  { %4056 = vmatmul.mubr.msk.bf16.gmra.mrb[84].mxu0 %vm275_vm0, %v4268_v28  ;;  %4130 = vmatmul.mubr.msk.bf16.gmra.mrb[84].mxu1 %vm275_vm0, %v4269_v29 }
  0xbf   :  { %4059 = vmatprep.mubr.msk.bf16.mxu0 %vm275_vm0, %v4270_v30  ;;  %4133 = vmatprep.mubr.msk.bf16.mxu1 %vm275_vm0, %v4271_v31  ;;  %v4302_v30 = vld [vmem:[%s5764_s0 + $0x2e0] sm:$0xff]  }
  0xc0   :  { %v4303_v31 = vld [vmem:[%s5764_s0 + $0x3e0] sm:$0xff]  }
  0xc6   :  { %4060 = vmatmul.mubr.msk.bf16.gmra.mrb[88].mxu0 %vm275_vm0, %v4272_v32  ;;  %4134 = vmatmul.mubr.msk.bf16.gmra.mrb[88].mxu1 %vm275_vm0, %v4273_v33 }
  0xc7   :  { %4063 = vmatprep.mubr.msk.bf16.mxu0 %vm275_vm0, %v4274_v34  ;;  %4137 = vmatprep.mubr.msk.bf16.mxu1 %vm275_vm0, %v4275_v35 }
  0xce   :  { %4064 = vmatmul.mubr.msk.bf16.gmra.mrb[92].mxu0 %vm275_vm0, %v4276_v36  ;;  %4138 = vmatmul.mubr.msk.bf16.gmra.mrb[92].mxu1 %vm275_vm0, %v4277_v37 }
  0xcf   :  { %4067 = vmatprep.mubr.msk.bf16.mxu0 %vm275_vm0, %v4278_v38  ;;  %4141 = vmatprep.mubr.msk.bf16.mxu1 %vm275_vm0, %v4279_v39 }
  0xd6   :  { %4068 = vmatmul.mubr.msk.bf16.gmra.mrb[96].mxu0 %vm275_vm0, %v4280_v40  ;;  %4142 = vmatmul.mubr.msk.bf16.gmra.mrb[96].mxu1 %vm275_vm0, %v4281_v41  ;;  %v4304_v41 = vld [vmem:[%s5764_s0 + $0x2e8] sm:$0xff]  }
  0xd7   :  { %4071 = vmatprep.mubr.msk.bf16.mxu0 %vm275_vm0, %v4282_v42  ;;  %4145 = vmatprep.mubr.msk.bf16.mxu1 %vm275_vm0, %v4283_v43  ;;  %v4305_v42 = vld [vmem:[%s5764_s0 + $0x3e8] sm:$0xff]  }
  0xde   :  { %4072 = vmatmul.mubr.msk.bf16.gmra.mrb[100].mxu0 %vm275_vm0, %v4284_v44  ;;  %4146 = vmatmul.mubr.msk.bf16.gmra.mrb[100].mxu1 %vm275_vm0, %v4285_v45 }
  0xdf   :  { %4075 = vmatprep.mubr.msk.bf16.mxu0 %vm275_vm0, %v4286_v46  ;;  %4149 = vmatprep.mubr.msk.bf16.mxu1 %vm275_vm0, %v4287_v47  ;;  %v4306_v46 = vld [vmem:[%s5764_s0 + $0x2f0] sm:$0xff]  }
  0xe0   :  { %v4307_v47 = vld [vmem:[%s5764_s0 + $0x3f0] sm:$0xff]  }
  0xe6   :  { %4076 = vmatmul.mubr.msk.bf16.gmra.mrb[104].mxu0 %vm275_vm0, %v4288_v48  ;;  %4150 = vmatmul.mubr.msk.bf16.gmra.mrb[104].mxu1 %vm275_vm0, %v4289_v49 }
  0xe7   :  { %4079 = vmatprep.mubr.msk.bf16.mxu0 %vm275_vm0, %v4290_v50  ;;  %4153 = vmatprep.mubr.msk.bf16.mxu1 %vm275_vm0, %v4291_v51 }
  0xe9   :  { %v4790_v52 = vpop.f32.mrb[0].mxu0  ;;  %v4792_v53 = vpop.f32.mrb[0].mxu1 }
  0xea   :  { %v4796_v55 = vpop.f32.mrb[1].mxu0  ;;  %v4798_v56 = vpop.f32.mrb[1].mxu1 }
  0xeb   :  { %v4808_v60 = vpop.f32.mrb[2].mxu0  ;;  %v4810_v61 = vpop.f32.mrb[2].mxu1 }
  0xec   :  { %v4820_v1 = vpop.f32.mrb[3].mxu0  ;;  %v4822_v2 = vpop.f32.mrb[3].mxu1 }
  0xee   :  { %4080 = vmatmul.mubr.msk.bf16.gmra.mrb[108].mxu0 %vm275_vm0, %v4292_v57  ;;  %4154 = vmatmul.mubr.msk.bf16.gmra.mrb[108].mxu1 %vm275_vm0, %v4293_v58 }
  0xef   :  { %4083 = vmatprep.mubr.msk.bf16.mxu0 %vm275_vm0, %v4294_v62  ;;  %4157 = vmatprep.mubr.msk.bf16.mxu1 %vm275_vm0, %v4295_v63 }
  0xf1   :  { %v4830_v4 = vpop.f32.mrb[4].mxu0  ;;  %v4832_v5 = vpop.f32.mrb[4].mxu1 }
  0xf2   :  { %v4836_v7 = vpop.f32.mrb[5].mxu0  ;;  %v4838_v8 = vpop.f32.mrb[5].mxu1 }
  0xf3   :  { %v4848_v12 = vpop.f32.mrb[6].mxu0  ;;  %v4850_v13 = vpop.f32.mrb[6].mxu1 }
  0xf4   :  { %v4860_v17 = vpop.f32.mrb[7].mxu0  ;;  %v4862_v18 = vpop.f32.mrb[7].mxu1 }
  0xf6   :  { %4084 = vmatmul.mubr.msk.bf16.gmra.mrb[112].mxu0 %vm275_vm0, %v4296_v9  ;;  %4158 = vmatmul.mubr.msk.bf16.gmra.mrb[112].mxu1 %vm275_vm0, %v4297_v10  ;;  %v4308_v10 = vld [vmem:[%s5764_s0 + $0x2f8] sm:$0xff]  }
  0xf7   :  { %4087 = vmatprep.mubr.msk.bf16.mxu0 %vm275_vm0, %v4298_v14  ;;  %4161 = vmatprep.mubr.msk.bf16.mxu1 %vm275_vm0, %v4299_v15  ;;  %v4309_v14 = vld [vmem:[%s5764_s0 + $0x3f8] sm:$0xff]   ;;  %v5930_v15 = vmax.f32 %v4796_v55, %v4798_v56 }
  0xf9   :  { %v4870_v20 = vpop.f32.mrb[8].mxu0  ;;  %v4872_v21 = vpop.f32.mrb[8].mxu1 }
  0xfa   :  { %v4876_v23 = vpop.f32.mrb[9].mxu0  ;;  %v4878_v24 = vpop.f32.mrb[9].mxu1 }
  0xfb   :  { %v4888_v28 = vpop.f32.mrb[10].mxu0  ;;  %v4890_v29 = vpop.f32.mrb[10].mxu1 }
  0xfc   :  { %v4900_v33 = vpop.f32.mrb[11].mxu0  ;;  %v4902_v34 = vpop.f32.mrb[11].mxu1 }
  0xfe   :  { %4088 = vmatmul.mubr.msk.bf16.gmra.mrb[116].mxu0 %vm275_vm0, %v4300_v25  ;;  %4162 = vmatmul.mubr.msk.bf16.gmra.mrb[116].mxu1 %vm275_vm0, %v4301_v26 }
  0xff   :  { %4091 = vmatprep.mubr.msk.bf16.mxu0 %vm275_vm0, %v4302_v30  ;;  %4165 = vmatprep.mubr.msk.bf16.mxu1 %vm275_vm0, %v4303_v31 }
 0x101   :  { %v4910_v36 = vpop.f32.mrb[12].mxu0  ;;  %v4912_v37 = vpop.f32.mrb[12].mxu1 }
 0x102   :  { %v4916_v39 = vpop.f32.mrb[13].mxu0  ;;  %v4918_v40 = vpop.f32.mrb[13].mxu1 }
 0x103   :  { %v4928_v44 = vpop.f32.mrb[14].mxu0  ;;  %v4930_v45 = vpop.f32.mrb[14].mxu1 }
 0x104   :  { %v4940_v49 = vpop.f32.mrb[15].mxu0  ;;  %v4942_v50 = vpop.f32.mrb[15].mxu1 }
 0x106   :  { %4092 = vmatmul.mubr.msk.bf16.gmra.mrb[120].mxu0 %vm275_vm0, %v4304_v41  ;;  %4166 = vmatmul.mubr.msk.bf16.gmra.mrb[120].mxu1 %vm275_vm0, %v4305_v42 }
 0x107   :  { %4095 = vmatprep.mubr.msk.bf16.mxu0 %vm275_vm0, %v4306_v46  ;;  %4169 = vmatprep.mubr.msk.bf16.mxu1 %vm275_vm0, %v4307_v47 }
 0x109   :  { %v4950_v57 = vpop.f32.mrb[16].mxu0  ;;  %v4952_v58 = vpop.f32.mrb[16].mxu1 }
 0x10a   :  { %v4956_v63 = vpop.f32.mrb[17].mxu0  ;;  %v4958_v9 = vpop.f32.mrb[17].mxu1 }
 0x10b   :  { %v4968_v25 = vpop.f32.mrb[18].mxu0  ;;  %v4970_v26 = vpop.f32.mrb[18].mxu1 }
 0x10c   :  { %v4974_v31 = vpop.f32.mrb[19].mxu0  ;;  %v4976_v41 = vpop.f32.mrb[19].mxu1 }
 0x10e   :  { %4096 = vmatmul.mubr.msk.bf16.gmra.mrb[124].mxu0 %vm275_vm0, %v4308_v10  ;;  %4170 = vmatmul.mubr.msk.bf16.gmra.mrb[124].mxu1 %vm275_vm0, %v4309_v14 }
 0x111   :  { %v4982_v46 = vpop.f32.mrb[20].mxu0  ;;  %v4984_v47 = vpop.f32.mrb[20].mxu1 }
 0x112   :  { %v4988_v62 = vpop.f32.mrb[21].mxu0  ;;  %v4990_v30 = vpop.f32.mrb[21].mxu1 }
 0x113   :  { %v4994_v48 = vpop.f32.mrb[22].mxu0  ;;  %v4996_v42 = vpop.f32.mrb[22].mxu1 }
 0x114   :  { %v5000_v14 = vpop.f32.mrb[23].mxu0  ;;  %v5002_v43 = vpop.f32.mrb[23].mxu1 }
 0x115   :  { %5848 = vst [vmem:[#allocation2_spill] sm:$0xff] %v5002_v43 }
 0x119   :  { %v5006_v38 = vpop.f32.mrb[24].mxu0  ;;  %v5008_v35 = vpop.f32.mrb[24].mxu1 }
 0x11a   :  { %5849 = vst [vmem:[#allocation3_spill] sm:$0xff] %v5006_v38  ;;  %5850 = vst [vmem:[#allocation4_spill] sm:$0xff] %v5008_v35  ;;  %v5012_v32 = vpop.f32.mrb[25].mxu0  ;;  %v5014_v27 = vpop.f32.mrb[25].mxu1 }
 0x11b   :  { %5851 = vst [vmem:[#allocation5_spill] sm:$0xff] %v5012_v32  ;;  %5852 = vst [vmem:[#allocation6_spill] sm:$0xff] %v5014_v27  ;;  %v5018_v22 = vpop.f32.mrb[26].mxu0  ;;  %v5020_v19 = vpop.f32.mrb[26].mxu1  ;;  %v5252_v27 = vld [vmem:[%s5765_s2] ss:$0 sm:$0xff] }
 0x11c   :  { %5853 = vst [vmem:[#allocation7_spill] sm:$0xff] %v5018_v22  ;;  %5854 = vst [vmem:[#allocation8_spill] sm:$0xff] %v5020_v19  ;;  %v5024_v16 = vpop.f32.mrb[27].mxu0  ;;  %v5026_v11 = vpop.f32.mrb[27].mxu1  ;;  %v5929_v22 = vmax.f32 %v4790_v52, %v4792_v53 }
 0x11d   :  { %5855 = vst [vmem:[#allocation9_spill] sm:$0xff] %v5024_v16  ;;  %5856 = vst [vmem:[#allocation10_spill] sm:$0xff] %v5026_v11 }
 0x121   :  { %v5030_v6 = vpop.f32.mrb[28].mxu0  ;;  %v5032_v3 = vpop.f32.mrb[28].mxu1 }
 0x122   :  { %5857 = vst [vmem:[#allocation11_spill] sm:$0xff] %v5030_v6  ;;  %5858 = vst [vmem:[#allocation12_spill] sm:$0xff] %v5032_v3  ;;  %v5036_v0 = vpop.f32.mrb[29].mxu0  ;;  %v5038_v59 = vpop.f32.mrb[29].mxu1 }
 0x123   :  { %5859 = vst [vmem:[#allocation13_spill] sm:$0xff] %v5036_v0  ;;  %5860 = vst [vmem:[#allocation14_spill] sm:$0xff] %v5038_v59  ;;  %v5042_v54 = vpop.f32.mrb[30].mxu0  ;;  %v5044_v19 = vpop.f32.mrb[30].mxu1 }
 0x124   :  { %5861 = vst [vmem:[#allocation15_spill] sm:$0xff] %v5042_v54  ;;  %5862 = vst [vmem:[#allocation16_spill] sm:$0xff] %v5044_v19  ;;  %v5048_v11 = vpop.f32.mrb[31].mxu0  ;;  %v5050_v16 = vpop.f32.mrb[31].mxu1 }
 0x125   :  { %5863 = vst [vmem:[#allocation17_spill] sm:$0xff] %v5048_v11  ;;  %5864 = vst [vmem:[#allocation18_spill] sm:$0xff] %v5050_v16 }
 0x129   :  { %v5054_v3 = vpop.f32.mrb[32].mxu0  ;;  %v5056_v6 = vpop.f32.mrb[32].mxu1 }
 0x12a   :  { %5865 = vst [vmem:[#allocation19_spill] sm:$0xff] %v5054_v3  ;;  %5866 = vst [vmem:[#allocation20_spill] sm:$0xff] %v5056_v6  ;;  %v5060_v59 = vpop.f32.mrb[33].mxu0  ;;  %v5062_v0 = vpop.f32.mrb[33].mxu1 }
 0x12b   :  { %5867 = vst [vmem:[#allocation21_spill] sm:$0xff] %v5060_v59  ;;  %5868 = vst [vmem:[#allocation22_spill] sm:$0xff] %v5062_v0  ;;  %v5066_v19 = vpop.f32.mrb[34].mxu0  ;;  %v5068_v54 = vpop.f32.mrb[34].mxu1 }
 0x12c   :  { %5869 = vst [vmem:[#allocation23_spill] sm:$0xff] %v5066_v19  ;;  %5870 = vst [vmem:[#allocation24_spill] sm:$0xff] %v5068_v54  ;;  %v5072_v16 = vpop.f32.mrb[35].mxu0  ;;  %v5074_v11 = vpop.f32.mrb[35].mxu1 }
 0x12d   :  { %5871 = vst [vmem:[#allocation25_spill] sm:$0xff] %v5072_v16  ;;  %5872 = vst [vmem:[#allocation26_spill] sm:$0xff] %v5074_v11 }
 0x131   :  { %v5078_v6 = vpop.f32.mrb[36].mxu0  ;;  %v5080_v3 = vpop.f32.mrb[36].mxu1 }
 0x132   :  { %5873 = vst [vmem:[#allocation27_spill] sm:$0xff] %v5078_v6  ;;  %5874 = vst [vmem:[#allocation28_spill] sm:$0xff] %v5080_v3  ;;  %v5084_v0 = vpop.f32.mrb[37].mxu0  ;;  %v5086_v59 = vpop.f32.mrb[37].mxu1 }
 0x133   :  { %5875 = vst [vmem:[#allocation29_spill] sm:$0xff] %v5084_v0  ;;  %5876 = vst [vmem:[#allocation30_spill] sm:$0xff] %v5086_v59  ;;  %v5090_v54 = vpop.f32.mrb[38].mxu0  ;;  %v5092_v19 = vpop.f32.mrb[38].mxu1 }
 0x134   :  { %5877 = vst [vmem:[#allocation31_spill] sm:$0xff] %v5090_v54  ;;  %5878 = vst [vmem:[#allocation32_spill] sm:$0xff] %v5092_v19  ;;  %v5096_v11 = vpop.f32.mrb[39].mxu0  ;;  %v5098_v16 = vpop.f32.mrb[39].mxu1 }
 0x135   :  { %5879 = vst [vmem:[#allocation33_spill] sm:$0xff] %v5096_v11  ;;  %5880 = vst [vmem:[#allocation34_spill] sm:$0xff] %v5098_v16 }
 0x139   :  { %v5102_v3 = vpop.f32.mrb[40].mxu0  ;;  %v5104_v6 = vpop.f32.mrb[40].mxu1 }
 0x13a   :  { %5881 = vst [vmem:[#allocation35_spill] sm:$0xff] %v5102_v3  ;;  %5882 = vst [vmem:[#allocation36_spill] sm:$0xff] %v5104_v6  ;;  %v5108_v59 = vpop.f32.mrb[41].mxu0  ;;  %v5110_v0 = vpop.f32.mrb[41].mxu1 }
 0x13b   :  { %5883 = vst [vmem:[#allocation37_spill] sm:$0xff] %v5108_v59  ;;  %5884 = vst [vmem:[#allocation38_spill] sm:$0xff] %v5110_v0  ;;  %v5114_v19 = vpop.f32.mrb[42].mxu0  ;;  %v5116_v54 = vpop.f32.mrb[42].mxu1 }
 0x13c   :  { %5885 = vst [vmem:[#allocation39_spill] sm:$0xff] %v5114_v19  ;;  %5886 = vst [vmem:[#allocation40_spill] sm:$0xff] %v5116_v54  ;;  %v5120_v16 = vpop.f32.mrb[43].mxu0  ;;  %v5122_v11 = vpop.f32.mrb[43].mxu1 }
 0x13d   :  { %5887 = vst [vmem:[#allocation41_spill] sm:$0xff] %v5120_v16  ;;  %5888 = vst [vmem:[#allocation42_spill] sm:$0xff] %v5122_v11 }
 0x141   :  { %v5126_v6 = vpop.f32.mrb[44].mxu0  ;;  %v5128_v3 = vpop.f32.mrb[44].mxu1 }
 0x142   :  { %5889 = vst [vmem:[#allocation43_spill] sm:$0xff] %v5126_v6  ;;  %5890 = vst [vmem:[#allocation44_spill] sm:$0xff] %v5128_v3  ;;  %v5132_v0 = vpop.f32.mrb[45].mxu0  ;;  %v5134_v59 = vpop.f32.mrb[45].mxu1 }
 0x143   :  { %5891 = vst [vmem:[#allocation45_spill] sm:$0xff] %v5132_v0  ;;  %5892 = vst [vmem:[#allocation46_spill] sm:$0xff] %v5134_v59  ;;  %v5138_v54 = vpop.f32.mrb[46].mxu0  ;;  %v5140_v19 = vpop.f32.mrb[46].mxu1 }
 0x144   :  { %5893 = vst [vmem:[#allocation47_spill] sm:$0xff] %v5138_v54  ;;  %5894 = vst [vmem:[#allocation48_spill] sm:$0xff] %v5140_v19  ;;  %v5144_v11 = vpop.f32.mrb[47].mxu0  ;;  %v5146_v16 = vpop.f32.mrb[47].mxu1 }
 0x145   :  { %5895 = vst [vmem:[#allocation49_spill] sm:$0xff] %v5144_v11  ;;  %5896 = vst [vmem:[#allocation50_spill] sm:$0xff] %v5146_v16 }
 0x149   :  { %v5150_v3 = vpop.f32.mrb[48].mxu0  ;;  %v5152_v6 = vpop.f32.mrb[48].mxu1 }
 0x14a   :  { %5897 = vst [vmem:[#allocation51_spill] sm:$0xff] %v5150_v3  ;;  %5898 = vst [vmem:[#allocation52_spill] sm:$0xff] %v5152_v6  ;;  %v5156_v59 = vpop.f32.mrb[49].mxu0  ;;  %v5158_v0 = vpop.f32.mrb[49].mxu1 }
 0x14b   :  { %5899 = vst [vmem:[#allocation53_spill] sm:$0xff] %v5156_v59  ;;  %5900 = vst [vmem:[#allocation54_spill] sm:$0xff] %v5158_v0  ;;  %v5162_v19 = vpop.f32.mrb[50].mxu0  ;;  %v5164_v54 = vpop.f32.mrb[50].mxu1 }
 0x14c   :  { %5901 = vst [vmem:[#allocation55_spill] sm:$0xff] %v5162_v19  ;;  %5902 = vst [vmem:[#allocation56_spill] sm:$0xff] %v5164_v54  ;;  %v5168_v16 = vpop.f32.mrb[51].mxu0  ;;  %v5170_v11 = vpop.f32.mrb[51].mxu1 }
 0x14d   :  { %5903 = vst [vmem:[#allocation57_spill] sm:$0xff] %v5168_v16  ;;  %5904 = vst [vmem:[#allocation58_spill] sm:$0xff] %v5170_v11 }
 0x151   :  { %v5174_v6 = vpop.f32.mrb[52].mxu0  ;;  %v5176_v3 = vpop.f32.mrb[52].mxu1 }
 0x152   :  { %5905 = vst [vmem:[#allocation59_spill] sm:$0xff] %v5174_v6  ;;  %5906 = vst [vmem:[#allocation60_spill] sm:$0xff] %v5176_v3  ;;  %v5180_v0 = vpop.f32.mrb[53].mxu0  ;;  %v5182_v59 = vpop.f32.mrb[53].mxu1 }
 0x153   :  { %5907 = vst [vmem:[#allocation61_spill] sm:$0xff] %v5180_v0  ;;  %5908 = vst [vmem:[#allocation62_spill] sm:$0xff] %v5182_v59  ;;  %v5186_v54 = vpop.f32.mrb[54].mxu0  ;;  %v5188_v19 = vpop.f32.mrb[54].mxu1 }
 0x154   :  { %5909 = vst [vmem:[#allocation63_spill] sm:$0xff] %v5186_v54  ;;  %5910 = vst [vmem:[#allocation64_spill] sm:$0xff] %v5188_v19  ;;  %v5192_v11 = vpop.f32.mrb[55].mxu0  ;;  %v5194_v16 = vpop.f32.mrb[55].mxu1 }
 0x155   :  { %5911 = vst [vmem:[#allocation65_spill] sm:$0xff] %v5192_v11  ;;  %5912 = vst [vmem:[#allocation66_spill] sm:$0xff] %v5194_v16 }
 0x159   :  { %v5198_v3 = vpop.f32.mrb[56].mxu0  ;;  %v5200_v6 = vpop.f32.mrb[56].mxu1 }
 0x15a   :  { %5913 = vst [vmem:[#allocation67_spill] sm:$0xff] %v5198_v3  ;;  %5914 = vst [vmem:[#allocation68_spill] sm:$0xff] %v5200_v6  ;;  %v5204_v59 = vpop.f32.mrb[57].mxu0  ;;  %v5206_v0 = vpop.f32.mrb[57].mxu1 }
 0x15b   :  { %5915 = vst [vmem:[#allocation69_spill] sm:$0xff] %v5204_v59  ;;  %5916 = vst [vmem:[#allocation70_spill] sm:$0xff] %v5206_v0  ;;  %v5210_v19 = vpop.f32.mrb[58].mxu0  ;;  %v5212_v54 = vpop.f32.mrb[58].mxu1 }
 0x15c   :  { %5917 = vst [vmem:[#allocation71_spill] sm:$0xff] %v5210_v19  ;;  %5918 = vst [vmem:[#allocation72_spill] sm:$0xff] %v5212_v54  ;;  %v5216_v16 = vpop.f32.mrb[59].mxu0  ;;  %v5218_v11 = vpop.f32.mrb[59].mxu1 }
 0x15d   :  { %5919 = vst [vmem:[#allocation73_spill] sm:$0xff] %v5216_v16  ;;  %5920 = vst [vmem:[#allocation74_spill] sm:$0xff] %v5218_v11 }
 0x161   :  { %v5222_v6 = vpop.f32.mrb[60].mxu0  ;;  %v5224_v3 = vpop.f32.mrb[60].mxu1 }
 0x162   :  { %5921 = vst [vmem:[#allocation75_spill] sm:$0xff] %v5222_v6  ;;  %5922 = vst [vmem:[#allocation76_spill] sm:$0xff] %v5224_v3  ;;  %v5228_v0 = vpop.f32.mrb[61].mxu0  ;;  %v5230_v59 = vpop.f32.mrb[61].mxu1 }
 0x163   :  { %5923 = vst [vmem:[#allocation77_spill] sm:$0xff] %v5228_v0  ;;  %5924 = vst [vmem:[#allocation78_spill] sm:$0xff] %v5230_v59  ;;  %v5234_v54 = vpop.f32.mrb[62].mxu0  ;;  %v5236_v19 = vpop.f32.mrb[62].mxu1 }
 0x164   :  { %5925 = vst [vmem:[#allocation79_spill] sm:$0xff] %v5234_v54  ;;  %5926 = vst [vmem:[#allocation80_spill] sm:$0xff] %v5236_v19  ;;  %v5240_v11 = vpop.f32.mrb[63].mxu0  ;;  %v5242_v16 = vpop.f32.mrb[63].mxu1 }
 0x165   :  { %5927 = vst [vmem:[#allocation81_spill] sm:$0xff] %v5240_v11  ;;  %5928 = vst [vmem:[#allocation82_spill] sm:$0xff] %v5242_v16  ;;  %v5931_v16 = vmax.f32 %v4808_v60, %v4810_v61 }
 0x169   :  { %v4037_v3 = vpop.f32.mrb[64].mxu0  ;;  %v4111_v6 = vpop.f32.mrb[64].mxu1 }
 0x16a   :  { %v1951_v10 = vmax.f32 %v5929_v22, %v4037_v3  ;;  %v1694_v59 = vpop.f32.mrb[65].mxu0  ;;  %v2368_v0 = vpop.f32.mrb[65].mxu1  ;;  %v5932_v22 = vmax.f32 %v4820_v1, %v4822_v2  ;;  %v5933_v1 = vmax.f32 %v4830_v4, %v4832_v5  ;;  %v5935_v4 = vmax.f32 %v4848_v12, %v4850_v13 }
 0x16b   :  { %v1949_v19 = vmax.f32 %v5930_v15, %v1694_v59  ;;  %v4038_v54 = vpop.f32.mrb[66].mxu0  ;;  %v4112_v32 = vpop.f32.mrb[66].mxu1 }
 0x16c   :  { %v2625_v51 = vmax.f32 %v1951_v10, %v4111_v6  ;;  %v1952_v11 = vmax.f32 %v5931_v16, %v4038_v54  ;;  %v1697_v52 = vpop.f32.mrb[67].mxu0  ;;  %v2371_v53 = vpop.f32.mrb[67].mxu1 }
 0x16d   :  { %v2623_v3 = vmax.f32 %v1949_v19, %v2368_v0  ;;  %v1950_v35 = vmax.f32 %v5932_v22, %v1697_v52 }
 0x16e   :  { %v2696_v38 = vadd.f32 %v5252_v27, %v2625_v51  ;;  %v2626_v43 = vmax.f32 %v1952_v11, %v4112_v32 }
 0x16f   :  { %v2694_v55 = vadd.f32 %v5252_v27, %v2623_v3  ;;  %v2624_v56 = vmax.f32 %v1950_v35, %v2371_v53  ;;  %v5934_v35 = vmax.f32 %v4836_v7, %v4838_v8 }
 0x170   :  { %v2760_v59 = vmax.f32 %v2696_v38, 0.0  ;;  %v2697_v6 = vadd.f32 %v5252_v27, %v2626_v43 }
 0x171   :  { %v2758_v15 = vmax.f32 %v2694_v55, 0.0  ;;  %v2695_v54 = vadd.f32 %v5252_v27, %v2624_v56  ;;  %v4041_v60 = vpop.f32.mrb[68].mxu0  ;;  %v4115_v61 = vpop.f32.mrb[68].mxu1  ;;  %v5936_v55 = vmax.f32 %v4860_v17, %v4862_v18 }
 0x172   :  { %v3667_v0 = vpack.c.bf16 %v2760_v59, %v2760_v59  ;;  %v2761_v16 = vmax.f32 %v2697_v6, 0.0  ;;  %v1955_v2 = vmax.f32 %v5933_v1, %v4041_v60  ;;  %v1710_v19 = vpop.f32.mrb[69].mxu0  ;;  %v2384_v11 = vpop.f32.mrb[69].mxu1  ;;  %v5937_v1 = vmax.f32 %v4870_v20, %v4872_v21 }
 0x173   :  { %v3665_v32 = vpack.c.bf16 %v2758_v15, %v2758_v15  ;;  %v2759_v51 = vmax.f32 %v2695_v54, 0.0  ;;  %v1953_v38 = vmax.f32 %v5934_v35, %v1710_v19  ;;  %v4042_v43 = vpop.f32.mrb[70].mxu0  ;;  %v4116_v10 = vpop.f32.mrb[70].mxu1  ;;  %v5938_v35 = vmax.f32 %v4876_v23, %v4878_v24 }
 0x174   :  { %3081 = vst.msk [vmem:[%s5766_s3 + $0x8] sm:$0xf] %vm3078_vm2, %v3667_v0  ;;  %v3668_v52 = vpack.c.bf16 %v2761_v16, %v2761_v16  ;;  %v2629_v53 = vmax.f32 %v1955_v2, %v4115_v61  ;;  %v1956_v5 = vmax.f32 %v5935_v4, %v4042_v43  ;;  %v1713_v3 = vpop.f32.mrb[71].mxu0  ;;  %v2387_v22 = vpop.f32.mrb[71].mxu1  ;;  %v5939_v20 = vmax.f32 %v4888_v28, %v4890_v29 }
 0x175   :  { %3079 = vst.msk [vmem:[%s5766_s3] sm:$0xf] %vm3078_vm2, %v3665_v32  ;;  %v3666_v7 = vpack.c.bf16 %v2759_v51, %v2759_v51  ;;  %v2627_v8 = vmax.f32 %v1953_v38, %v2384_v11  ;;  %v1954_v56 = vmax.f32 %v5936_v55, %v1713_v3  ;;  %v5940_v3 = vmax.f32 %v4900_v33, %v4902_v34 }
 0x176   :  { %3082 = vst.msk [vmem:[%s5766_s3 + $0xc] sm:$0xf] %vm3078_vm2, %v3668_v52  ;;  %v2700_v12 = vadd.f32 %v5252_v27, %v2629_v53  ;;  %v2630_v13 = vmax.f32 %v1956_v5, %v4116_v10 }
 0x177   :  { %3080 = vst.msk [vmem:[%s5766_s3 + $0x4] sm:$0xf] %vm3078_vm2, %v3666_v7  ;;  %v2698_v59 = vadd.f32 %v5252_v27, %v2627_v8  ;;  %v2628_v6 = vmax.f32 %v1954_v56, %v2387_v22 }
 0x178   :  { %v2764_v15 = vmax.f32 %v2700_v12, 0.0  ;;  %v2701_v17 = vadd.f32 %v5252_v27, %v2630_v13 }
 0x179   :  { %v2762_v18 = vmax.f32 %v2698_v59, 0.0  ;;  %v2699_v54 = vadd.f32 %v5252_v27, %v2628_v6  ;;  %v4045_v60 = vpop.f32.mrb[72].mxu0  ;;  %v4119_v61 = vpop.f32.mrb[72].mxu1 }
 0x17a   :  { %v3671_v0 = vpack.c.bf16 %v2764_v15, %v2764_v15  ;;  %v2765_v16 = vmax.f32 %v2701_v17, 0.0  ;;  %v1959_v2 = vmax.f32 %v5937_v1, %v4045_v60  ;;  %v1726_v19 = vpop.f32.mrb[73].mxu0  ;;  %v2400_v11 = vpop.f32.mrb[73].mxu1  ;;  %v5941_v15 = vmax.f32 %v4910_v36, %v4912_v37 }
 0x17b   :  { %v3669_v32 = vpack.c.bf16 %v2762_v18, %v2762_v18  ;;  %v2763_v51 = vmax.f32 %v2699_v54, 0.0  ;;  %v1957_v38 = vmax.f32 %v5938_v35, %v1726_v19  ;;  %v4046_v43 = vpop.f32.mrb[74].mxu0  ;;  %v4120_v10 = vpop.f32.mrb[74].mxu1  ;;  %v5943_v36 = vmax.f32 %v4928_v44, %v4930_v45 }
 0x17c   :  { %3085 = vst.msk [vmem:[%s5766_s3 + $0x18] sm:$0xf] %vm3078_vm2, %v3671_v0  ;;  %v3672_v52 = vpack.c.bf16 %v2765_v16, %v2765_v16  ;;  %v2633_v53 = vmax.f32 %v1959_v2, %v4119_v61  ;;  %v1960_v21 = vmax.f32 %v5939_v20, %v4046_v43  ;;  %v1729_v4 = vpop.f32.mrb[75].mxu0  ;;  %v2403_v5 = vpop.f32.mrb[75].mxu1  ;;  %v5942_v0 = vmax.f32 %v4916_v39, %v4918_v40 }
 0x17d   :  { %3083 = vst.msk [vmem:[%s5766_s3 + $0x10] sm:$0xf] %vm3078_vm2, %v3669_v32  ;;  %v3670_v23 = vpack.c.bf16 %v2763_v51, %v2763_v51  ;;  %v2631_v24 = vmax.f32 %v1957_v38, %v2400_v11  ;;  %v1958_v22 = vmax.f32 %v5940_v3, %v1729_v4  ;;  %v5944_v35 = vmax.f32 %v4940_v49, %v4942_v50 }
 0x17e   :  { %3086 = vst.msk [vmem:[%s5766_s3 + $0x1c] sm:$0xf] %vm3078_vm2, %v3672_v52  ;;  %v2704_v28 = vadd.f32 %v5252_v27, %v2633_v53  ;;  %v2634_v29 = vmax.f32 %v1960_v21, %v4120_v10 }
 0x17f   :  { %3084 = vst.msk [vmem:[%s5766_s3 + $0x14] sm:$0xf] %vm3078_vm2, %v3670_v23  ;;  %v2702_v7 = vadd.f32 %v5252_v27, %v2631_v24  ;;  %v2632_v8 = vmax.f32 %v1958_v22, %v2403_v5  ;;  %v5945_v23 = vmax.f32 %v4950_v57, %v4952_v58  ;;  %v5947_v57 = vmax.f32 %v4968_v25, %v4970_v26 }
 0x180   :  { %v2768_v55 = vmax.f32 %v2704_v28, 0.0  ;;  %v2705_v33 = vadd.f32 %v5252_v27, %v2634_v29 }
 0x181   :  { %v2766_v34 = vmax.f32 %v2702_v7, 0.0  ;;  %v2703_v56 = vadd.f32 %v5252_v27, %v2632_v8  ;;  %v4049_v12 = vpop.f32.mrb[76].mxu0  ;;  %v4123_v13 = vpop.f32.mrb[76].mxu1  ;;  %v5946_v7 = vmax.f32 %v4956_v63, %v4958_v9 }
 0x182   :  { %v3675_v59 = vpack.c.bf16 %v2768_v55, %v2768_v55  ;;  %v2769_v6 = vmax.f32 %v2705_v33, 0.0  ;;  %v1963_v17 = vmax.f32 %v5941_v15, %v4049_v12  ;;  %v1742_v18 = vpop.f32.mrb[77].mxu0  ;;  %v2416_v54 = vpop.f32.mrb[77].mxu1 }
 0x183   :  { %v3673_v60 = vpack.c.bf16 %v2766_v34, %v2766_v34  ;;  %v2767_v61 = vmax.f32 %v2703_v56, 0.0  ;;  %v1961_v16 = vmax.f32 %v5942_v0, %v1742_v18  ;;  %v4050_v1 = vpop.f32.mrb[78].mxu0  ;;  %v4124_v2 = vpop.f32.mrb[78].mxu1 }
 0x184   :  { %3089 = vst.msk [vmem:[%s5766_s3 + $0x28] sm:$0xf] %vm3078_vm2, %v3675_v59  ;;  %v3676_v19 = vpack.c.bf16 %v2769_v6, %v2769_v6  ;;  %v2637_v11 = vmax.f32 %v1963_v17, %v4123_v13  ;;  %v1964_v37 = vmax.f32 %v5943_v36, %v4050_v1  ;;  %v1745_v32 = vpop.f32.mrb[79].mxu0  ;;  %v2419_v51 = vpop.f32.mrb[79].mxu1  ;;  %v5948_v59 = vmax.f32 %v4974_v31, %v4976_v41 }
 0x185   :  { %3087 = vst.msk [vmem:[%s5766_s3 + $0x20] sm:$0xf] %vm3078_vm2, %v3673_v60  ;;  %v3674_v39 = vpack.c.bf16 %v2767_v61, %v2767_v61  ;;  %v2635_v40 = vmax.f32 %v1961_v16, %v2416_v54  ;;  %v1962_v38 = vmax.f32 %v5944_v35, %v1745_v32  ;;  %v5949_v1 = vmax.f32 %v4982_v46, %v4984_v47 }
 0x186   :  { %3090 = vst.msk [vmem:[%s5766_s3 + $0x2c] sm:$0xf] %vm3078_vm2, %v3676_v19  ;;  %v2708_v44 = vadd.f32 %v5252_v27, %v2637_v11  ;;  %v2638_v45 = vmax.f32 %v1964_v37, %v4124_v2  ;;  %v5950_v32 = vmax.f32 %v4988_v62, %v4990_v30  ;;  %v5951_v46 = vmax.f32 %v4994_v48, %v4996_v42 }
 0x187   :  { %3088 = vst.msk [vmem:[%s5766_s3 + $0x24] sm:$0xf] %vm3078_vm2, %v3674_v39  ;;  %v2706_v43 = vadd.f32 %v5252_v27, %v2635_v40  ;;  %v2636_v10 = vmax.f32 %v1962_v38, %v2419_v51 }
 0x188   :  { %v2772_v52 = vmax.f32 %v2708_v44, 0.0  ;;  %v2709_v49 = vadd.f32 %v5252_v27, %v2638_v45 }
 0x189   :  { %v2770_v50 = vmax.f32 %v2706_v43, 0.0  ;;  %v2707_v53 = vadd.f32 %v5252_v27, %v2636_v10  ;;  %v4053_v20 = vpop.f32.mrb[80].mxu0  ;;  %v4127_v21 = vpop.f32.mrb[80].mxu1  ;;  %v5952_v43 = vld [vmem:[#allocation2_spill] sm:$0xff] }
 0x18a   :  { %v3679_v4 = vpack.c.bf16 %v2772_v52, %v2772_v52  ;;  %v2773_v5 = vmax.f32 %v2709_v49, 0.0  ;;  %v1967_v24 = vmax.f32 %v5945_v23, %v4053_v20  ;;  %v1758_v3 = vpop.f32.mrb[81].mxu0  ;;  %v2432_v22 = vpop.f32.mrb[81].mxu1  ;;  %v5953_v10 = vmax.f32 %v5000_v14, %v5952_v43  ;;  %v5969_v43 = vld [vmem:[#allocation13_spill] sm:$0xff] }
 0x18b   :  { %v3677_v28 = vpack.c.bf16 %v2770_v50, %v2770_v50  ;;  %v2771_v29 = vmax.f32 %v2707_v53, 0.0  ;;  %v1965_v8 = vmax.f32 %v5946_v7, %v1758_v3  ;;  %v4054_v55 = vpop.f32.mrb[82].mxu0  ;;  %v4128_v33 = vpop.f32.mrb[82].mxu1  ;;  %v5954_v3 = vld [vmem:[#allocation3_spill] sm:$0xff] }
 0x18c   :  { %3093 = vst.msk [vmem:[%s5766_s3 + $0x38] sm:$0xf] %vm3078_vm2, %v3679_v4  ;;  %v3680_v34 = vpack.c.bf16 %v2773_v5, %v2773_v5  ;;  %v2641_v56 = vmax.f32 %v1967_v24, %v4127_v21  ;;  %v1968_v58 = vmax.f32 %v5947_v57, %v4054_v55  ;;  %v1761_v12 = vpop.f32.mrb[83].mxu0  ;;  %v2435_v13 = vpop.f32.mrb[83].mxu1 }
 0x18d   :  { %3091 = vst.msk [vmem:[%s5766_s3 + $0x30] sm:$0xf] %vm3078_vm2, %v3677_v28  ;;  %v3678_v63 = vpack.c.bf16 %v2771_v29, %v2771_v29  ;;  %v2639_v9 = vmax.f32 %v1965_v8, %v2432_v22  ;;  %v1966_v6 = vmax.f32 %v5948_v59, %v1761_v12  ;;  %v5955_v22 = vld [vmem:[#allocation4_spill] sm:$0xff]  ;;  %v5960_v59 = vld [vmem:[#allocation7_spill] sm:$0xff] }
 0x18e   :  { %3094 = vst.msk [vmem:[%s5766_s3 + $0x3c] sm:$0xf] %vm3078_vm2, %v3680_v34  ;;  %v2712_v25 = vadd.f32 %v5252_v27, %v2641_v56  ;;  %v2642_v26 = vmax.f32 %v1968_v58, %v4128_v33  ;;  %v5956_v28 = vmax.f32 %v5954_v3, %v5955_v22  ;;  %v5957_v34 = vld [vmem:[#allocation5_spill] sm:$0xff]  ;;  %v5958_v56 = vld [vmem:[#allocation6_spill] sm:$0xff] }
 0x18f   :  { %3092 = vst.msk [vmem:[%s5766_s3 + $0x34] sm:$0xf] %vm3078_vm2, %v3678_v63  ;;  %v2710_v15 = vadd.f32 %v5252_v27, %v2639_v9  ;;  %v2640_v17 = vmax.f32 %v1966_v6, %v2435_v13  ;;  %v5959_v57 = vmax.f32 %v5957_v34, %v5958_v56  ;;  %v5961_v6 = vld [vmem:[#allocation8_spill] sm:$0xff]  ;;  %v5975_v22 = vld [vmem:[#allocation17_spill] sm:$0xff] }
 0x190   :  { %v2776_v18 = vmax.f32 %v2712_v25, 0.0  ;;  %v2713_v31 = vadd.f32 %v5252_v27, %v2642_v26  ;;  %v5962_v25 = vmax.f32 %v5960_v59, %v5961_v6  ;;  %v5978_v6 = vld [vmem:[#allocation19_spill] sm:$0xff] }
 0x191   :  { %v2774_v41 = vmax.f32 %v2710_v15, 0.0  ;;  %v2711_v54 = vadd.f32 %v5252_v27, %v2640_v17  ;;  %v4057_v60 = vpop.f32.mrb[84].mxu0  ;;  %v4131_v61 = vpop.f32.mrb[84].mxu1 }
 0x192   :  { %v3683_v0 = vpack.c.bf16 %v2776_v18, %v2776_v18  ;;  %v2777_v16 = vmax.f32 %v2713_v31, 0.0  ;;  %v1971_v2 = vmax.f32 %v5949_v1, %v4057_v60  ;;  %v1774_v19 = vpop.f32.mrb[85].mxu0  ;;  %v2448_v11 = vpop.f32.mrb[85].mxu1 }
 0x193   :  { %v3681_v36 = vpack.c.bf16 %v2774_v41, %v2774_v41  ;;  %v2775_v37 = vmax.f32 %v2711_v54, 0.0  ;;  %v1969_v51 = vmax.f32 %v5950_v32, %v1774_v19  ;;  %v4058_v39 = vpop.f32.mrb[86].mxu0  ;;  %v4132_v40 = vpop.f32.mrb[86].mxu1  ;;  %v5963_v41 = vld [vmem:[#allocation9_spill] sm:$0xff]  ;;  %v5964_v54 = vld [vmem:[#allocation10_spill] sm:$0xff] }
 0x194   :  { %3097 = vst.msk [vmem:[%s5766_s3 + $0x48] sm:$0xf] %vm3078_vm2, %v3683_v0  ;;  %v3684_v35 = vpack.c.bf16 %v2777_v16, %v2777_v16  ;;  %v2645_v38 = vmax.f32 %v1971_v2, %v4131_v61  ;;  %v1972_v47 = vmax.f32 %v5951_v46, %v4058_v39  ;;  %v1777_v44 = vpop.f32.mrb[87].mxu0  ;;  %v2451_v45 = vpop.f32.mrb[87].mxu1  ;;  %v5965_v60 = vmax.f32 %v5963_v41, %v5964_v54  ;;  %v5981_v54 = vld [vmem:[#allocation21_spill] sm:$0xff] }
 0x195   :  { %3095 = vst.msk [vmem:[%s5766_s3 + $0x40] sm:$0xf] %vm3078_vm2, %v3681_v36  ;;  %v3682_v62 = vpack.c.bf16 %v2775_v37, %v2775_v37  ;;  %v2643_v30 = vmax.f32 %v1969_v51, %v2448_v11  ;;  %v1970_v52 = vmax.f32 %v5953_v10, %v1777_v44  ;;  %v5970_v10 = vld [vmem:[#allocation14_spill] sm:$0xff] }
 0x196   :  { %3098 = vst.msk [vmem:[%s5766_s3 + $0x4c] sm:$0xf] %vm3078_vm2, %v3684_v35  ;;  %v2716_v48 = vadd.f32 %v5252_v27, %v2645_v38  ;;  %v2646_v42 = vmax.f32 %v1972_v47, %v4132_v40  ;;  %v5966_v35 = vld [vmem:[#allocation11_spill] sm:$0xff]  ;;  %v5967_v38 = vld [vmem:[#allocation12_spill] sm:$0xff] }
 0x197   :  { %3096 = vst.msk [vmem:[%s5766_s3 + $0x44] sm:$0xf] %vm3078_vm2, %v3682_v62  ;;  %v2714_v49 = vadd.f32 %v5252_v27, %v2643_v30  ;;  %v2644_v50 = vmax.f32 %v1970_v52, %v2451_v45  ;;  %v5968_v46 = vmax.f32 %v5966_v35, %v5967_v38  ;;  %v5971_v52 = vmax.f32 %v5969_v43, %v5970_v10  ;;  %v5987_v38 = vld [vmem:[#allocation25_spill] sm:$0xff] }
 0x198   :  { %v2780_v53 = vmax.f32 %v2716_v48, 0.0  ;;  %v2717_v14 = vadd.f32 %v5252_v27, %v2646_v42 }
 0x199   :  { %v2778_v20 = vmax.f32 %v2714_v49, 0.0  ;;  %v2715_v21 = vadd.f32 %v5252_v27, %v2644_v50  ;;  %v4061_v4 = vpop.f32.mrb[88].mxu0  ;;  %v4135_v5 = vpop.f32.mrb[88].mxu1 }
 0x19a   :  { %v3687_v23 = vpack.c.bf16 %v2780_v53, %v2780_v53  ;;  %v2781_v24 = vmax.f32 %v2717_v14, 0.0  ;;  %v1975_v29 = vmax.f32 %v5956_v28, %v4061_v4  ;;  %v1790_v7 = vpop.f32.mrb[89].mxu0  ;;  %v2464_v8 = vpop.f32.mrb[89].mxu1  ;;  %v5972_v14 = vld [vmem:[#allocation15_spill] sm:$0xff]  ;;  %v5976_v28 = vld [vmem:[#allocation18_spill] sm:$0xff] }
 0x19b   :  { %v3685_v55 = vpack.c.bf16 %v2778_v20, %v2778_v20  ;;  %v2779_v33 = vmax.f32 %v2715_v21, 0.0  ;;  %v1973_v58 = vmax.f32 %v5959_v57, %v1790_v7  ;;  %v4062_v12 = vpop.f32.mrb[90].mxu0  ;;  %v4136_v13 = vpop.f32.mrb[90].mxu1  ;;  %v5973_v20 = vld [vmem:[#allocation16_spill] sm:$0xff] }
 0x19c   :  { %3101 = vst.msk [vmem:[%s5766_s3 + $0x58] sm:$0xf] %vm3078_vm2, %v3687_v23  ;;  %v3688_v63 = vpack.c.bf16 %v2781_v24, %v2781_v24  ;;  %v2649_v9 = vmax.f32 %v1975_v29, %v4135_v5  ;;  %v1976_v26 = vmax.f32 %v5962_v25, %v4062_v12  ;;  %v1793_v15 = vpop.f32.mrb[91].mxu0  ;;  %v2467_v17 = vpop.f32.mrb[91].mxu1  ;;  %v5974_v21 = vmax.f32 %v5972_v14, %v5973_v20  ;;  %v5979_v25 = vld [vmem:[#allocation20_spill] sm:$0xff]  ;;  %v5990_v20 = vld [vmem:[#allocation27_spill] sm:$0xff] }
 0x19d   :  { %3099 = vst.msk [vmem:[%s5766_s3 + $0x50] sm:$0xf] %vm3078_vm2, %v3685_v55  ;;  %v3686_v18 = vpack.c.bf16 %v2779_v33, %v2779_v33  ;;  %v2647_v31 = vmax.f32 %v1973_v58, %v2464_v8  ;;  %v1974_v61 = vmax.f32 %v5965_v60, %v1793_v15  ;;  %v5977_v29 = vmax.f32 %v5975_v22, %v5976_v28  ;;  %v5982_v60 = vld [vmem:[#allocation22_spill] sm:$0xff]  ;;  %v5993_v28 = vld [vmem:[#allocation29_spill] sm:$0xff] }
 0x19e   :  { %3102 = vst.msk [vmem:[%s5766_s3 + $0x5c] sm:$0xf] %vm3078_vm2, %v3688_v63  ;;  %v2720_v0 = vadd.f32 %v5252_v27, %v2649_v9  ;;  %v2650_v16 = vmax.f32 %v1976_v26, %v4136_v13  ;;  %v5980_v26 = vmax.f32 %v5978_v6, %v5979_v25  ;;  %v5999_v25 = vld [vmem:[#allocation33_spill] sm:$0xff] }
 0x19f   :  { %3100 = vst.msk [vmem:[%s5766_s3 + $0x54] sm:$0xf] %vm3078_vm2, %v3686_v18  ;;  %v2718_v1 = vadd.f32 %v5252_v27, %v2647_v31  ;;  %v2648_v2 = vmax.f32 %v1974_v61, %v2467_v17  ;;  %v5983_v61 = vmax.f32 %v5981_v54, %v5982_v60 }
 0x1a0   :  { %v2784_v19 = vmax.f32 %v2720_v0, 0.0  ;;  %v2721_v11 = vadd.f32 %v5252_v27, %v2650_v16 }
 0x1a1   :  { %v2782_v36 = vmax.f32 %v2718_v1, 0.0  ;;  %v2719_v37 = vadd.f32 %v5252_v27, %v2648_v2  ;;  %v4065_v32 = vpop.f32.mrb[92].mxu0  ;;  %v4139_v51 = vpop.f32.mrb[92].mxu1 }
 0x1a2   :  { %v3691_v39 = vpack.c.bf16 %v2784_v19, %v2784_v19  ;;  %v2785_v40 = vmax.f32 %v2721_v11, 0.0  ;;  %v1979_v47 = vmax.f32 %v5968_v46, %v4065_v32  ;;  %v1806_v44 = vpop.f32.mrb[93].mxu0  ;;  %v2480_v45 = vpop.f32.mrb[93].mxu1  ;;  %v5984_v11 = vld [vmem:[#allocation23_spill] sm:$0xff]  ;;  %v5988_v46 = vld [vmem:[#allocation26_spill] sm:$0xff] }
 0x1a3   :  { %v3689_v62 = vpack.c.bf16 %v2782_v36, %v2782_v36  ;;  %v2783_v30 = vmax.f32 %v2719_v37, 0.0  ;;  %v1977_v48 = vmax.f32 %v5971_v52, %v1806_v44  ;;  %v4066_v42 = vpop.f32.mrb[94].mxu0  ;;  %v4140_v49 = vpop.f32.mrb[94].mxu1  ;;  %v5985_v36 = vld [vmem:[#allocation24_spill] sm:$0xff] }
 0x1a4   :  { %3105 = vst.msk [vmem:[%s5766_s3 + $0x68] sm:$0xf] %vm3078_vm2, %v3691_v39  ;;  %v3692_v50 = vpack.c.bf16 %v2785_v40, %v2785_v40  ;;  %v2653_v53 = vmax.f32 %v1979_v47, %v4139_v51  ;;  %v1980_v4 = vmax.f32 %v5974_v21, %v4066_v42  ;;  %v1809_v5 = vpop.f32.mrb[95].mxu0  ;;  %v2483_v23 = vpop.f32.mrb[95].mxu1  ;;  %v5986_v37 = vmax.f32 %v5984_v11, %v5985_v36  ;;  %v5991_v21 = vld [vmem:[#allocation28_spill] sm:$0xff]  ;;  %v6002_v36 = vld [vmem:[#allocation35_spill] sm:$0xff] }
 0x1a5   :  { %3103 = vst.msk [vmem:[%s5766_s3 + $0x60] sm:$0xf] %vm3078_vm2, %v3689_v62  ;;  %v3690_v24 = vpack.c.bf16 %v2783_v30, %v2783_v30  ;;  %v2651_v3 = vmax.f32 %v1977_v48, %v2480_v45  ;;  %v1978_v7 = vmax.f32 %v5977_v29, %v1809_v5  ;;  %v5989_v47 = vmax.f32 %v5987_v38, %v5988_v46  ;;  %v5994_v29 = vld [vmem:[#allocation30_spill] sm:$0xff]  ;;  %v6005_v46 = vld [vmem:[#allocation37_spill] sm:$0xff] }
 0x1a6   :  { %3106 = vst.msk [vmem:[%s5766_s3 + $0x6c] sm:$0xf] %vm3078_vm2, %v3692_v50  ;;  %v2724_v8 = vadd.f32 %v5252_v27, %v2653_v53  ;;  %v2654_v55 = vmax.f32 %v1980_v4, %v4140_v49  ;;  %v5992_v4 = vmax.f32 %v5990_v20, %v5991_v21  ;;  %v6011_v21 = vld [vmem:[#allocation41_spill] sm:$0xff] }
 0x1a7   :  { %3104 = vst.msk [vmem:[%s5766_s3 + $0x64] sm:$0xf] %vm3078_vm2, %v3690_v24  ;;  %v2722_v33 = vadd.f32 %v5252_v27, %v2651_v3  ;;  %v2652_v34 = vmax.f32 %v1978_v7, %v2483_v23  ;;  %v5995_v7 = vmax.f32 %v5993_v28, %v5994_v29 }
 0x1a8   :  { %v2788_v56 = vmax.f32 %v2724_v8, 0.0  ;;  %v2725_v57 = vadd.f32 %v5252_v27, %v2654_v55 }
 0x1a9   :  { %v2786_v58 = vmax.f32 %v2722_v33, 0.0  ;;  %v2723_v12 = vadd.f32 %v5252_v27, %v2652_v34  ;;  %v4069_v13 = vpop.f32.mrb[96].mxu0  ;;  %v4143_v63 = vpop.f32.mrb[96].mxu1 }
 0x1aa   :  { %v3695_v9 = vpack.c.bf16 %v2788_v56, %v2788_v56  ;;  %v2789_v59 = vmax.f32 %v2725_v57, 0.0  ;;  %v1983_v15 = vmax.f32 %v5980_v26, %v4069_v13  ;;  %v1822_v17 = vpop.f32.mrb[97].mxu0  ;;  %v2496_v18 = vpop.f32.mrb[97].mxu1  ;;  %v5996_v57 = vld [vmem:[#allocation31_spill] sm:$0xff]  ;;  %v6000_v26 = vld [vmem:[#allocation34_spill] sm:$0xff] }
 0x1ab   :  { %v3693_v31 = vpack.c.bf16 %v2786_v58, %v2786_v58  ;;  %v2787_v41 = vmax.f32 %v2723_v12, 0.0  ;;  %v1981_v0 = vmax.f32 %v5983_v61, %v1822_v17  ;;  %v4070_v16 = vpop.f32.mrb[98].mxu0  ;;  %v4144_v1 = vpop.f32.mrb[98].mxu1  ;;  %v5997_v58 = vld [vmem:[#allocation32_spill] sm:$0xff] }
 0x1ac   :  { %3109 = vst.msk [vmem:[%s5766_s3 + $0x78] sm:$0xf] %vm3078_vm2, %v3695_v9  ;;  %v3696_v2 = vpack.c.bf16 %v2789_v59, %v2789_v59  ;;  %v2657_v19 = vmax.f32 %v1983_v15, %v4143_v63  ;;  %v1984_v32 = vmax.f32 %v5986_v37, %v4070_v16  ;;  %v1825_v51 = vpop.f32.mrb[99].mxu0  ;;  %v2499_v39 = vpop.f32.mrb[99].mxu1  ;;  %v5998_v12 = vmax.f32 %v5996_v57, %v5997_v58  ;;  %v6003_v37 = vld [vmem:[#allocation36_spill] sm:$0xff]  ;;  %v6014_v58 = vld [vmem:[#allocation43_spill] sm:$0xff] }
 0x1ad   :  { %3107 = vst.msk [vmem:[%s5766_s3 + $0x70] sm:$0xf] %vm3078_vm2, %v3693_v31  ;;  %v3694_v40 = vpack.c.bf16 %v2787_v41, %v2787_v41  ;;  %v2655_v35 = vmax.f32 %v1981_v0, %v2496_v18  ;;  %v1982_v44 = vmax.f32 %v5989_v47, %v1825_v51  ;;  %v6001_v15 = vmax.f32 %v5999_v25, %v6000_v26  ;;  %v6006_v47 = vld [vmem:[#allocation38_spill] sm:$0xff]  ;;  %v6017_v26 = vld [vmem:[#allocation45_spill] sm:$0xff] }
 0x1ae   :  { %3110 = vst.msk [vmem:[%s5766_s3 + $0x7c] sm:$0xf] %vm3078_vm2, %v3696_v2  ;;  %v2728_v45 = vadd.f32 %v5252_v27, %v2657_v19  ;;  %v2658_v62 = vmax.f32 %v1984_v32, %v4144_v1  ;;  %v6004_v32 = vmax.f32 %v6002_v36, %v6003_v37  ;;  %v6023_v37 = vld [vmem:[#allocation49_spill] sm:$0xff] }
 0x1af   :  { %3108 = vst.msk [vmem:[%s5766_s3 + $0x74] sm:$0xf] %vm3078_vm2, %v3694_v40  ;;  %v2726_v30 = vadd.f32 %v5252_v27, %v2655_v35  ;;  %v2656_v43 = vmax.f32 %v1982_v44, %v2499_v39  ;;  %v6007_v44 = vmax.f32 %v6005_v46, %v6006_v47 }
 0x1b0   :  { %v2792_v10 = vmax.f32 %v2728_v45, 0.0  ;;  %v2729_v52 = vadd.f32 %v5252_v27, %v2658_v62 }
 0x1b1   :  { %v2790_v48 = vmax.f32 %v2726_v30, 0.0  ;;  %v2727_v42 = vadd.f32 %v5252_v27, %v2656_v43  ;;  %v4073_v49 = vpop.f32.mrb[100].mxu0  ;;  %v4147_v50 = vpop.f32.mrb[100].mxu1 }
 0x1b2   :  { %v3699_v53 = vpack.c.bf16 %v2792_v10, %v2792_v10  ;;  %v2793_v14 = vmax.f32 %v2729_v52, 0.0  ;;  %v1987_v5 = vmax.f32 %v5992_v4, %v4073_v49  ;;  %v1838_v23 = vpop.f32.mrb[101].mxu0  ;;  %v2512_v24 = vpop.f32.mrb[101].mxu1  ;;  %v6008_v52 = vld [vmem:[#allocation39_spill] sm:$0xff]  ;;  %v6012_v4 = vld [vmem:[#allocation42_spill] sm:$0xff] }
 0x1b3   :  { %v3697_v3 = vpack.c.bf16 %v2790_v48, %v2790_v48  ;;  %v2791_v22 = vmax.f32 %v2727_v42, 0.0  ;;  %v1985_v8 = vmax.f32 %v5995_v7, %v1838_v23  ;;  %v4074_v55 = vpop.f32.mrb[102].mxu0  ;;  %v4148_v33 = vpop.f32.mrb[102].mxu1  ;;  %v6009_v48 = vld [vmem:[#allocation40_spill] sm:$0xff] }
 0x1b4   :  { %3113 = vst.msk [vmem:[%s5766_s3 + $0x88] sm:$0xf] %vm3078_vm2, %v3699_v53  ;;  %v3700_v34 = vpack.c.bf16 %v2793_v14, %v2793_v14  ;;  %v2661_v56 = vmax.f32 %v1987_v5, %v4147_v50  ;;  %v1988_v13 = vmax.f32 %v5998_v12, %v4074_v55  ;;  %v1841_v63 = vpop.f32.mrb[103].mxu0  ;;  %v2515_v9 = vpop.f32.mrb[103].mxu1  ;;  %v6010_v42 = vmax.f32 %v6008_v52, %v6009_v48  ;;  %v6015_v12 = vld [vmem:[#allocation44_spill] sm:$0xff]  ;;  %v6026_v48 = vld [vmem:[#allocation51_spill] sm:$0xff] }
 0x1b5   :  { %3111 = vst.msk [vmem:[%s5766_s3 + $0x80] sm:$0xf] %vm3078_vm2, %v3697_v3  ;;  %v3698_v59 = vpack.c.bf16 %v2791_v22, %v2791_v22  ;;  %v2659_v6 = vmax.f32 %v1985_v8, %v2512_v24  ;;  %v1986_v17 = vmax.f32 %v6001_v15, %v1841_v63  ;;  %v6013_v5 = vmax.f32 %v6011_v21, %v6012_v4  ;;  %v6018_v15 = vld [vmem:[#allocation46_spill] sm:$0xff]  ;;  %v6029_v4 = vld [vmem:[#allocation53_spill] sm:$0xff] }
 0x1b6   :  { %3114 = vst.msk [vmem:[%s5766_s3 + $0x8c] sm:$0xf] %vm3078_vm2, %v3700_v34  ;;  %v2732_v18 = vadd.f32 %v5252_v27, %v2661_v56  ;;  %v2662_v31 = vmax.f32 %v1988_v13, %v4148_v33  ;;  %v6016_v13 = vmax.f32 %v6014_v58, %v6015_v12  ;;  %v6035_v12 = vld [vmem:[#allocation57_spill] sm:$0xff] }
 0x1b7   :  { %3112 = vst.msk [vmem:[%s5766_s3 + $0x84] sm:$0xf] %vm3078_vm2, %v3698_v59  ;;  %v2730_v41 = vadd.f32 %v5252_v27, %v2659_v6  ;;  %v2660_v54 = vmax.f32 %v1986_v17, %v2515_v9  ;;  %v6019_v17 = vmax.f32 %v6017_v26, %v6018_v15 }
 0x1b8   :  { %v2796_v60 = vmax.f32 %v2732_v18, 0.0  ;;  %v2733_v61 = vadd.f32 %v5252_v27, %v2662_v31 }
 0x1b9   :  { %v2794_v0 = vmax.f32 %v2730_v41, 0.0  ;;  %v2731_v16 = vadd.f32 %v5252_v27, %v2660_v54  ;;  %v4077_v1 = vpop.f32.mrb[104].mxu0  ;;  %v4151_v2 = vpop.f32.mrb[104].mxu1 }
 0x1ba   :  { %v3703_v19 = vpack.c.bf16 %v2796_v60, %v2796_v60  ;;  %v2797_v11 = vmax.f32 %v2733_v61, 0.0  ;;  %v1991_v51 = vmax.f32 %v6004_v32, %v4077_v1  ;;  %v1854_v39 = vpop.f32.mrb[105].mxu0  ;;  %v2528_v40 = vpop.f32.mrb[105].mxu1  ;;  %v6020_v61 = vld [vmem:[#allocation47_spill] sm:$0xff]  ;;  %v6024_v32 = vld [vmem:[#allocation50_spill] sm:$0xff] }
 0x1bb   :  { %v3701_v35 = vpack.c.bf16 %v2794_v0, %v2794_v0  ;;  %v2795_v38 = vmax.f32 %v2731_v16, 0.0  ;;  %v1989_v45 = vmax.f32 %v6007_v44, %v1854_v39  ;;  %v4078_v62 = vpop.f32.mrb[106].mxu0  ;;  %v4152_v30 = vpop.f32.mrb[106].mxu1  ;;  %v6021_v0 = vld [vmem:[#allocation48_spill] sm:$0xff] }
 0x1bc   :  { %3117 = vst.msk [vmem:[%s5766_s3 + $0x98] sm:$0xf] %vm3078_vm2, %v3703_v19  ;;  %v3704_v43 = vpack.c.bf16 %v2797_v11, %v2797_v11  ;;  %v2665_v10 = vmax.f32 %v1991_v51, %v4151_v2  ;;  %v1992_v49 = vmax.f32 %v6010_v42, %v4078_v62  ;;  %v1857_v50 = vpop.f32.mrb[107].mxu0  ;;  %v2531_v53 = vpop.f32.mrb[107].mxu1  ;;  %v6022_v16 = vmax.f32 %v6020_v61, %v6021_v0  ;;  %v6027_v42 = vld [vmem:[#allocation52_spill] sm:$0xff]  ;;  %v6038_v0 = vld [vmem:[#allocation59_spill] sm:$0xff] }
 0x1bd   :  { %3115 = vst.msk [vmem:[%s5766_s3 + $0x90] sm:$0xf] %vm3078_vm2, %v3701_v35  ;;  %v3702_v14 = vpack.c.bf16 %v2795_v38, %v2795_v38  ;;  %v2663_v20 = vmax.f32 %v1989_v45, %v2528_v40  ;;  %v1990_v23 = vmax.f32 %v6013_v5, %v1857_v50  ;;  %v6025_v51 = vmax.f32 %v6023_v37, %v6024_v32  ;;  %v6030_v5 = vld [vmem:[#allocation54_spill] sm:$0xff]  ;;  %v6041_v32 = vld [vmem:[#allocation61_spill] sm:$0xff] }
 0x1be   :  { %3118 = vst.msk [vmem:[%s5766_s3 + $0x9c] sm:$0xf] %vm3078_vm2, %v3704_v43  ;;  %v2736_v24 = vadd.f32 %v5252_v27, %v2665_v10  ;;  %v2666_v3 = vmax.f32 %v1992_v49, %v4152_v30  ;;  %v6028_v49 = vmax.f32 %v6026_v48, %v6027_v42  ;;  %v6047_v42 = vld [vmem:[#allocation65_spill] sm:$0xff] }
 0x1bf   :  { %3116 = vst.msk [vmem:[%s5766_s3 + $0x94] sm:$0xf] %vm3078_vm2, %v3702_v14  ;;  %v2734_v22 = vadd.f32 %v5252_v27, %v2663_v20  ;;  %v2664_v28 = vmax.f32 %v1990_v23, %v2531_v53  ;;  %v6031_v23 = vmax.f32 %v6029_v4, %v6030_v5 }
 0x1c0   :  { %v2800_v29 = vmax.f32 %v2736_v24, 0.0  ;;  %v2737_v7 = vadd.f32 %v5252_v27, %v2666_v3 }
 0x1c1   :  { %v2798_v8 = vmax.f32 %v2734_v22, 0.0  ;;  %v2735_v55 = vadd.f32 %v5252_v27, %v2664_v28  ;;  %v4081_v33 = vpop.f32.mrb[108].mxu0  ;;  %v4155_v34 = vpop.f32.mrb[108].mxu1 }
 0x1c2   :  { %v3707_v56 = vpack.c.bf16 %v2800_v29, %v2800_v29  ;;  %v2801_v57 = vmax.f32 %v2737_v7, 0.0  ;;  %v1995_v63 = vmax.f32 %v6016_v13, %v4081_v33  ;;  %v1870_v9 = vpop.f32.mrb[109].mxu0  ;;  %v2544_v59 = vpop.f32.mrb[109].mxu1  ;;  %v6032_v7 = vld [vmem:[#allocation55_spill] sm:$0xff]  ;;  %v6036_v13 = vld [vmem:[#allocation58_spill] sm:$0xff] }
 0x1c3   :  { %v3705_v6 = vpack.c.bf16 %v2798_v8, %v2798_v8  ;;  %v2799_v25 = vmax.f32 %v2735_v55, 0.0  ;;  %v1993_v18 = vmax.f32 %v6019_v17, %v1870_v9  ;;  %v4082_v31 = vpop.f32.mrb[110].mxu0  ;;  %v4156_v41 = vpop.f32.mrb[110].mxu1  ;;  %v6033_v8 = vld [vmem:[#allocation56_spill] sm:$0xff] }
 0x1c4   :  { %3121 = vst.msk [vmem:[%s5766_s3 + $0xa8] sm:$0xf] %vm3078_vm2, %v3707_v56  ;;  %v3708_v54 = vpack.c.bf16 %v2801_v57, %v2801_v57  ;;  %v2669_v60 = vmax.f32 %v1995_v63, %v4155_v34  ;;  %v1996_v1 = vmax.f32 %v6022_v16, %v4082_v31  ;;  %v1873_v2 = vpop.f32.mrb[111].mxu0  ;;  %v2547_v19 = vpop.f32.mrb[111].mxu1  ;;  %v6034_v55 = vmax.f32 %v6032_v7, %v6033_v8  ;;  %v6039_v16 = vld [vmem:[#allocation60_spill] sm:$0xff]  ;;  %v6050_v8 = vld [vmem:[#allocation67_spill] sm:$0xff] }
 0x1c5   :  { %3119 = vst.msk [vmem:[%s5766_s3 + $0xa0] sm:$0xf] %vm3078_vm2, %v3705_v6  ;;  %v3706_v11 = vpack.c.bf16 %v2799_v25, %v2799_v25  ;;  %v2667_v36 = vmax.f32 %v1993_v18, %v2544_v59  ;;  %v1994_v39 = vmax.f32 %v6025_v51, %v1873_v2  ;;  %v6037_v63 = vmax.f32 %v6035_v12, %v6036_v13  ;;  %v6042_v51 = vld [vmem:[#allocation62_spill] sm:$0xff]  ;;  %v6053_v13 = vld [vmem:[#allocation69_spill] sm:$0xff] }
 0x1c6   :  { %3122 = vst.msk [vmem:[%s5766_s3 + $0xac] sm:$0xf] %vm3078_vm2, %v3708_v54  ;;  %v2740_v40 = vadd.f32 %v5252_v27, %v2669_v60  ;;  %v2670_v35 = vmax.f32 %v1996_v1, %v4156_v41  ;;  %v6040_v1 = vmax.f32 %v6038_v0, %v6039_v16  ;;  %v6059_v16 = vld [vmem:[#allocation73_spill] sm:$0xff] }
 0x1c7   :  { %3120 = vst.msk [vmem:[%s5766_s3 + $0xa4] sm:$0xf] %vm3078_vm2, %v3706_v11  ;;  %v2738_v38 = vadd.f32 %v5252_v27, %v2667_v36  ;;  %v2668_v46 = vmax.f32 %v1994_v39, %v2547_v19  ;;  %v6043_v39 = vmax.f32 %v6041_v32, %v6042_v51 }
 0x1c8   :  { %v2804_v47 = vmax.f32 %v2740_v40, 0.0  ;;  %v2741_v44 = vadd.f32 %v5252_v27, %v2670_v35 }
 0x1c9   :  { %v2802_v45 = vmax.f32 %v2738_v38, 0.0  ;;  %v2739_v62 = vadd.f32 %v5252_v27, %v2668_v46  ;;  %v4085_v30 = vpop.f32.mrb[112].mxu0  ;;  %v4159_v43 = vpop.f32.mrb[112].mxu1 }
 0x1ca   :  { %v3711_v10 = vpack.c.bf16 %v2804_v47, %v2804_v47  ;;  %v2805_v52 = vmax.f32 %v2741_v44, 0.0  ;;  %v1999_v50 = vmax.f32 %v6028_v49, %v4085_v30  ;;  %v1886_v53 = vpop.f32.mrb[113].mxu0  ;;  %v2560_v14 = vpop.f32.mrb[113].mxu1  ;;  %v6044_v44 = vld [vmem:[#allocation63_spill] sm:$0xff]  ;;  %v6048_v49 = vld [vmem:[#allocation66_spill] sm:$0xff] }
 0x1cb   :  { %v3709_v20 = vpack.c.bf16 %v2802_v45, %v2802_v45  ;;  %v2803_v21 = vmax.f32 %v2739_v62, 0.0  ;;  %v1997_v24 = vmax.f32 %v6031_v23, %v1886_v53  ;;  %v4086_v3 = vpop.f32.mrb[114].mxu0  ;;  %v4160_v22 = vpop.f32.mrb[114].mxu1  ;;  %v6045_v45 = vld [vmem:[#allocation64_spill] sm:$0xff] }
 0x1cc   :  { %3125 = vst.msk [vmem:[%s5766_s3 + $0xb8] sm:$0xf] %vm3078_vm2, %v3711_v10  ;;  %v3712_v28 = vpack.c.bf16 %v2805_v52, %v2805_v52  ;;  %v2673_v29 = vmax.f32 %v1999_v50, %v4159_v43  ;;  %v2000_v33 = vmax.f32 %v6034_v55, %v4086_v3  ;;  %v1889_v34 = vpop.f32.mrb[115].mxu0  ;;  %v2563_v56 = vpop.f32.mrb[115].mxu1  ;;  %v6046_v62 = vmax.f32 %v6044_v44, %v6045_v45  ;;  %v6051_v55 = vld [vmem:[#allocation68_spill] sm:$0xff]  ;;  %v6062_v45 = vld [vmem:[#allocation75_spill] sm:$0xff] }
 0x1cd   :  { %3123 = vst.msk [vmem:[%s5766_s3 + $0xb0] sm:$0xf] %vm3078_vm2, %v3709_v20  ;;  %v3710_v57 = vpack.c.bf16 %v2803_v21, %v2803_v21  ;;  %v2671_v58 = vmax.f32 %v1997_v24, %v2560_v14  ;;  %v1998_v9 = vmax.f32 %v6037_v63, %v1889_v34  ;;  %v6049_v50 = vmax.f32 %v6047_v42, %v6048_v49  ;;  %v6054_v63 = vld [vmem:[#allocation70_spill] sm:$0xff]  ;;  %v6065_v49 = vld [vmem:[#allocation77_spill] sm:$0xff] }
 0x1ce   :  { %3126 = vst.msk [vmem:[%s5766_s3 + $0xbc] sm:$0xf] %vm3078_vm2, %v3712_v28  ;;  %v2744_v59 = vadd.f32 %v5252_v27, %v2673_v29  ;;  %v2674_v6 = vmax.f32 %v2000_v33, %v4160_v22  ;;  %v6052_v33 = vmax.f32 %v6050_v8, %v6051_v55  ;;  %v6071_v55 = vld [vmem:[#allocation81_spill] sm:$0xff] }
 0x1cf   :  { %3124 = vst.msk [vmem:[%s5766_s3 + $0xb4] sm:$0xf] %vm3078_vm2, %v3710_v57  ;;  %v2742_v25 = vadd.f32 %v5252_v27, %v2671_v58  ;;  %v2672_v26 = vmax.f32 %v1998_v9, %v2563_v56  ;;  %v6055_v9 = vmax.f32 %v6053_v13, %v6054_v63 }
 0x1d0   :  { %v2808_v15 = vmax.f32 %v2744_v59, 0.0  ;;  %v2745_v17 = vadd.f32 %v5252_v27, %v2674_v6 }
 0x1d1   :  { %v2806_v18 = vmax.f32 %v2742_v25, 0.0  ;;  %v2743_v31 = vadd.f32 %v5252_v27, %v2672_v26  ;;  %v4089_v41 = vpop.f32.mrb[116].mxu0  ;;  %v4163_v54 = vpop.f32.mrb[116].mxu1 }
 0x1d2   :  { %v3715_v60 = vpack.c.bf16 %v2808_v15, %v2808_v15  ;;  %v2809_v61 = vmax.f32 %v2745_v17, 0.0  ;;  %v2003_v2 = vmax.f32 %v6040_v1, %v4089_v41  ;;  %v1902_v19 = vpop.f32.mrb[117].mxu0  ;;  %v2576_v11 = vpop.f32.mrb[117].mxu1  ;;  %v6056_v17 = vld [vmem:[#allocation71_spill] sm:$0xff]  ;;  %v6060_v1 = vld [vmem:[#allocation74_spill] sm:$0xff] }
 0x1d3   :  { %v3713_v36 = vpack.c.bf16 %v2806_v18, %v2806_v18  ;;  %v2807_v37 = vmax.f32 %v2743_v31, 0.0  ;;  %v2001_v40 = vmax.f32 %v6043_v39, %v1902_v19  ;;  %v4090_v35 = vpop.f32.mrb[118].mxu0  ;;  %v4164_v38 = vpop.f32.mrb[118].mxu1  ;;  %v6057_v18 = vld [vmem:[#allocation72_spill] sm:$0xff] }
 0x1d4   :  { %3129 = vst.msk [vmem:[%s5766_s3 + $0xc8] sm:$0xf] %vm3078_vm2, %v3715_v60  ;;  %v3716_v46 = vpack.c.bf16 %v2809_v61, %v2809_v61  ;;  %v2677_v47 = vmax.f32 %v2003_v2, %v4163_v54  ;;  %v2004_v30 = vmax.f32 %v6046_v62, %v4090_v35  ;;  %v1905_v43 = vpop.f32.mrb[119].mxu0  ;;  %v2579_v10 = vpop.f32.mrb[119].mxu1  ;;  %v6058_v31 = vmax.f32 %v6056_v17, %v6057_v18  ;;  %v6063_v62 = vld [vmem:[#allocation76_spill] sm:$0xff] }
 0x1d5   :  { %3127 = vst.msk [vmem:[%s5766_s3 + $0xc0] sm:$0xf] %vm3078_vm2, %v3713_v36  ;;  %v3714_v52 = vpack.c.bf16 %v2807_v37, %v2807_v37  ;;  %v2675_v48 = vmax.f32 %v2001_v40, %v2576_v11  ;;  %v2002_v53 = vmax.f32 %v6049_v50, %v1905_v43  ;;  %v6061_v2 = vmax.f32 %v6059_v16, %v6060_v1  ;;  %v6066_v50 = vld [vmem:[#allocation78_spill] sm:$0xff] }
 0x1d6   :  { %3130 = vst.msk [vmem:[%s5766_s3 + $0xcc] sm:$0xf] %vm3078_vm2, %v3716_v46  ;;  %v2748_v14 = vadd.f32 %v5252_v27, %v2677_v47  ;;  %v2678_v20 = vmax.f32 %v2004_v30, %v4164_v38  ;;  %v6064_v30 = vmax.f32 %v6062_v45, %v6063_v62 }
 0x1d7   :  { %3128 = vst.msk [vmem:[%s5766_s3 + $0xc4] sm:$0xf] %vm3078_vm2, %v3714_v52  ;;  %v2746_v21 = vadd.f32 %v5252_v27, %v2675_v48  ;;  %v2676_v4 = vmax.f32 %v2002_v53, %v2579_v10  ;;  %v6067_v53 = vmax.f32 %v6065_v49, %v6066_v50 }
 0x1d8   :  { %v2812_v5 = vmax.f32 %v2748_v14, 0.0  ;;  %v2749_v23 = vadd.f32 %v5252_v27, %v2678_v20 }
 0x1d9   :  { %v2810_v24 = vmax.f32 %v2746_v21, 0.0  ;;  %v2747_v3 = vadd.f32 %v5252_v27, %v2676_v4  ;;  %v4093_v22 = vpop.f32.mrb[120].mxu0  ;;  %v4167_v28 = vpop.f32.mrb[120].mxu1 }
 0x1da   :  { %v3719_v29 = vpack.c.bf16 %v2812_v5, %v2812_v5  ;;  %v2813_v7 = vmax.f32 %v2749_v23, 0.0  ;;  %v2007_v34 = vmax.f32 %v6052_v33, %v4093_v22  ;;  %v1918_v56 = vpop.f32.mrb[121].mxu0  ;;  %v2592_v57 = vpop.f32.mrb[121].mxu1  ;;  %v6068_v23 = vld [vmem:[#allocation79_spill] sm:$0xff]  ;;  %v6072_v33 = vld [vmem:[#allocation82_spill] sm:$0xff] }
 0x1db   :  { %v3717_v58 = vpack.c.bf16 %v2810_v24, %v2810_v24  ;;  %v2811_v12 = vmax.f32 %v2747_v3, 0.0  ;;  %v2005_v59 = vmax.f32 %v6055_v9, %v1918_v56  ;;  %v4094_v6 = vpop.f32.mrb[122].mxu0  ;;  %v4168_v25 = vpop.f32.mrb[122].mxu1  ;;  %v6069_v24 = vld [vmem:[#allocation80_spill] sm:$0xff] }
 0x1dc   :  { %3133 = vst.msk [vmem:[%s5766_s3 + $0xd8] sm:$0xf] %vm3078_vm2, %v3719_v29  ;;  %v3720_v26 = vpack.c.bf16 %v2813_v7, %v2813_v7  ;;  %v2681_v15 = vmax.f32 %v2007_v34, %v4167_v28  ;;  %v2008_v41 = vmax.f32 %v6058_v31, %v4094_v6  ;;  %v1921_v54 = vpop.f32.mrb[123].mxu0  ;;  %v2595_v60 = vpop.f32.mrb[123].mxu1  ;;  %v6070_v3 = vmax.f32 %v6068_v23, %v6069_v24 }
 0x1dd   :  { %3131 = vst.msk [vmem:[%s5766_s3 + $0xd0] sm:$0xf] %vm3078_vm2, %v3717_v58  ;;  %v3718_v61 = vpack.c.bf16 %v2811_v12, %v2811_v12  ;;  %v2679_v0 = vmax.f32 %v2005_v59, %v2592_v57  ;;  %v2006_v19 = vmax.f32 %v6061_v2, %v1921_v54  ;;  %v6073_v34 = vmax.f32 %v6071_v55, %v6072_v33 }
 0x1de   :  { %3134 = vst.msk [vmem:[%s5766_s3 + $0xdc] sm:$0xf] %vm3078_vm2, %v3720_v26  ;;  %v2752_v11 = vadd.f32 %v5252_v27, %v2681_v15  ;;  %v2682_v36 = vmax.f32 %v2008_v41, %v4168_v25 }
 0x1df   :  { %3132 = vst.msk [vmem:[%s5766_s3 + $0xd4] sm:$0xf] %vm3078_vm2, %v3718_v61  ;;  %v2750_v37 = vadd.f32 %v5252_v27, %v2679_v0  ;;  %v2680_v32 = vmax.f32 %v2006_v19, %v2595_v60 }
 0x1e0   :  { %v2816_v51 = vmax.f32 %v2752_v11, 0.0  ;;  %v2753_v39 = vadd.f32 %v5252_v27, %v2682_v36 }
 0x1e1   :  { %v2814_v40 = vmax.f32 %v2750_v37, 0.0  ;;  %v2751_v35 = vadd.f32 %v5252_v27, %v2680_v32  ;;  %v4097_v38 = vpop.f32.mrb[124].mxu0  ;;  %v4171_v46 = vpop.f32.mrb[124].mxu1 }
 0x1e2   :  { %v3723_v47 = vpack.c.bf16 %v2816_v51, %v2816_v51  ;;  %v2817_v44 = vmax.f32 %v2753_v39, 0.0  ;;  %v2011_v43 = vmax.f32 %v6064_v30, %v4097_v38  ;;  %v1934_v10 = vpop.f32.mrb[125].mxu0  ;;  %v2608_v52 = vpop.f32.mrb[125].mxu1 }
 0x1e3   :  { %v3721_v48 = vpack.c.bf16 %v2814_v40, %v2814_v40  ;;  %v2815_v42 = vmax.f32 %v2751_v35, 0.0  ;;  %v2009_v14 = vmax.f32 %v6067_v53, %v1934_v10  ;;  %v4098_v20 = vpop.f32.mrb[126].mxu0  ;;  %v4172_v21 = vpop.f32.mrb[126].mxu1 }
 0x1e4   :  { %3137 = vst.msk [vmem:[%s5766_s3 + $0xe8] sm:$0xf] %vm3078_vm2, %v3723_v47  ;;  %v3724_v4 = vpack.c.bf16 %v2817_v44, %v2817_v44  ;;  %v2685_v5 = vmax.f32 %v2011_v43, %v4171_v46  ;;  %v2012_v22 = vmax.f32 %v6070_v3, %v4098_v20  ;;  %v1937_v28 = vpop.f32.mrb[127].mxu0  ;;  %v2611_v29 = vpop.f32.mrb[127].mxu1 }
 0x1e5   :  { %3135 = vst.msk [vmem:[%s5766_s3 + $0xe0] sm:$0xf] %vm3078_vm2, %v3721_v48  ;;  %v3722_v7 = vpack.c.bf16 %v2815_v42, %v2815_v42  ;;  %v2683_v8 = vmax.f32 %v2009_v14, %v2608_v52  ;;  %v2010_v56 = vmax.f32 %v6073_v34, %v1937_v28 }
 0x1e6   :  { %3138 = vst.msk [vmem:[%s5766_s3 + $0xec] sm:$0xf] %vm3078_vm2, %v3724_v4  ;;  %v2756_v57 = vadd.f32 %v5252_v27, %v2685_v5  ;;  %v2686_v58 = vmax.f32 %v2012_v22, %v4172_v21 }
 0x1e7   :  { %3136 = vst.msk [vmem:[%s5766_s3 + $0xe4] sm:$0xf] %vm3078_vm2, %v3722_v7  ;;  %v2754_v12 = vadd.f32 %v5252_v27, %v2683_v8  ;;  %v2684_v13 = vmax.f32 %v2010_v56, %v2611_v29 }
 0x1e8   :  { %v2820_v63 = vmax.f32 %v2756_v57, 0.0  ;;  %v2757_v9 = vadd.f32 %v5252_v27, %v2686_v58 }
 0x1e9   :  { %v2818_v59 = vmax.f32 %v2754_v12, 0.0  ;;  %v2755_v6 = vadd.f32 %v5252_v27, %v2684_v13 }
 0x1ea   :  { %v3727_v25 = vpack.c.bf16 %v2820_v63, %v2820_v63  ;;  %v2821_v26 = vmax.f32 %v2757_v9, 0.0 }
 0x1eb   :  { %v3725_v15 = vpack.c.bf16 %v2818_v59, %v2818_v59  ;;  %v2819_v17 = vmax.f32 %v2755_v6, 0.0 }
 0x1ec   :  { %3141 = vst.msk [vmem:[%s5766_s3 + $0xf8] sm:$0xf] %vm3078_vm2, %v3727_v25  ;;  %v3728_v18 = vpack.c.bf16 %v2821_v26, %v2821_v26 }
 0x1ed   :  { %3139 = vst.msk [vmem:[%s5766_s3 + $0xf0] sm:$0xf] %vm3078_vm2, %v3725_v15  ;;  %v3726_v31 = vpack.c.bf16 %v2819_v17, %v2819_v17 }
 0x1ee   :  { %3142 = vst.msk [vmem:[%s5766_s3 + $0xfc] sm:$0xf] %vm3078_vm2, %v3728_v18 }
 0x1ef   :  { %3140 = vst.msk [vmem:[%s5766_s3 + $0xf4] sm:$0xf] %vm3078_vm2, %v3726_v31 }

// kernel: net_forward.8
= control target key start
LH: loop header
LB: loop body
LE: loop exit
PB: predicated region body
PF: predicated region fallthrough
CT: control target
= control target key end

     0   :  { %v1391_v0 = vmov 0   ;;  %vm175_vm0 = vcmask 130048   ;;  %vm1078_vm1 = vcmask 257024   ;;  %s1976_s1 = inlined_call_operand.vmem [shape: bf16[144,32], index: 1, kind: input, shape index: {}]   ;;  %s1977_s0 = inlined_call_operand.vmem [shape: bf16[4,128,144], index: 0, kind: input, shape index: {}]   ;;  %s1978_s2 = inlined_call_operand.vmem [shape: f32[1,32], index: 2, kind: input, shape index: {}]   ;;  %s1979_s3 = inlined_call_operand.vmem [shape: bf16[128,32], index: 3, kind: output, shape index: {}]  }
   0x1   :  { %200 = vmatprep.subr.bf16.mxu0 %v1391_v0  ;;  %410 = vmatprep.subr.bf16.mxu1 %v1391_v0  ;;  %v1286_v1 = vld [vmem:[%s1976_s1] sm:$0xff]   ;;  %v1420_v2 = vld [vmem:[%s1976_s1 + $0x8] sm:$0xff]   ;;  %v1429_v3 = vld [vmem:[%s1976_s1 + $0x10] sm:$0xff]  }
   0x2   :  { %201 = vmatpush1.bf16.msra.mxu0 %v1286_v1  ;;  %411 = vmatpush1.bf16.msra.mxu1 %v1286_v1  ;;  %v1436_v4 = vld [vmem:[%s1976_s1 + $0x18] sm:$0xff]   ;;  %v1297_v5 = vld [vmem:[%s1977_s0 + $0x4] ss:$8 sps:$4 sm:$0xff]   ;;  %v1473_v9 = vld [vmem:[%s1976_s1 + $0x30] sm:$0xff]  }
   0x3   :  { %202 = vmatprep.subr.bf16.mxu0 %v1391_v0  ;;  %412 = vmatprep.subr.bf16.mxu1 %v1391_v0  ;;  %v1300_v6 = vld [vmem:[%s1977_s0 + $0x84] ss:$8 sps:$4 sm:$0xff]   ;;  %v1482_v10 = vld [vmem:[%s1976_s1 + $0x38] sm:$0xff]   ;;  %v1295_v12 = vld [vmem:[%s1977_s0] ss:$8 sps:$4 sm:$0xff]  }
   0x4   :  { %1124 = vmatprep.mubr.msk.bf16.mxu0 %vm175_vm0, %v1297_v5  ;;  %1164 = vmatprep.mubr.msk.bf16.mxu1 %vm175_vm0, %v1300_v6  ;;  %v1455_v7 = vld [vmem:[%s1976_s1 + $0x20] sm:$0xff]   ;;  %v1464_v8 = vld [vmem:[%s1976_s1 + $0x28] sm:$0xff]   ;;  %v1301_v14 = vld [vmem:[%s1977_s0 + $0x14] ss:$8 sps:$4 sm:$0xff]  }
   0x5   :  { %v1491_v11 = vld [vmem:[%s1976_s1 + $0x40] sm:$0xff]   ;;  %v1303_v15 = vld [vmem:[%s1977_s0 + $0x94] ss:$8 sps:$4 sm:$0xff]   ;;  %v1305_v16 = vld [vmem:[%s1977_s0 + $0x10] ss:$8 sps:$4 sm:$0xff]  }
   0x6   :  { %203 = vmatpush1.bf16.msra.mxu0 %v1420_v2  ;;  %413 = vmatpush1.bf16.msra.mxu1 %v1420_v2  ;;  %v1298_v13 = vld [vmem:[%s1977_s0 + $0x80] ss:$8 sps:$4 sm:$0xff]   ;;  %v1306_v17 = vld [vmem:[%s1977_s0 + $0x90] ss:$8 sps:$4 sm:$0xff]   ;;  %v1307_v18 = vld [vmem:[%s1977_s0 + $0x24] ss:$8 sps:$4 sm:$0xff]  }
   0x7   :  { %204 = vmatprep.subr.bf16.mxu0 %v1391_v0  ;;  %414 = vmatprep.subr.bf16.mxu1 %v1391_v0  ;;  %v1309_v19 = vld [vmem:[%s1977_s0 + $0xa4] ss:$8 sps:$4 sm:$0xff]   ;;  %v1311_v20 = vld [vmem:[%s1977_s0 + $0x20] ss:$8 sps:$4 sm:$0xff]   ;;  %v1313_v22 = vld [vmem:[%s1977_s0 + $0x34] ss:$8 sps:$4 sm:$0xff]  }
   0x8   :  { %v1312_v21 = vld [vmem:[%s1977_s0 + $0xa0] ss:$8 sps:$4 sm:$0xff]   ;;  %v1315_v23 = vld [vmem:[%s1977_s0 + $0xb4] ss:$8 sps:$4 sm:$0xff]   ;;  %v1317_v24 = vld [vmem:[%s1977_s0 + $0x30] ss:$8 sps:$4 sm:$0xff]  }
   0x9   :  { %v1318_v25 = vld [vmem:[%s1977_s0 + $0xb0] ss:$8 sps:$4 sm:$0xff]   ;;  %v1319_v26 = vld [vmem:[%s1977_s0 + $0x44] ss:$8 sps:$4 sm:$0xff]   ;;  %v1323_v28 = vld [vmem:[%s1977_s0 + $0x40] ss:$8 sps:$4 sm:$0xff]  }
   0xa   :  { %205 = vmatpush1.bf16.msra.mxu0 %v1429_v3  ;;  %415 = vmatpush1.bf16.msra.mxu1 %v1429_v3  ;;  %v1321_v27 = vld [vmem:[%s1977_s0 + $0xc4] ss:$8 sps:$4 sm:$0xff]   ;;  %v1324_v29 = vld [vmem:[%s1977_s0 + $0xc0] ss:$8 sps:$4 sm:$0xff]   ;;  %v1325_v30 = vld [vmem:[%s1977_s0 + $0x54] ss:$8 sps:$4 sm:$0xff]  }
   0xb   :  { %206 = vmatprep.subr.bf16.mxu0 %v1391_v0  ;;  %416 = vmatprep.subr.bf16.mxu1 %v1391_v0  ;;  %v1327_v31 = vld [vmem:[%s1977_s0 + $0xd4] ss:$8 sps:$4 sm:$0xff]   ;;  %v1329_v32 = vld [vmem:[%s1977_s0 + $0x50] ss:$8 sps:$4 sm:$0xff]   ;;  %v1331_v34 = vld [vmem:[%s1977_s0 + $0x64] ss:$8 sps:$4 sm:$0xff]  }
   0xc   :  { %v1330_v33 = vld [vmem:[%s1977_s0 + $0xd0] ss:$8 sps:$4 sm:$0xff]   ;;  %v1333_v35 = vld [vmem:[%s1977_s0 + $0xe4] ss:$8 sps:$4 sm:$0xff]   ;;  %v1335_v36 = vld [vmem:[%s1977_s0 + $0x60] ss:$8 sps:$4 sm:$0xff]  }
   0xd   :  { %v1336_v37 = vld [vmem:[%s1977_s0 + $0xe0] ss:$8 sps:$4 sm:$0xff]   ;;  %v1337_v38 = vld [vmem:[%s1977_s0 + $0x74] ss:$8 sps:$4 sm:$0xff]   ;;  %v1341_v40 = vld [vmem:[%s1977_s0 + $0x70] ss:$8 sps:$4 sm:$0xff]  }
   0xe   :  { %207 = vmatpush1.bf16.msra.mxu0 %v1436_v4  ;;  %417 = vmatpush1.bf16.msra.mxu1 %v1436_v4  ;;  %v1339_v39 = vld [vmem:[%s1977_s0 + $0xf4] ss:$8 sps:$4 sm:$0xff]   ;;  %v1342_v41 = vld [vmem:[%s1977_s0 + $0xf0] ss:$8 sps:$4 sm:$0xff]   ;;  %v1345_v42 = vld [vmem:[%s1977_s0 + $0x104] ss:$8 sps:$4 sm:$0xff]  }
   0xf   :  { %208 = vmatprep.subr.bf16.mxu0 %v1391_v0  ;;  %418 = vmatprep.subr.bf16.mxu1 %v1391_v0  ;;  %v1348_v43 = vld [vmem:[%s1977_s0 + $0x184] ss:$8 sps:$4 sm:$0xff]   ;;  %v1343_v44 = vld [vmem:[%s1977_s0 + $0x100] ss:$8 sps:$4 sm:$0xff]   ;;  %v1349_v46 = vld [vmem:[%s1977_s0 + $0x114] ss:$8 sps:$4 sm:$0xff]  }
  0x10   :  { %v1346_v45 = vld [vmem:[%s1977_s0 + $0x180] ss:$8 sps:$4 sm:$0xff]   ;;  %v1351_v47 = vld [vmem:[%s1977_s0 + $0x194] ss:$8 sps:$4 sm:$0xff]   ;;  %v1353_v48 = vld [vmem:[%s1977_s0 + $0x110] ss:$8 sps:$4 sm:$0xff]  }
  0x11   :  { %v1354_v49 = vld [vmem:[%s1977_s0 + $0x190] ss:$8 sps:$4 sm:$0xff]   ;;  %v1355_v50 = vld [vmem:[%s1977_s0 + $0x124] ss:$8 sps:$4 sm:$0xff]   ;;  %v1359_v52 = vld [vmem:[%s1977_s0 + $0x120] ss:$8 sps:$4 sm:$0xff]  }
  0x12   :  { %209 = vmatpush1.bf16.msra.mxu0 %v1455_v7  ;;  %419 = vmatpush1.bf16.msra.mxu1 %v1455_v7  ;;  %v1357_v51 = vld [vmem:[%s1977_s0 + $0x1a4] ss:$8 sps:$4 sm:$0xff]   ;;  %v1360_v53 = vld [vmem:[%s1977_s0 + $0x1a0] ss:$8 sps:$4 sm:$0xff]   ;;  %v1361_v54 = vld [vmem:[%s1977_s0 + $0x134] ss:$8 sps:$4 sm:$0xff]  }
  0x13   :  { %210 = vmatprep.subr.bf16.mxu0 %v1391_v0  ;;  %420 = vmatprep.subr.bf16.mxu1 %v1391_v0  ;;  %v1363_v55 = vld [vmem:[%s1977_s0 + $0x1b4] ss:$8 sps:$4 sm:$0xff]   ;;  %v1365_v56 = vld [vmem:[%s1977_s0 + $0x130] ss:$8 sps:$4 sm:$0xff]   ;;  %v1367_v58 = vld [vmem:[%s1977_s0 + $0x144] ss:$8 sps:$4 sm:$0xff]  }
  0x14   :  { %v1366_v57 = vld [vmem:[%s1977_s0 + $0x1b0] ss:$8 sps:$4 sm:$0xff]   ;;  %v1369_v59 = vld [vmem:[%s1977_s0 + $0x1c4] ss:$8 sps:$4 sm:$0xff]   ;;  %v1371_v60 = vld [vmem:[%s1977_s0 + $0x140] ss:$8 sps:$4 sm:$0xff]  }
  0x15   :  { %v1372_v61 = vld [vmem:[%s1977_s0 + $0x1c0] ss:$8 sps:$4 sm:$0xff]   ;;  %v1373_v62 = vld [vmem:[%s1977_s0 + $0x154] ss:$8 sps:$4 sm:$0xff]  }
  0x16   :  { %211 = vmatpush1.bf16.msra.mxu0 %v1464_v8  ;;  %421 = vmatpush1.bf16.msra.mxu1 %v1464_v8  ;;  %v1375_v63 = vld [vmem:[%s1977_s0 + $0x1d4] ss:$8 sps:$4 sm:$0xff]   ;;  %v1384_v5 = vld [vmem:[%s1977_s0 + $0x1e0] ss:$8 sps:$4 sm:$0xff]  }
  0x17   :  { %212 = vmatprep.subr.bf16.mxu0 %v1391_v0  ;;  %422 = vmatprep.subr.bf16.mxu1 %v1391_v0  ;;  %v1385_v6 = vld [vmem:[%s1977_s0 + $0x174] ss:$8 sps:$4 sm:$0xff]  }
  0x1a   :  { %213 = vmatpush1.bf16.msra.mxu0 %v1473_v9  ;;  %423 = vmatpush1.bf16.msra.mxu1 %v1473_v9 }
  0x1b   :  { %214 = vmatprep.subr.bf16.mxu0 %v1391_v0  ;;  %424 = vmatprep.subr.bf16.mxu1 %v1391_v0 }
  0x1e   :  { %215 = vmatpush1.bf16.msra.mxu0 %v1482_v10  ;;  %425 = vmatpush1.bf16.msra.mxu1 %v1482_v10 }
  0x1f   :  { %216 = vmatprep.subr.bf16.mxu0 %v1391_v0  ;;  %426 = vmatprep.subr.bf16.mxu1 %v1391_v0 }
  0x22   :  { %217 = vmatpush1.bf16.msra.mxu0 %v1491_v11  ;;  %427 = vmatpush1.bf16.msra.mxu1 %v1491_v11 }
  0x23   :  { %636 = vmatprep.subr.bf16.mxu0 %v1391_v0  ;;  %862 = vmatprep.subr.bf16.mxu1 %v1391_v0 }
  0x25   :  { %233 = vmatmul.mubr.bf16.vlgmr.msra.gmra.mrb[0].mxu0 %v1295_v12  ;;  %443 = vmatmul.mubr.bf16.vlgmr.msra.gmra.mrb[0].mxu1 %v1298_v13 }
  0x26   :  { %637 = vmatpush1.bf16.msra.mxu0 %v1286_v1  ;;  %863 = vmatpush1.bf16.msra.mxu1 %v1286_v1  ;;  %v1378_v1 = vld [vmem:[%s1977_s0 + $0x1d0] ss:$8 sps:$4 sm:$0xff]  }
  0x27   :  { %1125 = vmatprep.mubr.msk.bf16.mxu0 %vm175_vm0, %v1301_v14  ;;  %1165 = vmatprep.mubr.msk.bf16.mxu1 %vm175_vm0, %v1303_v15 }
  0x28   :  { %638 = vmatprep.subr.bf16.mxu0 %v1391_v0  ;;  %864 = vmatprep.subr.bf16.mxu1 %v1391_v0 }
  0x2a   :  { %639 = vmatpush1.bf16.msra.mxu0 %v1420_v2  ;;  %865 = vmatpush1.bf16.msra.mxu1 %v1420_v2  ;;  %v1379_v2 = vld [vmem:[%s1977_s0 + $0x164] ss:$8 sps:$4 sm:$0xff]  }
  0x2b   :  { %640 = vmatprep.subr.bf16.mxu0 %v1391_v0  ;;  %866 = vmatprep.subr.bf16.mxu1 %v1391_v0 }
  0x2d   :  { %241 = vmatmul.mubr.bf16.gmra.mrb[4].mxu0 %v1305_v16  ;;  %451 = vmatmul.mubr.bf16.gmra.mrb[4].mxu1 %v1306_v17 }
  0x2e   :  { %1126 = vmatprep.mubr.msk.bf16.mxu0 %vm175_vm0, %v1307_v18  ;;  %1166 = vmatprep.mubr.msk.bf16.mxu1 %vm175_vm0, %v1309_v19 }
  0x2f   :  { %641 = vmatpush1.bf16.msra.mxu0 %v1429_v3  ;;  %867 = vmatpush1.bf16.msra.mxu1 %v1429_v3  ;;  %v1381_v3 = vld [vmem:[%s1977_s0 + $0x1e4] ss:$8 sps:$4 sm:$0xff]  }
  0x30   :  { %642 = vmatprep.subr.bf16.mxu0 %v1391_v0  ;;  %868 = vmatprep.subr.bf16.mxu1 %v1391_v0 }
  0x33   :  { %643 = vmatpush1.bf16.msra.mxu0 %v1436_v4  ;;  %869 = vmatpush1.bf16.msra.mxu1 %v1436_v4  ;;  %v1383_v4 = vld [vmem:[%s1977_s0 + $0x160] ss:$8 sps:$4 sm:$0xff]  }
  0x34   :  { %644 = vmatprep.subr.bf16.mxu0 %v1391_v0  ;;  %870 = vmatprep.subr.bf16.mxu1 %v1391_v0 }
  0x35   :  { %249 = vmatmul.mubr.bf16.gmra.mrb[8].mxu0 %v1311_v20  ;;  %459 = vmatmul.mubr.bf16.gmra.mrb[8].mxu1 %v1312_v21 }
  0x36   :  { %1127 = vmatprep.mubr.msk.bf16.mxu0 %vm175_vm0, %v1313_v22  ;;  %1167 = vmatprep.mubr.msk.bf16.mxu1 %vm175_vm0, %v1315_v23 }
  0x37   :  { %645 = vmatpush1.bf16.msra.mxu0 %v1455_v7  ;;  %871 = vmatpush1.bf16.msra.mxu1 %v1455_v7  ;;  %v1387_v7 = vld [vmem:[%s1977_s0 + $0x1f4] ss:$8 sps:$4 sm:$0xff]  }
  0x38   :  { %646 = vmatprep.subr.bf16.mxu0 %v1391_v0  ;;  %872 = vmatprep.subr.bf16.mxu1 %v1391_v0 }
  0x3b   :  { %647 = vmatpush1.bf16.msra.mxu0 %v1464_v8  ;;  %873 = vmatpush1.bf16.msra.mxu1 %v1464_v8  ;;  %v1389_v8 = vld [vmem:[%s1977_s0 + $0x170] ss:$8 sps:$4 sm:$0xff]  }
  0x3c   :  { %648 = vmatprep.subr.bf16.mxu0 %v1391_v0  ;;  %874 = vmatprep.subr.bf16.mxu1 %v1391_v0 }
  0x3d   :  { %257 = vmatmul.mubr.bf16.gmra.mrb[12].mxu0 %v1317_v24  ;;  %467 = vmatmul.mubr.bf16.gmra.mrb[12].mxu1 %v1318_v25 }
  0x3e   :  { %1128 = vmatprep.mubr.msk.bf16.mxu0 %vm175_vm0, %v1319_v26  ;;  %1168 = vmatprep.mubr.msk.bf16.mxu1 %vm175_vm0, %v1321_v27 }
  0x3f   :  { %649 = vmatpush1.bf16.msra.mxu0 %v1473_v9  ;;  %875 = vmatpush1.bf16.msra.mxu1 %v1473_v9  ;;  %v1390_v9 = vld [vmem:[%s1977_s0 + $0x1f0] ss:$8 sps:$4 sm:$0xff]  }
  0x40   :  { %650 = vmatprep.subr.bf16.mxu0 %v1391_v0  ;;  %876 = vmatprep.subr.bf16.mxu1 %v1391_v0 }
  0x43   :  { %651 = vmatpush1.bf16.msra.mxu0 %v1482_v10  ;;  %877 = vmatpush1.bf16.msra.mxu1 %v1482_v10 }
  0x44   :  { %652 = vmatprep.subr.bf16.mxu0 %v1391_v0  ;;  %878 = vmatprep.subr.bf16.mxu1 %v1391_v0  ;;  %v1377_v0 = vld [vmem:[%s1977_s0 + $0x150] ss:$8 sps:$4 sm:$0xff]  }
  0x45   :  { %265 = vmatmul.mubr.bf16.gmra.mrb[16].mxu0 %v1323_v28  ;;  %475 = vmatmul.mubr.bf16.gmra.mrb[16].mxu1 %v1324_v29 }
  0x46   :  { %1129 = vmatprep.mubr.msk.bf16.mxu0 %vm175_vm0, %v1325_v30  ;;  %1169 = vmatprep.mubr.msk.bf16.mxu1 %vm175_vm0, %v1327_v31 }
  0x47   :  { %653 = vmatpush1.bf16.msra.mxu0 %v1491_v11  ;;  %879 = vmatpush1.bf16.msra.mxu1 %v1491_v11 }
  0x4d   :  { %273 = vmatmul.mubr.bf16.gmra.mrb[20].mxu0 %v1329_v32  ;;  %483 = vmatmul.mubr.bf16.gmra.mrb[20].mxu1 %v1330_v33 }
  0x4e   :  { %1130 = vmatprep.mubr.msk.bf16.mxu0 %vm175_vm0, %v1331_v34  ;;  %1170 = vmatprep.mubr.msk.bf16.mxu1 %vm175_vm0, %v1333_v35 }
  0x55   :  { %281 = vmatmul.mubr.bf16.gmra.mrb[24].mxu0 %v1335_v36  ;;  %491 = vmatmul.mubr.bf16.gmra.mrb[24].mxu1 %v1336_v37 }
  0x56   :  { %1131 = vmatprep.mubr.msk.bf16.mxu0 %vm175_vm0, %v1337_v38  ;;  %1171 = vmatprep.mubr.msk.bf16.mxu1 %vm175_vm0, %v1339_v39 }
  0x5d   :  { %289 = vmatmul.mubr.bf16.gmra.mrb[28].mxu0 %v1341_v40  ;;  %499 = vmatmul.mubr.bf16.gmra.mrb[28].mxu1 %v1342_v41 }
  0x5e   :  { %1204 = vmatprep.mubr.msk.bf16.mxu0 %vm175_vm0, %v1345_v42  ;;  %1244 = vmatprep.mubr.msk.bf16.mxu1 %vm175_vm0, %v1348_v43 }
  0x65   :  { %669 = vmatmul.mubr.bf16.vlgmr.msra.gmra.mrb[32].mxu0 %v1343_v44  ;;  %895 = vmatmul.mubr.bf16.vlgmr.msra.gmra.mrb[32].mxu1 %v1346_v45 }
  0x66   :  { %1205 = vmatprep.mubr.msk.bf16.mxu0 %vm175_vm0, %v1349_v46  ;;  %1245 = vmatprep.mubr.msk.bf16.mxu1 %vm175_vm0, %v1351_v47 }
  0x6d   :  { %677 = vmatmul.mubr.bf16.gmra.mrb[36].mxu0 %v1353_v48  ;;  %903 = vmatmul.mubr.bf16.gmra.mrb[36].mxu1 %v1354_v49 }
  0x6e   :  { %1206 = vmatprep.mubr.msk.bf16.mxu0 %vm175_vm0, %v1355_v50  ;;  %1246 = vmatprep.mubr.msk.bf16.mxu1 %vm175_vm0, %v1357_v51 }
  0x75   :  { %685 = vmatmul.mubr.bf16.gmra.mrb[40].mxu0 %v1359_v52  ;;  %911 = vmatmul.mubr.bf16.gmra.mrb[40].mxu1 %v1360_v53 }
  0x76   :  { %1207 = vmatprep.mubr.msk.bf16.mxu0 %vm175_vm0, %v1361_v54  ;;  %1247 = vmatprep.mubr.msk.bf16.mxu1 %vm175_vm0, %v1363_v55 }
  0x7d   :  { %693 = vmatmul.mubr.bf16.gmra.mrb[44].mxu0 %v1365_v56  ;;  %919 = vmatmul.mubr.bf16.gmra.mrb[44].mxu1 %v1366_v57 }
  0x7e   :  { %1208 = vmatprep.mubr.msk.bf16.mxu0 %vm175_vm0, %v1367_v58  ;;  %1248 = vmatprep.mubr.msk.bf16.mxu1 %vm175_vm0, %v1369_v59 }
  0x85   :  { %701 = vmatmul.mubr.bf16.gmra.mrb[48].mxu0 %v1371_v60  ;;  %927 = vmatmul.mubr.bf16.gmra.mrb[48].mxu1 %v1372_v61 }
  0x86   :  { %1209 = vmatprep.mubr.msk.bf16.mxu0 %vm175_vm0, %v1373_v62  ;;  %1249 = vmatprep.mubr.msk.bf16.mxu1 %vm175_vm0, %v1375_v63 }
  0x8d   :  { %709 = vmatmul.mubr.bf16.gmra.mrb[52].mxu0 %v1377_v0  ;;  %935 = vmatmul.mubr.bf16.gmra.mrb[52].mxu1 %v1378_v1 }
  0x8e   :  { %1210 = vmatprep.mubr.msk.bf16.mxu0 %vm175_vm0, %v1379_v2  ;;  %1250 = vmatprep.mubr.msk.bf16.mxu1 %vm175_vm0, %v1381_v3 }
  0x95   :  { %717 = vmatmul.mubr.bf16.gmra.mrb[56].mxu0 %v1383_v4  ;;  %943 = vmatmul.mubr.bf16.gmra.mrb[56].mxu1 %v1384_v5 }
  0x96   :  { %1211 = vmatprep.mubr.msk.bf16.mxu0 %vm175_vm0, %v1385_v6  ;;  %1251 = vmatprep.mubr.msk.bf16.mxu1 %vm175_vm0, %v1387_v7 }
  0x9d   :  { %725 = vmatmul.mubr.bf16.gmra.mrb[60].mxu0 %v1389_v8  ;;  %951 = vmatmul.mubr.bf16.gmra.mrb[60].mxu1 %v1390_v9 }
  0xf8   :  { %v1747_v10 = vpop.f32.mrb[0].mxu0  ;;  %v1749_v11 = vpop.f32.mrb[0].mxu1 }
  0xf9   :  { %v507_v12 = vmax.f32 %v1747_v10, %v1749_v11  ;;  %v236_v13 = vpop.f32.mrb[1].mxu0  ;;  %v446_v14 = vpop.f32.mrb[1].mxu1 }
  0xfa   :  { %v1753_v15 = vpop.f32.mrb[2].mxu0  ;;  %v1755_v16 = vpop.f32.mrb[2].mxu1 }
  0xfb   :  { %v508_v17 = vmax.f32 %v1753_v15, %v1755_v16  ;;  %v239_v18 = vpop.f32.mrb[3].mxu0  ;;  %v449_v19 = vpop.f32.mrb[3].mxu1 }
 0x100   :  { %v1759_v20 = vpop.f32.mrb[4].mxu0  ;;  %v1761_v21 = vpop.f32.mrb[4].mxu1 }
 0x101   :  { %v509_v22 = vmax.f32 %v1759_v20, %v1761_v21  ;;  %v244_v23 = vpop.f32.mrb[5].mxu0  ;;  %v454_v24 = vpop.f32.mrb[5].mxu1 }
 0x102   :  { %v1765_v25 = vpop.f32.mrb[6].mxu0  ;;  %v1767_v26 = vpop.f32.mrb[6].mxu1 }
 0x103   :  { %v510_v27 = vmax.f32 %v1765_v25, %v1767_v26  ;;  %v247_v28 = vpop.f32.mrb[7].mxu0  ;;  %v457_v29 = vpop.f32.mrb[7].mxu1 }
 0x108   :  { %v1771_v30 = vpop.f32.mrb[8].mxu0  ;;  %v1773_v31 = vpop.f32.mrb[8].mxu1 }
 0x109   :  { %v511_v32 = vmax.f32 %v1771_v30, %v1773_v31  ;;  %v252_v33 = vpop.f32.mrb[9].mxu0  ;;  %v462_v34 = vpop.f32.mrb[9].mxu1 }
 0x10a   :  { %v1777_v35 = vpop.f32.mrb[10].mxu0  ;;  %v1779_v36 = vpop.f32.mrb[10].mxu1 }
 0x10b   :  { %v512_v37 = vmax.f32 %v1777_v35, %v1779_v36  ;;  %v255_v38 = vpop.f32.mrb[11].mxu0  ;;  %v465_v39 = vpop.f32.mrb[11].mxu1 }
 0x110   :  { %v1783_v40 = vpop.f32.mrb[12].mxu0  ;;  %v1785_v41 = vpop.f32.mrb[12].mxu1 }
 0x111   :  { %v513_v42 = vmax.f32 %v1783_v40, %v1785_v41  ;;  %v260_v43 = vpop.f32.mrb[13].mxu0  ;;  %v470_v44 = vpop.f32.mrb[13].mxu1 }
 0x112   :  { %v1789_v45 = vpop.f32.mrb[14].mxu0  ;;  %v1791_v46 = vpop.f32.mrb[14].mxu1 }
 0x113   :  { %v514_v47 = vmax.f32 %v1789_v45, %v1791_v46  ;;  %v263_v48 = vpop.f32.mrb[15].mxu0  ;;  %v473_v49 = vpop.f32.mrb[15].mxu1 }
 0x118   :  { %v1795_v50 = vpop.f32.mrb[16].mxu0  ;;  %v1797_v51 = vpop.f32.mrb[16].mxu1 }
 0x119   :  { %v515_v52 = vmax.f32 %v1795_v50, %v1797_v51  ;;  %v268_v53 = vpop.f32.mrb[17].mxu0  ;;  %v478_v54 = vpop.f32.mrb[17].mxu1 }
 0x11a   :  { %v1801_v55 = vpop.f32.mrb[18].mxu0  ;;  %v1803_v56 = vpop.f32.mrb[18].mxu1 }
 0x11b   :  { %v516_v57 = vmax.f32 %v1801_v55, %v1803_v56  ;;  %v271_v58 = vpop.f32.mrb[19].mxu0  ;;  %v481_v59 = vpop.f32.mrb[19].mxu1 }
 0x120   :  { %v1807_v60 = vpop.f32.mrb[20].mxu0  ;;  %v1809_v61 = vpop.f32.mrb[20].mxu1 }
 0x121   :  { %v517_v62 = vmax.f32 %v1807_v60, %v1809_v61  ;;  %v276_v63 = vpop.f32.mrb[21].mxu0  ;;  %v486_v0 = vpop.f32.mrb[21].mxu1 }
 0x122   :  { %v1813_v1 = vpop.f32.mrb[22].mxu0  ;;  %v1815_v2 = vpop.f32.mrb[22].mxu1  ;;  %v1849_v0 = vld [vmem:[%s1978_s2] ss:$0 sm:$0xff] }
 0x123   :  { %v518_v3 = vmax.f32 %v1813_v1, %v1815_v2  ;;  %v279_v4 = vpop.f32.mrb[23].mxu0  ;;  %v489_v5 = vpop.f32.mrb[23].mxu1 }
 0x128   :  { %v1819_v6 = vpop.f32.mrb[24].mxu0  ;;  %v1821_v7 = vpop.f32.mrb[24].mxu1 }
 0x129   :  { %v519_v8 = vmax.f32 %v1819_v6, %v1821_v7  ;;  %v284_v9 = vpop.f32.mrb[25].mxu0  ;;  %v494_v13 = vpop.f32.mrb[25].mxu1 }
 0x12a   :  { %v1825_v14 = vpop.f32.mrb[26].mxu0  ;;  %v1827_v18 = vpop.f32.mrb[26].mxu1 }
 0x12b   :  { %v520_v19 = vmax.f32 %v1825_v14, %v1827_v18  ;;  %v287_v23 = vpop.f32.mrb[27].mxu0  ;;  %v497_v24 = vpop.f32.mrb[27].mxu1 }
 0x130   :  { %v1831_v28 = vpop.f32.mrb[28].mxu0  ;;  %v1833_v29 = vpop.f32.mrb[28].mxu1 }
 0x131   :  { %v521_v33 = vmax.f32 %v1831_v28, %v1833_v29  ;;  %v292_v34 = vpop.f32.mrb[29].mxu0  ;;  %v502_v38 = vpop.f32.mrb[29].mxu1 }
 0x132   :  { %v1837_v39 = vpop.f32.mrb[30].mxu0  ;;  %v1839_v43 = vpop.f32.mrb[30].mxu1 }
 0x133   :  { %v522_v44 = vmax.f32 %v1837_v39, %v1839_v43  ;;  %v295_v48 = vpop.f32.mrb[31].mxu0  ;;  %v505_v49 = vpop.f32.mrb[31].mxu1 }
 0x138   :  { %v670_v53 = vpop.f32.mrb[32].mxu0  ;;  %v896_v54 = vpop.f32.mrb[32].mxu1 }
 0x139   :  { %v733_v58 = vmax.f32 %v507_v12, %v670_v53  ;;  %v672_v59 = vpop.f32.mrb[33].mxu0  ;;  %v898_v63 = vpop.f32.mrb[33].mxu1 }
 0x13a   :  { %v673_v4 = vpop.f32.mrb[34].mxu0  ;;  %v899_v5 = vpop.f32.mrb[34].mxu1 }
 0x13b   :  { %v959_v9 = vmax.f32 %v733_v58, %v896_v54  ;;  %v734_v13 = vmax.f32 %v508_v17, %v673_v4  ;;  %v675_v23 = vpop.f32.mrb[35].mxu0  ;;  %v901_v24 = vpop.f32.mrb[35].mxu1 }
 0x13d   :  { %v982_v34 = vadd.f32 %v1849_v0, %v959_v9  ;;  %v960_v10 = vmax.f32 %v734_v13, %v899_v5 }
 0x13f   :  { %v998_v11 = vmax.f32 %v982_v34, 0.0  ;;  %v983_v12 = vadd.f32 %v1849_v0, %v960_v10 }
 0x140   :  { %v678_v38 = vpop.f32.mrb[36].mxu0  ;;  %v904_v48 = vpop.f32.mrb[36].mxu1 }
 0x141   :  { %v1269_v49 = vpack.c.bf16 %v998_v11, %v998_v11  ;;  %v999_v53 = vmax.f32 %v983_v12, 0.0  ;;  %v735_v54 = vmax.f32 %v509_v22, %v678_v38  ;;  %v680_v58 = vpop.f32.mrb[37].mxu0  ;;  %v906_v15 = vpop.f32.mrb[37].mxu1 }
 0x142   :  { %v681_v16 = vpop.f32.mrb[38].mxu0  ;;  %v907_v17 = vpop.f32.mrb[38].mxu1 }
 0x143   :  { %1079 = vst.msk [vmem:[%s1979_s3] sm:$0xf] %vm1078_vm1, %v1269_v49  ;;  %v1270_v59 = vpack.c.bf16 %v999_v53, %v999_v53  ;;  %v961_v63 = vmax.f32 %v735_v54, %v904_v48  ;;  %v736_v4 = vmax.f32 %v510_v27, %v681_v16  ;;  %v683_v5 = vpop.f32.mrb[39].mxu0  ;;  %v909_v9 = vpop.f32.mrb[39].mxu1 }
 0x145   :  { %1080 = vst.msk [vmem:[%s1979_s3 + $0x4] sm:$0xf] %vm1078_vm1, %v1270_v59  ;;  %v984_v20 = vadd.f32 %v1849_v0, %v961_v63  ;;  %v962_v21 = vmax.f32 %v736_v4, %v907_v17 }
 0x147   :  { %v1000_v22 = vmax.f32 %v984_v20, 0.0  ;;  %v985_v13 = vadd.f32 %v1849_v0, %v962_v21 }
 0x148   :  { %v686_v23 = vpop.f32.mrb[40].mxu0  ;;  %v912_v24 = vpop.f32.mrb[40].mxu1 }
 0x149   :  { %v1271_v34 = vpack.c.bf16 %v1000_v22, %v1000_v22  ;;  %v1001_v10 = vmax.f32 %v985_v13, 0.0  ;;  %v737_v25 = vmax.f32 %v511_v32, %v686_v23  ;;  %v688_v26 = vpop.f32.mrb[41].mxu0  ;;  %v914_v27 = vpop.f32.mrb[41].mxu1 }
 0x14a   :  { %v689_v11 = vpop.f32.mrb[42].mxu0  ;;  %v915_v12 = vpop.f32.mrb[42].mxu1 }
 0x14b   :  { %1081 = vst.msk [vmem:[%s1979_s3 + $0x8] sm:$0xf] %vm1078_vm1, %v1271_v34  ;;  %v1272_v38 = vpack.c.bf16 %v1001_v10, %v1001_v10  ;;  %v963_v48 = vmax.f32 %v737_v25, %v912_v24  ;;  %v738_v49 = vmax.f32 %v512_v37, %v689_v11  ;;  %v691_v53 = vpop.f32.mrb[43].mxu0  ;;  %v917_v54 = vpop.f32.mrb[43].mxu1 }
 0x14d   :  { %1082 = vst.msk [vmem:[%s1979_s3 + $0xc] sm:$0xf] %vm1078_vm1, %v1272_v38  ;;  %v986_v30 = vadd.f32 %v1849_v0, %v963_v48  ;;  %v964_v31 = vmax.f32 %v738_v49, %v915_v12 }
 0x14f   :  { %v1002_v32 = vmax.f32 %v986_v30, 0.0  ;;  %v987_v58 = vadd.f32 %v1849_v0, %v964_v31 }
 0x150   :  { %v694_v15 = vpop.f32.mrb[44].mxu0  ;;  %v920_v16 = vpop.f32.mrb[44].mxu1 }
 0x151   :  { %v1273_v17 = vpack.c.bf16 %v1002_v32, %v1002_v32  ;;  %v1003_v59 = vmax.f32 %v987_v58, 0.0  ;;  %v739_v35 = vmax.f32 %v513_v42, %v694_v15  ;;  %v696_v36 = vpop.f32.mrb[45].mxu0  ;;  %v922_v37 = vpop.f32.mrb[45].mxu1 }
 0x152   :  { %v697_v63 = vpop.f32.mrb[46].mxu0  ;;  %v923_v4 = vpop.f32.mrb[46].mxu1 }
 0x153   :  { %1083 = vst.msk [vmem:[%s1979_s3 + $0x10] sm:$0xf] %vm1078_vm1, %v1273_v17  ;;  %v1274_v5 = vpack.c.bf16 %v1003_v59, %v1003_v59  ;;  %v965_v9 = vmax.f32 %v739_v35, %v920_v16  ;;  %v740_v20 = vmax.f32 %v514_v47, %v697_v63  ;;  %v699_v21 = vpop.f32.mrb[47].mxu0  ;;  %v925_v22 = vpop.f32.mrb[47].mxu1 }
 0x155   :  { %1084 = vst.msk [vmem:[%s1979_s3 + $0x14] sm:$0xf] %vm1078_vm1, %v1274_v5  ;;  %v988_v40 = vadd.f32 %v1849_v0, %v965_v9  ;;  %v966_v41 = vmax.f32 %v740_v20, %v923_v4 }
 0x157   :  { %v1004_v42 = vmax.f32 %v988_v40, 0.0  ;;  %v989_v13 = vadd.f32 %v1849_v0, %v966_v41 }
 0x158   :  { %v702_v23 = vpop.f32.mrb[48].mxu0  ;;  %v928_v24 = vpop.f32.mrb[48].mxu1 }
 0x159   :  { %v1275_v34 = vpack.c.bf16 %v1004_v42, %v1004_v42  ;;  %v1005_v10 = vmax.f32 %v989_v13, 0.0  ;;  %v741_v45 = vmax.f32 %v515_v52, %v702_v23  ;;  %v704_v46 = vpop.f32.mrb[49].mxu0  ;;  %v930_v47 = vpop.f32.mrb[49].mxu1 }
 0x15a   :  { %v705_v25 = vpop.f32.mrb[50].mxu0  ;;  %v931_v26 = vpop.f32.mrb[50].mxu1 }
 0x15b   :  { %1085 = vst.msk [vmem:[%s1979_s3 + $0x18] sm:$0xf] %vm1078_vm1, %v1275_v34  ;;  %v1276_v27 = vpack.c.bf16 %v1005_v10, %v1005_v10  ;;  %v967_v11 = vmax.f32 %v741_v45, %v928_v24  ;;  %v742_v12 = vmax.f32 %v516_v57, %v705_v25  ;;  %v707_v38 = vpop.f32.mrb[51].mxu0  ;;  %v933_v48 = vpop.f32.mrb[51].mxu1 }
 0x15d   :  { %1086 = vst.msk [vmem:[%s1979_s3 + $0x1c] sm:$0xf] %vm1078_vm1, %v1276_v27  ;;  %v990_v50 = vadd.f32 %v1849_v0, %v967_v11  ;;  %v968_v51 = vmax.f32 %v742_v12, %v931_v26 }
 0x15f   :  { %v1006_v52 = vmax.f32 %v990_v50, 0.0  ;;  %v991_v49 = vadd.f32 %v1849_v0, %v968_v51 }
 0x160   :  { %v710_v53 = vpop.f32.mrb[52].mxu0  ;;  %v936_v54 = vpop.f32.mrb[52].mxu1 }
 0x161   :  { %v1277_v30 = vpack.c.bf16 %v1006_v52, %v1006_v52  ;;  %v1007_v31 = vmax.f32 %v991_v49, 0.0  ;;  %v743_v55 = vmax.f32 %v517_v62, %v710_v53  ;;  %v712_v56 = vpop.f32.mrb[53].mxu0  ;;  %v938_v57 = vpop.f32.mrb[53].mxu1 }
 0x162   :  { %v713_v32 = vpop.f32.mrb[54].mxu0  ;;  %v939_v58 = vpop.f32.mrb[54].mxu1 }
 0x163   :  { %1087 = vst.msk [vmem:[%s1979_s3 + $0x20] sm:$0xf] %vm1078_vm1, %v1277_v30  ;;  %v1278_v15 = vpack.c.bf16 %v1007_v31, %v1007_v31  ;;  %v969_v16 = vmax.f32 %v743_v55, %v936_v54  ;;  %v744_v17 = vmax.f32 %v518_v3, %v713_v32  ;;  %v715_v59 = vpop.f32.mrb[55].mxu0  ;;  %v941_v35 = vpop.f32.mrb[55].mxu1 }
 0x165   :  { %1088 = vst.msk [vmem:[%s1979_s3 + $0x24] sm:$0xf] %vm1078_vm1, %v1278_v15  ;;  %v992_v60 = vadd.f32 %v1849_v0, %v969_v16  ;;  %v970_v61 = vmax.f32 %v744_v17, %v939_v58 }
 0x167   :  { %v1008_v62 = vmax.f32 %v992_v60, 0.0  ;;  %v993_v36 = vadd.f32 %v1849_v0, %v970_v61 }
 0x168   :  { %v718_v37 = vpop.f32.mrb[56].mxu0  ;;  %v944_v63 = vpop.f32.mrb[56].mxu1 }
 0x169   :  { %v1279_v4 = vpack.c.bf16 %v1008_v62, %v1008_v62  ;;  %v1009_v5 = vmax.f32 %v993_v36, 0.0  ;;  %v745_v1 = vmax.f32 %v519_v8, %v718_v37  ;;  %v720_v2 = vpop.f32.mrb[57].mxu0  ;;  %v946_v3 = vpop.f32.mrb[57].mxu1 }
 0x16a   :  { %v721_v9 = vpop.f32.mrb[58].mxu0  ;;  %v947_v20 = vpop.f32.mrb[58].mxu1 }
 0x16b   :  { %1089 = vst.msk [vmem:[%s1979_s3 + $0x28] sm:$0xf] %vm1078_vm1, %v1279_v4  ;;  %v1280_v21 = vpack.c.bf16 %v1009_v5, %v1009_v5  ;;  %v971_v22 = vmax.f32 %v745_v1, %v944_v63  ;;  %v746_v40 = vmax.f32 %v520_v19, %v721_v9  ;;  %v723_v41 = vpop.f32.mrb[59].mxu0  ;;  %v949_v42 = vpop.f32.mrb[59].mxu1 }
 0x16d   :  { %1090 = vst.msk [vmem:[%s1979_s3 + $0x2c] sm:$0xf] %vm1078_vm1, %v1280_v21  ;;  %v994_v6 = vadd.f32 %v1849_v0, %v971_v22  ;;  %v972_v7 = vmax.f32 %v746_v40, %v947_v20 }
 0x16f   :  { %v1010_v8 = vmax.f32 %v994_v6, 0.0  ;;  %v995_v13 = vadd.f32 %v1849_v0, %v972_v7 }
 0x170   :  { %v726_v23 = vpop.f32.mrb[60].mxu0  ;;  %v952_v24 = vpop.f32.mrb[60].mxu1 }
 0x171   :  { %v1281_v34 = vpack.c.bf16 %v1010_v8, %v1010_v8  ;;  %v1011_v10 = vmax.f32 %v995_v13, 0.0  ;;  %v747_v14 = vmax.f32 %v521_v33, %v726_v23  ;;  %v728_v18 = vpop.f32.mrb[61].mxu0  ;;  %v954_v19 = vpop.f32.mrb[61].mxu1 }
 0x172   :  { %v729_v45 = vpop.f32.mrb[62].mxu0  ;;  %v955_v46 = vpop.f32.mrb[62].mxu1 }
 0x173   :  { %1091 = vst.msk [vmem:[%s1979_s3 + $0x30] sm:$0xf] %vm1078_vm1, %v1281_v34  ;;  %v1282_v47 = vpack.c.bf16 %v1011_v10, %v1011_v10  ;;  %v973_v25 = vmax.f32 %v747_v14, %v952_v24  ;;  %v748_v26 = vmax.f32 %v522_v44, %v729_v45  ;;  %v731_v27 = vpop.f32.mrb[63].mxu0  ;;  %v957_v11 = vpop.f32.mrb[63].mxu1 }
 0x175   :  { %1092 = vst.msk [vmem:[%s1979_s3 + $0x34] sm:$0xf] %vm1078_vm1, %v1282_v47  ;;  %v996_v28 = vadd.f32 %v1849_v0, %v973_v25  ;;  %v974_v29 = vmax.f32 %v748_v26, %v955_v46 }
 0x177   :  { %v1012_v33 = vmax.f32 %v996_v28, 0.0  ;;  %v997_v12 = vadd.f32 %v1849_v0, %v974_v29 }
 0x179   :  { %v1283_v38 = vpack.c.bf16 %v1012_v33, %v1012_v33  ;;  %v1013_v48 = vmax.f32 %v997_v12, 0.0 }
 0x17b   :  { %1093 = vst.msk [vmem:[%s1979_s3 + $0x38] sm:$0xf] %vm1078_vm1, %v1283_v38  ;;  %v1284_v39 = vpack.c.bf16 %v1013_v48, %v1013_v48 }
 0x17d   :  { %1094 = vst.msk [vmem:[%s1979_s3 + $0x3c] sm:$0xf] %vm1078_vm1, %v1284_v39 }

// kernel: net_forward.9
= control target key start
LH: loop header
LB: loop body
LE: loop exit
PB: predicated region body
PF: predicated region fallthrough
CT: control target
= control target key end

     0   :  { %vm197_vm0 = vcmask 261120   ;;  %vm774_vm1 = vcmask 519168   ;;  %s1365_s1 = inlined_call_operand.vmem [shape: bf16[288,64], index: 1, kind: input, shape index: {}]   ;;  %s1366_s0 = inlined_call_operand.vmem [shape: bf16[4,32,288], index: 0, kind: input, shape index: {}]   ;;  %s1367_s2 = inlined_call_operand.vmem [shape: f32[1,64], index: 2, kind: input, shape index: {}]   ;;  %s1368_s3 = inlined_call_operand.vmem [shape: bf16[32,64], index: 3, kind: output, shape index: {}]  }
   0x1   :  { %v1099_v0 = vld [vmem:[%s1365_s1 + $0x40] sm:$0xff]   ;;  %v1116_v3 = vld [vmem:[%s1365_s1 + $0x48] sm:$0xff]   ;;  %v1135_v6 = vld [vmem:[%s1365_s1 + $0x50] sm:$0xff]  }
   0x2   :  { %v1104_v1 = vld [vmem:[%s1365_s1 + $0x80] sm:$0xff]   ;;  %866 = vmatprep.subr.bf16.mxu0 %v1099_v0  ;;  %v1123_v4 = vld [vmem:[%s1365_s1 + $0x88] sm:$0xff]   ;;  %v1145_v8 = vld [vmem:[%s1365_s1 + $0x10] sm:$0xff]  }
   0x3   :  { %v1110_v2 = vld [vmem:[%s1365_s1] sm:$0xff]   ;;  %994 = vmatprep.subr.bf16.mxu1 %v1104_v1  ;;  %v1129_v5 = vld [vmem:[%s1365_s1 + $0x8] sm:$0xff]   ;;  %v1156_v10 = vld [vmem:[%s1365_s1 + $0x58] sm:$0xff]  }
   0x4   :  { %867 = vmatpush3.bf16.msra.mxu0 %v1110_v2  ;;  %995 = vmatpush3.bf16.msra.mxu1 %v1104_v1  ;;  %v1033_v7 = vld [vmem:[%s1366_s0 + $0x8] ss:$12 sps:$4 sm:$0xff]   ;;  %v1035_v9 = vld [vmem:[%s1366_s0 + $0x20] ss:$12 sps:$4 sm:$0xff]   ;;  %v1164_v11 = vld [vmem:[%s1365_s1 + $0x18] sm:$0xff]  }
   0x5   :  { %868 = vmatprep.subr.bf16.mxu0 %v1116_v3  ;;  %996 = vmatprep.subr.bf16.mxu1 %v1123_v4  ;;  %v1171_v12 = vld [vmem:[%s1365_s1 + $0x60] sm:$0xff]   ;;  %v1185_v14 = vld [vmem:[%s1365_s1 + $0x68] sm:$0xff]   ;;  %v1197_v16 = vld [vmem:[%s1365_s1 + $0x70] sm:$0xff]  }
   0x6   :  { %998 = vmatprep.mubr.msk.bf16.mxu1 %vm197_vm0, %v1033_v7  ;;  %v1178_v13 = vld [vmem:[%s1365_s1 + $0x20] sm:$0xff]   ;;  %v1190_v15 = vld [vmem:[%s1365_s1 + $0x28] sm:$0xff]   ;;  %v1212_v19 = vld [vmem:[%s1365_s1 + $0x30] sm:$0xff]  }
   0x7   :  { %v1048_v17 = vld [vmem:[%s1366_s0 + $0x4] ss:$12 sps:$4 sm:$0xff]   ;;  %v1053_v18 = vld [vmem:[%s1366_s0 + $0x34] ss:$12 sps:$4 sm:$0xff]   ;;  %v1219_v20 = vld [vmem:[%s1365_s1 + $0x78] sm:$0xff]  }
   0x8   :  { %869 = vmatpush3.bf16.msra.mxu0 %v1129_v5  ;;  %997 = vmatpush3.bf16.msra.mxu1 %v1123_v4  ;;  %v1226_v21 = vld [vmem:[%s1365_s1 + $0x38] sm:$0xff]   ;;  %v1046_v22 = vld [vmem:[%s1366_s0] ss:$12 sps:$4 sm:$0xff]   ;;  %v1058_v28 = vld [vmem:[%s1366_s0 + $0x48] ss:$12 sps:$4 sm:$0xff]  }
   0x9   :  { %870 = vmatprep.subr.bf16.mxu0 %v1135_v6  ;;  %898 = vmatprep.subr.bf16.mxu1 %v1099_v0  ;;  %v1049_v23 = vld [vmem:[%s1366_s0 + $0x1c] ss:$12 sps:$4 sm:$0xff]   ;;  %v1054_v25 = vld [vmem:[%s1366_s0 + $0x18] ss:$12 sps:$4 sm:$0xff]   ;;  %v1061_v32 = vld [vmem:[%s1366_s0 + $0x80] ss:$12 sps:$4 sm:$0xff]  }
   0xa   :  { %236 = vmatprep.mubr.bf16.mxu0 %v1048_v17  ;;  %v1051_v24 = vld [vmem:[%s1366_s0 + $0x30] ss:$12 sps:$4 sm:$0xff]   ;;  %v1055_v26 = vld [vmem:[%s1366_s0 + $0x4c] ss:$12 sps:$4 sm:$0xff]   ;;  %v1060_v30 = vld [vmem:[%s1366_s0 + $0x68] ss:$12 sps:$4 sm:$0xff]  }
   0xb   :  { %999 = vmatmul.mubr.msk.bf16.vlgmr.msra.gmra.mrb[0].mxu1 %vm197_vm0, %v1035_v9  ;;  %v1057_v27 = vld [vmem:[%s1366_s0 + $0x38] ss:$12 sps:$4 sm:$0xff]   ;;  %v1059_v29 = vld [vmem:[%s1366_s0 + $0x50] ss:$12 sps:$4 sm:$0xff]   ;;  %v1070_v33 = vld [vmem:[%s1366_s0 + $0x94] ss:$12 sps:$4 sm:$0xff]  }
   0xc   :  { %871 = vmatpush3.bf16.msra.mxu0 %v1145_v8  ;;  %899 = vmatpush3.bf16.msra.mxu1 %v1110_v2  ;;  %v1064_v31 = vld [vmem:[%s1366_s0 + $0x64] ss:$12 sps:$4 sm:$0xff]   ;;  %v1062_v34 = vld [vmem:[%s1366_s0 + $0x60] ss:$12 sps:$4 sm:$0xff]   ;;  %v1065_v35 = vld [vmem:[%s1366_s0 + $0x7c] ss:$12 sps:$4 sm:$0xff]  }
   0xd   :  { %872 = vmatprep.subr.bf16.mxu0 %v1156_v10  ;;  %900 = vmatprep.subr.bf16.mxu1 %v1116_v3  ;;  %v1067_v36 = vld [vmem:[%s1366_s0 + $0x78] ss:$12 sps:$4 sm:$0xff]   ;;  %v1068_v38 = vld [vmem:[%s1366_s0 + $0x90] ss:$12 sps:$4 sm:$0xff]   ;;  %v1075_v41 = vld [vmem:[%s1366_s0 + $0xa8] ss:$12 sps:$4 sm:$0xff]  }
   0xe   :  { %379 = vmatprep.mubr.bf16.mxu1 %v1053_v18  ;;  %v1071_v37 = vld [vmem:[%s1366_s0 + $0x98] ss:$12 sps:$4 sm:$0xff]   ;;  %v1072_v39 = vld [vmem:[%s1366_s0 + $0xb0] ss:$12 sps:$4 sm:$0xff]  }
   0xf   :  { %v1073_v40 = vld [vmem:[%s1366_s0 + $0xac] ss:$12 sps:$4 sm:$0xff]  }
  0x10   :  { %873 = vmatpush3.bf16.msra.mxu0 %v1164_v11  ;;  %901 = vmatpush3.bf16.msra.mxu1 %v1129_v5 }
  0x11   :  { %874 = vmatprep.subr.bf16.mxu0 %v1171_v12  ;;  %902 = vmatprep.subr.bf16.mxu1 %v1135_v6 }
  0x14   :  { %875 = vmatpush3.bf16.msra.mxu0 %v1178_v13  ;;  %903 = vmatpush3.bf16.msra.mxu1 %v1145_v8 }
  0x15   :  { %876 = vmatprep.subr.bf16.mxu0 %v1185_v14  ;;  %904 = vmatprep.subr.bf16.mxu1 %v1156_v10 }
  0x18   :  { %877 = vmatpush3.bf16.msra.mxu0 %v1190_v15  ;;  %905 = vmatpush3.bf16.msra.mxu1 %v1164_v11 }
  0x19   :  { %878 = vmatprep.subr.bf16.mxu0 %v1197_v16  ;;  %906 = vmatprep.subr.bf16.mxu1 %v1171_v12 }
  0x1c   :  { %879 = vmatpush3.bf16.msra.mxu0 %v1212_v19  ;;  %907 = vmatpush3.bf16.msra.mxu1 %v1178_v13 }
  0x1d   :  { %880 = vmatprep.subr.bf16.mxu0 %v1219_v20  ;;  %908 = vmatprep.subr.bf16.mxu1 %v1185_v14 }
  0x20   :  { %881 = vmatpush3.bf16.msra.mxu0 %v1226_v21  ;;  %909 = vmatpush3.bf16.msra.mxu1 %v1190_v15 }
  0x21   :  { %910 = vmatprep.subr.bf16.mxu1 %v1197_v16  ;;  %1002 = vmatprep.subr.bf16.mxu0 %v1104_v1 }
  0x23   :  { %237 = vmatmul.mubr.bf16.vlgmr.msra.gmra.mrb[0].mxu0 %v1046_v22 }
  0x24   :  { %911 = vmatpush3.bf16.msra.mxu1 %v1212_v19  ;;  %1003 = vmatpush3.bf16.msra.mxu0 %v1104_v1 }
  0x25   :  { %912 = vmatprep.subr.bf16.mxu1 %v1219_v20  ;;  %244 = vmatprep.mubr.bf16.mxu0 %v1049_v23 }
  0x26   :  { %1004 = vmatprep.subr.bf16.mxu0 %v1123_v4 }
  0x28   :  { %913 = vmatpush3.bf16.msra.mxu1 %v1226_v21  ;;  %1005 = vmatpush3.bf16.msra.mxu0 %v1123_v4 }
  0x29   :  { %930 = vmatprep.subr.bf16.mxu1 %v1099_v0  ;;  %1010 = vmatprep.subr.bf16.mxu0 %v1104_v1 }
  0x2b   :  { %245 = vmatmul.mubr.bf16.gmra.mrb[4].mxu0 %v1054_v25  ;;  %380 = vmatmul.mubr.bf16.vlgmr.msra.gmra.mrb[4].mxu1 %v1051_v24 }
  0x2c   :  { %931 = vmatpush3.bf16.msra.mxu1 %v1110_v2  ;;  %387 = vmatprep.mubr.bf16.mxu1 %v1055_v26 }
  0x2d   :  { %932 = vmatprep.subr.bf16.mxu1 %v1116_v3  ;;  %1006 = vmatprep.mubr.msk.bf16.mxu0 %vm197_vm0, %v1057_v27 }
  0x30   :  { %933 = vmatpush3.bf16.msra.mxu1 %v1129_v5 }
  0x31   :  { %934 = vmatprep.subr.bf16.mxu1 %v1135_v6 }
  0x33   :  { %388 = vmatmul.mubr.bf16.gmra.mrb[8].mxu1 %v1058_v28  ;;  %1007 = vmatmul.mubr.msk.bf16.vlgmr.msra.gmra.mrb[8].mxu0 %vm197_vm0, %v1059_v29 }
  0x34   :  { %1011 = vmatpush3.bf16.msra.mxu0 %v1104_v1  ;;  %935 = vmatpush3.bf16.msra.mxu1 %v1145_v8 }
  0x35   :  { %1012 = vmatprep.subr.bf16.mxu0 %v1123_v4  ;;  %936 = vmatprep.subr.bf16.mxu1 %v1156_v10 }
  0x36   :  { %1014 = vmatprep.mubr.msk.bf16.mxu0 %vm197_vm0, %v1060_v30  ;;  %526 = vmatprep.mubr.bf16.mxu1 %v1064_v31 }
  0x38   :  { %1013 = vmatpush3.bf16.msra.mxu0 %v1123_v4  ;;  %937 = vmatpush3.bf16.msra.mxu1 %v1164_v11 }
  0x39   :  { %962 = vmatprep.subr.bf16.mxu0 %v1099_v0  ;;  %938 = vmatprep.subr.bf16.mxu1 %v1171_v12 }
  0x3b   :  { %1015 = vmatmul.mubr.msk.bf16.vlgmr.msra.gmra.mrb[12].mxu0 %vm197_vm0, %v1061_v32 }
  0x3c   :  { %963 = vmatpush3.bf16.msra.mxu0 %v1110_v2  ;;  %939 = vmatpush3.bf16.msra.mxu1 %v1178_v13 }
  0x3d   :  { %964 = vmatprep.subr.bf16.mxu0 %v1116_v3  ;;  %940 = vmatprep.subr.bf16.mxu1 %v1185_v14 }
  0x3e   :  { %673 = vmatprep.mubr.bf16.mxu0 %v1070_v33 }
  0x40   :  { %965 = vmatpush3.bf16.msra.mxu0 %v1129_v5  ;;  %941 = vmatpush3.bf16.msra.mxu1 %v1190_v15 }
  0x41   :  { %966 = vmatprep.subr.bf16.mxu0 %v1135_v6  ;;  %942 = vmatprep.subr.bf16.mxu1 %v1197_v16 }
  0x44   :  { %967 = vmatpush3.bf16.msra.mxu0 %v1145_v8  ;;  %943 = vmatpush3.bf16.msra.mxu1 %v1212_v19 }
  0x45   :  { %968 = vmatprep.subr.bf16.mxu0 %v1156_v10  ;;  %944 = vmatprep.subr.bf16.mxu1 %v1219_v20 }
  0x48   :  { %969 = vmatpush3.bf16.msra.mxu0 %v1164_v11  ;;  %945 = vmatpush3.bf16.msra.mxu1 %v1226_v21 }
  0x49   :  { %970 = vmatprep.subr.bf16.mxu0 %v1171_v12  ;;  %1018 = vmatprep.subr.bf16.mxu1 %v1104_v1 }
  0x4b   :  { %527 = vmatmul.mubr.bf16.vlgmr.msra.gmra.mrb[12].mxu1 %v1062_v34 }
  0x4c   :  { %971 = vmatpush3.bf16.msra.mxu0 %v1178_v13  ;;  %534 = vmatprep.mubr.bf16.mxu1 %v1065_v35 }
  0x4d   :  { %972 = vmatprep.subr.bf16.mxu0 %v1185_v14  ;;  %1019 = vmatpush3.bf16.msra.mxu1 %v1104_v1 }
  0x4e   :  { %1020 = vmatprep.subr.bf16.mxu1 %v1123_v4 }
  0x50   :  { %973 = vmatpush3.bf16.msra.mxu0 %v1190_v15 }
  0x51   :  { %974 = vmatprep.subr.bf16.mxu0 %v1197_v16  ;;  %1021 = vmatpush3.bf16.msra.mxu1 %v1123_v4 }
  0x53   :  { %535 = vmatmul.mubr.bf16.gmra.mrb[16].mxu1 %v1067_v36 }
  0x54   :  { %975 = vmatpush3.bf16.msra.mxu0 %v1212_v19  ;;  %1022 = vmatprep.mubr.msk.bf16.mxu1 %vm197_vm0, %v1071_v37 }
  0x55   :  { %976 = vmatprep.subr.bf16.mxu0 %v1219_v20 }
  0x58   :  { %977 = vmatpush3.bf16.msra.mxu0 %v1226_v21 }
  0x5b   :  { %674 = vmatmul.mubr.bf16.vlgmr.msra.gmra.mrb[16].mxu0 %v1068_v38  ;;  %1023 = vmatmul.mubr.msk.bf16.vlgmr.msra.gmra.mrb[20].mxu1 %vm197_vm0, %v1072_v39 }
  0x5c   :  { %681 = vmatprep.mubr.bf16.mxu0 %v1073_v40 }
  0x63   :  { %682 = vmatmul.mubr.bf16.gmra.mrb[20].mxu0 %v1075_v41 }
  0xde   :  { %v1000_v42 = vpop.f32.mrb[0].mxu1 }
  0xdf   :  { %v287_v43 = vpop.f32.mrb[1].mxu1 }
  0xe0   :  { %v1001_v44 = vpop.f32.mrb[2].mxu1 }
  0xe1   :  { %v290_v45 = vpop.f32.mrb[3].mxu1 }
  0xf6   :  { %v882_v46 = vpop.f32.mrb[0].mxu0 }
  0xf7   :  { %v883_v47 = vpop.f32.mrb[1].mxu0 }
  0xf8   :  { %v884_v48 = vadd.f32 %v883_v47, %v882_v46  ;;  %v885_v49 = vpop.f32.mrb[2].mxu0 }
  0xf9   :  { %v886_v50 = vpop.f32.mrb[3].mxu0 }
  0xfa   :  { %v288_v51 = vadd.f32 %v884_v48, %v287_v43  ;;  %v887_v52 = vadd.f32 %v886_v50, %v885_v49 }
  0xfc   :  { %v291_v53 = vadd.f32 %v887_v52, %v290_v45 }
  0xfe   :  { %v888_v54 = vpop.f32.mrb[4].mxu0  ;;  %v914_v55 = vpop.f32.mrb[4].mxu1 }
  0xff   :  { %v889_v56 = vpop.f32.mrb[5].mxu0  ;;  %v915_v57 = vpop.f32.mrb[5].mxu1 }
 0x100   :  { %v890_v58 = vadd.f32 %v889_v56, %v888_v54  ;;  %v891_v59 = vpop.f32.mrb[6].mxu0  ;;  %v916_v60 = vadd.f32 %v915_v57, %v914_v55  ;;  %v917_v61 = vpop.f32.mrb[6].mxu1  ;;  %v857_v57 = vld [vmem:[%s1367_s2] ss:$0 sm:$0xff] }
 0x101   :  { %v892_v62 = vpop.f32.mrb[7].mxu0  ;;  %v918_v63 = vpop.f32.mrb[7].mxu1 }
 0x102   :  { %v296_v0 = vadd.f32 %v1000_v42, %v890_v58  ;;  %v893_v1 = vadd.f32 %v892_v62, %v891_v59  ;;  %v919_v2 = vadd.f32 %v918_v63, %v917_v61 }
 0x104   :  { %v299_v3 = vadd.f32 %v1001_v44, %v893_v1 }
 0x106   :  { %v920_v4 = vpop.f32.mrb[8].mxu1  ;;  %v1008_v5 = vpop.f32.mrb[8].mxu0 }
 0x107   :  { %v921_v6 = vpop.f32.mrb[9].mxu1  ;;  %v430_v7 = vpop.f32.mrb[9].mxu0 }
 0x108   :  { %v922_v8 = vadd.f32 %v921_v6, %v920_v4  ;;  %v431_v9 = vadd.f32 %v916_v60, %v430_v7  ;;  %v923_v10 = vpop.f32.mrb[10].mxu1  ;;  %v1009_v11 = vpop.f32.mrb[10].mxu0 }
 0x109   :  { %v924_v12 = vpop.f32.mrb[11].mxu1  ;;  %v433_v13 = vpop.f32.mrb[11].mxu0 }
 0x10a   :  { %v439_v14 = vadd.f32 %v1008_v5, %v922_v8  ;;  %v445_v15 = vmax.f32 %v288_v51, %v431_v9  ;;  %v925_v16 = vadd.f32 %v924_v12, %v923_v10  ;;  %v434_v17 = vadd.f32 %v919_v2, %v433_v13 }
 0x10c   :  { %v447_v18 = vmax.f32 %v296_v0, %v439_v14  ;;  %v442_v19 = vadd.f32 %v1009_v11, %v925_v16  ;;  %v446_v20 = vmax.f32 %v291_v53, %v434_v17 }
 0x10e   :  { %v448_v21 = vmax.f32 %v299_v3, %v442_v19  ;;  %v1016_v22 = vpop.f32.mrb[12].mxu0 }
 0x10f   :  { %v577_v23 = vpop.f32.mrb[13].mxu0 }
 0x110   :  { %v1017_v24 = vpop.f32.mrb[14].mxu0 }
 0x111   :  { %v580_v25 = vpop.f32.mrb[15].mxu0 }
 0x11e   :  { %v946_v26 = vpop.f32.mrb[12].mxu1 }
 0x11f   :  { %v947_v27 = vpop.f32.mrb[13].mxu1 }
 0x120   :  { %v948_v28 = vadd.f32 %v947_v27, %v946_v26  ;;  %v949_v29 = vpop.f32.mrb[14].mxu1 }
 0x121   :  { %v950_v30 = vpop.f32.mrb[15].mxu1 }
 0x122   :  { %v578_v31 = vadd.f32 %v948_v28, %v577_v23  ;;  %v951_v32 = vadd.f32 %v950_v30, %v949_v29 }
 0x124   :  { %v581_v33 = vadd.f32 %v951_v32, %v580_v25  ;;  %v592_v34 = vmax.f32 %v445_v15, %v578_v31 }
 0x126   :  { %v952_v35 = vpop.f32.mrb[16].mxu1  ;;  %v593_v36 = vmax.f32 %v446_v20, %v581_v33 }
 0x127   :  { %v953_v37 = vpop.f32.mrb[17].mxu1 }
 0x128   :  { %v954_v38 = vadd.f32 %v953_v37, %v952_v35  ;;  %v955_v39 = vpop.f32.mrb[18].mxu1 }
 0x129   :  { %v956_v40 = vpop.f32.mrb[19].mxu1 }
 0x12a   :  { %v586_v41 = vadd.f32 %v1016_v22, %v954_v38  ;;  %v957_v42 = vadd.f32 %v956_v40, %v955_v39 }
 0x12c   :  { %v594_v43 = vmax.f32 %v447_v18, %v586_v41  ;;  %v589_v44 = vadd.f32 %v1017_v24, %v957_v42 }
 0x12e   :  { %v595_v45 = vmax.f32 %v448_v21, %v589_v44  ;;  %v978_v46 = vpop.f32.mrb[16].mxu0  ;;  %v1024_v47 = vpop.f32.mrb[20].mxu1 }
 0x12f   :  { %v979_v48 = vpop.f32.mrb[17].mxu0  ;;  %v724_v49 = vpop.f32.mrb[21].mxu1 }
 0x130   :  { %v980_v50 = vadd.f32 %v979_v48, %v978_v46  ;;  %v981_v51 = vpop.f32.mrb[18].mxu0  ;;  %v1025_v52 = vpop.f32.mrb[22].mxu1 }
 0x131   :  { %v982_v53 = vpop.f32.mrb[19].mxu0  ;;  %v727_v54 = vpop.f32.mrb[23].mxu1 }
 0x132   :  { %v983_v55 = vadd.f32 %v982_v53, %v981_v51  ;;  %v725_v56 = vadd.f32 %v980_v50, %v724_v49 }
 0x134   :  { %v739_v58 = vmax.f32 %v592_v34, %v725_v56  ;;  %v728_v59 = vadd.f32 %v983_v55, %v727_v54 }
 0x136   :  { %v750_v60 = vadd.f32 %v857_v57, %v739_v58  ;;  %v740_v61 = vmax.f32 %v593_v36, %v728_v59  ;;  %v984_v62 = vpop.f32.mrb[20].mxu0 }
 0x137   :  { %v985_v63 = vpop.f32.mrb[21].mxu0 }
 0x138   :  { %v754_v0 = vmax.f32 %v750_v60, 0.0  ;;  %v751_v1 = vadd.f32 %v857_v57, %v740_v61  ;;  %v986_v2 = vadd.f32 %v985_v63, %v984_v62  ;;  %v987_v3 = vpop.f32.mrb[22].mxu0 }
 0x139   :  { %v988_v4 = vpop.f32.mrb[23].mxu0 }
 0x13a   :  { %v862_v5 = vpack.c.bf16 %v754_v0, %v754_v0  ;;  %v755_v6 = vmax.f32 %v751_v1, 0.0  ;;  %v733_v7 = vadd.f32 %v1024_v47, %v986_v2  ;;  %v989_v8 = vadd.f32 %v988_v4, %v987_v3 }
 0x13c   :  { %775 = vst.msk [vmem:[%s1368_s3] sm:$0xf] %vm774_vm1, %v862_v5  ;;  %v863_v9 = vpack.c.bf16 %v755_v6, %v755_v6  ;;  %v741_v10 = vmax.f32 %v594_v43, %v733_v7  ;;  %v736_v11 = vadd.f32 %v1025_v52, %v989_v8 }
 0x13e   :  { %776 = vst.msk [vmem:[%s1368_s3 + $0x4] sm:$0xf] %vm774_vm1, %v863_v9  ;;  %v752_v12 = vadd.f32 %v857_v57, %v741_v10  ;;  %v742_v13 = vmax.f32 %v595_v45, %v736_v11 }
 0x140   :  { %v756_v14 = vmax.f32 %v752_v12, 0.0  ;;  %v753_v15 = vadd.f32 %v857_v57, %v742_v13 }
 0x142   :  { %v864_v16 = vpack.c.bf16 %v756_v14, %v756_v14  ;;  %v757_v17 = vmax.f32 %v753_v15, 0.0 }
 0x144   :  { %777 = vst.msk [vmem:[%s1368_s3 + $0x8] sm:$0xf] %vm774_vm1, %v864_v16  ;;  %v865_v18 = vpack.c.bf16 %v757_v17, %v757_v17 }
 0x146   :  { %778 = vst.msk [vmem:[%s1368_s3 + $0xc] sm:$0xf] %vm774_vm1, %v865_v18 }

// kernel: net_forward.10
= control target key start
LH: loop header
LB: loop body
LE: loop exit
PB: predicated region body
PF: predicated region fallthrough
CT: control target
= control target key end

     0   :  { %v1269_v39 = vmov 0.0   ;;  %vm1270_vm0 = vmmov 0   ;;  %vm323_vm1 = vcmask 523264   ;;  %s1685_s1 = inlined_call_operand.vmem [shape: bf16[576,128], index: 1, kind: input, shape index: {}]   ;;  %s1686_s0 = inlined_call_operand.vmem [shape: bf16[4,8,576], index: 0, kind: input, shape index: {}]   ;;  %s1687_s2 = inlined_call_operand.vmem [shape: f32[1,128], index: 2, kind: input, shape index: {}]   ;;  %s1688_s3 = inlined_call_operand.vmem [shape: bf16[8,128], index: 3, kind: output, shape index: {}]  }
   0x1   :  { %v1294_v0 = vld [vmem:[%s1685_s1 + $0x40] sm:$0xff]   ;;  %v1317_v4 = vld [vmem:[%s1685_s1 + $0x48] sm:$0xff]   ;;  %v1341_v8 = vld [vmem:[%s1685_s1 + $0x50] sm:$0xff]  }
   0x2   :  { %v1299_v1 = vld [vmem:[%s1685_s1 + $0xc0] sm:$0xff]   ;;  %967 = vmatprep.subr.bf16.mxu0 %v1294_v0  ;;  %v1323_v5 = vld [vmem:[%s1685_s1 + $0xc8] sm:$0xff]   ;;  %v1347_v9 = vld [vmem:[%s1685_s1 + $0xd0] sm:$0xff]  }
   0x3   :  { %v1305_v2 = vld [vmem:[%s1685_s1] sm:$0xff]   ;;  %989 = vmatprep.subr.bf16.mxu1 %v1299_v1  ;;  %v1329_v6 = vld [vmem:[%s1685_s1 + $0x8] sm:$0xff]   ;;  %v1353_v10 = vld [vmem:[%s1685_s1 + $0x10] sm:$0xff]  }
   0x4   :  { %v1311_v3 = vld [vmem:[%s1685_s1 + $0x80] sm:$0xff]   ;;  %968 = vmatpush3.bf16.msra.mxu0 %v1305_v2  ;;  %v1335_v7 = vld [vmem:[%s1685_s1 + $0x88] sm:$0xff]   ;;  %v1359_v11 = vld [vmem:[%s1685_s1 + $0x90] sm:$0xff]  }
   0x5   :  { %990 = vmatpush3.bf16.msra.mxu1 %v1311_v3  ;;  %969 = vmatprep.subr.bf16.mxu0 %v1317_v4  ;;  %v1365_v12 = vld [vmem:[%s1685_s1 + $0x58] sm:$0xff]   ;;  %v1389_v16 = vld [vmem:[%s1685_s1 + $0x60] sm:$0xff]   ;;  %v1413_v20 = vld [vmem:[%s1685_s1 + $0x68] sm:$0xff]  }
   0x6   :  { %991 = vmatprep.subr.bf16.mxu1 %v1323_v5  ;;  %v1371_v13 = vld [vmem:[%s1685_s1 + $0xd8] sm:$0xff]   ;;  %v1395_v17 = vld [vmem:[%s1685_s1 + $0xe0] sm:$0xff]   ;;  %v1419_v21 = vld [vmem:[%s1685_s1 + $0xe8] sm:$0xff]  }
   0x7   :  { %v1377_v14 = vld [vmem:[%s1685_s1 + $0x18] sm:$0xff]   ;;  %v1401_v18 = vld [vmem:[%s1685_s1 + $0x20] sm:$0xff]   ;;  %v1425_v22 = vld [vmem:[%s1685_s1 + $0x28] sm:$0xff]  }
   0x8   :  { %970 = vmatpush3.bf16.msra.mxu0 %v1329_v6  ;;  %v1383_v15 = vld [vmem:[%s1685_s1 + $0x98] sm:$0xff]   ;;  %v1407_v19 = vld [vmem:[%s1685_s1 + $0xa0] sm:$0xff]   ;;  %v1431_v23 = vld [vmem:[%s1685_s1 + $0xa8] sm:$0xff]  }
   0x9   :  { %992 = vmatpush3.bf16.msra.mxu1 %v1335_v7  ;;  %971 = vmatprep.subr.bf16.mxu0 %v1341_v8  ;;  %v1437_v24 = vld [vmem:[%s1685_s1 + $0x70] sm:$0xff]   ;;  %v1461_v28 = vld [vmem:[%s1685_s1 + $0x78] sm:$0xff]   ;;  %v87_v32 = vld [vmem:[%s1686_s0] sm:$0xff] }
   0xa   :  { %993 = vmatprep.subr.bf16.mxu1 %v1347_v9  ;;  %v1443_v25 = vld [vmem:[%s1685_s1 + $0xf0] sm:$0xff]   ;;  %v1467_v29 = vld [vmem:[%s1685_s1 + $0xf8] sm:$0xff]   ;;  %v88_v33 = vld [vmem:[%s1686_s0 + $0x8] sm:$0xff]  ;;  %v897_v34 = vcombine.low %v87_v32, %v87_v32  ;;  %v898_v35 = vcombine.high %v87_v32, %v87_v32 }
   0xb   :  { %v1449_v26 = vld [vmem:[%s1685_s1 + $0x30] sm:$0xff]   ;;  %v1473_v30 = vld [vmem:[%s1685_s1 + $0x38] sm:$0xff]   ;;  %v899_v36 = vcombine.low %v88_v33, %v88_v33  ;;  %v900_v37 = vcombine.high %v88_v33, %v88_v33  ;;  %v1492_v38 = vld [vmem:[%s1685_s1 + $0x100] sm:$0xff]  }
   0xc   :  { %972 = vmatpush3.bf16.msra.mxu0 %v1353_v10  ;;  %v1455_v27 = vld [vmem:[%s1685_s1 + $0xb0] sm:$0xff]   ;;  %v1479_v31 = vld [vmem:[%s1685_s1 + $0xb8] sm:$0xff]   ;;  %359 = vmatprep.mubr.bf16.mxu0 %v898_v35  ;;  %v1501_v40 = vld [vmem:[%s1685_s1 + $0x108] sm:$0xff]  }
   0xd   :  { %994 = vmatpush3.bf16.msra.mxu1 %v1359_v11  ;;  %973 = vmatprep.subr.bf16.mxu0 %v1365_v12  ;;  %v939_v41 = vld [vmem:[%s1686_s0 + $0x14] sm:$0xff]  ;;  %v1253_v45 = vld [vmem:[%s1686_s0 + $0x10] ss:$0 sps:$4 sm:$0xff]   ;;  %v940_v46 = vld [vmem:[%s1686_s0 + $0x1c] sm:$0xff] }
   0xe   :  { %995 = vmatprep.subr.bf16.mxu1 %v1371_v13  ;;  %399 = vmatprep.mubr.bf16.mxu1 %v900_v37  ;;  %v943_v42 = vcombine.high %v939_v41, %v939_v41  ;;  %v1515_v43 = vld [vmem:[%s1685_s1 + $0x110] sm:$0xff]   ;;  %v1524_v44 = vld [vmem:[%s1685_s1 + $0x118] sm:$0xff]   ;;  %v945_v47 = vcombine.high %v940_v46, %v940_v46  ;;  %v942_v48 = vcombine.low %v939_v41, %v939_v41  ;;  %v1258_v50 = vld [vmem:[%s1686_s0 + $0x24] ss:$0 sps:$4 sm:$0xff]  }
   0xf   :  { %v944_v49 = vcombine.low %v940_v46, %v940_v46  ;;  %v948_v51 = vld [vmem:[%s1686_s0 + $0x28] sm:$0xff]  ;;  %v949_v52 = vld [vmem:[%s1686_s0 + $0x30] sm:$0xff]  ;;  %v957_v57 = vld [vmem:[%s1686_s0 + $0x3c] sm:$0xff] }
  0x10   :  { %974 = vmatpush3.bf16.msra.mxu0 %v1377_v14  ;;  %v952_v53 = vcombine.high %v948_v51, %v948_v51  ;;  %v954_v54 = vcombine.high %v949_v52, %v949_v52  ;;  %v951_v55 = vcombine.low %v948_v51, %v948_v51  ;;  %v953_v56 = vcombine.low %v949_v52, %v949_v52  ;;  %v1263_v59 = vld [vmem:[%s1686_s0 + $0x38] ss:$0 sps:$4 sm:$0xff]   ;;  %v958_v60 = vld [vmem:[%s1686_s0 + $0x44] sm:$0xff] }
  0x11   :  { %996 = vmatpush3.bf16.msra.mxu1 %v1383_v15  ;;  %975 = vmatprep.subr.bf16.mxu0 %v1389_v16  ;;  %v961_v58 = vcombine.high %v957_v57, %v957_v57  ;;  %v963_v61 = vcombine.high %v958_v60, %v958_v60  ;;  %v960_v62 = vcombine.low %v957_v57, %v957_v57 }
  0x12   :  { %997 = vmatprep.subr.bf16.mxu1 %v1395_v17  ;;  %v962_v63 = vcombine.low %v958_v60, %v958_v60 }
  0x14   :  { %976 = vmatpush3.bf16.msra.mxu0 %v1401_v18 }
  0x15   :  { %998 = vmatpush3.bf16.msra.mxu1 %v1407_v19  ;;  %977 = vmatprep.subr.bf16.mxu0 %v1413_v20 }
  0x16   :  { %999 = vmatprep.subr.bf16.mxu1 %v1419_v21 }
  0x18   :  { %978 = vmatpush3.bf16.msra.mxu0 %v1425_v22 }
  0x19   :  { %1000 = vmatpush3.bf16.msra.mxu1 %v1431_v23  ;;  %979 = vmatprep.subr.bf16.mxu0 %v1437_v24 }
  0x1a   :  { %1001 = vmatprep.subr.bf16.mxu1 %v1443_v25 }
  0x1c   :  { %980 = vmatpush3.bf16.msra.mxu0 %v1449_v26 }
  0x1d   :  { %1002 = vmatpush3.bf16.msra.mxu1 %v1455_v27  ;;  %981 = vmatprep.subr.bf16.mxu0 %v1461_v28 }
  0x1e   :  { %1003 = vmatprep.subr.bf16.mxu1 %v1467_v29 }
  0x20   :  { %982 = vmatpush3.bf16.msra.mxu0 %v1473_v30 }
  0x21   :  { %1004 = vmatpush3.bf16.msra.mxu1 %v1479_v31  ;;  %1163 = vmatprep.subr.bf16.mxu0 %v1269_v39 }
  0x22   :  { %1016 = vmatprep.subr.bf16.mxu1 %v1294_v0 }
  0x23   :  { %360 = vmatmul.mubr.bf16.vlgmr.msra.gmra.mrb[0].mxu0 %v897_v34 }
  0x24   :  { %400 = vmatmul.mubr.bf16.vlgmr.msra.gmra.mrb[0].mxu1 %v899_v36  ;;  %1164 = vmatpush3.bf16.msra.mxu0 %v1492_v38 }
  0x25   :  { %1017 = vmatpush3.bf16.msra.mxu1 %v1305_v2  ;;  %1165 = vmatprep.subr.bf16.mxu0 %v1269_v39 }
  0x26   :  { %1018 = vmatprep.subr.bf16.mxu1 %v1317_v4  ;;  %1171 = vmatprep.mubr.msk.bf16.mxu0 %vm1270_vm0, %v1269_v39 }
  0x27   :  { %503 = vmatprep.mubr.bf16.mxu1 %v943_v42 }
  0x28   :  { %1166 = vmatpush3.bf16.msra.mxu0 %v1501_v40 }
  0x29   :  { %1019 = vmatpush3.bf16.msra.mxu1 %v1329_v6  ;;  %1167 = vmatprep.subr.bf16.mxu0 %v1269_v39 }
  0x2a   :  { %1020 = vmatprep.subr.bf16.mxu1 %v1341_v8 }
  0x2c   :  { %1168 = vmatpush3.bf16.msra.mxu0 %v1515_v43 }
  0x2d   :  { %1021 = vmatpush3.bf16.msra.mxu1 %v1353_v10  ;;  %1169 = vmatprep.subr.bf16.mxu0 %v1269_v39 }
  0x2e   :  { %1022 = vmatprep.subr.bf16.mxu1 %v1365_v12 }
  0x30   :  { %1170 = vmatpush3.bf16.msra.mxu0 %v1524_v44 }
  0x31   :  { %1023 = vmatpush3.bf16.msra.mxu1 %v1377_v14  ;;  %1038 = vmatprep.subr.bf16.mxu0 %v1299_v1 }
  0x32   :  { %1024 = vmatprep.subr.bf16.mxu1 %v1389_v16 }
  0x33   :  { %1172 = vmatmul.mubr.msk.bf16.vlgmr.msra.gmra.mrb[4].mxu0 %vm323_vm1, %v1253_v45 }
  0x34   :  { %1039 = vmatpush3.bf16.msra.mxu0 %v1311_v3  ;;  %543 = vmatprep.mubr.bf16.mxu0 %v945_v47 }
  0x35   :  { %1025 = vmatpush3.bf16.msra.mxu1 %v1401_v18  ;;  %1040 = vmatprep.subr.bf16.mxu0 %v1323_v5 }
  0x36   :  { %1026 = vmatprep.subr.bf16.mxu1 %v1413_v20 }
  0x38   :  { %1041 = vmatpush3.bf16.msra.mxu0 %v1335_v7 }
  0x39   :  { %1027 = vmatpush3.bf16.msra.mxu1 %v1425_v22  ;;  %1042 = vmatprep.subr.bf16.mxu0 %v1347_v9 }
  0x3a   :  { %1028 = vmatprep.subr.bf16.mxu1 %v1437_v24 }
  0x3c   :  { %1043 = vmatpush3.bf16.msra.mxu0 %v1359_v11 }
  0x3d   :  { %1029 = vmatpush3.bf16.msra.mxu1 %v1449_v26  ;;  %1044 = vmatprep.subr.bf16.mxu0 %v1371_v13 }
  0x3e   :  { %1030 = vmatprep.subr.bf16.mxu1 %v1461_v28 }
  0x40   :  { %1045 = vmatpush3.bf16.msra.mxu0 %v1383_v15 }
  0x41   :  { %1031 = vmatpush3.bf16.msra.mxu1 %v1473_v30  ;;  %1046 = vmatprep.subr.bf16.mxu0 %v1395_v17 }
  0x42   :  { %1175 = vmatprep.subr.bf16.mxu1 %v1269_v39 }
  0x44   :  { %504 = vmatmul.mubr.bf16.vlgmr.msra.gmra.mrb[4].mxu1 %v942_v48  ;;  %1047 = vmatpush3.bf16.msra.mxu0 %v1407_v19 }
  0x45   :  { %1176 = vmatpush3.bf16.msra.mxu1 %v1492_v38  ;;  %1048 = vmatprep.subr.bf16.mxu0 %v1419_v21 }
  0x46   :  { %1177 = vmatprep.subr.bf16.mxu1 %v1269_v39  ;;  %1183 = vmatprep.mubr.msk.bf16.mxu1 %vm1270_vm0, %v1269_v39 }
  0x48   :  { %1049 = vmatpush3.bf16.msra.mxu0 %v1431_v23 }
  0x49   :  { %1178 = vmatpush3.bf16.msra.mxu1 %v1501_v40  ;;  %1050 = vmatprep.subr.bf16.mxu0 %v1443_v25 }
  0x4a   :  { %1179 = vmatprep.subr.bf16.mxu1 %v1269_v39 }
  0x4c   :  { %1051 = vmatpush3.bf16.msra.mxu0 %v1455_v27 }
  0x4d   :  { %1180 = vmatpush3.bf16.msra.mxu1 %v1515_v43  ;;  %1052 = vmatprep.subr.bf16.mxu0 %v1467_v29 }
  0x4e   :  { %1181 = vmatprep.subr.bf16.mxu1 %v1269_v39 }
  0x50   :  { %1053 = vmatpush3.bf16.msra.mxu0 %v1479_v31 }
  0x51   :  { %1182 = vmatpush3.bf16.msra.mxu1 %v1524_v44  ;;  %1065 = vmatprep.subr.bf16.mxu0 %v1294_v0 }
  0x52   :  { %1087 = vmatprep.subr.bf16.mxu1 %v1299_v1 }
  0x53   :  { %544 = vmatmul.mubr.bf16.vlgmr.msra.gmra.mrb[8].mxu0 %v944_v49 }
  0x54   :  { %1184 = vmatmul.mubr.msk.bf16.vlgmr.msra.gmra.mrb[8].mxu1 %vm323_vm1, %v1258_v50  ;;  %1066 = vmatpush3.bf16.msra.mxu0 %v1305_v2 }
  0x55   :  { %1088 = vmatpush3.bf16.msra.mxu1 %v1311_v3  ;;  %1067 = vmatprep.subr.bf16.mxu0 %v1317_v4 }
  0x56   :  { %1089 = vmatprep.subr.bf16.mxu1 %v1323_v5  ;;  %648 = vmatprep.mubr.bf16.mxu0 %v952_v53 }
  0x57   :  { %688 = vmatprep.mubr.bf16.mxu1 %v954_v54 }
  0x58   :  { %1068 = vmatpush3.bf16.msra.mxu0 %v1329_v6 }
  0x59   :  { %1090 = vmatpush3.bf16.msra.mxu1 %v1335_v7  ;;  %1069 = vmatprep.subr.bf16.mxu0 %v1341_v8 }
  0x5a   :  { %1091 = vmatprep.subr.bf16.mxu1 %v1347_v9 }
  0x5c   :  { %1070 = vmatpush3.bf16.msra.mxu0 %v1353_v10 }
  0x5d   :  { %1092 = vmatpush3.bf16.msra.mxu1 %v1359_v11  ;;  %1071 = vmatprep.subr.bf16.mxu0 %v1365_v12 }
  0x5e   :  { %1093 = vmatprep.subr.bf16.mxu1 %v1371_v13 }
  0x60   :  { %1072 = vmatpush3.bf16.msra.mxu0 %v1377_v14 }
  0x61   :  { %1094 = vmatpush3.bf16.msra.mxu1 %v1383_v15  ;;  %1073 = vmatprep.subr.bf16.mxu0 %v1389_v16 }
  0x62   :  { %1095 = vmatprep.subr.bf16.mxu1 %v1395_v17 }
  0x64   :  { %1074 = vmatpush3.bf16.msra.mxu0 %v1401_v18 }
  0x65   :  { %1096 = vmatpush3.bf16.msra.mxu1 %v1407_v19  ;;  %1075 = vmatprep.subr.bf16.mxu0 %v1413_v20 }
  0x66   :  { %1097 = vmatprep.subr.bf16.mxu1 %v1419_v21 }
  0x68   :  { %1076 = vmatpush3.bf16.msra.mxu0 %v1425_v22 }
  0x69   :  { %1098 = vmatpush3.bf16.msra.mxu1 %v1431_v23  ;;  %1077 = vmatprep.subr.bf16.mxu0 %v1437_v24 }
  0x6a   :  { %1099 = vmatprep.subr.bf16.mxu1 %v1443_v25 }
  0x6c   :  { %1078 = vmatpush3.bf16.msra.mxu0 %v1449_v26 }
  0x6d   :  { %1100 = vmatpush3.bf16.msra.mxu1 %v1455_v27  ;;  %1079 = vmatprep.subr.bf16.mxu0 %v1461_v28 }
  0x6e   :  { %1101 = vmatprep.subr.bf16.mxu1 %v1467_v29 }
  0x70   :  { %1080 = vmatpush3.bf16.msra.mxu0 %v1473_v30 }
  0x71   :  { %1102 = vmatpush3.bf16.msra.mxu1 %v1479_v31  ;;  %1187 = vmatprep.subr.bf16.mxu0 %v1269_v39 }
  0x72   :  { %1114 = vmatprep.subr.bf16.mxu1 %v1294_v0  ;;  %v1268_v0 = vld [vmem:[%s1686_s0 + $0x4c] ss:$0 sps:$4 sm:$0xff]  }
  0x73   :  { %649 = vmatmul.mubr.bf16.vlgmr.msra.gmra.mrb[12].mxu0 %v951_v55 }
  0x74   :  { %689 = vmatmul.mubr.bf16.vlgmr.msra.gmra.mrb[12].mxu1 %v953_v56  ;;  %1188 = vmatpush3.bf16.msra.mxu0 %v1492_v38 }
  0x75   :  { %1115 = vmatpush3.bf16.msra.mxu1 %v1305_v2  ;;  %1189 = vmatprep.subr.bf16.mxu0 %v1269_v39 }
  0x76   :  { %1116 = vmatprep.subr.bf16.mxu1 %v1317_v4  ;;  %1195 = vmatprep.mubr.msk.bf16.mxu0 %vm1270_vm0, %v1269_v39 }
  0x77   :  { %793 = vmatprep.mubr.bf16.mxu1 %v961_v58 }
  0x78   :  { %1190 = vmatpush3.bf16.msra.mxu0 %v1501_v40 }
  0x79   :  { %1117 = vmatpush3.bf16.msra.mxu1 %v1329_v6  ;;  %1191 = vmatprep.subr.bf16.mxu0 %v1269_v39 }
  0x7a   :  { %1118 = vmatprep.subr.bf16.mxu1 %v1341_v8 }
  0x7c   :  { %1192 = vmatpush3.bf16.msra.mxu0 %v1515_v43 }
  0x7d   :  { %1119 = vmatpush3.bf16.msra.mxu1 %v1353_v10  ;;  %1193 = vmatprep.subr.bf16.mxu0 %v1269_v39 }
  0x7e   :  { %1120 = vmatprep.subr.bf16.mxu1 %v1365_v12 }
  0x80   :  { %1194 = vmatpush3.bf16.msra.mxu0 %v1524_v44 }
  0x81   :  { %1121 = vmatpush3.bf16.msra.mxu1 %v1377_v14  ;;  %1136 = vmatprep.subr.bf16.mxu0 %v1299_v1 }
  0x82   :  { %1122 = vmatprep.subr.bf16.mxu1 %v1389_v16 }
  0x83   :  { %1196 = vmatmul.mubr.msk.bf16.vlgmr.msra.gmra.mrb[16].mxu0 %vm323_vm1, %v1263_v59 }
  0x84   :  { %1137 = vmatpush3.bf16.msra.mxu0 %v1311_v3  ;;  %833 = vmatprep.mubr.bf16.mxu0 %v963_v61 }
  0x85   :  { %1123 = vmatpush3.bf16.msra.mxu1 %v1401_v18  ;;  %1138 = vmatprep.subr.bf16.mxu0 %v1323_v5 }
  0x86   :  { %1124 = vmatprep.subr.bf16.mxu1 %v1413_v20 }
  0x88   :  { %1139 = vmatpush3.bf16.msra.mxu0 %v1335_v7 }
  0x89   :  { %1125 = vmatpush3.bf16.msra.mxu1 %v1425_v22  ;;  %1140 = vmatprep.subr.bf16.mxu0 %v1347_v9 }
  0x8a   :  { %1126 = vmatprep.subr.bf16.mxu1 %v1437_v24 }
  0x8c   :  { %1141 = vmatpush3.bf16.msra.mxu0 %v1359_v11 }
  0x8d   :  { %1127 = vmatpush3.bf16.msra.mxu1 %v1449_v26  ;;  %1142 = vmatprep.subr.bf16.mxu0 %v1371_v13 }
  0x8e   :  { %1128 = vmatprep.subr.bf16.mxu1 %v1461_v28 }
  0x90   :  { %1143 = vmatpush3.bf16.msra.mxu0 %v1383_v15 }
  0x91   :  { %1129 = vmatpush3.bf16.msra.mxu1 %v1473_v30  ;;  %1144 = vmatprep.subr.bf16.mxu0 %v1395_v17 }
  0x92   :  { %1199 = vmatprep.subr.bf16.mxu1 %v1269_v39 }
  0x94   :  { %794 = vmatmul.mubr.bf16.vlgmr.msra.gmra.mrb[16].mxu1 %v960_v62  ;;  %1145 = vmatpush3.bf16.msra.mxu0 %v1407_v19 }
  0x95   :  { %1200 = vmatpush3.bf16.msra.mxu1 %v1492_v38  ;;  %1146 = vmatprep.subr.bf16.mxu0 %v1419_v21 }
  0x96   :  { %1201 = vmatprep.subr.bf16.mxu1 %v1269_v39  ;;  %1207 = vmatprep.mubr.msk.bf16.mxu1 %vm1270_vm0, %v1269_v39 }
  0x98   :  { %1147 = vmatpush3.bf16.msra.mxu0 %v1431_v23 }
  0x99   :  { %1202 = vmatpush3.bf16.msra.mxu1 %v1501_v40  ;;  %1148 = vmatprep.subr.bf16.mxu0 %v1443_v25 }
  0x9a   :  { %1203 = vmatprep.subr.bf16.mxu1 %v1269_v39 }
  0x9c   :  { %1149 = vmatpush3.bf16.msra.mxu0 %v1455_v27 }
  0x9d   :  { %1204 = vmatpush3.bf16.msra.mxu1 %v1515_v43  ;;  %1150 = vmatprep.subr.bf16.mxu0 %v1467_v29 }
  0x9e   :  { %1205 = vmatprep.subr.bf16.mxu1 %v1269_v39 }
  0xa0   :  { %1151 = vmatpush3.bf16.msra.mxu0 %v1479_v31 }
  0xa1   :  { %1206 = vmatpush3.bf16.msra.mxu1 %v1524_v44 }
  0xa3   :  { %834 = vmatmul.mubr.bf16.vlgmr.msra.gmra.mrb[20].mxu0 %v962_v63 }
  0xa4   :  { %1208 = vmatmul.mubr.msk.bf16.vlgmr.msra.gmra.mrb[20].mxu1 %vm323_vm1, %v1268_v0 }
  0xf6   :  { %v983_v1 = vpop.f32.mrb[0].mxu0 }
  0xf7   :  { %v1005_v2 = vpop.f32.mrb[0].mxu1  ;;  %v984_v3 = vpop.f32.mrb[1].mxu0 }
  0xf8   :  { %v1006_v4 = vpop.f32.mrb[1].mxu1  ;;  %v985_v5 = vadd.f32 %v984_v3, %v983_v1  ;;  %v986_v7 = vpop.f32.mrb[2].mxu0  ;;  %v966_v3 = vld [vmem:[%s1687_s2] ss:$0 sm:$0xff] }
  0xf9   :  { %v1007_v6 = vadd.f32 %v1006_v4, %v1005_v2  ;;  %v1008_v8 = vpop.f32.mrb[2].mxu1  ;;  %v987_v9 = vpop.f32.mrb[3].mxu0 }
  0xfa   :  { %v1009_v10 = vpop.f32.mrb[3].mxu1 }
  0xfb   :  { %v402_v11 = vadd.f32 %v1007_v6, %v985_v5 }
 0x106   :  { %v441_v12 = vpop.f32.mrb[4].mxu0 }
 0x107   :  { %v442_v13 = vadd.f32 %v441_v12, %v402_v11  ;;  %v1173_v14 = vpop.f32.mrb[5].mxu0 }
 0x108   :  { %v444_v15 = vpop.f32.mrb[6].mxu0 }
 0x109   :  { %v1174_v16 = vpop.f32.mrb[7].mxu0 }
 0x117   :  { %v1032_v17 = vpop.f32.mrb[4].mxu1 }
 0x118   :  { %v1033_v18 = vpop.f32.mrb[5].mxu1 }
 0x119   :  { %v1034_v19 = vadd.f32 %v1033_v18, %v1032_v17  ;;  %v1035_v20 = vpop.f32.mrb[6].mxu1 }
 0x11a   :  { %v1036_v21 = vpop.f32.mrb[7].mxu1 }
 0x126   :  { %v1054_v22 = vpop.f32.mrb[8].mxu0 }
 0x127   :  { %v585_v23 = vpop.f32.mrb[8].mxu1  ;;  %v1055_v24 = vpop.f32.mrb[9].mxu0 }
 0x128   :  { %v1185_v25 = vpop.f32.mrb[9].mxu1  ;;  %v1056_v26 = vadd.f32 %v1055_v24, %v1054_v22  ;;  %v1057_v27 = vpop.f32.mrb[10].mxu0 }
 0x129   :  { %v588_v28 = vpop.f32.mrb[10].mxu1  ;;  %v1058_v29 = vpop.f32.mrb[11].mxu0 }
 0x12a   :  { %v1186_v30 = vpop.f32.mrb[11].mxu1  ;;  %v546_v31 = vadd.f32 %v1056_v26, %v1034_v19 }
 0x12c   :  { %v586_v32 = vadd.f32 %v585_v23, %v546_v31 }
 0x12e   :  { %v591_v33 = vmax.f32 %v442_v13, %v586_v32 }
 0x146   :  { %v1081_v34 = vpop.f32.mrb[12].mxu0 }
 0x147   :  { %v1103_v35 = vpop.f32.mrb[12].mxu1  ;;  %v1082_v36 = vpop.f32.mrb[13].mxu0 }
 0x148   :  { %v1104_v37 = vpop.f32.mrb[13].mxu1  ;;  %v1083_v38 = vadd.f32 %v1082_v36, %v1081_v34  ;;  %v1084_v40 = vpop.f32.mrb[14].mxu0 }
 0x149   :  { %v1105_v39 = vadd.f32 %v1104_v37, %v1103_v35  ;;  %v1106_v41 = vpop.f32.mrb[14].mxu1  ;;  %v1085_v42 = vpop.f32.mrb[15].mxu0 }
 0x14a   :  { %v1107_v43 = vpop.f32.mrb[15].mxu1 }
 0x14b   :  { %v691_v44 = vadd.f32 %v1105_v39, %v1083_v38 }
 0x156   :  { %v730_v45 = vpop.f32.mrb[16].mxu0 }
 0x157   :  { %v731_v46 = vadd.f32 %v730_v45, %v691_v44  ;;  %v1197_v47 = vpop.f32.mrb[17].mxu0 }
 0x158   :  { %v733_v48 = vpop.f32.mrb[18].mxu0 }
 0x159   :  { %v736_v49 = vmax.f32 %v591_v33, %v731_v46  ;;  %v1198_v50 = vpop.f32.mrb[19].mxu0 }
 0x167   :  { %v1130_v51 = vpop.f32.mrb[16].mxu1 }
 0x168   :  { %v1131_v52 = vpop.f32.mrb[17].mxu1 }
 0x169   :  { %v1132_v53 = vadd.f32 %v1131_v52, %v1130_v51  ;;  %v1133_v54 = vpop.f32.mrb[18].mxu1 }
 0x16a   :  { %v1134_v55 = vpop.f32.mrb[19].mxu1 }
 0x176   :  { %v1152_v56 = vpop.f32.mrb[20].mxu0 }
 0x177   :  { %v875_v57 = vpop.f32.mrb[20].mxu1  ;;  %v1153_v58 = vpop.f32.mrb[21].mxu0 }
 0x178   :  { %v1209_v59 = vpop.f32.mrb[21].mxu1  ;;  %v1154_v60 = vadd.f32 %v1153_v58, %v1152_v56  ;;  %v1155_v61 = vpop.f32.mrb[22].mxu0 }
 0x179   :  { %v878_v62 = vpop.f32.mrb[22].mxu1  ;;  %v1156_v63 = vpop.f32.mrb[23].mxu0 }
 0x17a   :  { %v1210_v0 = vpop.f32.mrb[23].mxu1  ;;  %v836_v1 = vadd.f32 %v1154_v60, %v1132_v53 }
 0x17c   :  { %v876_v2 = vadd.f32 %v875_v57, %v836_v1 }
 0x17e   :  { %v881_v4 = vmax.f32 %v736_v49, %v876_v2 }
 0x180   :  { %v889_v5 = vadd.f32 %v966_v3, %v881_v4 }
 0x182   :  { %v890_v6 = vmax.f32 %v889_v5, 0.0 }
 0x184   :  { %v891_v7 = vpack.c.bf16 %v890_v6, %v890_v6 }
 0x186   :  { %892 = vst [vmem:[%s1688_s3] sm:$0xf] %v891_v7 }

// kernel: net_forward.11
= control target key start
LH: loop header
LB: loop body
LE: loop exit
PB: predicated region body
PF: predicated region fallthrough
CT: control target
= control target key end

     0   :  { %v159_v38 = vlaneseq  ;;  %v3149_v39 = vmov 1966171168   ;;  %s4120_s0 = inlined_call_operand.vmem [shape: bf16[2,512], index: 0, kind: input, shape index: {}]   ;;  %s4121_s1 = inlined_call_operand.vmem [shape: bf16[512,512], index: 1, kind: input, shape index: {}]   ;;  %s4122_s2 = inlined_call_operand.vmem [shape: f32[1,512], index: 2, kind: input, shape index: {}]   ;;  %s4123_s3 = inlined_call_operand.vmem [shape: bf16[512,512], index: 3, kind: input, shape index: {}]   ;;  %s4124_s4 = inlined_call_operand.vmem [shape: f32[1,512], index: 4, kind: input, shape index: {}]   ;;  %s4125_s5 = inlined_call_operand.vmem [shape: bf16[512,10], index: 5, kind: input, shape index: {}]   ;;  %s4126_s6 = inlined_call_operand.vmem [shape: f32[1,10], index: 6, kind: input, shape index: {}]   ;;  %s4127_s7 = inlined_call_operand.hbm [shape: f32[2,10], index: 7, kind: output, shape index: {}]  }
   0x1   :  { %v2705_v0 = vld [vmem:[%s4121_s1 + $0x4] ss:$16 sps:$4 sm:$0xff]   ;;  %v2707_v1 = vld [vmem:[%s4121_s1 + $0xc] ss:$16 sps:$4 sm:$0xff]   ;;  %v2709_v2 = vld [vmem:[%s4121_s1] ss:$16 sps:$4 sm:$0xff]   ;;  %v189_v40 = vunpack.c.l.s4 %v3149_v39 }
   0x2   :  { %848 = vmatprep.subr.bf16.mxu0 %v2705_v0  ;;  %v2710_v3 = vld [vmem:[%s4121_s1 + $0x8] ss:$16 sps:$4 sm:$0xff]   ;;  %930 = vmatprep.subr.bf16.mxu1 %v2707_v1  ;;  %v2711_v4 = vld [vmem:[%s4121_s1 + $0x24] ss:$16 sps:$4 sm:$0xff]   ;;  %v2713_v5 = vld [vmem:[%s4121_s1 + $0x2c] ss:$16 sps:$4 sm:$0xff]  }
   0x3   :  { %849 = vmatpush1.bf16.msra.mxu0 %v2709_v2  ;;  %931 = vmatpush1.bf16.msra.mxu1 %v2710_v3  ;;  %v2715_v6 = vld [vmem:[%s4121_s1 + $0x20] ss:$16 sps:$4 sm:$0xff]   ;;  %v2716_v7 = vld [vmem:[%s4121_s1 + $0x28] ss:$16 sps:$4 sm:$0xff]   ;;  %v2717_v8 = vld [vmem:[%s4121_s1 + $0x44] ss:$16 sps:$4 sm:$0xff]   ;;  %v190_v46 = vunpack.c.0.s8 %v189_v40 }
   0x4   :  { %850 = vmatprep.subr.bf16.mxu0 %v2711_v4  ;;  %932 = vmatprep.subr.bf16.mxu1 %v2713_v5  ;;  %v2719_v9 = vld [vmem:[%s4121_s1 + $0x4c] ss:$16 sps:$4 sm:$0xff]   ;;  %v2721_v10 = vld [vmem:[%s4121_s1 + $0x40] ss:$16 sps:$4 sm:$0xff]   ;;  %v2722_v11 = vld [vmem:[%s4121_s1 + $0x48] ss:$16 sps:$4 sm:$0xff]  }
   0x5   :  { %v2723_v12 = vld [vmem:[%s4121_s1 + $0x64] ss:$16 sps:$4 sm:$0xff]   ;;  %v2725_v13 = vld [vmem:[%s4121_s1 + $0x6c] ss:$16 sps:$4 sm:$0xff]   ;;  %v2727_v14 = vld [vmem:[%s4121_s1 + $0x60] ss:$16 sps:$4 sm:$0xff]  }
   0x6   :  { %v2728_v15 = vld [vmem:[%s4121_s1 + $0x68] ss:$16 sps:$4 sm:$0xff]   ;;  %v2729_v16 = vld [vmem:[%s4121_s1 + $0x84] ss:$16 sps:$4 sm:$0xff]   ;;  %v2731_v17 = vld [vmem:[%s4121_s1 + $0x8c] ss:$16 sps:$4 sm:$0xff]  }
   0x7   :  { %851 = vmatpush1.bf16.msra.mxu0 %v2715_v6  ;;  %933 = vmatpush1.bf16.msra.mxu1 %v2716_v7  ;;  %v2733_v18 = vld [vmem:[%s4121_s1 + $0x80] ss:$16 sps:$4 sm:$0xff]   ;;  %v2734_v19 = vld [vmem:[%s4121_s1 + $0x88] ss:$16 sps:$4 sm:$0xff]   ;;  %v2735_v20 = vld [vmem:[%s4121_s1 + $0xa4] ss:$16 sps:$4 sm:$0xff]  }
   0x8   :  { %852 = vmatprep.subr.bf16.mxu0 %v2717_v8  ;;  %934 = vmatprep.subr.bf16.mxu1 %v2719_v9  ;;  %v2737_v21 = vld [vmem:[%s4121_s1 + $0xac] ss:$16 sps:$4 sm:$0xff]   ;;  %v2739_v22 = vld [vmem:[%s4121_s1 + $0xa0] ss:$16 sps:$4 sm:$0xff]   ;;  %v2740_v23 = vld [vmem:[%s4121_s1 + $0xa8] ss:$16 sps:$4 sm:$0xff]  }
   0x9   :  { %v2741_v24 = vld [vmem:[%s4121_s1 + $0xc4] ss:$16 sps:$4 sm:$0xff]   ;;  %v2743_v25 = vld [vmem:[%s4121_s1 + $0xcc] ss:$16 sps:$4 sm:$0xff]   ;;  %v2745_v26 = vld [vmem:[%s4121_s1 + $0xc0] ss:$16 sps:$4 sm:$0xff]  }
   0xa   :  { %v2746_v27 = vld [vmem:[%s4121_s1 + $0xc8] ss:$16 sps:$4 sm:$0xff]   ;;  %v2747_v28 = vld [vmem:[%s4121_s1 + $0xe4] ss:$16 sps:$4 sm:$0xff]   ;;  %v2749_v29 = vld [vmem:[%s4121_s1 + $0xec] ss:$16 sps:$4 sm:$0xff]  }
   0xb   :  { %853 = vmatpush1.bf16.msra.mxu0 %v2721_v10  ;;  %935 = vmatpush1.bf16.msra.mxu1 %v2722_v11  ;;  %v2751_v30 = vld [vmem:[%s4121_s1 + $0xe0] ss:$16 sps:$4 sm:$0xff]   ;;  %v2752_v31 = vld [vmem:[%s4121_s1 + $0xe8] ss:$16 sps:$4 sm:$0xff]   ;;  %v2753_v32 = vld [vmem:[%s4121_s1 + $0x104] ss:$16 sps:$4 sm:$0xff]  }
   0xc   :  { %854 = vmatprep.subr.bf16.mxu0 %v2723_v12  ;;  %936 = vmatprep.subr.bf16.mxu1 %v2725_v13  ;;  %v2755_v33 = vld [vmem:[%s4121_s1 + $0x10c] ss:$16 sps:$4 sm:$0xff]   ;;  %v2757_v34 = vld [vmem:[%s4121_s1 + $0x100] ss:$16 sps:$4 sm:$0xff]   ;;  %v2758_v35 = vld [vmem:[%s4121_s1 + $0x108] ss:$16 sps:$4 sm:$0xff]  }
   0xd   :  { %v2759_v36 = vld [vmem:[%s4121_s1 + $0x124] ss:$16 sps:$4 sm:$0xff]   ;;  %v2761_v37 = vld [vmem:[%s4121_s1 + $0x12c] ss:$16 sps:$4 sm:$0xff]   ;;  %v2763_v41 = vld [vmem:[%s4121_s1 + $0x120] ss:$16 sps:$4 sm:$0xff]  }
   0xe   :  { %v2764_v42 = vld [vmem:[%s4121_s1 + $0x128] ss:$16 sps:$4 sm:$0xff]   ;;  %v2765_v43 = vld [vmem:[%s4121_s1 + $0x144] ss:$16 sps:$4 sm:$0xff]   ;;  %v2767_v44 = vld [vmem:[%s4121_s1 + $0x14c] ss:$16 sps:$4 sm:$0xff]  }
   0xf   :  { %855 = vmatpush1.bf16.msra.mxu0 %v2727_v14  ;;  %937 = vmatpush1.bf16.msra.mxu1 %v2728_v15  ;;  %v3317_v45 = vshrl.u32 %v159_v38, 7  ;;  %v2769_v47 = vld [vmem:[%s4121_s1 + $0x140] ss:$16 sps:$4 sm:$0xff]   ;;  %v2770_v48 = vld [vmem:[%s4121_s1 + $0x148] ss:$16 sps:$4 sm:$0xff]  }
  0x10   :  { %856 = vmatprep.subr.bf16.mxu0 %v2729_v16  ;;  %938 = vmatprep.subr.bf16.mxu1 %v2731_v17  ;;  %v2771_v49 = vld [vmem:[%s4121_s1 + $0x164] ss:$16 sps:$4 sm:$0xff]   ;;  %v2773_v50 = vld [vmem:[%s4121_s1 + $0x16c] ss:$16 sps:$4 sm:$0xff]   ;;  %v2775_v53 = vld [vmem:[%s4121_s1 + $0x160] ss:$16 sps:$4 sm:$0xff]  }
  0x11   :  { %v193_v51 = vsub.s32 %v190_v46, %v3317_v45  ;;  %v2345_v52 = vld.sshfl [vmem:[%s4120_s0] sm:$0x33 pattern:$0x75316420]  ;;  %v2776_v54 = vld [vmem:[%s4121_s1 + $0x168] ss:$16 sps:$4 sm:$0xff]  }
  0x12   :  { %v187_v55 = vcombine.high %v2345_v52, %v2345_v52  ;;  %v2777_v56 = vld [vmem:[%s4121_s1 + $0x184] ss:$16 sps:$4 sm:$0xff]   ;;  %v2779_v57 = vld [vmem:[%s4121_s1 + $0x18c] ss:$16 sps:$4 sm:$0xff]   ;;  %v2781_v59 = vld [vmem:[%s4121_s1 + $0x180] ss:$16 sps:$4 sm:$0xff]  }
  0x13   :  { %857 = vmatpush1.bf16.msra.mxu0 %v2733_v18  ;;  %939 = vmatpush1.bf16.msra.mxu1 %v2734_v19  ;;  %v2782_v60 = vld [vmem:[%s4121_s1 + $0x188] ss:$16 sps:$4 sm:$0xff]   ;;  %v2783_v61 = vld [vmem:[%s4121_s1 + $0x1a4] ss:$16 sps:$4 sm:$0xff]   ;;  %v2785_v62 = vld [vmem:[%s4121_s1 + $0x1ac] ss:$16 sps:$4 sm:$0xff]   ;;  %v3398_v12 = vrot.slane %v2345_v52, %v193_v51 }
  0x14   :  { %858 = vmatprep.subr.bf16.mxu0 %v2735_v20  ;;  %940 = vmatprep.subr.bf16.mxu1 %v2737_v21  ;;  %v201_v58 = vrot.slane %v187_v55, %v193_v51  ;;  %v2787_v63 = vld [vmem:[%s4121_s1 + $0x1a0] ss:$16 sps:$4 sm:$0xff]   ;;  %v2788_v0 = vld [vmem:[%s4121_s1 + $0x1a8] ss:$16 sps:$4 sm:$0xff]   ;;  %v2789_v1 = vld [vmem:[%s4121_s1 + $0x1c4] ss:$16 sps:$4 sm:$0xff]  }
  0x15   :  { %v2791_v2 = vld [vmem:[%s4121_s1 + $0x1cc] ss:$16 sps:$4 sm:$0xff]   ;;  %v2793_v3 = vld [vmem:[%s4121_s1 + $0x1c0] ss:$16 sps:$4 sm:$0xff]   ;;  %v2794_v4 = vld [vmem:[%s4121_s1 + $0x1c8] ss:$16 sps:$4 sm:$0xff]  }
  0x16   :  { %880 = vmatprep.mubr.bf16.mxu0 %v201_v58  ;;  %962 = vmatprep.mubr.bf16.mxu1 %v201_v58  ;;  %v2795_v5 = vld [vmem:[%s4121_s1 + $0x1e4] ss:$16 sps:$4 sm:$0xff]   ;;  %v2797_v6 = vld [vmem:[%s4121_s1 + $0x1ec] ss:$16 sps:$4 sm:$0xff]   ;;  %v2799_v7 = vld [vmem:[%s4121_s1 + $0x1e0] ss:$16 sps:$4 sm:$0xff]   ;;  %v203_v16 = vcombine.high %v201_v58, %v201_v58 }
  0x17   :  { %859 = vmatpush1.bf16.msra.mxu0 %v2739_v22  ;;  %941 = vmatpush1.bf16.msra.mxu1 %v2740_v23  ;;  %v2800_v8 = vld [vmem:[%s4121_s1 + $0x1e8] ss:$16 sps:$4 sm:$0xff]   ;;  %v2803_v9 = vld [vmem:[%s4121_s1 + $0x204] ss:$16 sps:$4 sm:$0xff]   ;;  %v2806_v10 = vld [vmem:[%s4121_s1 + $0x20c] ss:$16 sps:$4 sm:$0xff]  }
  0x18   :  { %860 = vmatprep.subr.bf16.mxu0 %v2741_v24  ;;  %942 = vmatprep.subr.bf16.mxu1 %v2743_v25  ;;  %v2801_v11 = vld [vmem:[%s4121_s1 + $0x200] ss:$16 sps:$4 sm:$0xff]   ;;  %v2804_v13 = vld [vmem:[%s4121_s1 + $0x208] ss:$16 sps:$4 sm:$0xff]   ;;  %v2809_v14 = vld [vmem:[%s4121_s1 + $0x224] ss:$16 sps:$4 sm:$0xff]  }
  0x19   :  { %v2812_v15 = vld [vmem:[%s4121_s1 + $0x22c] ss:$16 sps:$4 sm:$0xff]   ;;  %v2807_v17 = vld [vmem:[%s4121_s1 + $0x220] ss:$16 sps:$4 sm:$0xff]   ;;  %v2810_v18 = vld [vmem:[%s4121_s1 + $0x228] ss:$16 sps:$4 sm:$0xff]  }
  0x1a   :  { %v2815_v19 = vld [vmem:[%s4121_s1 + $0x244] ss:$16 sps:$4 sm:$0xff]   ;;  %v2818_v20 = vld [vmem:[%s4121_s1 + $0x24c] ss:$16 sps:$4 sm:$0xff]   ;;  %v2813_v21 = vld [vmem:[%s4121_s1 + $0x240] ss:$16 sps:$4 sm:$0xff]  }
  0x1b   :  { %861 = vmatpush1.bf16.msra.mxu0 %v2745_v26  ;;  %943 = vmatpush1.bf16.msra.mxu1 %v2746_v27  ;;  %v2816_v22 = vld [vmem:[%s4121_s1 + $0x248] ss:$16 sps:$4 sm:$0xff]   ;;  %v2821_v23 = vld [vmem:[%s4121_s1 + $0x264] ss:$16 sps:$4 sm:$0xff]   ;;  %v2824_v24 = vld [vmem:[%s4121_s1 + $0x26c] ss:$16 sps:$4 sm:$0xff]  }
  0x1c   :  { %862 = vmatprep.subr.bf16.mxu0 %v2747_v28  ;;  %944 = vmatprep.subr.bf16.mxu1 %v2749_v29  ;;  %v2819_v25 = vld [vmem:[%s4121_s1 + $0x260] ss:$16 sps:$4 sm:$0xff]   ;;  %v2822_v26 = vld [vmem:[%s4121_s1 + $0x268] ss:$16 sps:$4 sm:$0xff]   ;;  %v2827_v27 = vld [vmem:[%s4121_s1 + $0x284] ss:$16 sps:$4 sm:$0xff]  }
  0x1d   :  { %v2830_v28 = vld [vmem:[%s4121_s1 + $0x28c] ss:$16 sps:$4 sm:$0xff]   ;;  %v2825_v29 = vld [vmem:[%s4121_s1 + $0x280] ss:$16 sps:$4 sm:$0xff]   ;;  %v2840_v38 = vld [vmem:[%s4121_s1 + $0x2c8] ss:$16 sps:$4 sm:$0xff]  }
  0x1e   :  { %v2845_v39 = vld [vmem:[%s4121_s1 + $0x2e4] ss:$16 sps:$4 sm:$0xff]   ;;  %v2848_v40 = vld [vmem:[%s4121_s1 + $0x2ec] ss:$16 sps:$4 sm:$0xff]   ;;  %v2849_v46 = vld [vmem:[%s4121_s1 + $0x300] ss:$16 sps:$4 sm:$0xff]  }
  0x1f   :  { %863 = vmatpush1.bf16.msra.mxu0 %v2751_v30  ;;  %945 = vmatpush1.bf16.msra.mxu1 %v2752_v31  ;;  %v2828_v30 = vld [vmem:[%s4121_s1 + $0x288] ss:$16 sps:$4 sm:$0xff]   ;;  %v2833_v31 = vld [vmem:[%s4121_s1 + $0x2a4] ss:$16 sps:$4 sm:$0xff]   ;;  %v2867_v58 = vld [vmem:[%s4121_s1 + $0x360] ss:$16 sps:$4 sm:$0xff]  }
  0x20   :  { %864 = vmatprep.subr.bf16.mxu0 %v2753_v32  ;;  %946 = vmatprep.subr.bf16.mxu1 %v2755_v33  ;;  %v2836_v32 = vld [vmem:[%s4121_s1 + $0x2ac] ss:$16 sps:$4 sm:$0xff]   ;;  %v2831_v33 = vld [vmem:[%s4121_s1 + $0x2a0] ss:$16 sps:$4 sm:$0xff]   ;;  %v2858_v51 = vld [vmem:[%s4121_s1 + $0x328] ss:$16 sps:$4 sm:$0xff]  }
  0x21   :  { %v2863_v52 = vld [vmem:[%s4121_s1 + $0x344] ss:$16 sps:$4 sm:$0xff]   ;;  %v2864_v55 = vld [vmem:[%s4121_s1 + $0x348] ss:$16 sps:$4 sm:$0xff]  }
  0x23   :  { %865 = vmatpush1.bf16.msra.mxu0 %v2757_v34  ;;  %947 = vmatpush1.bf16.msra.mxu1 %v2758_v35  ;;  %v2834_v34 = vld [vmem:[%s4121_s1 + $0x2a8] ss:$16 sps:$4 sm:$0xff]   ;;  %v2839_v35 = vld [vmem:[%s4121_s1 + $0x2c4] ss:$16 sps:$4 sm:$0xff]  }
  0x24   :  { %866 = vmatprep.subr.bf16.mxu0 %v2759_v36  ;;  %948 = vmatprep.subr.bf16.mxu1 %v2761_v37  ;;  %v2842_v36 = vld [vmem:[%s4121_s1 + $0x2cc] ss:$16 sps:$4 sm:$0xff]   ;;  %v2837_v37 = vld [vmem:[%s4121_s1 + $0x2c0] ss:$16 sps:$4 sm:$0xff]  }
  0x27   :  { %867 = vmatpush1.bf16.msra.mxu0 %v2763_v41  ;;  %949 = vmatpush1.bf16.msra.mxu1 %v2764_v42  ;;  %v2843_v41 = vld [vmem:[%s4121_s1 + $0x2e0] ss:$16 sps:$4 sm:$0xff]   ;;  %v2846_v42 = vld [vmem:[%s4121_s1 + $0x2e8] ss:$16 sps:$4 sm:$0xff]  }
  0x28   :  { %868 = vmatprep.subr.bf16.mxu0 %v2765_v43  ;;  %950 = vmatprep.subr.bf16.mxu1 %v2767_v44  ;;  %v2851_v43 = vld [vmem:[%s4121_s1 + $0x304] ss:$16 sps:$4 sm:$0xff]   ;;  %v2854_v44 = vld [vmem:[%s4121_s1 + $0x30c] ss:$16 sps:$4 sm:$0xff]  }
  0x2b   :  { %869 = vmatpush1.bf16.msra.mxu0 %v2769_v47  ;;  %951 = vmatpush1.bf16.msra.mxu1 %v2770_v48  ;;  %v2852_v47 = vld [vmem:[%s4121_s1 + $0x308] ss:$16 sps:$4 sm:$0xff]   ;;  %v2857_v48 = vld [vmem:[%s4121_s1 + $0x324] ss:$16 sps:$4 sm:$0xff]  }
  0x2c   :  { %870 = vmatprep.subr.bf16.mxu0 %v2771_v49  ;;  %952 = vmatprep.subr.bf16.mxu1 %v2773_v50  ;;  %v2860_v49 = vld [vmem:[%s4121_s1 + $0x32c] ss:$16 sps:$4 sm:$0xff]   ;;  %v2855_v50 = vld [vmem:[%s4121_s1 + $0x320] ss:$16 sps:$4 sm:$0xff]  }
  0x2f   :  { %871 = vmatpush1.bf16.msra.mxu0 %v2775_v53  ;;  %953 = vmatpush1.bf16.msra.mxu1 %v2776_v54  ;;  %v2866_v53 = vld [vmem:[%s4121_s1 + $0x34c] ss:$16 sps:$4 sm:$0xff]   ;;  %v2861_v54 = vld [vmem:[%s4121_s1 + $0x340] ss:$16 sps:$4 sm:$0xff]  }
  0x30   :  { %872 = vmatprep.subr.bf16.mxu0 %v2777_v56  ;;  %954 = vmatprep.subr.bf16.mxu1 %v2779_v57  ;;  %v2869_v56 = vld [vmem:[%s4121_s1 + $0x364] ss:$16 sps:$4 sm:$0xff]   ;;  %v2872_v57 = vld [vmem:[%s4121_s1 + $0x36c] ss:$16 sps:$4 sm:$0xff]  }
  0x33   :  { %873 = vmatpush1.bf16.msra.mxu0 %v2781_v59  ;;  %955 = vmatpush1.bf16.msra.mxu1 %v2782_v60  ;;  %v2870_v59 = vld [vmem:[%s4121_s1 + $0x368] ss:$16 sps:$4 sm:$0xff]   ;;  %v2875_v60 = vld [vmem:[%s4121_s1 + $0x384] ss:$16 sps:$4 sm:$0xff]  }
  0x34   :  { %874 = vmatprep.subr.bf16.mxu0 %v2783_v61  ;;  %956 = vmatprep.subr.bf16.mxu1 %v2785_v62  ;;  %v2878_v61 = vld [vmem:[%s4121_s1 + $0x38c] ss:$16 sps:$4 sm:$0xff]   ;;  %v2873_v62 = vld [vmem:[%s4121_s1 + $0x380] ss:$16 sps:$4 sm:$0xff]  }
  0x37   :  { %875 = vmatpush1.bf16.msra.mxu0 %v2787_v63  ;;  %957 = vmatpush1.bf16.msra.mxu1 %v2788_v0  ;;  %v2876_v63 = vld [vmem:[%s4121_s1 + $0x388] ss:$16 sps:$4 sm:$0xff]   ;;  %v2881_v0 = vld [vmem:[%s4121_s1 + $0x3a4] ss:$16 sps:$4 sm:$0xff]  }
  0x38   :  { %876 = vmatprep.subr.bf16.mxu0 %v2789_v1  ;;  %958 = vmatprep.subr.bf16.mxu1 %v2791_v2  ;;  %v2884_v1 = vld [vmem:[%s4121_s1 + $0x3ac] ss:$16 sps:$4 sm:$0xff]   ;;  %v2879_v2 = vld [vmem:[%s4121_s1 + $0x3a0] ss:$16 sps:$4 sm:$0xff]  }
  0x3b   :  { %877 = vmatpush1.bf16.msra.mxu0 %v2793_v3  ;;  %959 = vmatpush1.bf16.msra.mxu1 %v2794_v4  ;;  %v2882_v3 = vld [vmem:[%s4121_s1 + $0x3a8] ss:$16 sps:$4 sm:$0xff]   ;;  %v2887_v4 = vld [vmem:[%s4121_s1 + $0x3c4] ss:$16 sps:$4 sm:$0xff]  }
  0x3c   :  { %878 = vmatprep.subr.bf16.mxu0 %v2795_v5  ;;  %960 = vmatprep.subr.bf16.mxu1 %v2797_v6  ;;  %v2890_v5 = vld [vmem:[%s4121_s1 + $0x3cc] ss:$16 sps:$4 sm:$0xff]   ;;  %v2885_v6 = vld [vmem:[%s4121_s1 + $0x3c0] ss:$16 sps:$4 sm:$0xff]  }
  0x3f   :  { %879 = vmatpush1.bf16.msra.mxu0 %v2799_v7  ;;  %961 = vmatpush1.bf16.msra.mxu1 %v2800_v8  ;;  %v2888_v7 = vld [vmem:[%s4121_s1 + $0x3c8] ss:$16 sps:$4 sm:$0xff]   ;;  %v2893_v8 = vld [vmem:[%s4121_s1 + $0x3e4] ss:$16 sps:$4 sm:$0xff]  }
  0x40   :  { %889 = vmatprep.subr.bf16.mxu0 %v2803_v9  ;;  %971 = vmatprep.subr.bf16.mxu1 %v2806_v10  ;;  %v2896_v9 = vld [vmem:[%s4121_s1 + $0x3ec] ss:$16 sps:$4 sm:$0xff]   ;;  %v2891_v10 = vld [vmem:[%s4121_s1 + $0x3e0] ss:$16 sps:$4 sm:$0xff]  }
  0x42   :  { %881 = vmatmul.mubr.bf16.vlgmr.msra.gmra.mrb[0].mxu0 %v3398_v12  ;;  %963 = vmatmul.mubr.bf16.vlgmr.msra.gmra.mrb[0].mxu1 %v3398_v12 }
  0x43   :  { %890 = vmatpush1.bf16.msra.mxu0 %v2801_v11  ;;  %972 = vmatpush1.bf16.msra.mxu1 %v2804_v13  ;;  %v2894_v11 = vld [vmem:[%s4121_s1 + $0x3e8] ss:$16 sps:$4 sm:$0xff]   ;;  %v2899_v13 = vld [vmem:[%s4123_s3 + $0x4] ss:$16 sps:$4 sm:$0xff]  }
  0x44   :  { %891 = vmatprep.subr.bf16.mxu0 %v2809_v14  ;;  %973 = vmatprep.subr.bf16.mxu1 %v2812_v15  ;;  %v2902_v14 = vld [vmem:[%s4123_s3 + $0xc] ss:$16 sps:$4 sm:$0xff]   ;;  %v2897_v15 = vld [vmem:[%s4123_s3] ss:$16 sps:$4 sm:$0xff]  }
  0x45   :  { %921 = vmatprep.mubr.bf16.mxu0 %v203_v16  ;;  %1003 = vmatprep.mubr.bf16.mxu1 %v203_v16  ;;  %v2900_v16 = vld [vmem:[%s4123_s3 + $0x8] ss:$16 sps:$4 sm:$0xff]  }
  0x47   :  { %892 = vmatpush1.bf16.msra.mxu0 %v2807_v17  ;;  %974 = vmatpush1.bf16.msra.mxu1 %v2810_v18  ;;  %v202_v17 = vcombine.high %v3398_v12, %v3398_v12  ;;  %v2905_v18 = vld [vmem:[%s4123_s3 + $0x24] ss:$16 sps:$4 sm:$0xff]   ;;  %v2906_v12 = vld [vmem:[%s4123_s3 + $0x28] ss:$16 sps:$4 sm:$0xff]  }
  0x48   :  { %893 = vmatprep.subr.bf16.mxu0 %v2815_v19  ;;  %975 = vmatprep.subr.bf16.mxu1 %v2818_v20  ;;  %v2908_v19 = vld [vmem:[%s4123_s3 + $0x2c] ss:$16 sps:$4 sm:$0xff]   ;;  %v2903_v20 = vld [vmem:[%s4123_s3 + $0x20] ss:$16 sps:$4 sm:$0xff]  }
  0x4b   :  { %894 = vmatpush1.bf16.msra.mxu0 %v2813_v21  ;;  %976 = vmatpush1.bf16.msra.mxu1 %v2816_v22  ;;  %v2911_v21 = vld [vmem:[%s4123_s3 + $0x44] ss:$16 sps:$4 sm:$0xff]   ;;  %v2914_v22 = vld [vmem:[%s4123_s3 + $0x4c] ss:$16 sps:$4 sm:$0xff]  }
  0x4c   :  { %895 = vmatprep.subr.bf16.mxu0 %v2821_v23  ;;  %977 = vmatprep.subr.bf16.mxu1 %v2824_v24  ;;  %v2909_v23 = vld [vmem:[%s4123_s3 + $0x40] ss:$16 sps:$4 sm:$0xff]   ;;  %v2912_v24 = vld [vmem:[%s4123_s3 + $0x48] ss:$16 sps:$4 sm:$0xff]  }
  0x4f   :  { %896 = vmatpush1.bf16.msra.mxu0 %v2819_v25  ;;  %978 = vmatpush1.bf16.msra.mxu1 %v2822_v26  ;;  %v2917_v25 = vld [vmem:[%s4123_s3 + $0x64] ss:$16 sps:$4 sm:$0xff]   ;;  %v2920_v26 = vld [vmem:[%s4123_s3 + $0x6c] ss:$16 sps:$4 sm:$0xff]  }
  0x50   :  { %897 = vmatprep.subr.bf16.mxu0 %v2827_v27  ;;  %979 = vmatprep.subr.bf16.mxu1 %v2830_v28  ;;  %v2915_v27 = vld [vmem:[%s4123_s3 + $0x60] ss:$16 sps:$4 sm:$0xff]   ;;  %v2918_v28 = vld [vmem:[%s4123_s3 + $0x68] ss:$16 sps:$4 sm:$0xff]  }
  0x53   :  { %898 = vmatpush1.bf16.msra.mxu0 %v2825_v29  ;;  %980 = vmatpush1.bf16.msra.mxu1 %v2828_v30  ;;  %v2923_v29 = vld [vmem:[%s4123_s3 + $0x84] ss:$16 sps:$4 sm:$0xff]   ;;  %v2926_v30 = vld [vmem:[%s4123_s3 + $0x8c] ss:$16 sps:$4 sm:$0xff]  }
  0x54   :  { %899 = vmatprep.subr.bf16.mxu0 %v2833_v31  ;;  %981 = vmatprep.subr.bf16.mxu1 %v2836_v32  ;;  %v2921_v31 = vld [vmem:[%s4123_s3 + $0x80] ss:$16 sps:$4 sm:$0xff]   ;;  %v2924_v32 = vld [vmem:[%s4123_s3 + $0x88] ss:$16 sps:$4 sm:$0xff]  }
  0x57   :  { %900 = vmatpush1.bf16.msra.mxu0 %v2831_v33  ;;  %982 = vmatpush1.bf16.msra.mxu1 %v2834_v34  ;;  %v2929_v33 = vld [vmem:[%s4123_s3 + $0xa4] ss:$16 sps:$4 sm:$0xff]   ;;  %v2932_v34 = vld [vmem:[%s4123_s3 + $0xac] ss:$16 sps:$4 sm:$0xff]  }
  0x58   :  { %901 = vmatprep.subr.bf16.mxu0 %v2839_v35  ;;  %983 = vmatprep.subr.bf16.mxu1 %v2842_v36  ;;  %v2927_v35 = vld [vmem:[%s4123_s3 + $0xa0] ss:$16 sps:$4 sm:$0xff]   ;;  %v2930_v36 = vld [vmem:[%s4123_s3 + $0xa8] ss:$16 sps:$4 sm:$0xff]  }
  0x5b   :  { %902 = vmatpush1.bf16.msra.mxu0 %v2837_v37  ;;  %984 = vmatpush1.bf16.msra.mxu1 %v2840_v38  ;;  %v2935_v37 = vld [vmem:[%s4123_s3 + $0xc4] ss:$16 sps:$4 sm:$0xff]   ;;  %v2938_v38 = vld [vmem:[%s4123_s3 + $0xcc] ss:$16 sps:$4 sm:$0xff]  }
  0x5c   :  { %903 = vmatprep.subr.bf16.mxu0 %v2845_v39  ;;  %985 = vmatprep.subr.bf16.mxu1 %v2848_v40  ;;  %v2933_v39 = vld [vmem:[%s4123_s3 + $0xc0] ss:$16 sps:$4 sm:$0xff]   ;;  %v2936_v40 = vld [vmem:[%s4123_s3 + $0xc8] ss:$16 sps:$4 sm:$0xff]  }
  0x5f   :  { %904 = vmatpush1.bf16.msra.mxu0 %v2843_v41  ;;  %986 = vmatpush1.bf16.msra.mxu1 %v2846_v42  ;;  %v2941_v41 = vld [vmem:[%s4123_s3 + $0xe4] ss:$16 sps:$4 sm:$0xff]   ;;  %v2944_v42 = vld [vmem:[%s4123_s3 + $0xec] ss:$16 sps:$4 sm:$0xff]  }
  0x60   :  { %905 = vmatprep.subr.bf16.mxu0 %v2851_v43  ;;  %987 = vmatprep.subr.bf16.mxu1 %v2854_v44  ;;  %v2939_v43 = vld [vmem:[%s4123_s3 + $0xe0] ss:$16 sps:$4 sm:$0xff]   ;;  %v2942_v44 = vld [vmem:[%s4123_s3 + $0xe8] ss:$16 sps:$4 sm:$0xff]  }
  0x63   :  { %906 = vmatpush1.bf16.msra.mxu0 %v2849_v46  ;;  %988 = vmatpush1.bf16.msra.mxu1 %v2852_v47  ;;  %v2947_v46 = vld [vmem:[%s4123_s3 + $0x104] ss:$16 sps:$4 sm:$0xff]   ;;  %v2950_v47 = vld [vmem:[%s4123_s3 + $0x10c] ss:$16 sps:$4 sm:$0xff]  }
  0x64   :  { %907 = vmatprep.subr.bf16.mxu0 %v2857_v48  ;;  %989 = vmatprep.subr.bf16.mxu1 %v2860_v49  ;;  %v2945_v48 = vld [vmem:[%s4123_s3 + $0x100] ss:$16 sps:$4 sm:$0xff]   ;;  %v2948_v49 = vld [vmem:[%s4123_s3 + $0x108] ss:$16 sps:$4 sm:$0xff]  }
  0x67   :  { %908 = vmatpush1.bf16.msra.mxu0 %v2855_v50  ;;  %990 = vmatpush1.bf16.msra.mxu1 %v2858_v51  ;;  %v2953_v50 = vld [vmem:[%s4123_s3 + $0x124] ss:$16 sps:$4 sm:$0xff]   ;;  %v2956_v51 = vld [vmem:[%s4123_s3 + $0x12c] ss:$16 sps:$4 sm:$0xff]  }
  0x68   :  { %909 = vmatprep.subr.bf16.mxu0 %v2863_v52  ;;  %991 = vmatprep.subr.bf16.mxu1 %v2866_v53  ;;  %v2951_v52 = vld [vmem:[%s4123_s3 + $0x120] ss:$16 sps:$4 sm:$0xff]   ;;  %v2954_v53 = vld [vmem:[%s4123_s3 + $0x128] ss:$16 sps:$4 sm:$0xff]  }
  0x6b   :  { %910 = vmatpush1.bf16.msra.mxu0 %v2861_v54  ;;  %992 = vmatpush1.bf16.msra.mxu1 %v2864_v55  ;;  %v2959_v54 = vld [vmem:[%s4123_s3 + $0x144] ss:$16 sps:$4 sm:$0xff]   ;;  %v2962_v55 = vld [vmem:[%s4123_s3 + $0x14c] ss:$16 sps:$4 sm:$0xff]  }
  0x6c   :  { %911 = vmatprep.subr.bf16.mxu0 %v2869_v56  ;;  %993 = vmatprep.subr.bf16.mxu1 %v2872_v57  ;;  %v2957_v56 = vld [vmem:[%s4123_s3 + $0x140] ss:$16 sps:$4 sm:$0xff]   ;;  %v2960_v57 = vld [vmem:[%s4123_s3 + $0x148] ss:$16 sps:$4 sm:$0xff]  }
  0x6f   :  { %912 = vmatpush1.bf16.msra.mxu0 %v2867_v58  ;;  %994 = vmatpush1.bf16.msra.mxu1 %v2870_v59  ;;  %v2965_v58 = vld [vmem:[%s4123_s3 + $0x164] ss:$16 sps:$4 sm:$0xff]   ;;  %v2968_v59 = vld [vmem:[%s4123_s3 + $0x16c] ss:$16 sps:$4 sm:$0xff]  }
  0x70   :  { %913 = vmatprep.subr.bf16.mxu0 %v2875_v60  ;;  %995 = vmatprep.subr.bf16.mxu1 %v2878_v61 }
  0x73   :  { %914 = vmatpush1.bf16.msra.mxu0 %v2873_v62  ;;  %996 = vmatpush1.bf16.msra.mxu1 %v2876_v63 }
  0x74   :  { %915 = vmatprep.subr.bf16.mxu0 %v2881_v0  ;;  %997 = vmatprep.subr.bf16.mxu1 %v2884_v1 }
  0x77   :  { %916 = vmatpush1.bf16.msra.mxu0 %v2879_v2  ;;  %998 = vmatpush1.bf16.msra.mxu1 %v2882_v3 }
  0x78   :  { %917 = vmatprep.subr.bf16.mxu0 %v2887_v4  ;;  %999 = vmatprep.subr.bf16.mxu1 %v2890_v5 }
  0x7b   :  { %918 = vmatpush1.bf16.msra.mxu0 %v2885_v6  ;;  %1000 = vmatpush1.bf16.msra.mxu1 %v2888_v7 }
  0x7c   :  { %919 = vmatprep.subr.bf16.mxu0 %v2893_v8  ;;  %1001 = vmatprep.subr.bf16.mxu1 %v2896_v9 }
  0x7f   :  { %920 = vmatpush1.bf16.msra.mxu0 %v2891_v10  ;;  %1002 = vmatpush1.bf16.msra.mxu1 %v2894_v11 }
  0x80   :  { %1806 = vmatprep.subr.bf16.mxu0 %v2899_v13  ;;  %1888 = vmatprep.subr.bf16.mxu1 %v2902_v14 }
  0x82   :  { %922 = vmatmul.mubr.bf16.vlgmr.msra.gmra.mrb[0].mxu0 %v202_v17  ;;  %1004 = vmatmul.mubr.bf16.vlgmr.msra.gmra.mrb[0].mxu1 %v202_v17 }
  0x83   :  { %1807 = vmatpush1.bf16.msra.mxu0 %v2897_v15  ;;  %1889 = vmatpush1.bf16.msra.mxu1 %v2900_v16 }
  0x84   :  { %1808 = vmatprep.subr.bf16.mxu0 %v2905_v18  ;;  %1890 = vmatprep.subr.bf16.mxu1 %v2908_v19 }
  0x87   :  { %1809 = vmatpush1.bf16.msra.mxu0 %v2903_v20  ;;  %1891 = vmatpush1.bf16.msra.mxu1 %v2906_v12 }
  0x88   :  { %1810 = vmatprep.subr.bf16.mxu0 %v2911_v21  ;;  %1892 = vmatprep.subr.bf16.mxu1 %v2914_v22 }
  0x8b   :  { %1811 = vmatpush1.bf16.msra.mxu0 %v2909_v23  ;;  %1893 = vmatpush1.bf16.msra.mxu1 %v2912_v24 }
  0x8c   :  { %1812 = vmatprep.subr.bf16.mxu0 %v2917_v25  ;;  %1894 = vmatprep.subr.bf16.mxu1 %v2920_v26 }
  0x8f   :  { %1813 = vmatpush1.bf16.msra.mxu0 %v2915_v27  ;;  %1895 = vmatpush1.bf16.msra.mxu1 %v2918_v28 }
  0x90   :  { %1814 = vmatprep.subr.bf16.mxu0 %v2923_v29  ;;  %1896 = vmatprep.subr.bf16.mxu1 %v2926_v30 }
  0x93   :  { %1815 = vmatpush1.bf16.msra.mxu0 %v2921_v31  ;;  %1897 = vmatpush1.bf16.msra.mxu1 %v2924_v32 }
  0x94   :  { %1816 = vmatprep.subr.bf16.mxu0 %v2929_v33  ;;  %1898 = vmatprep.subr.bf16.mxu1 %v2932_v34 }
  0x97   :  { %1817 = vmatpush1.bf16.msra.mxu0 %v2927_v35  ;;  %1899 = vmatpush1.bf16.msra.mxu1 %v2930_v36 }
  0x98   :  { %1818 = vmatprep.subr.bf16.mxu0 %v2935_v37  ;;  %1900 = vmatprep.subr.bf16.mxu1 %v2938_v38 }
  0x9b   :  { %1819 = vmatpush1.bf16.msra.mxu0 %v2933_v39  ;;  %1901 = vmatpush1.bf16.msra.mxu1 %v2936_v40 }
  0x9c   :  { %1820 = vmatprep.subr.bf16.mxu0 %v2941_v41  ;;  %1902 = vmatprep.subr.bf16.mxu1 %v2944_v42 }
  0x9f   :  { %1821 = vmatpush1.bf16.msra.mxu0 %v2939_v43  ;;  %1903 = vmatpush1.bf16.msra.mxu1 %v2942_v44 }
  0xa0   :  { %1822 = vmatprep.subr.bf16.mxu0 %v2947_v46  ;;  %1904 = vmatprep.subr.bf16.mxu1 %v2950_v47 }
  0xa3   :  { %1823 = vmatpush1.bf16.msra.mxu0 %v2945_v48  ;;  %1905 = vmatpush1.bf16.msra.mxu1 %v2948_v49 }
  0xa4   :  { %1824 = vmatprep.subr.bf16.mxu0 %v2953_v50  ;;  %1906 = vmatprep.subr.bf16.mxu1 %v2956_v51 }
  0xa7   :  { %1825 = vmatpush1.bf16.msra.mxu0 %v2951_v52  ;;  %1907 = vmatpush1.bf16.msra.mxu1 %v2954_v53 }
  0xa8   :  { %1826 = vmatprep.subr.bf16.mxu0 %v2959_v54  ;;  %1908 = vmatprep.subr.bf16.mxu1 %v2962_v55 }
  0xa9   :  { %12 = vsyncpa [#allocation3], 0  ;;  %v2963_v60 = vld [vmem:[%s4123_s3 + $0x160] ss:$16 sps:$4 sm:$0xff]   ;;  %v2966_v61 = vld [vmem:[%s4123_s3 + $0x168] ss:$16 sps:$4 sm:$0xff]  }
  0xaa   :  { %v2971_v62 = vld [vmem:[%s4123_s3 + $0x184] ss:$16 sps:$4 sm:$0xff]   ;;  %v2974_v63 = vld [vmem:[%s4123_s3 + $0x18c] ss:$16 sps:$4 sm:$0xff]   ;;  %v2969_v0 = vld [vmem:[%s4123_s3 + $0x180] ss:$16 sps:$4 sm:$0xff]  }
  0xab   :  { %1827 = vmatpush1.bf16.msra.mxu0 %v2957_v56  ;;  %1909 = vmatpush1.bf16.msra.mxu1 %v2960_v57  ;;  %v2972_v1 = vld [vmem:[%s4123_s3 + $0x188] ss:$16 sps:$4 sm:$0xff]   ;;  %v2977_v2 = vld [vmem:[%s4123_s3 + $0x1a4] ss:$16 sps:$4 sm:$0xff]   ;;  %v2980_v3 = vld [vmem:[%s4123_s3 + $0x1ac] ss:$16 sps:$4 sm:$0xff]  }
  0xac   :  { %1828 = vmatprep.subr.bf16.mxu0 %v2965_v58  ;;  %1910 = vmatprep.subr.bf16.mxu1 %v2968_v59  ;;  %v2975_v4 = vld [vmem:[%s4123_s3 + $0x1a0] ss:$16 sps:$4 sm:$0xff]   ;;  %v2978_v5 = vld [vmem:[%s4123_s3 + $0x1a8] ss:$16 sps:$4 sm:$0xff]   ;;  %v2983_v6 = vld [vmem:[%s4123_s3 + $0x1c4] ss:$16 sps:$4 sm:$0xff]  }
  0xad   :  { %v2986_v7 = vld [vmem:[%s4123_s3 + $0x1cc] ss:$16 sps:$4 sm:$0xff]   ;;  %v2981_v8 = vld [vmem:[%s4123_s3 + $0x1c0] ss:$16 sps:$4 sm:$0xff]   ;;  %v2984_v9 = vld [vmem:[%s4123_s3 + $0x1c8] ss:$16 sps:$4 sm:$0xff]  }
  0xae   :  { %v2989_v10 = vld [vmem:[%s4123_s3 + $0x1e4] ss:$16 sps:$4 sm:$0xff]   ;;  %v2992_v11 = vld [vmem:[%s4123_s3 + $0x1ec] ss:$16 sps:$4 sm:$0xff]   ;;  %v2987_v13 = vld [vmem:[%s4123_s3 + $0x1e0] ss:$16 sps:$4 sm:$0xff]  }
  0xaf   :  { %1829 = vmatpush1.bf16.msra.mxu0 %v2963_v60  ;;  %1911 = vmatpush1.bf16.msra.mxu1 %v2966_v61  ;;  %v2990_v14 = vld [vmem:[%s4123_s3 + $0x1e8] ss:$16 sps:$4 sm:$0xff]   ;;  %v2995_v15 = vld [vmem:[%s4123_s3 + $0x204] ss:$16 sps:$4 sm:$0xff]   ;;  %v2998_v16 = vld [vmem:[%s4123_s3 + $0x20c] ss:$16 sps:$4 sm:$0xff]  }
  0xb0   :  { %1830 = vmatprep.subr.bf16.mxu0 %v2971_v62  ;;  %1912 = vmatprep.subr.bf16.mxu1 %v2974_v63  ;;  %v161_v17 = vsub.s32 0, %v3317_v45  ;;  %v3789_v18 = vld [vmem:[%s4122_s2] sm:$0xf]  ;;  %v165_v19 = vsub.s32 1, %v3317_v45  ;;  %v173_v20 = vsub.s32 3, %v3317_v45  ;;  %vm2317_vm0 = vcmask 74752  }
  0xb1   :  { %v2993_v35 = vld [vmem:[%s4123_s3 + $0x200] ss:$16 sps:$4 sm:$0xff]   ;;  %v2996_v36 = vld [vmem:[%s4123_s3 + $0x208] ss:$16 sps:$4 sm:$0xff]   ;;  %v3001_v38 = vld [vmem:[%s4123_s3 + $0x224] ss:$16 sps:$4 sm:$0xff]  }
  0xb2   :  { %v162_v12 = vrot.slane %v3789_v18, %v161_v17  ;;  %v166_v21 = vrot.slane %v3789_v18, %v165_v19  ;;  %v174_v22 = vrot.slane %v3789_v18, %v173_v20  ;;  %v3004_v39 = vld [vmem:[%s4123_s3 + $0x22c] ss:$16 sps:$4 sm:$0xff]   ;;  %v2999_v41 = vld [vmem:[%s4123_s3 + $0x220] ss:$16 sps:$4 sm:$0xff]   ;;  %v3002_v42 = vld [vmem:[%s4123_s3 + $0x228] ss:$16 sps:$4 sm:$0xff]  }
  0xb3   :  { %1831 = vmatpush1.bf16.msra.mxu0 %v2969_v0  ;;  %1913 = vmatpush1.bf16.msra.mxu1 %v2972_v1  ;;  %v3007_v43 = vld [vmem:[%s4123_s3 + $0x244] ss:$16 sps:$4 sm:$0xff]   ;;  %v3010_v44 = vld [vmem:[%s4123_s3 + $0x24c] ss:$16 sps:$4 sm:$0xff]   ;;  %v3005_v46 = vld [vmem:[%s4123_s3 + $0x240] ss:$16 sps:$4 sm:$0xff]  }
  0xb4   :  { %1832 = vmatprep.subr.bf16.mxu0 %v2977_v2  ;;  %1914 = vmatprep.subr.bf16.mxu1 %v2980_v3  ;;  %v3008_v47 = vld [vmem:[%s4123_s3 + $0x248] ss:$16 sps:$4 sm:$0xff]   ;;  %v3013_v48 = vld [vmem:[%s4123_s3 + $0x264] ss:$16 sps:$4 sm:$0xff]   ;;  %v3016_v49 = vld [vmem:[%s4123_s3 + $0x26c] ss:$16 sps:$4 sm:$0xff]  }
  0xb5   :  { %v3011_v50 = vld [vmem:[%s4123_s3 + $0x260] ss:$16 sps:$4 sm:$0xff]   ;;  %v3014_v51 = vld [vmem:[%s4123_s3 + $0x268] ss:$16 sps:$4 sm:$0xff]   ;;  %v3019_v52 = vld [vmem:[%s4123_s3 + $0x284] ss:$16 sps:$4 sm:$0xff]  }
  0xb6   :  { %v3022_v53 = vld [vmem:[%s4123_s3 + $0x28c] ss:$16 sps:$4 sm:$0xff]   ;;  %v3017_v54 = vld [vmem:[%s4123_s3 + $0x280] ss:$16 sps:$4 sm:$0xff]   ;;  %v3020_v55 = vld [vmem:[%s4123_s3 + $0x288] ss:$16 sps:$4 sm:$0xff]  }
  0xb7   :  { %1833 = vmatpush1.bf16.msra.mxu0 %v2975_v4  ;;  %1915 = vmatpush1.bf16.msra.mxu1 %v2978_v5  ;;  %v3025_v56 = vld [vmem:[%s4123_s3 + $0x2a4] ss:$16 sps:$4 sm:$0xff]   ;;  %v3028_v57 = vld [vmem:[%s4123_s3 + $0x2ac] ss:$16 sps:$4 sm:$0xff]   ;;  %v3023_v58 = vld [vmem:[%s4123_s3 + $0x2a0] ss:$16 sps:$4 sm:$0xff]  }
  0xb8   :  { %1834 = vmatprep.subr.bf16.mxu0 %v2983_v6  ;;  %1916 = vmatprep.subr.bf16.mxu1 %v2986_v7  ;;  %v3026_v59 = vld [vmem:[%s4123_s3 + $0x2a8] ss:$16 sps:$4 sm:$0xff]   ;;  %v3031_v60 = vld [vmem:[%s4123_s3 + $0x2c4] ss:$16 sps:$4 sm:$0xff]   ;;  %v3034_v61 = vld [vmem:[%s4123_s3 + $0x2cc] ss:$16 sps:$4 sm:$0xff]  }
  0xb9   :  { %v3029_v62 = vld [vmem:[%s4123_s3 + $0x2c0] ss:$16 sps:$4 sm:$0xff]   ;;  %v3032_v63 = vld [vmem:[%s4123_s3 + $0x2c8] ss:$16 sps:$4 sm:$0xff]   ;;  %v3037_v0 = vld [vmem:[%s4123_s3 + $0x2e4] ss:$16 sps:$4 sm:$0xff]  }
  0xba   :  { %v3040_v1 = vld [vmem:[%s4123_s3 + $0x2ec] ss:$16 sps:$4 sm:$0xff]   ;;  %v3035_v2 = vld [vmem:[%s4123_s3 + $0x2e0] ss:$16 sps:$4 sm:$0xff]   ;;  %v3038_v3 = vld [vmem:[%s4123_s3 + $0x2e8] ss:$16 sps:$4 sm:$0xff]  }
  0xbb   :  { %1835 = vmatpush1.bf16.msra.mxu0 %v2981_v8  ;;  %1917 = vmatpush1.bf16.msra.mxu1 %v2984_v9  ;;  %v3043_v4 = vld [vmem:[%s4123_s3 + $0x304] ss:$16 sps:$4 sm:$0xff]   ;;  %v3046_v5 = vld [vmem:[%s4123_s3 + $0x30c] ss:$16 sps:$4 sm:$0xff]   ;;  %v3041_v6 = vld [vmem:[%s4123_s3 + $0x300] ss:$16 sps:$4 sm:$0xff]  }
  0xbc   :  { %1836 = vmatprep.subr.bf16.mxu0 %v2989_v10  ;;  %1918 = vmatprep.subr.bf16.mxu1 %v2992_v11  ;;  %v3044_v7 = vld [vmem:[%s4123_s3 + $0x308] ss:$16 sps:$4 sm:$0xff]   ;;  %v3049_v8 = vld [vmem:[%s4123_s3 + $0x324] ss:$16 sps:$4 sm:$0xff]   ;;  %v3052_v9 = vld [vmem:[%s4123_s3 + $0x32c] ss:$16 sps:$4 sm:$0xff]  }
  0xbd   :  { %v3047_v10 = vld [vmem:[%s4123_s3 + $0x320] ss:$16 sps:$4 sm:$0xff]   ;;  %v3050_v11 = vld [vmem:[%s4123_s3 + $0x328] ss:$16 sps:$4 sm:$0xff]  }
  0xbf   :  { %1837 = vmatpush1.bf16.msra.mxu0 %v2987_v13  ;;  %1919 = vmatpush1.bf16.msra.mxu1 %v2990_v14  ;;  %v3055_v13 = vld [vmem:[%s4123_s3 + $0x344] ss:$16 sps:$4 sm:$0xff]   ;;  %v3058_v14 = vld [vmem:[%s4123_s3 + $0x34c] ss:$16 sps:$4 sm:$0xff]  }
  0xc0   :  { %1847 = vmatprep.subr.bf16.mxu0 %v2995_v15  ;;  %1929 = vmatprep.subr.bf16.mxu1 %v2998_v16  ;;  %v3053_v15 = vld [vmem:[%s4123_s3 + $0x340] ss:$16 sps:$4 sm:$0xff]   ;;  %v3056_v16 = vld [vmem:[%s4123_s3 + $0x348] ss:$16 sps:$4 sm:$0xff]  }
 0x155   :  { %v923_v23 = vpop.f32.mrb[0].mxu0  ;;  %v3802_v24 = vpop.f32.mrb[0].mxu1 }
 0x156   :  { %v2679_v25 = vadd.f32 %v923_v23, %v162_v12  ;;  %v925_v26 = vpop.f32.mrb[1].mxu0  ;;  %v1007_v27 = vpop.f32.mrb[1].mxu1  ;;  %v3061_v12 = vld [vmem:[%s4123_s3 + $0x364] ss:$16 sps:$4 sm:$0xff]   ;;  %v3062_v23 = vld [vmem:[%s4123_s3 + $0x368] ss:$16 sps:$4 sm:$0xff]  }
 0x157   :  { %v2680_v28 = vadd.f32 %v925_v26, %v166_v21  ;;  %v927_v29 = vpop.f32.mrb[2].mxu0  ;;  %v1009_v30 = vpop.f32.mrb[2].mxu1  ;;  %v2682_v31 = vadd.f32 %v1007_v27, %v174_v22  ;;  %v3064_v21 = vld [vmem:[%s4123_s3 + $0x36c] ss:$16 sps:$4 sm:$0xff]   ;;  %v3059_v22 = vld [vmem:[%s4123_s3 + $0x360] ss:$16 sps:$4 sm:$0xff]  }
 0x158   :  { %v928_v32 = vpop.f32.mrb[3].mxu0  ;;  %v1010_v33 = vpop.f32.mrb[3].mxu1  ;;  %v1012_v37 = vpack.c.bf16 %v2679_v25, %v2679_v25  ;;  %v3067_v25 = vld [vmem:[%s4123_s3 + $0x384] ss:$16 sps:$4 sm:$0xff]   ;;  %v3070_v26 = vld [vmem:[%s4123_s3 + $0x38c] ss:$16 sps:$4 sm:$0xff]  }
 0x159   :  { %v1013_v34 = vpack.c.bf16 %v2680_v28, %v2680_v28  ;;  %v1015_v40 = vpack.c.bf16 %v2682_v31, %v2682_v31  ;;  %v3065_v27 = vld [vmem:[%s4123_s3 + $0x380] ss:$16 sps:$4 sm:$0xff]   ;;  %v3068_v28 = vld [vmem:[%s4123_s3 + $0x388] ss:$16 sps:$4 sm:$0xff]   ;;  %v3073_v29 = vld [vmem:[%s4123_s3 + $0x3a4] ss:$16 sps:$4 sm:$0xff]  }
 0x15a   :  { %v3076_v30 = vld [vmem:[%s4123_s3 + $0x3ac] ss:$16 sps:$4 sm:$0xff]   ;;  %v3071_v31 = vld [vmem:[%s4123_s3 + $0x3a0] ss:$16 sps:$4 sm:$0xff]   ;;  %v3074_v32 = vld [vmem:[%s4123_s3 + $0x3a8] ss:$16 sps:$4 sm:$0xff]  }
 0x15b   :  { %1838 = vmatprep.mubr.bf16.mxu0 %v1013_v34  ;;  %1920 = vmatprep.mubr.bf16.mxu1 %v1013_v34  ;;  %v169_v33 = vsub.s32 2, %v3317_v45  ;;  %v3079_v34 = vld [vmem:[%s4123_s3 + $0x3c4] ss:$16 sps:$4 sm:$0xff]  }
 0x15c   :  { %1839 = vmatmul.mubr.bf16.vlgmr.msra.gmra.mrb[4].mxu0 %v1012_v37  ;;  %1921 = vmatmul.mubr.bf16.vlgmr.msra.gmra.mrb[4].mxu1 %v1012_v37  ;;  %v3080_v37 = vld [vmem:[%s4123_s3 + $0x3c8] ss:$16 sps:$4 sm:$0xff]  }
 0x15d   :  { %1848 = vmatpush1.bf16.msra.mxu0 %v2993_v35  ;;  %1930 = vmatpush1.bf16.msra.mxu1 %v2996_v36  ;;  %v3082_v35 = vld [vmem:[%s4123_s3 + $0x3cc] ss:$16 sps:$4 sm:$0xff]   ;;  %v3077_v36 = vld [vmem:[%s4123_s3 + $0x3c0] ss:$16 sps:$4 sm:$0xff]  }
 0x15e   :  { %1879 = vmatprep.mubr.bf16.mxu0 %v1015_v40  ;;  %1961 = vmatprep.mubr.bf16.mxu1 %v1015_v40  ;;  %v3088_v40 = vld [vmem:[%s4123_s3 + $0x3ec] ss:$16 sps:$4 sm:$0xff]  }
 0x15f   :  { %1849 = vmatprep.subr.bf16.mxu0 %v3001_v38  ;;  %1931 = vmatprep.subr.bf16.mxu1 %v3004_v39  ;;  %v170_v38 = vrot.slane %v3789_v18, %v169_v33  ;;  %v3085_v39 = vld [vmem:[%s4123_s3 + $0x3e4] ss:$16 sps:$4 sm:$0xff]   ;;  %v3086_v18 = vld [vmem:[%s4123_s3 + $0x3e8] ss:$16 sps:$4 sm:$0xff]  }
 0x161   :  { %1850 = vmatpush1.bf16.msra.mxu0 %v2999_v41  ;;  %1932 = vmatpush1.bf16.msra.mxu1 %v3002_v42  ;;  %v3083_v41 = vld [vmem:[%s4123_s3 + $0x3e0] ss:$16 sps:$4 sm:$0xff]   ;;  %v2681_v42 = vadd.f32 %v3802_v24, %v170_v38 }
 0x162   :  { %1851 = vmatprep.subr.bf16.mxu0 %v3007_v43  ;;  %1933 = vmatprep.subr.bf16.mxu1 %v3010_v44  ;;  %v3089_v43 = vld [vmem:[%s4125_s5 + $0x40] sm:$0xff]  }
 0x163   :  { %v3090_v44 = vld [vmem:[%s4125_s5 + $0xc0] sm:$0xff]  }
 0x164   :  { %v3092_v24 = vld [vmem:[%s4125_s5 + $0x80] sm:$0xff]  }
 0x165   :  { %1852 = vmatpush1.bf16.msra.mxu0 %v3005_v46  ;;  %1934 = vmatpush1.bf16.msra.mxu1 %v3008_v47  ;;  %v3091_v46 = vld [vmem:[%s4125_s5] sm:$0xff]   ;;  %v1014_v47 = vpack.c.bf16 %v2681_v42, %v2681_v42 }
 0x166   :  { %1853 = vmatprep.subr.bf16.mxu0 %v3013_v48  ;;  %1935 = vmatprep.subr.bf16.mxu1 %v3016_v49  ;;  %v3093_v48 = vld [vmem:[%s4125_s5 + $0x48] sm:$0xff]  }
 0x167   :  { %v3094_v49 = vld [vmem:[%s4125_s5 + $0xc8] sm:$0xff]  }
 0x169   :  { %1854 = vmatpush1.bf16.msra.mxu0 %v3011_v50  ;;  %1936 = vmatpush1.bf16.msra.mxu1 %v3014_v51  ;;  %v3095_v50 = vld [vmem:[%s4125_s5 + $0x8] sm:$0xff]  }
 0x16a   :  { %1855 = vmatprep.subr.bf16.mxu0 %v3019_v52  ;;  %1937 = vmatprep.subr.bf16.mxu1 %v3022_v53  ;;  %v3096_v51 = vld [vmem:[%s4125_s5 + $0x88] sm:$0xff]   ;;  %v3097_v52 = vld [vmem:[%s4125_s5 + $0x50] sm:$0xff]  }
 0x16b   :  { %v3098_v53 = vld [vmem:[%s4125_s5 + $0xd0] sm:$0xff]  }
 0x16d   :  { %1856 = vmatpush1.bf16.msra.mxu0 %v3017_v54  ;;  %1938 = vmatpush1.bf16.msra.mxu1 %v3020_v55  ;;  %v3099_v54 = vld [vmem:[%s4125_s5 + $0x10] sm:$0xff]  }
 0x16e   :  { %1857 = vmatprep.subr.bf16.mxu0 %v3025_v56  ;;  %1939 = vmatprep.subr.bf16.mxu1 %v3028_v57  ;;  %v3100_v55 = vld [vmem:[%s4125_s5 + $0x90] sm:$0xff]   ;;  %v3101_v56 = vld [vmem:[%s4125_s5 + $0x58] sm:$0xff]  }
 0x16f   :  { %v3102_v57 = vld [vmem:[%s4125_s5 + $0xd8] sm:$0xff]  }
 0x171   :  { %1858 = vmatpush1.bf16.msra.mxu0 %v3023_v58  ;;  %1940 = vmatpush1.bf16.msra.mxu1 %v3026_v59  ;;  %v3103_v58 = vld [vmem:[%s4125_s5 + $0x18] sm:$0xff]  }
 0x172   :  { %1859 = vmatprep.subr.bf16.mxu0 %v3031_v60  ;;  %1941 = vmatprep.subr.bf16.mxu1 %v3034_v61  ;;  %v3104_v59 = vld [vmem:[%s4125_s5 + $0x98] sm:$0xff]   ;;  %v3105_v60 = vld [vmem:[%s4125_s5 + $0x60] sm:$0xff]  }
 0x173   :  { %v3106_v61 = vld [vmem:[%s4125_s5 + $0xe0] sm:$0xff]  }
 0x175   :  { %1860 = vmatpush1.bf16.msra.mxu0 %v3029_v62  ;;  %1942 = vmatpush1.bf16.msra.mxu1 %v3032_v63  ;;  %v3107_v62 = vld [vmem:[%s4125_s5 + $0x20] sm:$0xff]  }
 0x176   :  { %1861 = vmatprep.subr.bf16.mxu0 %v3037_v0  ;;  %1943 = vmatprep.subr.bf16.mxu1 %v3040_v1  ;;  %v3108_v63 = vld [vmem:[%s4125_s5 + $0xa0] sm:$0xff]   ;;  %v3109_v0 = vld [vmem:[%s4125_s5 + $0x68] sm:$0xff]  }
 0x177   :  { %v3110_v1 = vld [vmem:[%s4125_s5 + $0xe8] sm:$0xff]  }
 0x179   :  { %1862 = vmatpush1.bf16.msra.mxu0 %v3035_v2  ;;  %1944 = vmatpush1.bf16.msra.mxu1 %v3038_v3  ;;  %v3111_v2 = vld [vmem:[%s4125_s5 + $0x28] sm:$0xff]  }
 0x17a   :  { %1863 = vmatprep.subr.bf16.mxu0 %v3043_v4  ;;  %1945 = vmatprep.subr.bf16.mxu1 %v3046_v5  ;;  %v3112_v3 = vld [vmem:[%s4125_s5 + $0xa8] sm:$0xff]   ;;  %v3113_v4 = vld [vmem:[%s4125_s5 + $0x70] sm:$0xff]  }
 0x17b   :  { %v3114_v5 = vld [vmem:[%s4125_s5 + $0xf0] sm:$0xff]  }
 0x17d   :  { %1864 = vmatpush1.bf16.msra.mxu0 %v3041_v6  ;;  %1946 = vmatpush1.bf16.msra.mxu1 %v3044_v7  ;;  %v3115_v6 = vld [vmem:[%s4125_s5 + $0x30] sm:$0xff]  }
 0x17e   :  { %1865 = vmatprep.subr.bf16.mxu0 %v3049_v8  ;;  %1947 = vmatprep.subr.bf16.mxu1 %v3052_v9  ;;  %v3116_v7 = vld [vmem:[%s4125_s5 + $0xb0] sm:$0xff]   ;;  %v3117_v8 = vld [vmem:[%s4125_s5 + $0x78] sm:$0xff]  }
 0x17f   :  { %v3118_v9 = vld [vmem:[%s4125_s5 + $0xf8] sm:$0xff]  }
 0x181   :  { %1866 = vmatpush1.bf16.msra.mxu0 %v3047_v10  ;;  %1948 = vmatpush1.bf16.msra.mxu1 %v3050_v11  ;;  %v3119_v10 = vld [vmem:[%s4125_s5 + $0x38] sm:$0xff]  }
 0x182   :  { %1867 = vmatprep.subr.bf16.mxu0 %v3055_v13  ;;  %1949 = vmatprep.subr.bf16.mxu1 %v3058_v14  ;;  %v3120_v11 = vld [vmem:[%s4125_s5 + $0xb8] sm:$0xff]   ;;  %v1144_v13 = vld [vmem:[%s4124_s4] sm:$0xf] }
 0x183   :  { %v1149_v14 = vrot.slane %v1144_v13, %v161_v17 }
 0x185   :  { %1868 = vmatpush1.bf16.msra.mxu0 %v3053_v15  ;;  %1950 = vmatpush1.bf16.msra.mxu1 %v3056_v16  ;;  %v1157_v15 = vrot.slane %v1144_v13, %v169_v33  ;;  %v1153_v16 = vrot.slane %v1144_v13, %v165_v19 }
 0x186   :  { %1869 = vmatprep.subr.bf16.mxu0 %v3061_v12  ;;  %1951 = vmatprep.subr.bf16.mxu1 %v3064_v21  ;;  %v1161_v12 = vrot.slane %v1144_v13, %v173_v20  ;;  %v2602_v20 = vld [vmem:[%s4126_s6] ss:$0 sm:$0xff]  ;;  %s3150_s6 = smov [#allocation2]  }
 0x187   :  { %s2337_s0 = sshll.u32 %s3150_s6, 4  ;;  %s2338_s0 = int_to_ptr.vmem [resolvable:$true] %s2337_s0 }
 0x188   :  { %s3125_s11 = scalar_lea.vmem %s2338_s0, 32  ;;  %p3130_p1 = scmp.lt.s32.totalorder %s2338_s0, %s2338_s0 }
 0x189   :  { %1870 = vmatpush1.bf16.msra.mxu0 %v3059_v22  ;;  %1952 = vmatpush1.bf16.msra.mxu1 %v3062_v23  ;;  %p3126_p0 = scmp.ne.s32.totalorder %s2338_s0, %s3125_s11  ;;  %p3131_p2 = scmp.lt.s32.totalorder %s3125_s11, %s3125_s11 }
 0x18a   :  { %1871 = vmatprep.subr.bf16.mxu0 %v3067_v25  ;;  %1953 = vmatprep.subr.bf16.mxu1 %v3070_v26 }
 0x18b   :  { %p3132_p3 = por %p3131_p2, %p3130_p1 }
 0x18d   :  { %1872 = vmatpush1.bf16.msra.mxu0 %v3065_v27  ;;  %1954 = vmatpush1.bf16.msra.mxu1 %v3068_v28  ;;  %p3133_p4 = pnand %p3132_p3, %p3126_p0 }
 0x18e   :  { %1873 = vmatprep.subr.bf16.mxu0 %v3073_v29  ;;  %1955 = vmatprep.subr.bf16.mxu1 %v3076_v30 }
 0x191   :  { %1874 = vmatpush1.bf16.msra.mxu0 %v3071_v31  ;;  %1956 = vmatpush1.bf16.msra.mxu1 %v3074_v32 }
 0x192   :  { %1875 = vmatprep.subr.bf16.mxu0 %v3079_v34  ;;  %1957 = vmatprep.subr.bf16.mxu1 %v3082_v35 }
 0x195   :  { %1876 = vmatpush1.bf16.msra.mxu0 %v3077_v36  ;;  %1958 = vmatpush1.bf16.msra.mxu1 %v3080_v37 }
 0x196   :  { %1877 = vmatprep.subr.bf16.mxu0 %v3085_v39  ;;  %1959 = vmatprep.subr.bf16.mxu1 %v3088_v40 }
 0x199   :  { %1878 = vmatpush1.bf16.msra.mxu0 %v3083_v41  ;;  %1960 = vmatpush1.bf16.msra.mxu1 %v3086_v18 }
 0x19a   :  { %2635 = vmatprep.subr.bf16.mxu0 %v3089_v43  ;;  %2657 = vmatprep.subr.bf16.mxu1 %v3090_v44 }
 0x19c   :  { %1880 = vmatmul.mubr.bf16.vlgmr.msra.gmra.mrb[4].mxu0 %v1014_v47  ;;  %1962 = vmatmul.mubr.bf16.vlgmr.msra.gmra.mrb[4].mxu1 %v1014_v47 }
 0x19d   :  { %2636 = vmatpush3.bf16.msra.mxu0 %v3091_v46  ;;  %2658 = vmatpush3.bf16.msra.mxu1 %v3092_v24 }
 0x19e   :  { %2637 = vmatprep.subr.bf16.mxu0 %v3093_v48  ;;  %2659 = vmatprep.subr.bf16.mxu1 %v3094_v49 }
 0x1a1   :  { %2638 = vmatpush3.bf16.msra.mxu0 %v3095_v50  ;;  %2660 = vmatpush3.bf16.msra.mxu1 %v3096_v51 }
 0x1a2   :  { %2639 = vmatprep.subr.bf16.mxu0 %v3097_v52  ;;  %2661 = vmatprep.subr.bf16.mxu1 %v3098_v53 }
 0x1a5   :  { %2640 = vmatpush3.bf16.msra.mxu0 %v3099_v54  ;;  %2662 = vmatpush3.bf16.msra.mxu1 %v3100_v55 }
 0x1a6   :  { %2641 = vmatprep.subr.bf16.mxu0 %v3101_v56  ;;  %2663 = vmatprep.subr.bf16.mxu1 %v3102_v57 }
 0x1a9   :  { %2642 = vmatpush3.bf16.msra.mxu0 %v3103_v58  ;;  %2664 = vmatpush3.bf16.msra.mxu1 %v3104_v59 }
 0x1aa   :  { %2643 = vmatprep.subr.bf16.mxu0 %v3105_v60  ;;  %2665 = vmatprep.subr.bf16.mxu1 %v3106_v61 }
 0x1ad   :  { %2644 = vmatpush3.bf16.msra.mxu0 %v3107_v62  ;;  %2666 = vmatpush3.bf16.msra.mxu1 %v3108_v63 }
 0x1ae   :  { %2645 = vmatprep.subr.bf16.mxu0 %v3109_v0  ;;  %2667 = vmatprep.subr.bf16.mxu1 %v3110_v1 }
 0x1b1   :  { %2646 = vmatpush3.bf16.msra.mxu0 %v3111_v2  ;;  %2668 = vmatpush3.bf16.msra.mxu1 %v3112_v3 }
 0x1b2   :  { %2647 = vmatprep.subr.bf16.mxu0 %v3113_v4  ;;  %2669 = vmatprep.subr.bf16.mxu1 %v3114_v5 }
 0x1b5   :  { %2648 = vmatpush3.bf16.msra.mxu0 %v3115_v6  ;;  %2670 = vmatpush3.bf16.msra.mxu1 %v3116_v7 }
 0x1b6   :  { %2649 = vmatprep.subr.bf16.mxu0 %v3117_v8  ;;  %2671 = vmatprep.subr.bf16.mxu1 %v3118_v9 }
 0x1b9   :  { %2650 = vmatpush3.bf16.msra.mxu0 %v3119_v10  ;;  %2672 = vmatpush3.bf16.msra.mxu1 %v3120_v11 }
 0x26f   :  { %v1881_v21 = vpop.f32.mrb[4].mxu0  ;;  %v1963_v22 = vpop.f32.mrb[4].mxu1 }
 0x270   :  { %v2683_v23 = vadd.f32 %v1881_v21, %v1149_v14  ;;  %v2685_v25 = vadd.f32 %v1963_v22, %v1157_v15  ;;  %v1883_v26 = vpop.f32.mrb[5].mxu0  ;;  %v1965_v27 = vpop.f32.mrb[5].mxu1 }
 0x271   :  { %v2684_v28 = vadd.f32 %v1883_v26, %v1153_v16  ;;  %v2686_v29 = vadd.f32 %v1965_v27, %v1161_v12  ;;  %v1885_v30 = vpop.f32.mrb[6].mxu0  ;;  %v1967_v31 = vpop.f32.mrb[6].mxu1 }
 0x272   :  { %v1886_v17 = vpop.f32.mrb[7].mxu0  ;;  %v1968_v32 = vpop.f32.mrb[7].mxu1  ;;  %v1970_v35 = vpack.c.bf16 %v2683_v23, %v2683_v23  ;;  %v1972_v36 = vpack.c.bf16 %v2685_v25, %v2685_v25 }
 0x273   :  { %v1971_v34 = vpack.c.bf16 %v2684_v28, %v2684_v28  ;;  %v1973_v33 = vpack.c.bf16 %v2686_v29, %v2686_v29 }
 0x275   :  { %2269 = vmatprep.mubr.bf16.mxu0 %v1971_v34  ;;  %2309 = vmatprep.mubr.bf16.mxu1 %v1973_v33 }
 0x276   :  { %2270 = vmatmul.mubr.bf16.vlgmr.msra.gmra.mrb[8].mxu0 %v1970_v35  ;;  %2310 = vmatmul.mubr.bf16.vlgmr.msra.gmra.mrb[8].mxu1 %v1972_v36 }
 0x349   :  { %v2651_v45 = vpop.f32.mrb[8].mxu0  ;;  %v2673_v19 = vpop.f32.mrb[8].mxu1 }
 0x34a   :  { %v2652_v37 = vpop.f32.mrb[9].mxu0  ;;  %v2674_v38 = vpop.f32.mrb[9].mxu1 }
 0x34b   :  { %v2653_v39 = vadd.f32 %v2652_v37, %v2651_v45  ;;  %v2675_v40 = vadd.f32 %v2674_v38, %v2673_v19  ;;  %v2654_v41 = vpop.f32.mrb[10].mxu0  ;;  %v2676_v18 = vpop.f32.mrb[10].mxu1 }
 0x34c   :  { %v2655_v42 = vpop.f32.mrb[11].mxu0  ;;  %v2677_v43 = vpop.f32.mrb[11].mxu1 }
 0x34d   :  { %v2272_v44 = vadd.f32 %v2653_v39, %v2602_v20 }
 0x34f   :  { %v2312_v46 = vadd.f32 %v2675_v40, %v2272_v44 }
 0x351   :  { %v2318_v24 = vsel %vm2317_vm0, %v2312_v46, -inf }
 0x352   :  { %2319 = vmax.xlane.f32.xlu0 %v2318_v24 }
 0x3df   :  { %v2320_v47 = vpop.xlane.xlu0 %2319 }
 0x3e0   :  { %v2321_v48 = vsub.f32 %v2312_v46, %v2320_v47 }
 0x3e2   :  { %v2322_v49 = vmul.f32 1.442695, %v2321_v48 }
 0x3e4   :  { %3121 = vpow2.f32 %v2322_v49 }
 0x3ee   :  { %v3122_v50 = vpop.eup %3121 }
 0x3ef   :  { %v2324_v51 = vsel %vm2317_vm0, %v3122_v50, 0.0 }
 0x3f0   :  { %2325 = vadd.xlane.f32.xlu0 %v2324_v51 }
 0x47d   :  { %v2326_v52 = vpop.xlane.xlu0 %2325 }
 0x47e   :  { %3123 = vlog2.f32 %v2326_v52 }
 0x488   :  { %v3124_v53 = vpop.eup %3123 }
 0x489   :  { %v2328_v54 = vmul.f32 0.6931472, %v3124_v53 }
 0x48b   :  { %v2329_v55 = vsub.f32 %v2321_v48, %v2328_v54 }
 0x48d   :  { %2330 = vst.msk [vmem:[#allocation2] sm:$0x3] %vm2317_vm0, %v2329_v55 }
 0x48e   :  { %3136 = shalt.err (!%p3133_p4)
}
 0x48f   :  { %s3137_s14 = scalar_lea.hbm %s4127_s7, 32 }
 0x490   :  { %p3138_p5 = scmp.ne.s32.totalorder %s4127_s7, %s3137_s14  ;;  %p3141_p6 = scmp.lt.u32.totalorder %s3137_s14, %s4127_s7 }
 0x492   :  { %p3143_p7 = pnand %p3141_p6, %p3138_p5 }
 0x494   :  { %3146 = shalt.err (!%p3143_p7)
}
 0x495   :  { %2340 = dma.vmem_to_hbm [thread:$0]  %s2338_s0, 32, %s4127_s7, [#allocation3]  }
 0x496   :  { %3147 = dma.done.wait [#allocation3], 32  }
 0x497   :  { %3148 = vsyncadd [#allocation3], 4294967264 }
 0x498   :  { %2344 = vsyncpa [#allocation3], 1 }

</bundles_post_ra>
